<compile_context>
chip_gen: v6e
topology: v6e:2x2x1
jax: 0.10.0
libtpu: 0.0.40
codegen_flags: <defaults>
</compile_context>

<pallas_src>
import functools

import jax
import jax.numpy as jnp
from jax import lax
from jax.experimental import pallas as pl
from jax.experimental.pallas import tpu as pltpu


def _round_up(x, m):
    return ((x + m - 1) // m) * m


# ----------------------------------------------------------------------------
# Pallas matmul kernel: bf16 operands, f32 accumulation, fused activation.
# Full-K / full-N blocks; grid only over M.
# ----------------------------------------------------------------------------
def _matmul_act_kernel(a_ref, b_ref, o_ref, *, act, neg_slope):
    r = jnp.dot(a_ref[...], b_ref[...], preferred_element_type=jnp.float32)
    if act == "relu":
        r = jnp.maximum(r, 0.0)
    elif act == "leaky_relu":
        r = jnp.where(r >= 0.0, r, neg_slope * r)
    o_ref[...] = r


def pallas_matmul(a, b, act="none", neg_slope=0.1):
    """out = act(a @ b).  a:(M,K), b:(K,N).  Returns f32 (M,N)."""
    M, K = a.shape
    K2, N = b.shape
    assert K == K2

    # bf16 operands feed the MXU at native rate and halve DMA/VMEM bytes;
    # accumulation stays f32.
    a = a.astype(jnp.bfloat16)
    b = b.astype(jnp.bfloat16)

    # Full-K / full-N blocks (K <= 4608, N <= 512 in this model).  Grid over M
    # only.  Large M (early layers) gets one or two big tiles; tiny late-stage
    # matmuls (M = 2..8) pad only to the bf16 sublane tile of 16 rows.
    tm = min(512, _round_up(max(M, 1), 16))
    Mp = _round_up(M, tm)
    Kp = _round_up(K, 128)
    Np = _round_up(N, 128)

    a_p = jnp.pad(a, ((0, Mp - M), (0, Kp - K)))
    b_p = jnp.pad(b, ((0, Kp - K), (0, Np - N)))

    out = pl.pallas_call(
        functools.partial(_matmul_act_kernel, act=act, neg_slope=neg_slope),
        out_shape=jax.ShapeDtypeStruct((Mp, Np), jnp.float32),
        grid_spec=pltpu.PrefetchScalarGridSpec(
            num_scalar_prefetch=0,
            grid=(Mp // tm,),
            in_specs=[
                pl.BlockSpec((tm, Kp), lambda i: (i, 0)),
                # Weight block index is constant across the M grid, so Pallas
                # does not re-DMA it between steps.
                pl.BlockSpec((Kp, Np), lambda i: (0, 0)),
            ],
            out_specs=pl.BlockSpec((tm, Np), lambda i: (i, 0)),
        ),
        compiler_params=pltpu.CompilerParams(
            dimension_semantics=("parallel",)),
    )(a_p, b_p)
    return out[:M, :N]


# ----------------------------------------------------------------------------
# Conv / BN / pooling glue (NHWC, lane-dense), built on the Pallas matmul.
# ----------------------------------------------------------------------------
def conv2d_nhwc(x, w, stride=1, pad=0, act="none"):
    """x: (N,H,W,C) NHWC, w: (O,C,kh,kw) PyTorch layout, bias-free conv."""
    O, C, kh, kw = w.shape
    N = x.shape[0]
    x = x.astype(jnp.bfloat16)          # exact copy of values into matmul dtype
    if kh == 1 and kw == 1 and pad == 0:
        xs = x[:, ::stride, ::stride, :]
        Ho, Wo = xs.shape[1], xs.shape[2]
        patches = xs.reshape(N * Ho * Wo, C)
    else:
        # Output feature dim is C-major, then (kh, kw) — matches
        # w.reshape(O, C*kh*kw).
        patches = lax.conv_general_dilated_patches(
            x, (kh, kw), (stride, stride),
            padding=((pad, pad), (pad, pad)),
            dimension_numbers=("NHWC", "HWIO", "NHWC"))
        Ho, Wo = patches.shape[1], patches.shape[2]
        patches = patches.reshape(N * Ho * Wo, C * kh * kw)
    w2d = w.reshape(O, C * kh * kw).T
    out = pallas_matmul(patches, w2d, act=act)      # (N*Ho*Wo, O), f32
    return out.reshape(N, Ho, Wo, O)                # no transpose needed in NHWC


def batchnorm_nhwc(x, bn, eps=1e-5):
    # Training-mode BN (fresh nn.Module): batch statistics, biased variance.
    # Batch-stat reductions are left to XLA (lane-dense NHWC reduce over
    # N,H,W); they fuse with the surrounding elementwise ops.
    mean = x.mean(axis=(0, 1, 2), keepdims=True)
    var = x.var(axis=(0, 1, 2), keepdims=True)
    return bn["gamma"] * (x - mean) * lax.rsqrt(var + eps) + bn["beta"]


def maxpool_nhwc(x, k=3, stride=2, pad=1):
    return lax.reduce_window(
        x, -jnp.inf, lax.max,
        window_dimensions=(1, k, k, 1),
        window_strides=(1, stride, stride, 1),
        padding=((0, 0), (pad, pad), (pad, pad), (0, 0)))


# ----------------------------------------------------------------------------
# Deterministic parameter initialization (synthetic; no checkpoint load)
# ----------------------------------------------------------------------------
def init_params(key):
    counter = [0]

    def nk():
        counter[0] += 1
        return jax.random.fold_in(key, counter[0])

    def conv_w(o, c, kh, kw):
        fan_in = c * kh * kw
        return jax.random.normal(nk(), (o, c, kh, kw), jnp.float32) / jnp.sqrt(fan_in)

    def bn_p(c):
        return {"gamma": jnp.ones((c,), jnp.float32),
                "beta": jnp.zeros((c,), jnp.float32)}

    p = {"conv1": conv_w(64, 3, 7, 7), "bn1": bn_p(64)}
    inplanes = 64
    for li, (planes, blocks, stride) in enumerate(
            [(64, 2, 1), (128, 2, 2), (256, 2, 2), (512, 2, 2)], start=1):
        layer = []
        for b in range(blocks):
            s = stride if b == 0 else 1
            blk = {"conv1": conv_w(planes, inplanes, 3, 3), "bn1": bn_p(planes),
                   "conv2": conv_w(planes, planes, 3, 3), "bn2": bn_p(planes)}
            if s != 1 or inplanes != planes:
                blk["down_conv"] = conv_w(planes, inplanes, 1, 1)
                blk["down_bn"] = bn_p(planes)
            inplanes = planes
            layer.append(blk)
        p[f"layer{li}"] = layer
    p["enc_bn"] = bn_p(512)           # Encoder.bn (builder.batchnorm(512, last_bn=True))
    return p


# ----------------------------------------------------------------------------
# Encoder forward (mirrors Encoder.forward = ResNet-18 + final BN)
# ----------------------------------------------------------------------------
def basic_block(x, blk, stride):
    identity = x
    out = conv2d_nhwc(x, blk["conv1"], stride=stride, pad=1)
    out = batchnorm_nhwc(out, blk["bn1"])
    out = jnp.maximum(out, 0.0)
    out = conv2d_nhwc(out, blk["conv2"], stride=1, pad=1)
    out = batchnorm_nhwc(out, blk["bn2"])
    if "down_conv" in blk:
        identity = conv2d_nhwc(x, blk["down_conv"], stride=stride, pad=0)
        identity = batchnorm_nhwc(identity, blk["down_bn"])
    # Residual add + ReLU can't fuse into the conv matmul because bn2 uses
    # batch statistics of the conv output; XLA fuses them as elementwise ops.
    return jnp.maximum(out + identity, 0.0)


@jax.jit
def encoder_forward(params, images_nchw):
    # Convert to NHWC once at the boundary; everything inside is lane-dense.
    x = jnp.transpose(images_nchw, (0, 2, 3, 1))
    x = conv2d_nhwc(x, params["conv1"], stride=2, pad=3)
    x = batchnorm_nhwc(x, params["bn1"])
    x = jnp.maximum(x, 0.0)
    x = maxpool_nhwc(x, k=3, stride=2, pad=1)
    for li in range(1, 5):
        for bi, blk in enumerate(params[f"layer{li}"]):
            stride = 2 if (li > 1 and bi == 0) else 1
            x = basic_block(x, blk, stride)
    x = x.mean(axis=(1, 2), keepdims=True)          # AdaptiveAvgPool2d(1): (N,1,1,512)
    x = batchnorm_nhwc(x, params["enc_bn"])         # Encoder.bn (training-mode batch stats)
    return jnp.transpose(x, (0, 3, 1, 2))           # back to PyTorch NCHW: (N,512,1,1)


# ----------------------------------------------------------------------------
if __name__ == "__main__":
    root = jax.random.PRNGKey(0)
    k_params, k_img = jax.random.split(root)

    params = init_params(k_params)
    images = jax.random.normal(k_img, (2, 3, 32, 32), jnp.float32)

    feats = encoder_forward(params, images)
    jax.block_until_ready(feats)

    assert feats.shape == (2, 512, 1, 1)
    assert bool(jnp.all(jnp.isfinite(feats)))
    print("KERNEL_OK")
</pallas_src>

<mosaic_0001>
module attributes {stable_mosaic.version = 11 : i64} {
  func.func @_matmul_act_kernel(%arg0: i32, %arg1: memref<512x256xbf16, #tpu.memory_space<vmem>>, %arg2: memref<256x128xbf16, #tpu.memory_space<vmem>>, %arg3: memref<512x128xf32, #tpu.memory_space<vmem>>) attributes {dimension_semantics = [#tpu.dimension_semantics<parallel>], iteration_bounds = array<i64: 1>, scalar_prefetch = 0 : i64, scratch_operands = 0 : i64, tpu.core_type = #tpu.core_type<tc>, window_params = [{transform_indices = @transform_0, window_bounds = array<i64: 512, 256>}, {pipeline_mode = #tpu.pipeline_mode<synchronous>, transform_indices = @transform_1, window_bounds = array<i64: 256, 128>}, {transform_indices = @transform_2, window_bounds = array<i64: 512, 128>}]} {
    %c0 = arith.constant 0 : index
    %c0_0 = arith.constant 0 : index
    %0 = vector.load %arg1[%c0, %c0_0] : memref<512x256xbf16, #tpu.memory_space<vmem>>, vector<512x256xbf16>
    %c0_1 = arith.constant 0 : index
    %c0_2 = arith.constant 0 : index
    %1 = vector.load %arg2[%c0_1, %c0_2] : memref<256x128xbf16, #tpu.memory_space<vmem>>, vector<256x128xbf16>
    %cst = arith.constant dense<0.000000e+00> : vector<512x128xf32>
    %2 = tpu.matmul %0, %1, %cst {dimension_numbers = #tpu.dot_dimension_numbers<[1], [0], [0], [1], [0, 0, 1, 1], [], []>} : vector<512x256xbf16>, vector<256x128xbf16>, vector<512x128xf32> -> vector<512x128xf32>
    %c0_3 = arith.constant 0 : index
    %c0_4 = arith.constant 0 : index
    %3 = vector.load %arg3[%c0_3, %c0_4] : memref<512x128xf32, #tpu.memory_space<vmem>>, vector<512x128xf32>
    tpu.vector_store %arg3[%c0_3, %c0_4], %2 {strides = array<i32>} : memref<512x128xf32, #tpu.memory_space<vmem>>, vector<512x128xf32>,
    return
  }
  func.func @transform_0(%arg0: i32) -> (i32, i32) {
    %c0_i32 = arith.constant 0 : i32
    %c0_i32_0 = arith.constant 0 : i32
    return %arg0, %c0_i32 : i32, i32
  }
  func.func @transform_1(%arg0: i32) -> (i32, i32) {
    %c0_i32 = arith.constant 0 : i32
    %c0_i32_0 = arith.constant 0 : i32
    %c0_i32_1 = arith.constant 0 : i32
    return %c0_i32, %c0_i32_0 : i32, i32
  }
  func.func @transform_2(%arg0: i32) -> (i32, i32) {
    %c0_i32 = arith.constant 0 : i32
    %c0_i32_0 = arith.constant 0 : i32
    return %arg0, %c0_i32 : i32, i32
  }
}

module attributes {stable_mosaic.version = 11 : i64} {
  func.func @_matmul_act_kernel(%arg0: i32, %arg1: memref<128x640xbf16, #tpu.memory_space<vmem>>, %arg2: memref<640x128xbf16, #tpu.memory_space<vmem>>, %arg3: memref<128x128xf32, #tpu.memory_space<vmem>>) attributes {dimension_semantics = [#tpu.dimension_semantics<parallel>], iteration_bounds = array<i64: 1>, scalar_prefetch = 0 : i64, scratch_operands = 0 : i64, tpu.core_type = #tpu.core_type<tc>, window_params = [{transform_indices = @transform_0, window_bounds = array<i64: 128, 640>}, {pipeline_mode = #tpu.pipeline_mode<synchronous>, transform_indices = @transform_1, window_bounds = array<i64: 640, 128>}, {transform_indices = @transform_2, window_bounds = array<i64: 128, 128>}]} {
    %c0 = arith.constant 0 : index
    %c0_0 = arith.constant 0 : index
    %0 = vector.load %arg1[%c0, %c0_0] : memref<128x640xbf16, #tpu.memory_space<vmem>>, vector<128x640xbf16>
    %c0_1 = arith.constant 0 : index
    %c0_2 = arith.constant 0 : index
    %1 = vector.load %arg2[%c0_1, %c0_2] : memref<640x128xbf16, #tpu.memory_space<vmem>>, vector<640x128xbf16>
    %cst = arith.constant dense<0.000000e+00> : vector<128x128xf32>
    %2 = tpu.matmul %0, %1, %cst {dimension_numbers = #tpu.dot_dimension_numbers<[1], [0], [0], [1], [0, 0, 1, 1], [], []>} : vector<128x640xbf16>, vector<640x128xbf16>, vector<128x128xf32> -> vector<128x128xf32>
    %c0_3 = arith.constant 0 : index
    %c0_4 = arith.constant 0 : index
    %3 = vector.load %arg3[%c0_3, %c0_4] : memref<128x128xf32, #tpu.memory_space<vmem>>, vector<128x128xf32>
    tpu.vector_store %arg3[%c0_3, %c0_4], %2 {strides = array<i32>} : memref<128x128xf32, #tpu.memory_space<vmem>>, vector<128x128xf32>,
    return
  }
  func.func @transform_0(%arg0: i32) -> (i32, i32) {
    %c0_i32 = arith.constant 0 : i32
    %c0_i32_0 = arith.constant 0 : i32
    return %arg0, %c0_i32 : i32, i32
  }
  func.func @transform_1(%arg0: i32) -> (i32, i32) {
    %c0_i32 = arith.constant 0 : i32
    %c0_i32_0 = arith.constant 0 : i32
    %c0_i32_1 = arith.constant 0 : i32
    return %c0_i32, %c0_i32_0 : i32, i32
  }
  func.func @transform_2(%arg0: i32) -> (i32, i32) {
    %c0_i32 = arith.constant 0 : i32
    %c0_i32_0 = arith.constant 0 : i32
    return %arg0, %c0_i32 : i32, i32
  }
}

module attributes {stable_mosaic.version = 11 : i64} {
  func.func @_matmul_act_kernel(%arg0: i32, %arg1: memref<32x640xbf16, #tpu.memory_space<vmem>>, %arg2: memref<640x128xbf16, #tpu.memory_space<vmem>>, %arg3: memref<32x128xf32, #tpu.memory_space<vmem>>) attributes {dimension_semantics = [#tpu.dimension_semantics<parallel>], iteration_bounds = array<i64: 1>, scalar_prefetch = 0 : i64, scratch_operands = 0 : i64, tpu.core_type = #tpu.core_type<tc>, window_params = [{transform_indices = @transform_0, window_bounds = array<i64: 32, 640>}, {pipeline_mode = #tpu.pipeline_mode<synchronous>, transform_indices = @transform_1, window_bounds = array<i64: 640, 128>}, {transform_indices = @transform_2, window_bounds = array<i64: 32, 128>}]} {
    %c0 = arith.constant 0 : index
    %c0_0 = arith.constant 0 : index
    %0 = vector.load %arg1[%c0, %c0_0] : memref<32x640xbf16, #tpu.memory_space<vmem>>, vector<32x640xbf16>
    %c0_1 = arith.constant 0 : index
    %c0_2 = arith.constant 0 : index
    %1 = vector.load %arg2[%c0_1, %c0_2] : memref<640x128xbf16, #tpu.memory_space<vmem>>, vector<640x128xbf16>
    %cst = arith.constant dense<0.000000e+00> : vector<32x128xf32>
    %2 = tpu.matmul %0, %1, %cst {dimension_numbers = #tpu.dot_dimension_numbers<[1], [0], [0], [1], [0, 0, 1, 1], [], []>} : vector<32x640xbf16>, vector<640x128xbf16>, vector<32x128xf32> -> vector<32x128xf32>
    %c0_3 = arith.constant 0 : index
    %c0_4 = arith.constant 0 : index
    %3 = vector.load %arg3[%c0_3, %c0_4] : memref<32x128xf32, #tpu.memory_space<vmem>>, vector<32x128xf32>
    tpu.vector_store %arg3[%c0_3, %c0_4], %2 {strides = array<i32>} : memref<32x128xf32, #tpu.memory_space<vmem>>, vector<32x128xf32>,
    return
  }
  func.func @transform_0(%arg0: i32) -> (i32, i32) {
    %c0_i32 = arith.constant 0 : i32
    %c0_i32_0 = arith.constant 0 : i32
    return %arg0, %c0_i32 : i32, i32
  }
  func.func @transform_1(%arg0: i32) -> (i32, i32) {
    %c0_i32 = arith.constant 0 : i32
    %c0_i32_0 = arith.constant 0 : i32
    %c0_i32_1 = arith.constant 0 : i32
    return %c0_i32, %c0_i32_0 : i32, i32
  }
  func.func @transform_2(%arg0: i32) -> (i32, i32) {
    %c0_i32 = arith.constant 0 : i32
    %c0_i32_0 = arith.constant 0 : i32
    return %arg0, %c0_i32 : i32, i32
  }
}

module attributes {stable_mosaic.version = 11 : i64} {
  func.func @_matmul_act_kernel(%arg0: i32, %arg1: memref<32x1152xbf16, #tpu.memory_space<vmem>>, %arg2: memref<1152x128xbf16, #tpu.memory_space<vmem>>, %arg3: memref<32x128xf32, #tpu.memory_space<vmem>>) attributes {dimension_semantics = [#tpu.dimension_semantics<parallel>], iteration_bounds = array<i64: 1>, scalar_prefetch = 0 : i64, scratch_operands = 0 : i64, tpu.core_type = #tpu.core_type<tc>, window_params = [{transform_indices = @transform_0, window_bounds = array<i64: 32, 1152>}, {pipeline_mode = #tpu.pipeline_mode<synchronous>, transform_indices = @transform_1, window_bounds = array<i64: 1152, 128>}, {transform_indices = @transform_2, window_bounds = array<i64: 32, 128>}]} {
    %c0 = arith.constant 0 : index
    %c0_0 = arith.constant 0 : index
    %0 = vector.load %arg1[%c0, %c0_0] : memref<32x1152xbf16, #tpu.memory_space<vmem>>, vector<32x1152xbf16>
    %c0_1 = arith.constant 0 : index
    %c0_2 = arith.constant 0 : index
    %1 = vector.load %arg2[%c0_1, %c0_2] : memref<1152x128xbf16, #tpu.memory_space<vmem>>, vector<1152x128xbf16>
    %cst = arith.constant dense<0.000000e+00> : vector<32x128xf32>
    %2 = tpu.matmul %0, %1, %cst {dimension_numbers = #tpu.dot_dimension_numbers<[1], [0], [0], [1], [0, 0, 1, 1], [], []>} : vector<32x1152xbf16>, vector<1152x128xbf16>, vector<32x128xf32> -> vector<32x128xf32>
    %c0_3 = arith.constant 0 : index
    %c0_4 = arith.constant 0 : index
    %3 = vector.load %arg3[%c0_3, %c0_4] : memref<32x128xf32, #tpu.memory_space<vmem>>, vector<32x128xf32>
    tpu.vector_store %arg3[%c0_3, %c0_4], %2 {strides = array<i32>} : memref<32x128xf32, #tpu.memory_space<vmem>>, vector<32x128xf32>,
    return
  }
  func.func @transform_0(%arg0: i32) -> (i32, i32) {
    %c0_i32 = arith.constant 0 : i32
    %c0_i32_0 = arith.constant 0 : i32
    return %arg0, %c0_i32 : i32, i32
  }
  func.func @transform_1(%arg0: i32) -> (i32, i32) {
    %c0_i32 = arith.constant 0 : i32
    %c0_i32_0 = arith.constant 0 : i32
    %c0_i32_1 = arith.constant 0 : i32
    return %c0_i32, %c0_i32_0 : i32, i32
  }
  func.func @transform_2(%arg0: i32) -> (i32, i32) {
    %c0_i32 = arith.constant 0 : i32
    %c0_i32_0 = arith.constant 0 : i32
    return %arg0, %c0_i32 : i32, i32
  }
}

module attributes {stable_mosaic.version = 11 : i64} {
  func.func @_matmul_act_kernel(%arg0: i32, %arg1: memref<32x128xbf16, #tpu.memory_space<vmem>>, %arg2: memref<128x128xbf16, #tpu.memory_space<vmem>>, %arg3: memref<32x128xf32, #tpu.memory_space<vmem>>) attributes {dimension_semantics = [#tpu.dimension_semantics<parallel>], iteration_bounds = array<i64: 1>, scalar_prefetch = 0 : i64, scratch_operands = 0 : i64, tpu.core_type = #tpu.core_type<tc>, window_params = [{transform_indices = @transform_0, window_bounds = array<i64: 32, 128>}, {pipeline_mode = #tpu.pipeline_mode<synchronous>, transform_indices = @transform_1, window_bounds = array<i64: 128, 128>}, {transform_indices = @transform_2, window_bounds = array<i64: 32, 128>}]} {
    %c0 = arith.constant 0 : index
    %c0_0 = arith.constant 0 : index
    %0 = vector.load %arg1[%c0, %c0_0] : memref<32x128xbf16, #tpu.memory_space<vmem>>, vector<32x128xbf16>
    %c0_1 = arith.constant 0 : index
    %c0_2 = arith.constant 0 : index
    %1 = vector.load %arg2[%c0_1, %c0_2] : memref<128x128xbf16, #tpu.memory_space<vmem>>, vector<128x128xbf16>
    %cst = arith.constant dense<0.000000e+00> : vector<32x128xf32>
    %2 = tpu.matmul %0, %1, %cst {dimension_numbers = #tpu.dot_dimension_numbers<[1], [0], [0], [1], [0, 0, 1, 1], [], []>} : vector<32x128xbf16>, vector<128x128xbf16>, vector<32x128xf32> -> vector<32x128xf32>
    %c0_3 = arith.constant 0 : index
    %c0_4 = arith.constant 0 : index
    %3 = vector.load %arg3[%c0_3, %c0_4] : memref<32x128xf32, #tpu.memory_space<vmem>>, vector<32x128xf32>
    tpu.vector_store %arg3[%c0_3, %c0_4], %2 {strides = array<i32>} : memref<32x128xf32, #tpu.memory_space<vmem>>, vector<32x128xf32>,
    return
  }
  func.func @transform_0(%arg0: i32) -> (i32, i32) {
    %c0_i32 = arith.constant 0 : i32
    %c0_i32_0 = arith.constant 0 : i32
    return %arg0, %c0_i32 : i32, i32
  }
  func.func @transform_1(%arg0: i32) -> (i32, i32) {
    %c0_i32 = arith.constant 0 : i32
    %c0_i32_0 = arith.constant 0 : i32
    %c0_i32_1 = arith.constant 0 : i32
    return %c0_i32, %c0_i32_0 : i32, i32
  }
  func.func @transform_2(%arg0: i32) -> (i32, i32) {
    %c0_i32 = arith.constant 0 : i32
    %c0_i32_0 = arith.constant 0 : i32
    return %arg0, %c0_i32 : i32, i32
  }
}

module attributes {stable_mosaic.version = 11 : i64} {
  func.func @_matmul_act_kernel(%arg0: i32, %arg1: memref<16x1152xbf16, #tpu.memory_space<vmem>>, %arg2: memref<1152x256xbf16, #tpu.memory_space<vmem>>, %arg3: memref<16x256xf32, #tpu.memory_space<vmem>>) attributes {dimension_semantics = [#tpu.dimension_semantics<parallel>], iteration_bounds = array<i64: 1>, scalar_prefetch = 0 : i64, scratch_operands = 0 : i64, tpu.core_type = #tpu.core_type<tc>, window_params = [{transform_indices = @transform_0, window_bounds = array<i64: 16, 1152>}, {pipeline_mode = #tpu.pipeline_mode<synchronous>, transform_indices = @transform_1, window_bounds = array<i64: 1152, 256>}, {transform_indices = @transform_2, window_bounds = array<i64: 16, 256>}]} {
    %c0 = arith.constant 0 : index
    %c0_0 = arith.constant 0 : index
    %0 = vector.load %arg1[%c0, %c0_0] : memref<16x1152xbf16, #tpu.memory_space<vmem>>, vector<16x1152xbf16>
    %c0_1 = arith.constant 0 : index
    %c0_2 = arith.constant 0 : index
    %1 = vector.load %arg2[%c0_1, %c0_2] : memref<1152x256xbf16, #tpu.memory_space<vmem>>, vector<1152x256xbf16>
    %cst = arith.constant dense<0.000000e+00> : vector<16x256xf32>
    %2 = tpu.matmul %0, %1, %cst {dimension_numbers = #tpu.dot_dimension_numbers<[1], [0], [0], [1], [0, 0, 1, 1], [], []>} : vector<16x1152xbf16>, vector<1152x256xbf16>, vector<16x256xf32> -> vector<16x256xf32>
    %c0_3 = arith.constant 0 : index
    %c0_4 = arith.constant 0 : index
    %3 = vector.load %arg3[%c0_3, %c0_4] : memref<16x256xf32, #tpu.memory_space<vmem>>, vector<16x256xf32>
    tpu.vector_store %arg3[%c0_3, %c0_4], %2 {strides = array<i32>} : memref<16x256xf32, #tpu.memory_space<vmem>>, vector<16x256xf32>,
    return
  }
  func.func @transform_0(%arg0: i32) -> (i32, i32) {
    %c0_i32 = arith.constant 0 : i32
    %c0_i32_0 = arith.constant 0 : i32
    return %arg0, %c0_i32 : i32, i32
  }
  func.func @transform_1(%arg0: i32) -> (i32, i32) {
    %c0_i32 = arith.constant 0 : i32
    %c0_i32_0 = arith.constant 0 : i32
    %c0_i32_1 = arith.constant 0 : i32
    return %c0_i32, %c0_i32_0 : i32, i32
  }
  func.func @transform_2(%arg0: i32) -> (i32, i32) {
    %c0_i32 = arith.constant 0 : i32
    %c0_i32_0 = arith.constant 0 : i32
    return %arg0, %c0_i32 : i32, i32
  }
}

module attributes {stable_mosaic.version = 11 : i64} {
  func.func @_matmul_act_kernel(%arg0: i32, %arg1: memref<16x2304xbf16, #tpu.memory_space<vmem>>, %arg2: memref<2304x256xbf16, #tpu.memory_space<vmem>>, %arg3: memref<16x256xf32, #tpu.memory_space<vmem>>) attributes {dimension_semantics = [#tpu.dimension_semantics<parallel>], iteration_bounds = array<i64: 1>, scalar_prefetch = 0 : i64, scratch_operands = 0 : i64, tpu.core_type = #tpu.core_type<tc>, window_params = [{transform_indices = @transform_0, window_bounds = array<i64: 16, 2304>}, {pipeline_mode = #tpu.pipeline_mode<synchronous>, transform_indices = @transform_1, window_bounds = array<i64: 2304, 256>}, {transform_indices = @transform_2, window_bounds = array<i64: 16, 256>}]} {
    %c0 = arith.constant 0 : index
    %c0_0 = arith.constant 0 : index
    %0 = vector.load %arg1[%c0, %c0_0] : memref<16x2304xbf16, #tpu.memory_space<vmem>>, vector<16x2304xbf16>
    %c0_1 = arith.constant 0 : index
    %c0_2 = arith.constant 0 : index
    %1 = vector.load %arg2[%c0_1, %c0_2] : memref<2304x256xbf16, #tpu.memory_space<vmem>>, vector<2304x256xbf16>
    %cst = arith.constant dense<0.000000e+00> : vector<16x256xf32>
    %2 = tpu.matmul %0, %1, %cst {dimension_numbers = #tpu.dot_dimension_numbers<[1], [0], [0], [1], [0, 0, 1, 1], [], []>} : vector<16x2304xbf16>, vector<2304x256xbf16>, vector<16x256xf32> -> vector<16x256xf32>
    %c0_3 = arith.constant 0 : index
    %c0_4 = arith.constant 0 : index
    %3 = vector.load %arg3[%c0_3, %c0_4] : memref<16x256xf32, #tpu.memory_space<vmem>>, vector<16x256xf32>
    tpu.vector_store %arg3[%c0_3, %c0_4], %2 {strides = array<i32>} : memref<16x256xf32, #tpu.memory_space<vmem>>, vector<16x256xf32>,
    return
  }
  func.func @transform_0(%arg0: i32) -> (i32, i32) {
    %c0_i32 = arith.constant 0 : i32
    %c0_i32_0 = arith.constant 0 : i32
    return %arg0, %c0_i32 : i32, i32
  }
  func.func @transform_1(%arg0: i32) -> (i32, i32) {
    %c0_i32 = arith.constant 0 : i32
    %c0_i32_0 = arith.constant 0 : i32
    %c0_i32_1 = arith.constant 0 : i32
    return %c0_i32, %c0_i32_0 : i32, i32
  }
  func.func @transform_2(%arg0: i32) -> (i32, i32) {
    %c0_i32 = arith.constant 0 : i32
    %c0_i32_0 = arith.constant 0 : i32
    return %arg0, %c0_i32 : i32, i32
  }
}

module attributes {stable_mosaic.version = 11 : i64} {
  func.func @_matmul_act_kernel(%arg0: i32, %arg1: memref<16x128xbf16, #tpu.memory_space<vmem>>, %arg2: memref<128x256xbf16, #tpu.memory_space<vmem>>, %arg3: memref<16x256xf32, #tpu.memory_space<vmem>>) attributes {dimension_semantics = [#tpu.dimension_semantics<parallel>], iteration_bounds = array<i64: 1>, scalar_prefetch = 0 : i64, scratch_operands = 0 : i64, tpu.core_type = #tpu.core_type<tc>, window_params = [{transform_indices = @transform_0, window_bounds = array<i64: 16, 128>}, {pipeline_mode = #tpu.pipeline_mode<synchronous>, transform_indices = @transform_1, window_bounds = array<i64: 128, 256>}, {transform_indices = @transform_2, window_bounds = array<i64: 16, 256>}]} {
    %c0 = arith.constant 0 : index
    %c0_0 = arith.constant 0 : index
    %0 = vector.load %arg1[%c0, %c0_0] : memref<16x128xbf16, #tpu.memory_space<vmem>>, vector<16x128xbf16>
    %c0_1 = arith.constant 0 : index
    %c0_2 = arith.constant 0 : index
    %1 = vector.load %arg2[%c0_1, %c0_2] : memref<128x256xbf16, #tpu.memory_space<vmem>>, vector<128x256xbf16>
    %cst = arith.constant dense<0.000000e+00> : vector<16x256xf32>
    %2 = tpu.matmul %0, %1, %cst {dimension_numbers = #tpu.dot_dimension_numbers<[1], [0], [0], [1], [0, 0, 1, 1], [], []>} : vector<16x128xbf16>, vector<128x256xbf16>, vector<16x256xf32> -> vector<16x256xf32>
    %c0_3 = arith.constant 0 : index
    %c0_4 = arith.constant 0 : index
    %3 = vector.load %arg3[%c0_3, %c0_4] : memref<16x256xf32, #tpu.memory_space<vmem>>, vector<16x256xf32>
    tpu.vector_store %arg3[%c0_3, %c0_4], %2 {strides = array<i32>} : memref<16x256xf32, #tpu.memory_space<vmem>>, vector<16x256xf32>,
    return
  }
  func.func @transform_0(%arg0: i32) -> (i32, i32) {
    %c0_i32 = arith.constant 0 : i32
    %c0_i32_0 = arith.constant 0 : i32
    return %arg0, %c0_i32 : i32, i32
  }
  func.func @transform_1(%arg0: i32) -> (i32, i32) {
    %c0_i32 = arith.constant 0 : i32
    %c0_i32_0 = arith.constant 0 : i32
    %c0_i32_1 = arith.constant 0 : i32
    return %c0_i32, %c0_i32_0 : i32, i32
  }
  func.func @transform_2(%arg0: i32) -> (i32, i32) {
    %c0_i32 = arith.constant 0 : i32
    %c0_i32_0 = arith.constant 0 : i32
    return %arg0, %c0_i32 : i32, i32
  }
}

module attributes {stable_mosaic.version = 11 : i64} {
  func.func @_matmul_act_kernel(%arg0: i32, %arg1: memref<16x2304xbf16, #tpu.memory_space<vmem>>, %arg2: memref<2304x512xbf16, #tpu.memory_space<vmem>>, %arg3: memref<16x512xf32, #tpu.memory_space<vmem>>) attributes {dimension_semantics = [#tpu.dimension_semantics<parallel>], iteration_bounds = array<i64: 1>, scalar_prefetch = 0 : i64, scratch_operands = 0 : i64, tpu.core_type = #tpu.core_type<tc>, window_params = [{transform_indices = @transform_0, window_bounds = array<i64: 16, 2304>}, {pipeline_mode = #tpu.pipeline_mode<synchronous>, transform_indices = @transform_1, window_bounds = array<i64: 2304, 512>}, {transform_indices = @transform_2, window_bounds = array<i64: 16, 512>}]} {
    %c0 = arith.constant 0 : index
    %c0_0 = arith.constant 0 : index
    %0 = vector.load %arg1[%c0, %c0_0] : memref<16x2304xbf16, #tpu.memory_space<vmem>>, vector<16x2304xbf16>
    %c0_1 = arith.constant 0 : index
    %c0_2 = arith.constant 0 : index
    %1 = vector.load %arg2[%c0_1, %c0_2] : memref<2304x512xbf16, #tpu.memory_space<vmem>>, vector<2304x512xbf16>
    %cst = arith.constant dense<0.000000e+00> : vector<16x512xf32>
    %2 = tpu.matmul %0, %1, %cst {dimension_numbers = #tpu.dot_dimension_numbers<[1], [0], [0], [1], [0, 0, 1, 1], [], []>} : vector<16x2304xbf16>, vector<2304x512xbf16>, vector<16x512xf32> -> vector<16x512xf32>
    %c0_3 = arith.constant 0 : index
    %c0_4 = arith.constant 0 : index
    %3 = vector.load %arg3[%c0_3, %c0_4] : memref<16x512xf32, #tpu.memory_space<vmem>>, vector<16x512xf32>
    tpu.vector_store %arg3[%c0_3, %c0_4], %2 {strides = array<i32>} : memref<16x512xf32, #tpu.memory_space<vmem>>, vector<16x512xf32>,
    return
  }
  func.func @transform_0(%arg0: i32) -> (i32, i32) {
    %c0_i32 = arith.constant 0 : i32
    %c0_i32_0 = arith.constant 0 : i32
    return %arg0, %c0_i32 : i32, i32
  }
  func.func @transform_1(%arg0: i32) -> (i32, i32) {
    %c0_i32 = arith.constant 0 : i32
    %c0_i32_0 = arith.constant 0 : i32
    %c0_i32_1 = arith.constant 0 : i32
    return %c0_i32, %c0_i32_0 : i32, i32
  }
  func.func @transform_2(%arg0: i32) -> (i32, i32) {
    %c0_i32 = arith.constant 0 : i32
    %c0_i32_0 = arith.constant 0 : i32
    return %arg0, %c0_i32 : i32, i32
  }
}

module attributes {stable_mosaic.version = 11 : i64} {
  func.func @_matmul_act_kernel(%arg0: i32, %arg1: memref<16x4608xbf16, #tpu.memory_space<vmem>>, %arg2: memref<4608x512xbf16, #tpu.memory_space<vmem>>, %arg3: memref<16x512xf32, #tpu.memory_space<vmem>>) attributes {dimension_semantics = [#tpu.dimension_semantics<parallel>], iteration_bounds = array<i64: 1>, scalar_prefetch = 0 : i64, scratch_operands = 0 : i64, tpu.core_type = #tpu.core_type<tc>, window_params = [{transform_indices = @transform_0, window_bounds = array<i64: 16, 4608>}, {pipeline_mode = #tpu.pipeline_mode<synchronous>, transform_indices = @transform_1, window_bounds = array<i64: 4608, 512>}, {transform_indices = @transform_2, window_bounds = array<i64: 16, 512>}]} {
    %c0 = arith.constant 0 : index
    %c0_0 = arith.constant 0 : index
    %0 = vector.load %arg1[%c0, %c0_0] : memref<16x4608xbf16, #tpu.memory_space<vmem>>, vector<16x4608xbf16>
    %c0_1 = arith.constant 0 : index
    %c0_2 = arith.constant 0 : index
    %1 = vector.load %arg2[%c0_1, %c0_2] : memref<4608x512xbf16, #tpu.memory_space<vmem>>, vector<4608x512xbf16>
    %cst = arith.constant dense<0.000000e+00> : vector<16x512xf32>
    %2 = tpu.matmul %0, %1, %cst {dimension_numbers = #tpu.dot_dimension_numbers<[1], [0], [0], [1], [0, 0, 1, 1], [], []>} : vector<16x4608xbf16>, vector<4608x512xbf16>, vector<16x512xf32> -> vector<16x512xf32>
    %c0_3 = arith.constant 0 : index
    %c0_4 = arith.constant 0 : index
    %3 = vector.load %arg3[%c0_3, %c0_4] : memref<16x512xf32, #tpu.memory_space<vmem>>, vector<16x512xf32>
    tpu.vector_store %arg3[%c0_3, %c0_4], %2 {strides = array<i32>} : memref<16x512xf32, #tpu.memory_space<vmem>>, vector<16x512xf32>,
    return
  }
  func.func @transform_0(%arg0: i32) -> (i32, i32) {
    %c0_i32 = arith.constant 0 : i32
    %c0_i32_0 = arith.constant 0 : i32
    return %arg0, %c0_i32 : i32, i32
  }
  func.func @transform_1(%arg0: i32) -> (i32, i32) {
    %c0_i32 = arith.constant 0 : i32
    %c0_i32_0 = arith.constant 0 : i32
    %c0_i32_1 = arith.constant 0 : i32
    return %c0_i32, %c0_i32_0 : i32, i32
  }
  func.func @transform_2(%arg0: i32) -> (i32, i32) {
    %c0_i32 = arith.constant 0 : i32
    %c0_i32_0 = arith.constant 0 : i32
    return %arg0, %c0_i32 : i32, i32
  }
}

module attributes {stable_mosaic.version = 11 : i64} {
  func.func @_matmul_act_kernel(%arg0: i32, %arg1: memref<16x256xbf16, #tpu.memory_space<vmem>>, %arg2: memref<256x512xbf16, #tpu.memory_space<vmem>>, %arg3: memref<16x512xf32, #tpu.memory_space<vmem>>) attributes {dimension_semantics = [#tpu.dimension_semantics<parallel>], iteration_bounds = array<i64: 1>, scalar_prefetch = 0 : i64, scratch_operands = 0 : i64, tpu.core_type = #tpu.core_type<tc>, window_params = [{transform_indices = @transform_0, window_bounds = array<i64: 16, 256>}, {pipeline_mode = #tpu.pipeline_mode<synchronous>, transform_indices = @transform_1, window_bounds = array<i64: 256, 512>}, {transform_indices = @transform_2, window_bounds = array<i64: 16, 512>}]} {
    %c0 = arith.constant 0 : index
    %c0_0 = arith.constant 0 : index
    %0 = vector.load %arg1[%c0, %c0_0] : memref<16x256xbf16, #tpu.memory_space<vmem>>, vector<16x256xbf16>
    %c0_1 = arith.constant 0 : index
    %c0_2 = arith.constant 0 : index
    %1 = vector.load %arg2[%c0_1, %c0_2] : memref<256x512xbf16, #tpu.memory_space<vmem>>, vector<256x512xbf16>
    %cst = arith.constant dense<0.000000e+00> : vector<16x512xf32>
    %2 = tpu.matmul %0, %1, %cst {dimension_numbers = #tpu.dot_dimension_numbers<[1], [0], [0], [1], [0, 0, 1, 1], [], []>} : vector<16x256xbf16>, vector<256x512xbf16>, vector<16x512xf32> -> vector<16x512xf32>
    %c0_3 = arith.constant 0 : index
    %c0_4 = arith.constant 0 : index
    %3 = vector.load %arg3[%c0_3, %c0_4] : memref<16x512xf32, #tpu.memory_space<vmem>>, vector<16x512xf32>
    tpu.vector_store %arg3[%c0_3, %c0_4], %2 {strides = array<i32>} : memref<16x512xf32, #tpu.memory_space<vmem>>, vector<16x512xf32>,
    return
  }
  func.func @transform_0(%arg0: i32) -> (i32, i32) {
    %c0_i32 = arith.constant 0 : i32
    %c0_i32_0 = arith.constant 0 : i32
    return %arg0, %c0_i32 : i32, i32
  }
  func.func @transform_1(%arg0: i32) -> (i32, i32) {
    %c0_i32 = arith.constant 0 : i32
    %c0_i32_0 = arith.constant 0 : i32
    %c0_i32_1 = arith.constant 0 : i32
    return %c0_i32, %c0_i32_0 : i32, i32
  }
  func.func @transform_2(%arg0: i32) -> (i32, i32) {
    %c0_i32 = arith.constant 0 : i32
    %c0_i32_0 = arith.constant 0 : i32
    return %arg0, %c0_i32 : i32, i32
  }
}

</mosaic_0001>

<bundles_post_ra>
// kernel: encoder_forward.20
= control target key start
LH: loop header
LB: loop body
LE: loop exit
PB: predicated region body
PF: predicated region fallthrough
CT: control target
= control target key end

     0   :  { %v1106_v0 = vmov 0   ;;  %s1586_s1 = inlined_call_operand.vmem [shape: bf16[256,128], index: 1, kind: input, shape index: {}]   ;;  %s1587_s0 = inlined_call_operand.vmem [shape: bf16[512,256], index: 0, kind: input, shape index: {}]   ;;  %s1588_s2 = inlined_call_operand.vmem [shape: f32[512,128], index: 2, kind: output, shape index: {}]  }
   0x1   :  { %524 = vmatprep.subr.bf16.mxu0 %v1106_v0  ;;  %961 = vmatprep.subr.bf16.mxu1 %v1106_v0  ;;  %v994_v1 = vld [vmem:[%s1586_s1 + $0x38] sm:$0xff]   ;;  %v995_v2 = vld [vmem:[%s1586_s1 + $0x30] sm:$0xff]   ;;  %v996_v3 = vld [vmem:[%s1586_s1 + $0x28] sm:$0xff]  }
   0x2   :  { %525 = vmatpush1.bf16.msra.mxu0 %v994_v1  ;;  %977 = vmatpush1.bf16.msra.mxu1 %v994_v1  ;;  %v997_v4 = vld [vmem:[%s1586_s1 + $0x20] sm:$0xff]   ;;  %v998_v5 = vld [vmem:[%s1586_s1 + $0x18] sm:$0xff]   ;;  %v999_v7 = vld [vmem:[%s1586_s1 + $0x10] sm:$0xff]  }
   0x3   :  { %526 = vmatprep.subr.bf16.mxu0 %v1106_v0  ;;  %962 = vmatprep.subr.bf16.mxu1 %v1106_v0  ;;  %v1012_v6 = vld [vmem:[%s1587_s0 + $0x4] ss:$8 sps:$4 sm:$0xff]   ;;  %v1002_v11 = vld [vmem:[%s1586_s1 + $0x78] sm:$0xff]   ;;  %v1003_v12 = vld [vmem:[%s1586_s1 + $0x70] sm:$0xff]  }
   0x4   :  { %v1015_v8 = vld [vmem:[%s1587_s0 + $0x104] ss:$8 sps:$4 sm:$0xff]   ;;  %556 = vmatprep.mubr.bf16.mxu0 %v1012_v6  ;;  %v1006_v15 = vld [vmem:[%s1586_s1 + $0x58] sm:$0xff]   ;;  %v1007_v16 = vld [vmem:[%s1586_s1 + $0x50] sm:$0xff]  }
   0x5   :  { %684 = vmatprep.mubr.bf16.mxu1 %v1015_v8  ;;  %v1000_v9 = vld [vmem:[%s1586_s1 + $0x8] sm:$0xff]   ;;  %v1001_v10 = vld [vmem:[%s1586_s1] sm:$0xff]   ;;  %v1016_v21 = vld [vmem:[%s1587_s0 + $0x14] ss:$8 sps:$4 sm:$0xff]  }
   0x6   :  { %527 = vmatpush1.bf16.msra.mxu0 %v995_v2  ;;  %978 = vmatpush1.bf16.msra.mxu1 %v995_v2  ;;  %v1004_v13 = vld [vmem:[%s1586_s1 + $0x68] sm:$0xff]   ;;  %v1005_v14 = vld [vmem:[%s1586_s1 + $0x60] sm:$0xff]   ;;  %v1018_v22 = vld [vmem:[%s1587_s0 + $0x114] ss:$8 sps:$4 sm:$0xff]  }
   0x7   :  { %528 = vmatprep.subr.bf16.mxu0 %v1106_v0  ;;  %963 = vmatprep.subr.bf16.mxu1 %v1106_v0  ;;  %v1008_v17 = vld [vmem:[%s1586_s1 + $0x48] sm:$0xff]   ;;  %v1009_v18 = vld [vmem:[%s1586_s1 + $0x40] sm:$0xff]   ;;  %v1020_v23 = vld [vmem:[%s1587_s0 + $0x10] ss:$8 sps:$4 sm:$0xff]  }
   0x8   :  { %v1010_v19 = vld [vmem:[%s1587_s0] ss:$8 sps:$4 sm:$0xff]   ;;  %v1021_v24 = vld [vmem:[%s1587_s0 + $0x110] ss:$8 sps:$4 sm:$0xff]   ;;  %v1022_v25 = vld [vmem:[%s1587_s0 + $0x24] ss:$8 sps:$4 sm:$0xff]  }
   0x9   :  { %v1013_v20 = vld [vmem:[%s1587_s0 + $0x100] ss:$8 sps:$4 sm:$0xff]   ;;  %v1024_v26 = vld [vmem:[%s1587_s0 + $0x124] ss:$8 sps:$4 sm:$0xff]   ;;  %v1028_v29 = vld [vmem:[%s1587_s0 + $0x34] ss:$8 sps:$4 sm:$0xff]  }
   0xa   :  { %529 = vmatpush1.bf16.msra.mxu0 %v996_v3  ;;  %979 = vmatpush1.bf16.msra.mxu1 %v996_v3  ;;  %v1026_v27 = vld [vmem:[%s1587_s0 + $0x20] ss:$8 sps:$4 sm:$0xff]   ;;  %v1030_v30 = vld [vmem:[%s1587_s0 + $0x134] ss:$8 sps:$4 sm:$0xff]   ;;  %v1032_v31 = vld [vmem:[%s1587_s0 + $0x30] ss:$8 sps:$4 sm:$0xff]  }
   0xb   :  { %530 = vmatprep.subr.bf16.mxu0 %v1106_v0  ;;  %964 = vmatprep.subr.bf16.mxu1 %v1106_v0  ;;  %v1027_v28 = vld [vmem:[%s1587_s0 + $0x120] ss:$8 sps:$4 sm:$0xff]   ;;  %v1033_v32 = vld [vmem:[%s1587_s0 + $0x130] ss:$8 sps:$4 sm:$0xff]   ;;  %v1034_v33 = vld [vmem:[%s1587_s0 + $0x44] ss:$8 sps:$4 sm:$0xff]  }
   0xc   :  { %v1036_v34 = vld [vmem:[%s1587_s0 + $0x144] ss:$8 sps:$4 sm:$0xff]   ;;  %v1038_v35 = vld [vmem:[%s1587_s0 + $0x40] ss:$8 sps:$4 sm:$0xff]   ;;  %v1040_v37 = vld [vmem:[%s1587_s0 + $0x54] ss:$8 sps:$4 sm:$0xff]  }
   0xd   :  { %v1039_v36 = vld [vmem:[%s1587_s0 + $0x140] ss:$8 sps:$4 sm:$0xff]   ;;  %v1042_v38 = vld [vmem:[%s1587_s0 + $0x154] ss:$8 sps:$4 sm:$0xff]   ;;  %v1044_v39 = vld [vmem:[%s1587_s0 + $0x50] ss:$8 sps:$4 sm:$0xff]  }
   0xe   :  { %531 = vmatpush1.bf16.msra.mxu0 %v997_v4  ;;  %980 = vmatpush1.bf16.msra.mxu1 %v997_v4  ;;  %v1045_v40 = vld [vmem:[%s1587_s0 + $0x150] ss:$8 sps:$4 sm:$0xff]   ;;  %v1046_v41 = vld [vmem:[%s1587_s0 + $0x64] ss:$8 sps:$4 sm:$0xff]   ;;  %v1050_v43 = vld [vmem:[%s1587_s0 + $0x60] ss:$8 sps:$4 sm:$0xff]  }
   0xf   :  { %532 = vmatprep.subr.bf16.mxu0 %v1106_v0  ;;  %965 = vmatprep.subr.bf16.mxu1 %v1106_v0  ;;  %v1048_v42 = vld [vmem:[%s1587_s0 + $0x164] ss:$8 sps:$4 sm:$0xff]   ;;  %v1051_v44 = vld [vmem:[%s1587_s0 + $0x160] ss:$8 sps:$4 sm:$0xff]   ;;  %v1052_v45 = vld [vmem:[%s1587_s0 + $0x74] ss:$8 sps:$4 sm:$0xff]  }
  0x10   :  { %v1054_v46 = vld [vmem:[%s1587_s0 + $0x174] ss:$8 sps:$4 sm:$0xff]   ;;  %v1056_v47 = vld [vmem:[%s1587_s0 + $0x70] ss:$8 sps:$4 sm:$0xff]   ;;  %v1058_v49 = vld [vmem:[%s1587_s0 + $0x84] ss:$8 sps:$4 sm:$0xff]  }
  0x11   :  { %v1057_v48 = vld [vmem:[%s1587_s0 + $0x170] ss:$8 sps:$4 sm:$0xff]   ;;  %v1060_v50 = vld [vmem:[%s1587_s0 + $0x184] ss:$8 sps:$4 sm:$0xff]   ;;  %v1062_v51 = vld [vmem:[%s1587_s0 + $0x80] ss:$8 sps:$4 sm:$0xff]  }
  0x12   :  { %533 = vmatpush1.bf16.msra.mxu0 %v998_v5  ;;  %981 = vmatpush1.bf16.msra.mxu1 %v998_v5  ;;  %v1063_v52 = vld [vmem:[%s1587_s0 + $0x180] ss:$8 sps:$4 sm:$0xff]   ;;  %v1064_v53 = vld [vmem:[%s1587_s0 + $0x94] ss:$8 sps:$4 sm:$0xff]   ;;  %v1068_v55 = vld [vmem:[%s1587_s0 + $0x90] ss:$8 sps:$4 sm:$0xff]  }
  0x13   :  { %534 = vmatprep.subr.bf16.mxu0 %v1106_v0  ;;  %966 = vmatprep.subr.bf16.mxu1 %v1106_v0  ;;  %v1066_v54 = vld [vmem:[%s1587_s0 + $0x194] ss:$8 sps:$4 sm:$0xff]   ;;  %v1069_v56 = vld [vmem:[%s1587_s0 + $0x190] ss:$8 sps:$4 sm:$0xff]   ;;  %v1070_v57 = vld [vmem:[%s1587_s0 + $0xa4] ss:$8 sps:$4 sm:$0xff]  }
  0x14   :  { %v1072_v58 = vld [vmem:[%s1587_s0 + $0x1a4] ss:$8 sps:$4 sm:$0xff]   ;;  %v1074_v59 = vld [vmem:[%s1587_s0 + $0xa0] ss:$8 sps:$4 sm:$0xff]   ;;  %v1076_v61 = vld [vmem:[%s1587_s0 + $0xb4] ss:$8 sps:$4 sm:$0xff]  }
  0x15   :  { %v1075_v60 = vld [vmem:[%s1587_s0 + $0x1a0] ss:$8 sps:$4 sm:$0xff]   ;;  %v1078_v62 = vld [vmem:[%s1587_s0 + $0x1b4] ss:$8 sps:$4 sm:$0xff]   ;;  %v1080_v63 = vld [vmem:[%s1587_s0 + $0xb0] ss:$8 sps:$4 sm:$0xff]  }
  0x16   :  { %535 = vmatpush1.bf16.msra.mxu0 %v999_v7  ;;  %982 = vmatpush1.bf16.msra.mxu1 %v999_v7  ;;  %v1082_v1 = vld [vmem:[%s1587_s0 + $0xc4] ss:$8 sps:$4 sm:$0xff]   ;;  %v1086_v3 = vld [vmem:[%s1587_s0 + $0xc0] ss:$8 sps:$4 sm:$0xff]   ;;  %v1088_v5 = vld [vmem:[%s1587_s0 + $0xd4] ss:$8 sps:$4 sm:$0xff]  }
  0x17   :  { %536 = vmatprep.subr.bf16.mxu0 %v1106_v0  ;;  %967 = vmatprep.subr.bf16.mxu1 %v1106_v0  ;;  %v1084_v2 = vld [vmem:[%s1587_s0 + $0x1c4] ss:$8 sps:$4 sm:$0xff]   ;;  %v1087_v4 = vld [vmem:[%s1587_s0 + $0x1c0] ss:$8 sps:$4 sm:$0xff]   ;;  %v1090_v6 = vld [vmem:[%s1587_s0 + $0x1d4] ss:$8 sps:$4 sm:$0xff]  }
  0x18   :  { %v1092_v7 = vld [vmem:[%s1587_s0 + $0xd0] ss:$8 sps:$4 sm:$0xff]  }
  0x19   :  { %v1093_v8 = vld [vmem:[%s1587_s0 + $0x1d0] ss:$8 sps:$4 sm:$0xff]  }
  0x1a   :  { %537 = vmatpush1.bf16.msra.mxu0 %v1000_v9  ;;  %983 = vmatpush1.bf16.msra.mxu1 %v1000_v9  ;;  %v1094_v9 = vld [vmem:[%s1587_s0 + $0xe4] ss:$8 sps:$4 sm:$0xff]  }
  0x1b   :  { %538 = vmatprep.subr.bf16.mxu0 %v1106_v0  ;;  %968 = vmatprep.subr.bf16.mxu1 %v1106_v0 }
  0x1e   :  { %539 = vmatpush1.bf16.msra.mxu0 %v1001_v10  ;;  %984 = vmatpush1.bf16.msra.mxu1 %v1001_v10  ;;  %v1096_v10 = vld [vmem:[%s1587_s0 + $0x1e4] ss:$8 sps:$4 sm:$0xff]  }
  0x1f   :  { %540 = vmatprep.subr.bf16.mxu0 %v1106_v0  ;;  %969 = vmatprep.subr.bf16.mxu1 %v1106_v0 }
  0x22   :  { %541 = vmatpush2.bf16.msra.mxu0 %v1002_v11  ;;  %985 = vmatpush2.bf16.msra.mxu1 %v1002_v11  ;;  %v1098_v11 = vld [vmem:[%s1587_s0 + $0xe0] ss:$8 sps:$4 sm:$0xff]  }
  0x23   :  { %542 = vmatprep.subr.bf16.mxu0 %v1106_v0  ;;  %970 = vmatprep.subr.bf16.mxu1 %v1106_v0 }
  0x26   :  { %543 = vmatpush2.bf16.msra.mxu0 %v1003_v12  ;;  %986 = vmatpush2.bf16.msra.mxu1 %v1003_v12  ;;  %v1099_v12 = vld [vmem:[%s1587_s0 + $0x1e0] ss:$8 sps:$4 sm:$0xff]  }
  0x27   :  { %544 = vmatprep.subr.bf16.mxu0 %v1106_v0  ;;  %971 = vmatprep.subr.bf16.mxu1 %v1106_v0 }
  0x2a   :  { %545 = vmatpush2.bf16.msra.mxu0 %v1004_v13  ;;  %987 = vmatpush2.bf16.msra.mxu1 %v1004_v13  ;;  %v1100_v13 = vld [vmem:[%s1587_s0 + $0xf4] ss:$8 sps:$4 sm:$0xff]  }
  0x2b   :  { %546 = vmatprep.subr.bf16.mxu0 %v1106_v0  ;;  %972 = vmatprep.subr.bf16.mxu1 %v1106_v0 }
  0x2e   :  { %547 = vmatpush2.bf16.msra.mxu0 %v1005_v14  ;;  %988 = vmatpush2.bf16.msra.mxu1 %v1005_v14  ;;  %v1102_v14 = vld [vmem:[%s1587_s0 + $0x1f4] ss:$8 sps:$4 sm:$0xff]  }
  0x2f   :  { %548 = vmatprep.subr.bf16.mxu0 %v1106_v0  ;;  %973 = vmatprep.subr.bf16.mxu1 %v1106_v0 }
  0x32   :  { %549 = vmatpush2.bf16.msra.mxu0 %v1006_v15  ;;  %989 = vmatpush2.bf16.msra.mxu1 %v1006_v15  ;;  %v1104_v15 = vld [vmem:[%s1587_s0 + $0xf0] ss:$8 sps:$4 sm:$0xff]  }
  0x33   :  { %550 = vmatprep.subr.bf16.mxu0 %v1106_v0  ;;  %974 = vmatprep.subr.bf16.mxu1 %v1106_v0 }
  0x36   :  { %551 = vmatpush2.bf16.msra.mxu0 %v1007_v16  ;;  %990 = vmatpush2.bf16.msra.mxu1 %v1007_v16  ;;  %v1105_v16 = vld [vmem:[%s1587_s0 + $0x1f0] ss:$8 sps:$4 sm:$0xff]  }
  0x37   :  { %552 = vmatprep.subr.bf16.mxu0 %v1106_v0  ;;  %975 = vmatprep.subr.bf16.mxu1 %v1106_v0 }
  0x3a   :  { %553 = vmatpush2.bf16.msra.mxu0 %v1008_v17  ;;  %991 = vmatpush2.bf16.msra.mxu1 %v1008_v17 }
  0x3b   :  { %554 = vmatprep.subr.bf16.mxu0 %v1106_v0  ;;  %976 = vmatprep.subr.bf16.mxu1 %v1106_v0  ;;  %v1081_v0 = vld [vmem:[%s1587_s0 + $0x1b0] ss:$8 sps:$4 sm:$0xff]  }
  0x3e   :  { %555 = vmatpush2.bf16.msra.mxu0 %v1009_v18  ;;  %992 = vmatpush2.bf16.msra.mxu1 %v1009_v18 }
  0x41   :  { %557 = vmatmul.mubr.bf16.vlgmr.msra.gmra.mxu0 %v1010_v19  ;;  %685 = vmatmul.mubr.bf16.vlgmr.msra.gmra.mxu1 %v1013_v20 }
  0x42   :  { %564 = vmatprep.mubr.bf16.mxu0 %v1016_v21  ;;  %692 = vmatprep.mubr.bf16.mxu1 %v1018_v22 }
  0x49   :  { %565 = vmatmul.mubr.bf16.gmra.mxu0 %v1020_v23  ;;  %693 = vmatmul.mubr.bf16.gmra.mxu1 %v1021_v24 }
  0x4a   :  { %572 = vmatprep.mubr.bf16.mxu0 %v1022_v25  ;;  %700 = vmatprep.mubr.bf16.mxu1 %v1024_v26 }
  0x51   :  { %573 = vmatmul.mubr.bf16.gmra.mxu0 %v1026_v27  ;;  %701 = vmatmul.mubr.bf16.gmra.mxu1 %v1027_v28 }
  0x52   :  { %580 = vmatprep.mubr.bf16.mxu0 %v1028_v29  ;;  %708 = vmatprep.mubr.bf16.mxu1 %v1030_v30 }
  0x59   :  { %581 = vmatmul.mubr.bf16.gmra.mxu0 %v1032_v31  ;;  %709 = vmatmul.mubr.bf16.gmra.mxu1 %v1033_v32 }
  0x5a   :  { %588 = vmatprep.mubr.bf16.mxu0 %v1034_v33  ;;  %716 = vmatprep.mubr.bf16.mxu1 %v1036_v34 }
  0x61   :  { %589 = vmatmul.mubr.bf16.gmra.mxu0 %v1038_v35  ;;  %717 = vmatmul.mubr.bf16.gmra.mxu1 %v1039_v36 }
  0x62   :  { %596 = vmatprep.mubr.bf16.mxu0 %v1040_v37  ;;  %724 = vmatprep.mubr.bf16.mxu1 %v1042_v38 }
  0x69   :  { %597 = vmatmul.mubr.bf16.gmra.mxu0 %v1044_v39  ;;  %725 = vmatmul.mubr.bf16.gmra.mxu1 %v1045_v40 }
  0x6a   :  { %604 = vmatprep.mubr.bf16.mxu0 %v1046_v41  ;;  %732 = vmatprep.mubr.bf16.mxu1 %v1048_v42 }
  0x71   :  { %605 = vmatmul.mubr.bf16.gmra.mxu0 %v1050_v43  ;;  %733 = vmatmul.mubr.bf16.gmra.mxu1 %v1051_v44 }
  0x72   :  { %612 = vmatprep.mubr.bf16.mxu0 %v1052_v45  ;;  %740 = vmatprep.mubr.bf16.mxu1 %v1054_v46 }
  0x79   :  { %613 = vmatmul.mubr.bf16.gmra.mxu0 %v1056_v47  ;;  %741 = vmatmul.mubr.bf16.gmra.mxu1 %v1057_v48 }
  0x7a   :  { %620 = vmatprep.mubr.bf16.mxu0 %v1058_v49  ;;  %748 = vmatprep.mubr.bf16.mxu1 %v1060_v50 }
  0x81   :  { %621 = vmatmul.mubr.bf16.gmra.mxu0 %v1062_v51  ;;  %749 = vmatmul.mubr.bf16.gmra.mxu1 %v1063_v52 }
  0x82   :  { %628 = vmatprep.mubr.bf16.mxu0 %v1064_v53  ;;  %756 = vmatprep.mubr.bf16.mxu1 %v1066_v54 }
  0x89   :  { %629 = vmatmul.mubr.bf16.gmra.mxu0 %v1068_v55  ;;  %757 = vmatmul.mubr.bf16.gmra.mxu1 %v1069_v56 }
  0x8a   :  { %636 = vmatprep.mubr.bf16.mxu0 %v1070_v57  ;;  %764 = vmatprep.mubr.bf16.mxu1 %v1072_v58 }
  0x91   :  { %637 = vmatmul.mubr.bf16.gmra.mxu0 %v1074_v59  ;;  %765 = vmatmul.mubr.bf16.gmra.mxu1 %v1075_v60 }
  0x92   :  { %644 = vmatprep.mubr.bf16.mxu0 %v1076_v61  ;;  %772 = vmatprep.mubr.bf16.mxu1 %v1078_v62 }
  0x99   :  { %645 = vmatmul.mubr.bf16.gmra.mxu0 %v1080_v63  ;;  %773 = vmatmul.mubr.bf16.gmra.mxu1 %v1081_v0 }
  0x9a   :  { %652 = vmatprep.mubr.bf16.mxu0 %v1082_v1  ;;  %780 = vmatprep.mubr.bf16.mxu1 %v1084_v2 }
  0xa1   :  { %653 = vmatmul.mubr.bf16.gmra.mxu0 %v1086_v3  ;;  %781 = vmatmul.mubr.bf16.gmra.mxu1 %v1087_v4 }
  0xa2   :  { %660 = vmatprep.mubr.bf16.mxu0 %v1088_v5  ;;  %788 = vmatprep.mubr.bf16.mxu1 %v1090_v6 }
  0xa9   :  { %661 = vmatmul.mubr.bf16.gmra.mxu0 %v1092_v7  ;;  %789 = vmatmul.mubr.bf16.gmra.mxu1 %v1093_v8 }
  0xaa   :  { %668 = vmatprep.mubr.bf16.mxu0 %v1094_v9  ;;  %796 = vmatprep.mubr.bf16.mxu1 %v1096_v10 }
  0xb1   :  { %669 = vmatmul.mubr.bf16.gmra.mxu0 %v1098_v11  ;;  %797 = vmatmul.mubr.bf16.gmra.mxu1 %v1099_v12 }
  0xb2   :  { %676 = vmatprep.mubr.bf16.mxu0 %v1100_v13  ;;  %804 = vmatprep.mubr.bf16.mxu1 %v1102_v14 }
  0xb9   :  { %677 = vmatmul.mubr.bf16.gmra.mxu0 %v1104_v15  ;;  %805 = vmatmul.mubr.bf16.gmra.mxu1 %v1105_v16 }
 0x101   :  { %v558_v17 = vpop.f32.mrf.mxu0  ;;  %v686_v18 = vpop.f32.mrf.mxu1 }
 0x102   :  { %813 = vst [vmem:[%s1588_s2] sm:$0xff] %v558_v17  ;;  %845 = vst [vmem:[%s1588_s2 + $0x100] sm:$0xff] %v686_v18 }
 0x103   :  { %v560_v19 = vpop.f32.mrf.mxu0  ;;  %v688_v20 = vpop.f32.mrf.mxu1 }
 0x105   :  { %v561_v21 = vpop.f32.mrf.mxu0  ;;  %v689_v22 = vpop.f32.mrf.mxu1 }
 0x106   :  { %814 = vst [vmem:[%s1588_s2 + $0x8] sm:$0xff] %v561_v21  ;;  %846 = vst [vmem:[%s1588_s2 + $0x108] sm:$0xff] %v689_v22 }
 0x107   :  { %v563_v23 = vpop.f32.mrf.mxu0  ;;  %v691_v24 = vpop.f32.mrf.mxu1 }
 0x109   :  { %v566_v25 = vpop.f32.mrf.mxu0  ;;  %v694_v26 = vpop.f32.mrf.mxu1 }
 0x10a   :  { %815 = vst [vmem:[%s1588_s2 + $0x10] sm:$0xff] %v566_v25  ;;  %847 = vst [vmem:[%s1588_s2 + $0x110] sm:$0xff] %v694_v26 }
 0x10b   :  { %v568_v27 = vpop.f32.mrf.mxu0  ;;  %v696_v28 = vpop.f32.mrf.mxu1 }
 0x10d   :  { %v569_v29 = vpop.f32.mrf.mxu0  ;;  %v697_v30 = vpop.f32.mrf.mxu1 }
 0x10e   :  { %816 = vst [vmem:[%s1588_s2 + $0x18] sm:$0xff] %v569_v29  ;;  %848 = vst [vmem:[%s1588_s2 + $0x118] sm:$0xff] %v697_v30 }
 0x10f   :  { %v571_v31 = vpop.f32.mrf.mxu0  ;;  %v699_v32 = vpop.f32.mrf.mxu1 }
 0x111   :  { %v574_v33 = vpop.f32.mrf.mxu0  ;;  %v702_v34 = vpop.f32.mrf.mxu1 }
 0x112   :  { %817 = vst [vmem:[%s1588_s2 + $0x20] sm:$0xff] %v574_v33  ;;  %849 = vst [vmem:[%s1588_s2 + $0x120] sm:$0xff] %v702_v34 }
 0x113   :  { %v576_v35 = vpop.f32.mrf.mxu0  ;;  %v704_v36 = vpop.f32.mrf.mxu1 }
 0x115   :  { %v577_v37 = vpop.f32.mrf.mxu0  ;;  %v705_v38 = vpop.f32.mrf.mxu1 }
 0x116   :  { %818 = vst [vmem:[%s1588_s2 + $0x28] sm:$0xff] %v577_v37  ;;  %850 = vst [vmem:[%s1588_s2 + $0x128] sm:$0xff] %v705_v38 }
 0x117   :  { %v579_v39 = vpop.f32.mrf.mxu0  ;;  %v707_v40 = vpop.f32.mrf.mxu1 }
 0x119   :  { %v582_v41 = vpop.f32.mrf.mxu0  ;;  %v710_v42 = vpop.f32.mrf.mxu1 }
 0x11a   :  { %819 = vst [vmem:[%s1588_s2 + $0x30] sm:$0xff] %v582_v41  ;;  %851 = vst [vmem:[%s1588_s2 + $0x130] sm:$0xff] %v710_v42 }
 0x11b   :  { %v584_v43 = vpop.f32.mrf.mxu0  ;;  %v712_v44 = vpop.f32.mrf.mxu1 }
 0x11d   :  { %v585_v45 = vpop.f32.mrf.mxu0  ;;  %v713_v46 = vpop.f32.mrf.mxu1 }
 0x11e   :  { %820 = vst [vmem:[%s1588_s2 + $0x38] sm:$0xff] %v585_v45  ;;  %852 = vst [vmem:[%s1588_s2 + $0x138] sm:$0xff] %v713_v46 }
 0x11f   :  { %v587_v47 = vpop.f32.mrf.mxu0  ;;  %v715_v48 = vpop.f32.mrf.mxu1 }
 0x121   :  { %v590_v49 = vpop.f32.mrf.mxu0  ;;  %v718_v50 = vpop.f32.mrf.mxu1 }
 0x122   :  { %821 = vst [vmem:[%s1588_s2 + $0x40] sm:$0xff] %v590_v49  ;;  %853 = vst [vmem:[%s1588_s2 + $0x140] sm:$0xff] %v718_v50 }
 0x123   :  { %v592_v51 = vpop.f32.mrf.mxu0  ;;  %v720_v52 = vpop.f32.mrf.mxu1 }
 0x125   :  { %v593_v53 = vpop.f32.mrf.mxu0  ;;  %v721_v54 = vpop.f32.mrf.mxu1 }
 0x126   :  { %822 = vst [vmem:[%s1588_s2 + $0x48] sm:$0xff] %v593_v53  ;;  %854 = vst [vmem:[%s1588_s2 + $0x148] sm:$0xff] %v721_v54 }
 0x127   :  { %v595_v55 = vpop.f32.mrf.mxu0  ;;  %v723_v56 = vpop.f32.mrf.mxu1 }
 0x129   :  { %v598_v57 = vpop.f32.mrf.mxu0  ;;  %v726_v58 = vpop.f32.mrf.mxu1 }
 0x12a   :  { %823 = vst [vmem:[%s1588_s2 + $0x50] sm:$0xff] %v598_v57  ;;  %855 = vst [vmem:[%s1588_s2 + $0x150] sm:$0xff] %v726_v58 }
 0x12b   :  { %v600_v59 = vpop.f32.mrf.mxu0  ;;  %v728_v60 = vpop.f32.mrf.mxu1 }
 0x12d   :  { %v601_v61 = vpop.f32.mrf.mxu0  ;;  %v729_v62 = vpop.f32.mrf.mxu1 }
 0x12e   :  { %824 = vst [vmem:[%s1588_s2 + $0x58] sm:$0xff] %v601_v61  ;;  %856 = vst [vmem:[%s1588_s2 + $0x158] sm:$0xff] %v729_v62 }
 0x12f   :  { %v603_v63 = vpop.f32.mrf.mxu0  ;;  %v731_v0 = vpop.f32.mrf.mxu1 }
 0x131   :  { %v606_v1 = vpop.f32.mrf.mxu0  ;;  %v734_v2 = vpop.f32.mrf.mxu1 }
 0x132   :  { %825 = vst [vmem:[%s1588_s2 + $0x60] sm:$0xff] %v606_v1  ;;  %857 = vst [vmem:[%s1588_s2 + $0x160] sm:$0xff] %v734_v2 }
 0x133   :  { %v608_v3 = vpop.f32.mrf.mxu0  ;;  %v736_v4 = vpop.f32.mrf.mxu1 }
 0x135   :  { %v609_v5 = vpop.f32.mrf.mxu0  ;;  %v737_v6 = vpop.f32.mrf.mxu1 }
 0x136   :  { %826 = vst [vmem:[%s1588_s2 + $0x68] sm:$0xff] %v609_v5  ;;  %858 = vst [vmem:[%s1588_s2 + $0x168] sm:$0xff] %v737_v6 }
 0x137   :  { %v611_v7 = vpop.f32.mrf.mxu0  ;;  %v739_v8 = vpop.f32.mrf.mxu1 }
 0x139   :  { %v614_v9 = vpop.f32.mrf.mxu0  ;;  %v742_v10 = vpop.f32.mrf.mxu1 }
 0x13a   :  { %827 = vst [vmem:[%s1588_s2 + $0x70] sm:$0xff] %v614_v9  ;;  %859 = vst [vmem:[%s1588_s2 + $0x170] sm:$0xff] %v742_v10 }
 0x13b   :  { %v616_v11 = vpop.f32.mrf.mxu0  ;;  %v744_v12 = vpop.f32.mrf.mxu1 }
 0x13d   :  { %v617_v13 = vpop.f32.mrf.mxu0  ;;  %v745_v14 = vpop.f32.mrf.mxu1 }
 0x13e   :  { %828 = vst [vmem:[%s1588_s2 + $0x78] sm:$0xff] %v617_v13  ;;  %860 = vst [vmem:[%s1588_s2 + $0x178] sm:$0xff] %v745_v14 }
 0x13f   :  { %v619_v15 = vpop.f32.mrf.mxu0  ;;  %v747_v16 = vpop.f32.mrf.mxu1 }
 0x141   :  { %v622_v17 = vpop.f32.mrf.mxu0  ;;  %v750_v18 = vpop.f32.mrf.mxu1 }
 0x142   :  { %829 = vst [vmem:[%s1588_s2 + $0x80] sm:$0xff] %v622_v17  ;;  %861 = vst [vmem:[%s1588_s2 + $0x180] sm:$0xff] %v750_v18 }
 0x143   :  { %v624_v19 = vpop.f32.mrf.mxu0  ;;  %v752_v20 = vpop.f32.mrf.mxu1 }
 0x145   :  { %v625_v21 = vpop.f32.mrf.mxu0  ;;  %v753_v22 = vpop.f32.mrf.mxu1 }
 0x146   :  { %830 = vst [vmem:[%s1588_s2 + $0x88] sm:$0xff] %v625_v21  ;;  %862 = vst [vmem:[%s1588_s2 + $0x188] sm:$0xff] %v753_v22 }
 0x147   :  { %v627_v23 = vpop.f32.mrf.mxu0  ;;  %v755_v24 = vpop.f32.mrf.mxu1 }
 0x149   :  { %v630_v25 = vpop.f32.mrf.mxu0  ;;  %v758_v26 = vpop.f32.mrf.mxu1 }
 0x14a   :  { %831 = vst [vmem:[%s1588_s2 + $0x90] sm:$0xff] %v630_v25  ;;  %863 = vst [vmem:[%s1588_s2 + $0x190] sm:$0xff] %v758_v26 }
 0x14b   :  { %v632_v27 = vpop.f32.mrf.mxu0  ;;  %v760_v28 = vpop.f32.mrf.mxu1 }
 0x14d   :  { %v633_v29 = vpop.f32.mrf.mxu0  ;;  %v761_v30 = vpop.f32.mrf.mxu1 }
 0x14e   :  { %832 = vst [vmem:[%s1588_s2 + $0x98] sm:$0xff] %v633_v29  ;;  %864 = vst [vmem:[%s1588_s2 + $0x198] sm:$0xff] %v761_v30 }
 0x14f   :  { %v635_v31 = vpop.f32.mrf.mxu0  ;;  %v763_v32 = vpop.f32.mrf.mxu1 }
 0x151   :  { %v638_v33 = vpop.f32.mrf.mxu0  ;;  %v766_v34 = vpop.f32.mrf.mxu1 }
 0x152   :  { %833 = vst [vmem:[%s1588_s2 + $0xa0] sm:$0xff] %v638_v33  ;;  %865 = vst [vmem:[%s1588_s2 + $0x1a0] sm:$0xff] %v766_v34 }
 0x153   :  { %v640_v35 = vpop.f32.mrf.mxu0  ;;  %v768_v36 = vpop.f32.mrf.mxu1 }
 0x155   :  { %v641_v37 = vpop.f32.mrf.mxu0  ;;  %v769_v38 = vpop.f32.mrf.mxu1 }
 0x156   :  { %834 = vst [vmem:[%s1588_s2 + $0xa8] sm:$0xff] %v641_v37  ;;  %866 = vst [vmem:[%s1588_s2 + $0x1a8] sm:$0xff] %v769_v38 }
 0x157   :  { %v643_v39 = vpop.f32.mrf.mxu0  ;;  %v771_v40 = vpop.f32.mrf.mxu1 }
 0x159   :  { %v646_v41 = vpop.f32.mrf.mxu0  ;;  %v774_v42 = vpop.f32.mrf.mxu1 }
 0x15a   :  { %835 = vst [vmem:[%s1588_s2 + $0xb0] sm:$0xff] %v646_v41  ;;  %867 = vst [vmem:[%s1588_s2 + $0x1b0] sm:$0xff] %v774_v42 }
 0x15b   :  { %v648_v43 = vpop.f32.mrf.mxu0  ;;  %v776_v44 = vpop.f32.mrf.mxu1 }
 0x15d   :  { %v649_v45 = vpop.f32.mrf.mxu0  ;;  %v777_v46 = vpop.f32.mrf.mxu1 }
 0x15e   :  { %836 = vst [vmem:[%s1588_s2 + $0xb8] sm:$0xff] %v649_v45  ;;  %868 = vst [vmem:[%s1588_s2 + $0x1b8] sm:$0xff] %v777_v46 }
 0x15f   :  { %v651_v47 = vpop.f32.mrf.mxu0  ;;  %v779_v48 = vpop.f32.mrf.mxu1 }
 0x161   :  { %v654_v49 = vpop.f32.mrf.mxu0  ;;  %v782_v50 = vpop.f32.mrf.mxu1 }
 0x162   :  { %837 = vst [vmem:[%s1588_s2 + $0xc0] sm:$0xff] %v654_v49  ;;  %869 = vst [vmem:[%s1588_s2 + $0x1c0] sm:$0xff] %v782_v50 }
 0x163   :  { %v656_v51 = vpop.f32.mrf.mxu0  ;;  %v784_v52 = vpop.f32.mrf.mxu1 }
 0x165   :  { %v657_v53 = vpop.f32.mrf.mxu0  ;;  %v785_v54 = vpop.f32.mrf.mxu1 }
 0x166   :  { %838 = vst [vmem:[%s1588_s2 + $0xc8] sm:$0xff] %v657_v53  ;;  %870 = vst [vmem:[%s1588_s2 + $0x1c8] sm:$0xff] %v785_v54 }
 0x167   :  { %v659_v55 = vpop.f32.mrf.mxu0  ;;  %v787_v56 = vpop.f32.mrf.mxu1 }
 0x169   :  { %v662_v57 = vpop.f32.mrf.mxu0  ;;  %v790_v58 = vpop.f32.mrf.mxu1 }
 0x16a   :  { %839 = vst [vmem:[%s1588_s2 + $0xd0] sm:$0xff] %v662_v57  ;;  %871 = vst [vmem:[%s1588_s2 + $0x1d0] sm:$0xff] %v790_v58 }
 0x16b   :  { %v664_v59 = vpop.f32.mrf.mxu0  ;;  %v792_v60 = vpop.f32.mrf.mxu1 }
 0x16d   :  { %v665_v61 = vpop.f32.mrf.mxu0  ;;  %v793_v62 = vpop.f32.mrf.mxu1 }
 0x16e   :  { %840 = vst [vmem:[%s1588_s2 + $0xd8] sm:$0xff] %v665_v61  ;;  %872 = vst [vmem:[%s1588_s2 + $0x1d8] sm:$0xff] %v793_v62 }
 0x16f   :  { %v667_v63 = vpop.f32.mrf.mxu0  ;;  %v795_v0 = vpop.f32.mrf.mxu1 }
 0x171   :  { %v670_v1 = vpop.f32.mrf.mxu0  ;;  %v798_v2 = vpop.f32.mrf.mxu1 }
 0x172   :  { %841 = vst [vmem:[%s1588_s2 + $0xe0] sm:$0xff] %v670_v1  ;;  %873 = vst [vmem:[%s1588_s2 + $0x1e0] sm:$0xff] %v798_v2 }
 0x173   :  { %v672_v3 = vpop.f32.mrf.mxu0  ;;  %v800_v4 = vpop.f32.mrf.mxu1 }
 0x175   :  { %v673_v5 = vpop.f32.mrf.mxu0  ;;  %v801_v6 = vpop.f32.mrf.mxu1 }
 0x176   :  { %842 = vst [vmem:[%s1588_s2 + $0xe8] sm:$0xff] %v673_v5  ;;  %874 = vst [vmem:[%s1588_s2 + $0x1e8] sm:$0xff] %v801_v6 }
 0x177   :  { %v675_v7 = vpop.f32.mrf.mxu0  ;;  %v803_v8 = vpop.f32.mrf.mxu1 }
 0x179   :  { %v678_v9 = vpop.f32.mrf.mxu0  ;;  %v806_v10 = vpop.f32.mrf.mxu1 }
 0x17a   :  { %843 = vst [vmem:[%s1588_s2 + $0xf0] sm:$0xff] %v678_v9  ;;  %875 = vst [vmem:[%s1588_s2 + $0x1f0] sm:$0xff] %v806_v10 }
 0x17b   :  { %v680_v11 = vpop.f32.mrf.mxu0  ;;  %v808_v12 = vpop.f32.mrf.mxu1 }
 0x17d   :  { %v681_v13 = vpop.f32.mrf.mxu0  ;;  %v809_v14 = vpop.f32.mrf.mxu1 }
 0x17e   :  { %844 = vst [vmem:[%s1588_s2 + $0xf8] sm:$0xff] %v681_v13  ;;  %876 = vst [vmem:[%s1588_s2 + $0x1f8] sm:$0xff] %v809_v14 }
 0x17f   :  { %v683_v15 = vpop.f32.mrf.mxu0  ;;  %v811_v16 = vpop.f32.mrf.mxu1 }

// kernel: encoder_forward.21
= control target key start
LH: loop header
LB: loop body
LE: loop exit
PB: predicated region body
PF: predicated region fallthrough
CT: control target
= control target key end

     0   :  { %s1654_s1 = inlined_call_operand.vmem [shape: bf16[640,128], index: 1, kind: input, shape index: {}]   ;;  %s1655_s0 = inlined_call_operand.vmem [shape: bf16[128,640], index: 0, kind: input, shape index: {}]   ;;  %s1656_s2 = inlined_call_operand.vmem [shape: f32[128,128], index: 2, kind: output, shape index: {}]  }
   0x1   :  { %v1171_v0 = vld [vmem:[%s1654_s1 + $0x78] sm:$0xff]   ;;  %v1175_v4 = vld [vmem:[%s1654_s1 + $0x70] sm:$0xff]   ;;  %v1179_v8 = vld [vmem:[%s1654_s1 + $0x68] sm:$0xff]  }
   0x2   :  { %v1172_v1 = vld [vmem:[%s1654_s1 + $0xf8] sm:$0xff]   ;;  %979 = vmatprep.subr.bf16.mxu0 %v1171_v0  ;;  %v1176_v5 = vld [vmem:[%s1654_s1 + $0xf0] sm:$0xff]   ;;  %v1180_v9 = vld [vmem:[%s1654_s1 + $0xe8] sm:$0xff]  }
   0x3   :  { %v1173_v2 = vld [vmem:[%s1654_s1 + $0x38] sm:$0xff]   ;;  %1043 = vmatprep.subr.bf16.mxu1 %v1172_v1  ;;  %v1177_v6 = vld [vmem:[%s1654_s1 + $0x30] sm:$0xff]   ;;  %v1181_v10 = vld [vmem:[%s1654_s1 + $0x28] sm:$0xff]  }
   0x4   :  { %v1174_v3 = vld [vmem:[%s1654_s1 + $0xb8] sm:$0xff]   ;;  %980 = vmatpush3.bf16.msra.mxu0 %v1173_v2  ;;  %v1178_v7 = vld [vmem:[%s1654_s1 + $0xb0] sm:$0xff]   ;;  %v1182_v11 = vld [vmem:[%s1654_s1 + $0xa8] sm:$0xff]  }
   0x5   :  { %1044 = vmatpush3.bf16.msra.mxu1 %v1174_v3  ;;  %981 = vmatprep.subr.bf16.mxu0 %v1175_v4  ;;  %v1183_v12 = vld [vmem:[%s1654_s1 + $0x60] sm:$0xff]   ;;  %v1187_v16 = vld [vmem:[%s1654_s1 + $0x58] sm:$0xff]   ;;  %v1191_v20 = vld [vmem:[%s1654_s1 + $0x50] sm:$0xff]  }
   0x6   :  { %1045 = vmatprep.subr.bf16.mxu1 %v1176_v5  ;;  %v1184_v13 = vld [vmem:[%s1654_s1 + $0xe0] sm:$0xff]   ;;  %v1188_v17 = vld [vmem:[%s1654_s1 + $0xd8] sm:$0xff]   ;;  %v1192_v21 = vld [vmem:[%s1654_s1 + $0xd0] sm:$0xff]  }
   0x7   :  { %v1185_v14 = vld [vmem:[%s1654_s1 + $0x20] sm:$0xff]   ;;  %v1189_v18 = vld [vmem:[%s1654_s1 + $0x18] sm:$0xff]   ;;  %v1193_v22 = vld [vmem:[%s1654_s1 + $0x10] sm:$0xff]  }
   0x8   :  { %982 = vmatpush3.bf16.msra.mxu0 %v1177_v6  ;;  %v1186_v15 = vld [vmem:[%s1654_s1 + $0xa0] sm:$0xff]   ;;  %v1190_v19 = vld [vmem:[%s1654_s1 + $0x98] sm:$0xff]   ;;  %v1194_v23 = vld [vmem:[%s1654_s1 + $0x90] sm:$0xff]  }
   0x9   :  { %1046 = vmatpush3.bf16.msra.mxu1 %v1178_v7  ;;  %983 = vmatprep.subr.bf16.mxu0 %v1179_v8  ;;  %v1195_v24 = vld [vmem:[%s1654_s1 + $0x48] sm:$0xff]   ;;  %v1199_v28 = vld [vmem:[%s1654_s1 + $0x40] sm:$0xff]   ;;  %v1209_v36 = vld [vmem:[%s1654_s1 + $0x138] sm:$0xff]  }
   0xa   :  { %1047 = vmatprep.subr.bf16.mxu1 %v1180_v9  ;;  %v1196_v25 = vld [vmem:[%s1654_s1 + $0xc8] sm:$0xff]   ;;  %v1200_v29 = vld [vmem:[%s1654_s1 + $0xc0] sm:$0xff]   ;;  %v1216_v39 = vld [vmem:[%s1654_s1 + $0x130] sm:$0xff]  }
   0xb   :  { %v1197_v26 = vld [vmem:[%s1654_s1 + $0x8] sm:$0xff]   ;;  %v1201_v30 = vld [vmem:[%s1654_s1] sm:$0xff]   ;;  %v1219_v43 = vld [vmem:[%s1655_s0 + $0x5c] ss:$20 sps:$4 sm:$0xff]  }
   0xc   :  { %984 = vmatpush3.bf16.msra.mxu0 %v1181_v10  ;;  %v1198_v27 = vld [vmem:[%s1654_s1 + $0x88] sm:$0xff]   ;;  %v1202_v31 = vld [vmem:[%s1654_s1 + $0x80] sm:$0xff]   ;;  %v1224_v48 = vld [vmem:[%s1655_s0 + $0x7c] ss:$20 sps:$4 sm:$0xff]  }
   0xd   :  { %1048 = vmatpush3.bf16.msra.mxu1 %v1182_v11  ;;  %985 = vmatprep.subr.bf16.mxu0 %v1183_v12  ;;  %v1203_v32 = vld [vmem:[%s1655_s0] ss:$20 sps:$4 sm:$0xff]   ;;  %v1205_v33 = vld [vmem:[%s1655_s0 + $0x4] ss:$20 sps:$4 sm:$0xff]   ;;  %v1206_v34 = vld [vmem:[%s1655_s0 + $0x8] ss:$20 sps:$4 sm:$0xff]  }
   0xe   :  { %1049 = vmatprep.subr.bf16.mxu1 %v1184_v13  ;;  %v1208_v35 = vld [vmem:[%s1655_s0 + $0xc] ss:$20 sps:$4 sm:$0xff]   ;;  %620 = vmatprep.mubr.bf16.mxu0 %v1205_v33  ;;  %v1212_v38 = vld [vmem:[%s1655_s0 + $0x34] ss:$20 sps:$4 sm:$0xff]   ;;  %v1215_v41 = vld [vmem:[%s1655_s0 + $0x30] ss:$20 sps:$4 sm:$0xff]  }
   0xf   :  { %717 = vmatprep.mubr.bf16.mxu1 %v1208_v35  ;;  %v1210_v37 = vld [vmem:[%s1655_s0 + $0x2c] ss:$20 sps:$4 sm:$0xff]   ;;  %v1214_v40 = vld [vmem:[%s1655_s0 + $0x28] ss:$20 sps:$4 sm:$0xff]   ;;  %v1221_v46 = vld [vmem:[%s1655_s0 + $0x50] ss:$20 sps:$4 sm:$0xff]  }
  0x10   :  { %986 = vmatpush3.bf16.msra.mxu0 %v1185_v14  ;;  %v1217_v42 = vld [vmem:[%s1655_s0 + $0x54] ss:$20 sps:$4 sm:$0xff]   ;;  %v1230_v45 = vld [vmem:[%s1654_s1 + $0x120] sm:$0xff]   ;;  %v1222_v47 = vld [vmem:[%s1655_s0 + $0x58] ss:$20 sps:$4 sm:$0xff]  }
  0x11   :  { %1050 = vmatpush3.bf16.msra.mxu1 %v1186_v15  ;;  %987 = vmatprep.subr.bf16.mxu0 %v1187_v16  ;;  %v1223_v44 = vld [vmem:[%s1654_s1 + $0x128] sm:$0xff]   ;;  %v1226_v49 = vld [vmem:[%s1655_s0 + $0x84] ss:$20 sps:$4 sm:$0xff]   ;;  %v1244_v51 = vld [vmem:[%s1654_s1 + $0x110] sm:$0xff]  }
  0x12   :  { %1051 = vmatprep.subr.bf16.mxu1 %v1188_v17  ;;  %v1237_v50 = vld [vmem:[%s1654_s1 + $0x118] sm:$0xff]   ;;  %v1229_v53 = vld [vmem:[%s1655_s0 + $0x80] ss:$20 sps:$4 sm:$0xff]   ;;  %v1251_v55 = vld [vmem:[%s1654_s1 + $0x108] sm:$0xff]  }
  0x13   :  { %v1228_v52 = vld [vmem:[%s1655_s0 + $0x78] ss:$20 sps:$4 sm:$0xff]   ;;  %v1258_v57 = vld [vmem:[%s1654_s1 + $0x100] sm:$0xff]   ;;  %v1236_v59 = vld [vmem:[%s1655_s0 + $0xa8] ss:$20 sps:$4 sm:$0xff]  }
  0x14   :  { %988 = vmatpush3.bf16.msra.mxu0 %v1189_v18  ;;  %v1231_v54 = vld [vmem:[%s1655_s0 + $0xa4] ss:$20 sps:$4 sm:$0xff]   ;;  %v1233_v56 = vld [vmem:[%s1655_s0 + $0xac] ss:$20 sps:$4 sm:$0xff]   ;;  %v1240_v61 = vld [vmem:[%s1655_s0 + $0xd4] ss:$20 sps:$4 sm:$0xff]  }
  0x15   :  { %1052 = vmatpush3.bf16.msra.mxu1 %v1190_v19  ;;  %989 = vmatprep.subr.bf16.mxu0 %v1191_v20  ;;  %v1235_v58 = vld [vmem:[%s1655_s0 + $0xa0] ss:$20 sps:$4 sm:$0xff]   ;;  %v1242_v62 = vld [vmem:[%s1655_s0 + $0xc8] ss:$20 sps:$4 sm:$0xff]   ;;  %v1243_v63 = vld [vmem:[%s1655_s0 + $0xd0] ss:$20 sps:$4 sm:$0xff]  }
  0x16   :  { %1053 = vmatprep.subr.bf16.mxu1 %v1192_v21  ;;  %v1238_v60 = vld [vmem:[%s1655_s0 + $0xcc] ss:$20 sps:$4 sm:$0xff]   ;;  %v1245_v0 = vld [vmem:[%s1655_s0 + $0xf4] ss:$20 sps:$4 sm:$0xff]   ;;  %v1247_v1 = vld [vmem:[%s1655_s0 + $0xfc] ss:$20 sps:$4 sm:$0xff]  }
  0x17   :  { %v1249_v2 = vld [vmem:[%s1655_s0 + $0xf0] ss:$20 sps:$4 sm:$0xff]   ;;  %v1250_v3 = vld [vmem:[%s1655_s0 + $0xf8] ss:$20 sps:$4 sm:$0xff]   ;;  %v1257_v7 = vld [vmem:[%s1655_s0 + $0x120] ss:$20 sps:$4 sm:$0xff]  }
  0x18   :  { %990 = vmatpush3.bf16.msra.mxu0 %v1193_v22  ;;  %v1252_v4 = vld [vmem:[%s1655_s0 + $0x11c] ss:$20 sps:$4 sm:$0xff]   ;;  %v1254_v5 = vld [vmem:[%s1655_s0 + $0x124] ss:$20 sps:$4 sm:$0xff]   ;;  %v1263_v12 = vld [vmem:[%s1655_s0 + $0x60] ss:$20 sps:$4 sm:$0xff]  }
  0x19   :  { %1054 = vmatpush3.bf16.msra.mxu1 %v1194_v23  ;;  %991 = vmatprep.subr.bf16.mxu0 %v1195_v24  ;;  %v1256_v6 = vld [vmem:[%s1655_s0 + $0x118] ss:$20 sps:$4 sm:$0xff]   ;;  %v1259_v8 = vld [vmem:[%s1655_s0 + $0x10] ss:$20 sps:$4 sm:$0xff]   ;;  %v1264_v13 = vld [vmem:[%s1655_s0 + $0x100] ss:$20 sps:$4 sm:$0xff]  }
  0x1a   :  { %1055 = vmatprep.subr.bf16.mxu1 %v1196_v25  ;;  %v1260_v9 = vld [vmem:[%s1655_s0 + $0xb0] ss:$20 sps:$4 sm:$0xff]   ;;  %v1261_v10 = vld [vmem:[%s1655_s0 + $0x38] ss:$20 sps:$4 sm:$0xff]   ;;  %v1265_v14 = vld [vmem:[%s1655_s0 + $0x88] ss:$20 sps:$4 sm:$0xff]  }
  0x1b   :  { %v1262_v11 = vld [vmem:[%s1655_s0 + $0xd8] ss:$20 sps:$4 sm:$0xff]   ;;  %v1266_v15 = vld [vmem:[%s1655_s0 + $0x128] ss:$20 sps:$4 sm:$0xff]  }
  0x1c   :  { %992 = vmatpush3.bf16.msra.mxu0 %v1197_v26 }
  0x1d   :  { %1056 = vmatpush3.bf16.msra.mxu1 %v1198_v27  ;;  %993 = vmatprep.subr.bf16.mxu0 %v1199_v28 }
  0x1e   :  { %1057 = vmatprep.subr.bf16.mxu1 %v1200_v29 }
  0x20   :  { %994 = vmatpush3.bf16.msra.mxu0 %v1201_v30 }
  0x21   :  { %1058 = vmatpush3.bf16.msra.mxu1 %v1202_v31  ;;  %1123 = vmatprep.subr.bf16.mxu0 %v1209_v36 }
  0x22   :  { %1155 = vmatprep.subr.bf16.mxu1 %v1209_v36 }
  0x23   :  { %621 = vmatmul.mubr.bf16.vlgmr.msra.gmra.mxu0 %v1203_v32 }
  0x24   :  { %718 = vmatmul.mubr.bf16.vlgmr.msra.gmra.mxu1 %v1206_v34  ;;  %1124 = vmatpush3.bf16.msra.mxu0 %v1209_v36 }
  0x25   :  { %1163 = vmatpush3.bf16.msra.mxu1 %v1209_v36  ;;  %628 = vmatprep.mubr.bf16.mxu0 %v1210_v37 }
  0x26   :  { %725 = vmatprep.mubr.bf16.mxu1 %v1212_v38  ;;  %1125 = vmatprep.subr.bf16.mxu0 %v1216_v39 }
  0x27   :  { %1156 = vmatprep.subr.bf16.mxu1 %v1216_v39 }
  0x28   :  { %1126 = vmatpush3.bf16.msra.mxu0 %v1216_v39 }
  0x29   :  { %1164 = vmatpush3.bf16.msra.mxu1 %v1216_v39  ;;  %1127 = vmatprep.subr.bf16.mxu0 %v1223_v44 }
  0x2a   :  { %1157 = vmatprep.subr.bf16.mxu1 %v1223_v44 }
  0x2b   :  { %629 = vmatmul.mubr.bf16.gmra.mxu0 %v1214_v40 }
  0x2c   :  { %726 = vmatmul.mubr.bf16.gmra.mxu1 %v1215_v41  ;;  %636 = vmatprep.mubr.bf16.mxu0 %v1217_v42 }
  0x2d   :  { %733 = vmatprep.mubr.bf16.mxu1 %v1219_v43  ;;  %1128 = vmatpush3.bf16.msra.mxu0 %v1223_v44 }
  0x2e   :  { %1165 = vmatpush3.bf16.msra.mxu1 %v1223_v44  ;;  %1129 = vmatprep.subr.bf16.mxu0 %v1230_v45 }
  0x2f   :  { %1158 = vmatprep.subr.bf16.mxu1 %v1230_v45 }
  0x31   :  { %1130 = vmatpush3.bf16.msra.mxu0 %v1230_v45 }
  0x32   :  { %1166 = vmatpush3.bf16.msra.mxu1 %v1230_v45  ;;  %1131 = vmatprep.subr.bf16.mxu0 %v1237_v50 }
  0x33   :  { %637 = vmatmul.mubr.bf16.gmra.mxu0 %v1221_v46  ;;  %1159 = vmatprep.subr.bf16.mxu1 %v1237_v50 }
  0x34   :  { %734 = vmatmul.mubr.bf16.gmra.mxu1 %v1222_v47  ;;  %644 = vmatprep.mubr.bf16.mxu0 %v1224_v48 }
  0x35   :  { %741 = vmatprep.mubr.bf16.mxu1 %v1226_v49  ;;  %1132 = vmatpush3.bf16.msra.mxu0 %v1237_v50 }
  0x36   :  { %1167 = vmatpush3.bf16.msra.mxu1 %v1237_v50  ;;  %1133 = vmatprep.subr.bf16.mxu0 %v1244_v51 }
  0x37   :  { %1160 = vmatprep.subr.bf16.mxu1 %v1244_v51 }
  0x39   :  { %1134 = vmatpush3.bf16.msra.mxu0 %v1244_v51 }
  0x3a   :  { %1168 = vmatpush3.bf16.msra.mxu1 %v1244_v51  ;;  %1135 = vmatprep.subr.bf16.mxu0 %v1251_v55 }
  0x3b   :  { %645 = vmatmul.mubr.bf16.gmra.mxu0 %v1228_v52  ;;  %1161 = vmatprep.subr.bf16.mxu1 %v1251_v55 }
  0x3c   :  { %742 = vmatmul.mubr.bf16.gmra.mxu1 %v1229_v53  ;;  %652 = vmatprep.mubr.bf16.mxu0 %v1231_v54 }
  0x3d   :  { %749 = vmatprep.mubr.bf16.mxu1 %v1233_v56  ;;  %1136 = vmatpush3.bf16.msra.mxu0 %v1251_v55 }
  0x3e   :  { %1169 = vmatpush3.bf16.msra.mxu1 %v1251_v55  ;;  %1137 = vmatprep.subr.bf16.mxu0 %v1258_v57 }
  0x3f   :  { %1162 = vmatprep.subr.bf16.mxu1 %v1258_v57 }
  0x41   :  { %1138 = vmatpush3.bf16.msra.mxu0 %v1258_v57 }
  0x42   :  { %1170 = vmatpush3.bf16.msra.mxu1 %v1258_v57 }
  0x43   :  { %653 = vmatmul.mubr.bf16.gmra.mxu0 %v1235_v58 }
  0x44   :  { %750 = vmatmul.mubr.bf16.gmra.mxu1 %v1236_v59  ;;  %660 = vmatprep.mubr.bf16.mxu0 %v1238_v60 }
  0x45   :  { %757 = vmatprep.mubr.bf16.mxu1 %v1240_v61 }
  0x4b   :  { %661 = vmatmul.mubr.bf16.gmra.mxu0 %v1242_v62 }
  0x4c   :  { %758 = vmatmul.mubr.bf16.gmra.mxu1 %v1243_v63  ;;  %668 = vmatprep.mubr.bf16.mxu0 %v1245_v0 }
  0x4d   :  { %765 = vmatprep.mubr.bf16.mxu1 %v1247_v1 }
  0x53   :  { %669 = vmatmul.mubr.bf16.gmra.mxu0 %v1249_v2 }
  0x54   :  { %766 = vmatmul.mubr.bf16.gmra.mxu1 %v1250_v3  ;;  %676 = vmatprep.mubr.bf16.mxu0 %v1252_v4 }
  0x55   :  { %773 = vmatprep.mubr.bf16.mxu1 %v1254_v5 }
  0x5b   :  { %677 = vmatmul.mubr.bf16.gmra.mxu0 %v1256_v6 }
  0x5c   :  { %774 = vmatmul.mubr.bf16.gmra.mxu1 %v1257_v7  ;;  %1139 = vmatprep.mubr.bf16.mxu0 %v1259_v8 }
  0x5d   :  { %1147 = vmatprep.mubr.bf16.mxu1 %v1260_v9 }
  0x63   :  { %1140 = vmatmul.mubr.bf16.vlgmr.msra.gmra.mxu0 %v1261_v10 }
  0x64   :  { %1148 = vmatmul.mubr.bf16.vlgmr.msra.gmra.mxu1 %v1262_v11  ;;  %1143 = vmatprep.mubr.bf16.mxu0 %v1263_v12 }
  0x65   :  { %1151 = vmatprep.mubr.bf16.mxu1 %v1264_v13 }
  0x6b   :  { %1144 = vmatmul.mubr.bf16.gmra.mxu0 %v1265_v14 }
  0x6c   :  { %1152 = vmatmul.mubr.bf16.gmra.mxu1 %v1266_v15 }
  0xe3   :  { %v1522_v16 = vpop.f32.mrf.mxu0 }
  0xe4   :  { %v1524_v17 = vpop.f32.mrf.mxu1 }
  0xe5   :  { %v1526_v18 = vpop.f32.mrf.mxu0 }
  0xe6   :  { %v1528_v19 = vpop.f32.mrf.mxu1 }
  0xe7   :  { %v1530_v20 = vpop.f32.mrf.mxu0 }
  0xe8   :  { %v1532_v21 = vpop.f32.mrf.mxu1 }
  0xe9   :  { %v1534_v22 = vpop.f32.mrf.mxu0 }
  0xea   :  { %v1536_v23 = vpop.f32.mrf.mxu1 }
  0xeb   :  { %v1001_v24 = vpop.f32.mrf.mxu0 }
  0xec   :  { %v1065_v25 = vpop.f32.mrf.mxu1 }
  0xed   :  { %v1002_v26 = vpop.f32.mrf.mxu0 }
  0xee   :  { %v1066_v27 = vpop.f32.mrf.mxu1  ;;  %v1003_v11 = vadd.f32 %v1002_v26, %v1001_v24 }
  0xef   :  { %v1004_v28 = vpop.f32.mrf.mxu0  ;;  %v1067_v12 = vadd.f32 %v1066_v27, %v1065_v25 }
  0xf0   :  { %v1068_v29 = vpop.f32.mrf.mxu1 }
  0xf1   :  { %v1005_v30 = vpop.f32.mrf.mxu0 }
  0xf2   :  { %v1069_v31 = vpop.f32.mrf.mxu1 }
  0xf3   :  { %v1538_v32 = vpop.f32.mrf.mxu0 }
  0xf4   :  { %v1540_v33 = vpop.f32.mrf.mxu1 }
  0xf5   :  { %v1542_v34 = vpop.f32.mrf.mxu0 }
  0xf6   :  { %v1544_v35 = vpop.f32.mrf.mxu1 }
  0xf7   :  { %v1546_v36 = vpop.f32.mrf.mxu0 }
  0xf8   :  { %1657 = vst [vmem:[#allocation2_spill] sm:$0xff] %v1546_v36  ;;  %v1548_v37 = vpop.f32.mrf.mxu1 }
  0xf9   :  { %1658 = vst [vmem:[#allocation3_spill] sm:$0xff] %v1548_v37  ;;  %v1550_v38 = vpop.f32.mrf.mxu0  ;;  %v997_v37 = vadd.f32 %v1526_v18, %v1522_v16  ;;  %v1064_v16 = vadd.f32 %v1536_v23, %v1532_v21 }
  0xfa   :  { %1659 = vst [vmem:[#allocation4_spill] sm:$0xff] %v1550_v38  ;;  %v1552_v39 = vpop.f32.mrf.mxu1 }
  0xfb   :  { %1660 = vst [vmem:[#allocation5_spill] sm:$0xff] %v1552_v39  ;;  %v1554_v40 = vpop.f32.mrf.mxu0 }
  0xfc   :  { %v1556_v41 = vpop.f32.mrf.mxu1 }
  0xfd   :  { %v1558_v42 = vpop.f32.mrf.mxu0 }
  0xfe   :  { %v1560_v43 = vpop.f32.mrf.mxu1 }
  0xff   :  { %v1562_v44 = vpop.f32.mrf.mxu0 }
 0x100   :  { %v1564_v45 = vpop.f32.mrf.mxu1 }
 0x101   :  { %1661 = vst [vmem:[#allocation6_spill] sm:$0xff] %v1564_v45  ;;  %v1566_v46 = vpop.f32.mrf.mxu0 }
 0x102   :  { %1662 = vst [vmem:[#allocation7_spill] sm:$0xff] %v1566_v46  ;;  %v1568_v47 = vpop.f32.mrf.mxu1  ;;  %v728_v46 = vadd.f32 %v1067_v12, %v1003_v11 }
 0x103   :  { %1663 = vst [vmem:[#allocation8_spill] sm:$0xff] %v1568_v47  ;;  %v1019_v48 = vpop.f32.mrf.mxu0  ;;  %v1070_v47 = vadd.f32 %v1069_v31, %v1068_v29  ;;  %v1079_v31 = vadd.f32 %v1560_v43, %v1556_v41  ;;  %v1073_v41 = vadd.f32 %v1544_v35, %v1540_v33 }
 0x104   :  { %v1083_v49 = vpop.f32.mrf.mxu1 }
 0x105   :  { %v1020_v50 = vpop.f32.mrf.mxu0 }
 0x106   :  { %v1084_v51 = vpop.f32.mrf.mxu1  ;;  %v1021_v38 = vadd.f32 %v1020_v50, %v1019_v48 }
 0x107   :  { %v1022_v52 = vpop.f32.mrf.mxu0 }
 0x108   :  { %v1086_v53 = vpop.f32.mrf.mxu1  ;;  %v1669_v33 = vld [vmem:[#allocation6_spill] sm:$0xff] }
 0x109   :  { %v1023_v54 = vpop.f32.mrf.mxu0 }
 0x10a   :  { %v1087_v55 = vpop.f32.mrf.mxu1  ;;  %v1024_v48 = vadd.f32 %v1023_v54, %v1022_v52  ;;  %v1670_v35 = vld [vmem:[#allocation8_spill] sm:$0xff] }
 0x10b   :  { %v1025_v56 = vpop.f32.mrf.mxu0 }
 0x10c   :  { %v1089_v57 = vpop.f32.mrf.mxu1 }
 0x10d   :  { %v1026_v58 = vpop.f32.mrf.mxu0 }
 0x10e   :  { %v1090_v59 = vpop.f32.mrf.mxu1  ;;  %v1027_v14 = vadd.f32 %v1026_v58, %v1025_v56  ;;  %v1000_v56 = vadd.f32 %v1534_v22, %v1530_v20  ;;  %v1082_v58 = vadd.f32 %v1670_v35, %v1669_v33 }
 0x10f   :  { %v1028_v60 = vpop.f32.mrf.mxu0  ;;  %v1091_v15 = vadd.f32 %v1090_v59, %v1089_v57 }
 0x110   :  { %v1092_v61 = vpop.f32.mrf.mxu1 }
 0x111   :  { %v1029_v62 = vpop.f32.mrf.mxu0  ;;  %v760_v27 = vadd.f32 %v1091_v15, %v1027_v14 }
 0x112   :  { %v1093_v63 = vpop.f32.mrf.mxu1  ;;  %v1030_v24 = vadd.f32 %v1029_v62, %v1028_v60 }
 0x113   :  { %v1031_v0 = vpop.f32.mrf.mxu0  ;;  %v1094_v25 = vadd.f32 %v1093_v63, %v1092_v61 }
 0x114   :  { %v1095_v1 = vpop.f32.mrf.mxu1 }
 0x115   :  { %v1032_v2 = vpop.f32.mrf.mxu0 }
 0x116   :  { %v1096_v3 = vpop.f32.mrf.mxu1  ;;  %v1033_v52 = vadd.f32 %v1032_v2, %v1031_v0 }
 0x117   :  { %v1570_v4 = vpop.f32.mrf.mxu0 }
 0x118   :  { %1664 = vst [vmem:[#allocation9_spill] sm:$0xff] %v1570_v4  ;;  %v1572_v5 = vpop.f32.mrf.mxu1  ;;  %v1061_v4 = vadd.f32 %v1528_v19, %v1524_v17 }
 0x119   :  { %1665 = vst [vmem:[#allocation10_spill] sm:$0xff] %v1572_v5  ;;  %v1574_v6 = vpop.f32.mrf.mxu0 }
 0x11a   :  { %1666 = vst [vmem:[#allocation11_spill] sm:$0xff] %v1574_v6  ;;  %v1576_v7 = vpop.f32.mrf.mxu1  ;;  %v1085_v6 = vadd.f32 %v1084_v51, %v1083_v49  ;;  %v720_v19 = vadd.f32 %v1061_v4, %v997_v37  ;;  %v1088_v49 = vadd.f32 %v1087_v55, %v1086_v53  ;;  %v763_v51 = vadd.f32 %v1094_v25, %v1030_v24 }
 0x11b   :  { %1667 = vst [vmem:[#allocation12_spill] sm:$0xff] %v1576_v7  ;;  %v1037_v8 = vpop.f32.mrf.mxu0  ;;  %v1006_v7 = vadd.f32 %v1005_v30, %v1004_v28  ;;  %v1015_v30 = vadd.f32 %v1558_v42, %v1554_v40  ;;  %v1009_v40 = vadd.f32 %v1542_v34, %v1538_v32  ;;  %v1097_v53 = vadd.f32 %v1096_v3, %v1095_v1  ;;  %v1668_v32 = vld [vmem:[#allocation7_spill] sm:$0xff]  ;;  %v1672_v3 = vld [vmem:[#allocation4_spill] sm:$0xff] }
 0x11c   :  { %v1101_v9 = vpop.f32.mrf.mxu1  ;;  %v752_v29 = vadd.f32 %v1085_v6, %v1021_v38  ;;  %v755_v57 = vadd.f32 %v1088_v49, %v1024_v48  ;;  %v1018_v34 = vadd.f32 %v1668_v32, %v1562_v44  ;;  %v1671_v44 = vld [vmem:[#allocation2_spill] sm:$0xff]  ;;  %v1673_v6 = vld [vmem:[#allocation3_spill] sm:$0xff] }
 0x11d   :  { %v1038_v10 = vpop.f32.mrf.mxu0  ;;  %v731_v22 = vadd.f32 %v1070_v47, %v1006_v7  ;;  %v723_v47 = vadd.f32 %v1064_v16, %v1000_v56  ;;  %v744_v61 = vadd.f32 %v1079_v31, %v1015_v30  ;;  %v1012_v4 = vadd.f32 %v1672_v3, %v1671_v44  ;;  %v1674_v7 = vld [vmem:[#allocation5_spill] sm:$0xff] }
 0x11e   :  { %v1102_v13 = vpop.f32.mrf.mxu1  ;;  %v1039_v23 = vadd.f32 %v1038_v10, %v1037_v8  ;;  %v1076_v8 = vadd.f32 %v1674_v7, %v1673_v6  ;;  %v768_v24 = vadd.f32 %v1097_v53, %v1033_v52 }
 0x11f   :  { %v1040_v39 = vpop.f32.mrf.mxu0  ;;  %v1103_v37 = vadd.f32 %v1102_v13, %v1101_v9 }
 0x120   :  { %v1104_v5 = vpop.f32.mrf.mxu1  ;;  %v1677_v11 = vld [vmem:[#allocation10_spill] sm:$0xff]  ;;  %v739_v48 = vadd.f32 %v1076_v8, %v1012_v4 }
 0x121   :  { %v1041_v36 = vpop.f32.mrf.mxu0  ;;  %v776_v2 = vadd.f32 %v1103_v37, %v1039_v23 }
 0x122   :  { %v1105_v45 = vpop.f32.mrf.mxu1  ;;  %v1042_v62 = vadd.f32 %v1041_v36, %v1040_v39  ;;  %v736_v39 = vadd.f32 %v1073_v41, %v1009_v40  ;;  %v1678_v12 = vld [vmem:[#allocation12_spill] sm:$0xff] }
 0x123   :  { %v1141_v26 = vpop.f32.mrf.mxu0  ;;  %v1106_v63 = vadd.f32 %v1105_v45, %v1104_v5  ;;  %v1675_v45 = vld [vmem:[#allocation9_spill] sm:$0xff]  ;;  %v1676_v5 = vld [vmem:[#allocation11_spill] sm:$0xff]  ;;  %v1100_v13 = vadd.f32 %v1678_v12, %v1677_v11 }
 0x124   :  { %v825_v18 = vadd.f32 %v1141_v26, %v728_v46  ;;  %v1149_v17 = vpop.f32.mrf.mxu1  ;;  %v1036_v10 = vadd.f32 %v1676_v5, %v1675_v45 }
 0x125   :  { %v857_v50 = vadd.f32 %v1149_v17, %v760_v27  ;;  %v816_v28 = vpop.f32.mrf.mxu0  ;;  %v747_v27 = vadd.f32 %v1082_v58, %v1018_v34 }
 0x126   :  { %881 = vst [vmem:[%s1656_s2 + $0x10] sm:$0xff] %v825_v18  ;;  %v817_v20 = vadd.f32 %v816_v28, %v720_v19  ;;  %v848_v21 = vpop.f32.mrf.mxu1  ;;  %v779_v18 = vadd.f32 %v1106_v63, %v1042_v62  ;;  %v771_v28 = vadd.f32 %v1100_v13, %v1036_v10 }
 0x127   :  { %889 = vst [vmem:[%s1656_s2 + $0x50] sm:$0xff] %v857_v50  ;;  %v849_v38 = vadd.f32 %v848_v21, %v752_v29  ;;  %v1142_v46 = vpop.f32.mrf.mxu0 }
 0x128   :  { %879 = vst [vmem:[%s1656_s2] sm:$0xff] %v817_v20  ;;  %v828_v42 = vadd.f32 %v1142_v46, %v731_v22  ;;  %v1150_v43 = vpop.f32.mrf.mxu1 }
 0x129   :  { %887 = vst [vmem:[%s1656_s2 + $0x40] sm:$0xff] %v849_v38  ;;  %v860_v54 = vadd.f32 %v1150_v43, %v763_v51  ;;  %v819_v55 = vpop.f32.mrf.mxu0 }
 0x12a   :  { %882 = vst [vmem:[%s1656_s2 + $0x18] sm:$0xff] %v828_v42  ;;  %v820_v59 = vadd.f32 %v819_v55, %v723_v47  ;;  %v851_v60 = vpop.f32.mrf.mxu1 }
 0x12b   :  { %890 = vst [vmem:[%s1656_s2 + $0x58] sm:$0xff] %v860_v54  ;;  %v852_v0 = vadd.f32 %v851_v60, %v755_v57  ;;  %v1145_v1 = vpop.f32.mrf.mxu0 }
 0x12c   :  { %880 = vst [vmem:[%s1656_s2 + $0x8] sm:$0xff] %v820_v59  ;;  %v841_v9 = vadd.f32 %v1145_v1, %v744_v61  ;;  %v1153_v36 = vpop.f32.mrf.mxu1 }
 0x12d   :  { %888 = vst [vmem:[%s1656_s2 + $0x48] sm:$0xff] %v852_v0  ;;  %v873_v14 = vadd.f32 %v1153_v36, %v776_v2  ;;  %v832_v15 = vpop.f32.mrf.mxu0 }
 0x12e   :  { %885 = vst [vmem:[%s1656_s2 + $0x30] sm:$0xff] %v841_v9  ;;  %v833_v25 = vadd.f32 %v832_v15, %v736_v39  ;;  %v864_v26 = vpop.f32.mrf.mxu1 }
 0x12f   :  { %893 = vst [vmem:[%s1656_s2 + $0x70] sm:$0xff] %v873_v14  ;;  %v865_v56 = vadd.f32 %v864_v26, %v768_v24  ;;  %v1146_v16 = vpop.f32.mrf.mxu0 }
 0x130   :  { %883 = vst [vmem:[%s1656_s2 + $0x20] sm:$0xff] %v833_v25  ;;  %v844_v17 = vadd.f32 %v1146_v16, %v747_v27  ;;  %v1154_v19 = vpop.f32.mrf.mxu1 }
 0x131   :  { %891 = vst [vmem:[%s1656_s2 + $0x60] sm:$0xff] %v865_v56  ;;  %v876_v49 = vadd.f32 %v1154_v19, %v779_v18  ;;  %v835_v50 = vpop.f32.mrf.mxu0 }
 0x132   :  { %886 = vst [vmem:[%s1656_s2 + $0x38] sm:$0xff] %v844_v17  ;;  %v836_v29 = vadd.f32 %v835_v50, %v739_v48  ;;  %v867_v30 = vpop.f32.mrf.mxu1 }
 0x133   :  { %894 = vst [vmem:[%s1656_s2 + $0x78] sm:$0xff] %v876_v49  ;;  %v868_v31 = vadd.f32 %v867_v30, %v771_v28 }
 0x134   :  { %884 = vst [vmem:[%s1656_s2 + $0x28] sm:$0xff] %v836_v29 }
 0x135   :  { %892 = vst [vmem:[%s1656_s2 + $0x68] sm:$0xff] %v868_v31 }

// kernel: encoder_forward.25
= control target key start
LH: loop header
LB: loop body
LE: loop exit
PB: predicated region body
PF: predicated region fallthrough
CT: control target
= control target key end

     0   :  { %s918_s1 = inlined_call_operand.vmem [shape: bf16[640,128], index: 1, kind: input, shape index: {}]   ;;  %s919_s0 = inlined_call_operand.vmem [shape: bf16[32,640], index: 0, kind: input, shape index: {}]   ;;  %s920_s2 = inlined_call_operand.vmem [shape: f32[32,128], index: 2, kind: output, shape index: {}]  }
   0x1   :  { %v687_v0 = vld [vmem:[%s918_s1 + $0x78] sm:$0xff]   ;;  %v691_v4 = vld [vmem:[%s918_s1 + $0x70] sm:$0xff]   ;;  %v695_v8 = vld [vmem:[%s918_s1 + $0x68] sm:$0xff]  }
   0x2   :  { %v688_v1 = vld [vmem:[%s918_s1 + $0xf8] sm:$0xff]   ;;  %601 = vmatprep.subr.bf16.mxu0 %v687_v0  ;;  %v692_v5 = vld [vmem:[%s918_s1 + $0xf0] sm:$0xff]   ;;  %v696_v9 = vld [vmem:[%s918_s1 + $0xe8] sm:$0xff]  }
   0x3   :  { %v689_v2 = vld [vmem:[%s918_s1 + $0x38] sm:$0xff]   ;;  %629 = vmatprep.subr.bf16.mxu1 %v688_v1  ;;  %v693_v6 = vld [vmem:[%s918_s1 + $0x30] sm:$0xff]   ;;  %v697_v10 = vld [vmem:[%s918_s1 + $0x28] sm:$0xff]  }
   0x4   :  { %v690_v3 = vld [vmem:[%s918_s1 + $0xb8] sm:$0xff]   ;;  %602 = vmatpush3.bf16.msra.mxu0 %v689_v2  ;;  %v694_v7 = vld [vmem:[%s918_s1 + $0xb0] sm:$0xff]   ;;  %v698_v11 = vld [vmem:[%s918_s1 + $0xa8] sm:$0xff]  }
   0x5   :  { %630 = vmatpush3.bf16.msra.mxu1 %v690_v3  ;;  %603 = vmatprep.subr.bf16.mxu0 %v691_v4  ;;  %v699_v12 = vld [vmem:[%s918_s1 + $0x60] sm:$0xff]   ;;  %v703_v16 = vld [vmem:[%s918_s1 + $0x58] sm:$0xff]   ;;  %v707_v20 = vld [vmem:[%s918_s1 + $0x50] sm:$0xff]  }
   0x6   :  { %631 = vmatprep.subr.bf16.mxu1 %v692_v5  ;;  %v700_v13 = vld [vmem:[%s918_s1 + $0xe0] sm:$0xff]   ;;  %v704_v17 = vld [vmem:[%s918_s1 + $0xd8] sm:$0xff]   ;;  %v708_v21 = vld [vmem:[%s918_s1 + $0xd0] sm:$0xff]  }
   0x7   :  { %v701_v14 = vld [vmem:[%s918_s1 + $0x20] sm:$0xff]   ;;  %v705_v18 = vld [vmem:[%s918_s1 + $0x18] sm:$0xff]   ;;  %v709_v22 = vld [vmem:[%s918_s1 + $0x10] sm:$0xff]  }
   0x8   :  { %604 = vmatpush3.bf16.msra.mxu0 %v693_v6  ;;  %v702_v15 = vld [vmem:[%s918_s1 + $0xa0] sm:$0xff]   ;;  %v706_v19 = vld [vmem:[%s918_s1 + $0x98] sm:$0xff]   ;;  %v710_v23 = vld [vmem:[%s918_s1 + $0x90] sm:$0xff]  }
   0x9   :  { %632 = vmatpush3.bf16.msra.mxu1 %v694_v7  ;;  %605 = vmatprep.subr.bf16.mxu0 %v695_v8  ;;  %v711_v24 = vld [vmem:[%s918_s1 + $0x48] sm:$0xff]   ;;  %v715_v28 = vld [vmem:[%s918_s1 + $0x40] sm:$0xff]   ;;  %v725_v36 = vld [vmem:[%s918_s1 + $0x138] sm:$0xff]  }
   0xa   :  { %633 = vmatprep.subr.bf16.mxu1 %v696_v9  ;;  %v712_v25 = vld [vmem:[%s918_s1 + $0xc8] sm:$0xff]   ;;  %v716_v29 = vld [vmem:[%s918_s1 + $0xc0] sm:$0xff]   ;;  %v726_v37 = vld [vmem:[%s918_s1 + $0x130] sm:$0xff]  }
   0xb   :  { %v713_v26 = vld [vmem:[%s918_s1 + $0x8] sm:$0xff]   ;;  %v717_v30 = vld [vmem:[%s918_s1] sm:$0xff]   ;;  %v729_v45 = vld [vmem:[%s918_s1 + $0x118] sm:$0xff]  }
   0xc   :  { %606 = vmatpush3.bf16.msra.mxu0 %v697_v10  ;;  %v714_v27 = vld [vmem:[%s918_s1 + $0x88] sm:$0xff]   ;;  %v718_v31 = vld [vmem:[%s918_s1 + $0x80] sm:$0xff]   ;;  %v736_v46 = vld [vmem:[%s918_s1 + $0x110] sm:$0xff]  }
   0xd   :  { %634 = vmatpush3.bf16.msra.mxu1 %v698_v11  ;;  %607 = vmatprep.subr.bf16.mxu0 %v699_v12  ;;  %v719_v32 = vld [vmem:[%s919_s0] ss:$20 sps:$4 sm:$0xff]   ;;  %v721_v33 = vld [vmem:[%s919_s0 + $0x4] ss:$20 sps:$4 sm:$0xff]   ;;  %v722_v34 = vld [vmem:[%s919_s0 + $0x8] ss:$20 sps:$4 sm:$0xff]  }
   0xe   :  { %635 = vmatprep.subr.bf16.mxu1 %v700_v13  ;;  %v724_v35 = vld [vmem:[%s919_s0 + $0xc] ss:$20 sps:$4 sm:$0xff]   ;;  %428 = vmatprep.mubr.bf16.mxu0 %v721_v33  ;;  %v732_v40 = vld [vmem:[%s919_s0 + $0x34] ss:$20 sps:$4 sm:$0xff]   ;;  %v735_v42 = vld [vmem:[%s919_s0 + $0x30] ss:$20 sps:$4 sm:$0xff]  }
   0xf   :  { %477 = vmatprep.mubr.bf16.mxu1 %v724_v35  ;;  %v727_v38 = vld [vmem:[%s918_s1 + $0x128] sm:$0xff]   ;;  %v728_v43 = vld [vmem:[%s918_s1 + $0x120] sm:$0xff]  }
  0x10   :  { %608 = vmatpush3.bf16.msra.mxu0 %v701_v14  ;;  %v730_v39 = vld [vmem:[%s919_s0 + $0x2c] ss:$20 sps:$4 sm:$0xff]   ;;  %v734_v41 = vld [vmem:[%s919_s0 + $0x28] ss:$20 sps:$4 sm:$0xff]   ;;  %v739_v44 = vld [vmem:[%s919_s0 + $0x10] ss:$20 sps:$4 sm:$0xff]  }
  0x11   :  { %636 = vmatpush3.bf16.msra.mxu1 %v702_v15  ;;  %609 = vmatprep.subr.bf16.mxu0 %v703_v16  ;;  %v737_v47 = vld [vmem:[%s918_s1 + $0x108] sm:$0xff]   ;;  %v738_v48 = vld [vmem:[%s918_s1 + $0x100] sm:$0xff]  }
  0x12   :  { %637 = vmatprep.subr.bf16.mxu1 %v704_v17  ;;  %v740_v49 = vld [vmem:[%s919_s0 + $0x38] ss:$20 sps:$4 sm:$0xff]  }
  0x14   :  { %610 = vmatpush3.bf16.msra.mxu0 %v705_v18 }
  0x15   :  { %638 = vmatpush3.bf16.msra.mxu1 %v706_v19  ;;  %611 = vmatprep.subr.bf16.mxu0 %v707_v20 }
  0x16   :  { %639 = vmatprep.subr.bf16.mxu1 %v708_v21 }
  0x18   :  { %612 = vmatpush3.bf16.msra.mxu0 %v709_v22 }
  0x19   :  { %640 = vmatpush3.bf16.msra.mxu1 %v710_v23  ;;  %613 = vmatprep.subr.bf16.mxu0 %v711_v24 }
  0x1a   :  { %641 = vmatprep.subr.bf16.mxu1 %v712_v25 }
  0x1c   :  { %614 = vmatpush3.bf16.msra.mxu0 %v713_v26 }
  0x1d   :  { %642 = vmatpush3.bf16.msra.mxu1 %v714_v27  ;;  %615 = vmatprep.subr.bf16.mxu0 %v715_v28 }
  0x1e   :  { %643 = vmatprep.subr.bf16.mxu1 %v716_v29 }
  0x20   :  { %616 = vmatpush3.bf16.msra.mxu0 %v717_v30 }
  0x21   :  { %644 = vmatpush3.bf16.msra.mxu1 %v718_v31  ;;  %667 = vmatprep.subr.bf16.mxu0 %v725_v36 }
  0x23   :  { %429 = vmatmul.mubr.bf16.vlgmr.msra.gmra.mxu0 %v719_v32 }
  0x24   :  { %478 = vmatmul.mubr.bf16.vlgmr.msra.gmra.mxu1 %v722_v34  ;;  %668 = vmatpush3.bf16.msra.mxu0 %v725_v36 }
  0x25   :  { %669 = vmatprep.subr.bf16.mxu0 %v726_v37  ;;  %436 = vmatprep.mubr.bf16.mxu0 %v730_v39 }
  0x26   :  { %485 = vmatprep.mubr.bf16.mxu1 %v732_v40 }
  0x28   :  { %670 = vmatpush3.bf16.msra.mxu0 %v726_v37 }
  0x29   :  { %671 = vmatprep.subr.bf16.mxu0 %v727_v38 }
  0x2b   :  { %437 = vmatmul.mubr.bf16.gmra.mxu0 %v734_v41 }
  0x2c   :  { %486 = vmatmul.mubr.bf16.gmra.mxu1 %v735_v42  ;;  %672 = vmatpush3.bf16.msra.mxu0 %v727_v38 }
  0x2d   :  { %673 = vmatprep.subr.bf16.mxu0 %v728_v43  ;;  %683 = vmatprep.mubr.bf16.mxu0 %v739_v44 }
  0x30   :  { %674 = vmatpush3.bf16.msra.mxu0 %v728_v43 }
  0x31   :  { %675 = vmatprep.subr.bf16.mxu0 %v729_v45 }
  0x34   :  { %676 = vmatpush3.bf16.msra.mxu0 %v729_v45 }
  0x35   :  { %677 = vmatprep.subr.bf16.mxu0 %v736_v46 }
  0x38   :  { %678 = vmatpush3.bf16.msra.mxu0 %v736_v46 }
  0x39   :  { %679 = vmatprep.subr.bf16.mxu0 %v737_v47 }
  0x3c   :  { %680 = vmatpush3.bf16.msra.mxu0 %v737_v47 }
  0x3d   :  { %681 = vmatprep.subr.bf16.mxu0 %v738_v48 }
  0x40   :  { %682 = vmatpush3.bf16.msra.mxu0 %v738_v48 }
  0x43   :  { %684 = vmatmul.mubr.bf16.vlgmr.msra.gmra.mxu0 %v740_v49 }
  0xe3   :  { %v617_v50 = vpop.f32.mrf.mxu0 }
  0xe4   :  { %v645_v51 = vpop.f32.mrf.mxu1 }
  0xe5   :  { %v618_v52 = vpop.f32.mrf.mxu0 }
  0xe6   :  { %v646_v53 = vpop.f32.mrf.mxu1  ;;  %v619_v4 = vadd.f32 %v618_v52, %v617_v50 }
  0xe7   :  { %v620_v54 = vpop.f32.mrf.mxu0  ;;  %v647_v5 = vadd.f32 %v646_v53, %v645_v51 }
  0xe8   :  { %v648_v55 = vpop.f32.mrf.mxu1 }
  0xe9   :  { %v621_v56 = vpop.f32.mrf.mxu0  ;;  %v480_v13 = vadd.f32 %v647_v5, %v619_v4 }
  0xea   :  { %v649_v57 = vpop.f32.mrf.mxu1  ;;  %v622_v10 = vadd.f32 %v621_v56, %v620_v54 }
  0xeb   :  { %v623_v58 = vpop.f32.mrf.mxu0  ;;  %v650_v11 = vadd.f32 %v649_v57, %v648_v55 }
  0xec   :  { %v651_v59 = vpop.f32.mrf.mxu1 }
  0xed   :  { %v624_v60 = vpop.f32.mrf.mxu0  ;;  %v483_v19 = vadd.f32 %v650_v11, %v622_v10 }
  0xee   :  { %v652_v61 = vpop.f32.mrf.mxu1  ;;  %v625_v0 = vadd.f32 %v624_v60, %v623_v58 }
  0xef   :  { %v626_v62 = vpop.f32.mrf.mxu0  ;;  %v653_v1 = vadd.f32 %v652_v61, %v651_v59 }
  0xf0   :  { %v654_v63 = vpop.f32.mrf.mxu1 }
  0xf1   :  { %v627_v2 = vpop.f32.mrf.mxu0  ;;  %v488_v8 = vadd.f32 %v653_v1, %v625_v0 }
  0xf2   :  { %v655_v3 = vpop.f32.mrf.mxu1  ;;  %v628_v6 = vadd.f32 %v627_v2, %v626_v62 }
  0xf3   :  { %v656_v7 = vadd.f32 %v655_v3, %v654_v63 }
  0xf5   :  { %v491_v16 = vadd.f32 %v656_v7, %v628_v6 }
 0x103   :  { %v685_v9 = vpop.f32.mrf.mxu0 }
 0x104   :  { %v537_v12 = vadd.f32 %v685_v9, %v488_v8 }
 0x105   :  { %v528_v14 = vpop.f32.mrf.mxu0 }
 0x106   :  { %545 = vst [vmem:[%s920_s2 + $0x10] sm:$0xff] %v537_v12  ;;  %v529_v15 = vadd.f32 %v528_v14, %v480_v13 }
 0x107   :  { %v686_v17 = vpop.f32.mrf.mxu0 }
 0x108   :  { %543 = vst [vmem:[%s920_s2] sm:$0xff] %v529_v15  ;;  %v540_v18 = vadd.f32 %v686_v17, %v491_v16 }
 0x109   :  { %v531_v20 = vpop.f32.mrf.mxu0 }
 0x10a   :  { %546 = vst [vmem:[%s920_s2 + $0x18] sm:$0xff] %v540_v18  ;;  %v532_v21 = vadd.f32 %v531_v20, %v483_v19 }
 0x10c   :  { %544 = vst [vmem:[%s920_s2 + $0x8] sm:$0xff] %v532_v21 }

// kernel: encoder_forward.26
= control target key start
LH: loop header
LB: loop body
LE: loop exit
PB: predicated region body
PF: predicated region fallthrough
CT: control target
= control target key end

     0   :  { %s1580_s1 = inlined_call_operand.vmem [shape: bf16[1152,128], index: 1, kind: input, shape index: {}]   ;;  %s1581_s0 = inlined_call_operand.vmem [shape: bf16[32,1152], index: 0, kind: input, shape index: {}]   ;;  %s1582_s2 = inlined_call_operand.vmem [shape: f32[32,128], index: 2, kind: output, shape index: {}]  }
   0x1   :  { %v1185_v0 = vld [vmem:[%s1580_s1 + $0x78] sm:$0xff]   ;;  %v1189_v4 = vld [vmem:[%s1580_s1 + $0x70] sm:$0xff]   ;;  %v1193_v8 = vld [vmem:[%s1580_s1 + $0x68] sm:$0xff]  }
   0x2   :  { %v1186_v1 = vld [vmem:[%s1580_s1 + $0xf8] sm:$0xff]   ;;  %1043 = vmatprep.subr.bf16.mxu0 %v1185_v0  ;;  %v1190_v5 = vld [vmem:[%s1580_s1 + $0xf0] sm:$0xff]   ;;  %v1194_v9 = vld [vmem:[%s1580_s1 + $0xe8] sm:$0xff]  }
   0x3   :  { %v1187_v2 = vld [vmem:[%s1580_s1 + $0x38] sm:$0xff]   ;;  %1071 = vmatprep.subr.bf16.mxu1 %v1186_v1  ;;  %v1191_v6 = vld [vmem:[%s1580_s1 + $0x30] sm:$0xff]   ;;  %v1195_v10 = vld [vmem:[%s1580_s1 + $0x28] sm:$0xff]  }
   0x4   :  { %v1188_v3 = vld [vmem:[%s1580_s1 + $0xb8] sm:$0xff]   ;;  %1044 = vmatpush3.bf16.msra.mxu0 %v1187_v2  ;;  %v1192_v7 = vld [vmem:[%s1580_s1 + $0xb0] sm:$0xff]   ;;  %v1196_v11 = vld [vmem:[%s1580_s1 + $0xa8] sm:$0xff]  }
   0x5   :  { %1072 = vmatpush3.bf16.msra.mxu1 %v1188_v3  ;;  %1045 = vmatprep.subr.bf16.mxu0 %v1189_v4  ;;  %v1197_v12 = vld [vmem:[%s1580_s1 + $0x60] sm:$0xff]   ;;  %v1201_v16 = vld [vmem:[%s1580_s1 + $0x58] sm:$0xff]   ;;  %v1205_v20 = vld [vmem:[%s1580_s1 + $0x50] sm:$0xff]  }
   0x6   :  { %1073 = vmatprep.subr.bf16.mxu1 %v1190_v5  ;;  %v1198_v13 = vld [vmem:[%s1580_s1 + $0xe0] sm:$0xff]   ;;  %v1202_v17 = vld [vmem:[%s1580_s1 + $0xd8] sm:$0xff]   ;;  %v1206_v21 = vld [vmem:[%s1580_s1 + $0xd0] sm:$0xff]  }
   0x7   :  { %v1199_v14 = vld [vmem:[%s1580_s1 + $0x20] sm:$0xff]   ;;  %v1203_v18 = vld [vmem:[%s1580_s1 + $0x18] sm:$0xff]   ;;  %v1207_v22 = vld [vmem:[%s1580_s1 + $0x10] sm:$0xff]  }
   0x8   :  { %1046 = vmatpush3.bf16.msra.mxu0 %v1191_v6  ;;  %v1200_v15 = vld [vmem:[%s1580_s1 + $0xa0] sm:$0xff]   ;;  %v1204_v19 = vld [vmem:[%s1580_s1 + $0x98] sm:$0xff]   ;;  %v1208_v23 = vld [vmem:[%s1580_s1 + $0x90] sm:$0xff]  }
   0x9   :  { %1074 = vmatpush3.bf16.msra.mxu1 %v1192_v7  ;;  %1047 = vmatprep.subr.bf16.mxu0 %v1193_v8  ;;  %v1209_v24 = vld [vmem:[%s1580_s1 + $0x48] sm:$0xff]   ;;  %v1213_v28 = vld [vmem:[%s1580_s1 + $0x40] sm:$0xff]   ;;  %v1223_v36 = vld [vmem:[%s1580_s1 + $0x178] sm:$0xff]  }
   0xa   :  { %1075 = vmatprep.subr.bf16.mxu1 %v1194_v9  ;;  %v1210_v25 = vld [vmem:[%s1580_s1 + $0xc8] sm:$0xff]   ;;  %v1214_v29 = vld [vmem:[%s1580_s1 + $0xc0] sm:$0xff]   ;;  %v1224_v37 = vld [vmem:[%s1580_s1 + $0x138] sm:$0xff]  }
   0xb   :  { %v1211_v26 = vld [vmem:[%s1580_s1 + $0x8] sm:$0xff]   ;;  %v1215_v30 = vld [vmem:[%s1580_s1] sm:$0xff]   ;;  %v1225_v38 = vld [vmem:[%s1580_s1 + $0x1f8] sm:$0xff]  }
   0xc   :  { %1048 = vmatpush3.bf16.msra.mxu0 %v1195_v10  ;;  %v1212_v27 = vld [vmem:[%s1580_s1 + $0x88] sm:$0xff]   ;;  %v1216_v31 = vld [vmem:[%s1580_s1 + $0x80] sm:$0xff]   ;;  %v1226_v39 = vld [vmem:[%s1580_s1 + $0x1b8] sm:$0xff]  }
   0xd   :  { %1076 = vmatpush3.bf16.msra.mxu1 %v1196_v11  ;;  %1049 = vmatprep.subr.bf16.mxu0 %v1197_v12  ;;  %v1217_v32 = vld [vmem:[%s1581_s0] ss:$36 sps:$4 sm:$0xff]   ;;  %v1220_v34 = vld [vmem:[%s1581_s0 + $0x8] ss:$36 sps:$4 sm:$0xff]   ;;  %v1227_v40 = vld [vmem:[%s1580_s1 + $0x170] sm:$0xff]  }
   0xe   :  { %1077 = vmatprep.subr.bf16.mxu1 %v1198_v13  ;;  %v1219_v33 = vld [vmem:[%s1581_s0 + $0x4] ss:$36 sps:$4 sm:$0xff]   ;;  %v1222_v35 = vld [vmem:[%s1581_s0 + $0xc] ss:$36 sps:$4 sm:$0xff]   ;;  %v1239_v52 = vld [vmem:[%s1580_s1 + $0x158] sm:$0xff]  }
   0xf   :  { %732 = vmatprep.mubr.bf16.mxu0 %v1219_v33  ;;  %781 = vmatprep.mubr.bf16.mxu1 %v1222_v35  ;;  %v1228_v41 = vld [vmem:[%s1580_s1 + $0x130] sm:$0xff]   ;;  %v1231_v44 = vld [vmem:[%s1580_s1 + $0x168] sm:$0xff]   ;;  %v1235_v48 = vld [vmem:[%s1580_s1 + $0x160] sm:$0xff]  }
  0x10   :  { %1050 = vmatpush3.bf16.msra.mxu0 %v1199_v14  ;;  %v1229_v42 = vld [vmem:[%s1580_s1 + $0x1f0] sm:$0xff]   ;;  %v1232_v45 = vld [vmem:[%s1580_s1 + $0x128] sm:$0xff]   ;;  %v1236_v49 = vld [vmem:[%s1580_s1 + $0x120] sm:$0xff]  }
  0x11   :  { %1078 = vmatpush3.bf16.msra.mxu1 %v1200_v15  ;;  %1051 = vmatprep.subr.bf16.mxu0 %v1201_v16  ;;  %v1230_v43 = vld [vmem:[%s1580_s1 + $0x1b0] sm:$0xff]   ;;  %v1233_v46 = vld [vmem:[%s1580_s1 + $0x1e8] sm:$0xff]   ;;  %v1237_v50 = vld [vmem:[%s1580_s1 + $0x1e0] sm:$0xff]  }
  0x12   :  { %1079 = vmatprep.subr.bf16.mxu1 %v1202_v17  ;;  %v1234_v47 = vld [vmem:[%s1580_s1 + $0x1a8] sm:$0xff]   ;;  %v1238_v51 = vld [vmem:[%s1580_s1 + $0x1a0] sm:$0xff]   ;;  %v1240_v53 = vld [vmem:[%s1580_s1 + $0x118] sm:$0xff]  }
  0x13   :  { %v1241_v54 = vld [vmem:[%s1581_s0 + $0x4c] ss:$36 sps:$4 sm:$0xff]   ;;  %v1243_v55 = vld [vmem:[%s1581_s0 + $0x54] ss:$36 sps:$4 sm:$0xff]   ;;  %v1257_v4 = vld [vmem:[%s1580_s1 + $0x140] sm:$0xff]  }
  0x14   :  { %1052 = vmatpush3.bf16.msra.mxu0 %v1203_v18  ;;  %v1245_v56 = vld [vmem:[%s1580_s1 + $0x1d8] sm:$0xff]   ;;  %v1246_v57 = vld [vmem:[%s1581_s0 + $0x48] ss:$36 sps:$4 sm:$0xff]   ;;  %v1247_v58 = vld [vmem:[%s1581_s0 + $0x50] ss:$36 sps:$4 sm:$0xff]  }
  0x15   :  { %1080 = vmatpush3.bf16.msra.mxu1 %v1204_v19  ;;  %1053 = vmatprep.subr.bf16.mxu0 %v1205_v20  ;;  %v1248_v59 = vld [vmem:[%s1580_s1 + $0x198] sm:$0xff]   ;;  %v1249_v60 = vld [vmem:[%s1580_s1 + $0x150] sm:$0xff]   ;;  %v1253_v0 = vld [vmem:[%s1580_s1 + $0x148] sm:$0xff]  }
  0x16   :  { %1081 = vmatprep.subr.bf16.mxu1 %v1206_v21  ;;  %v1250_v61 = vld [vmem:[%s1580_s1 + $0x110] sm:$0xff]   ;;  %v1254_v1 = vld [vmem:[%s1580_s1 + $0x108] sm:$0xff]   ;;  %v1258_v5 = vld [vmem:[%s1580_s1 + $0x100] sm:$0xff]  }
  0x17   :  { %v1251_v62 = vld [vmem:[%s1580_s1 + $0x1d0] sm:$0xff]   ;;  %v1255_v2 = vld [vmem:[%s1580_s1 + $0x1c8] sm:$0xff]   ;;  %v1259_v6 = vld [vmem:[%s1580_s1 + $0x1c0] sm:$0xff]  }
  0x18   :  { %1054 = vmatpush3.bf16.msra.mxu0 %v1207_v22  ;;  %v1252_v63 = vld [vmem:[%s1580_s1 + $0x190] sm:$0xff]   ;;  %v1256_v3 = vld [vmem:[%s1580_s1 + $0x188] sm:$0xff]   ;;  %v1263_v9 = vld [vmem:[%s1580_s1 + $0x180] sm:$0xff]  }
  0x19   :  { %1082 = vmatpush3.bf16.msra.mxu1 %v1208_v23  ;;  %1055 = vmatprep.subr.bf16.mxu0 %v1209_v24  ;;  %v1260_v7 = vld [vmem:[%s1581_s0 + $0x10] ss:$36 sps:$4 sm:$0xff]   ;;  %v1264_v10 = vld [vmem:[%s1580_s1 + $0x238] sm:$0xff]   ;;  %v1272_v16 = vld [vmem:[%s1580_s1 + $0x228] sm:$0xff]  }
  0x1a   :  { %1083 = vmatprep.subr.bf16.mxu1 %v1210_v25  ;;  %v1262_v8 = vld [vmem:[%s1581_s0 + $0x14] ss:$36 sps:$4 sm:$0xff]   ;;  %v1267_v12 = vld [vmem:[%s1581_s0 + $0x1c] ss:$36 sps:$4 sm:$0xff]   ;;  %v1273_v17 = vld [vmem:[%s1581_s0 + $0x64] ss:$36 sps:$4 sm:$0xff]  }
  0x1b   :  { %v1265_v11 = vld [vmem:[%s1581_s0 + $0x18] ss:$36 sps:$4 sm:$0xff]   ;;  %v1268_v13 = vld [vmem:[%s1580_s1 + $0x230] sm:$0xff]   ;;  %v1275_v18 = vld [vmem:[%s1581_s0 + $0x60] ss:$36 sps:$4 sm:$0xff]  }
  0x1c   :  { %1056 = vmatpush3.bf16.msra.mxu0 %v1211_v26  ;;  %v1269_v14 = vld [vmem:[%s1581_s0 + $0x5c] ss:$36 sps:$4 sm:$0xff]   ;;  %v1278_v22 = vld [vmem:[%s1580_s1 + $0x210] sm:$0xff]   ;;  %v1279_v23 = vld [vmem:[%s1580_s1 + $0x208] sm:$0xff]  }
  0x1d   :  { %1084 = vmatpush3.bf16.msra.mxu1 %v1212_v27  ;;  %1057 = vmatprep.subr.bf16.mxu0 %v1213_v28  ;;  %v1271_v15 = vld [vmem:[%s1581_s0 + $0x58] ss:$36 sps:$4 sm:$0xff]   ;;  %v1276_v19 = vld [vmem:[%s1580_s1 + $0x220] sm:$0xff]   ;;  %v1282_v25 = vld [vmem:[%s1581_s0 + $0x68] ss:$36 sps:$4 sm:$0xff]  }
  0x1e   :  { %1085 = vmatprep.subr.bf16.mxu1 %v1214_v29  ;;  %v1277_v20 = vld [vmem:[%s1580_s1 + $0x218] sm:$0xff]   ;;  %v1281_v21 = vld [vmem:[%s1581_s0 + $0x20] ss:$36 sps:$4 sm:$0xff]  }
  0x1f   :  { %v1280_v24 = vld [vmem:[%s1580_s1 + $0x200] sm:$0xff]  }
  0x20   :  { %1058 = vmatpush3.bf16.msra.mxu0 %v1215_v30 }
  0x21   :  { %1086 = vmatpush3.bf16.msra.mxu1 %v1216_v31  ;;  %1099 = vmatprep.subr.bf16.mxu0 %v1223_v36 }
  0x22   :  { %1127 = vmatprep.subr.bf16.mxu1 %v1225_v38 }
  0x23   :  { %733 = vmatmul.mubr.bf16.vlgmr.msra.gmra.mxu0 %v1217_v32 }
  0x24   :  { %782 = vmatmul.mubr.bf16.vlgmr.msra.gmra.mxu1 %v1220_v34  ;;  %1100 = vmatpush3.bf16.msra.mxu0 %v1224_v37 }
  0x25   :  { %1128 = vmatpush3.bf16.msra.mxu1 %v1226_v39  ;;  %1101 = vmatprep.subr.bf16.mxu0 %v1227_v40 }
  0x26   :  { %1129 = vmatprep.subr.bf16.mxu1 %v1229_v42  ;;  %740 = vmatprep.mubr.bf16.mxu0 %v1241_v54 }
  0x27   :  { %789 = vmatprep.mubr.bf16.mxu1 %v1243_v55 }
  0x28   :  { %1102 = vmatpush3.bf16.msra.mxu0 %v1228_v41 }
  0x29   :  { %1130 = vmatpush3.bf16.msra.mxu1 %v1230_v43  ;;  %1103 = vmatprep.subr.bf16.mxu0 %v1231_v44 }
  0x2a   :  { %1131 = vmatprep.subr.bf16.mxu1 %v1233_v46 }
  0x2b   :  { %741 = vmatmul.mubr.bf16.gmra.mxu0 %v1246_v57 }
  0x2c   :  { %1104 = vmatpush3.bf16.msra.mxu0 %v1232_v45  ;;  %790 = vmatmul.mubr.bf16.gmra.mxu1 %v1247_v58 }
  0x2d   :  { %1132 = vmatpush3.bf16.msra.mxu1 %v1234_v47  ;;  %1105 = vmatprep.subr.bf16.mxu0 %v1235_v48 }
  0x2e   :  { %1133 = vmatprep.subr.bf16.mxu1 %v1237_v50  ;;  %830 = vmatprep.mubr.bf16.mxu0 %v1262_v8 }
  0x2f   :  { %879 = vmatprep.mubr.bf16.mxu1 %v1267_v12 }
  0x30   :  { %1106 = vmatpush3.bf16.msra.mxu0 %v1236_v49 }
  0x31   :  { %1134 = vmatpush3.bf16.msra.mxu1 %v1238_v51  ;;  %1107 = vmatprep.subr.bf16.mxu0 %v1239_v52 }
  0x32   :  { %1135 = vmatprep.subr.bf16.mxu1 %v1245_v56 }
  0x34   :  { %1108 = vmatpush3.bf16.msra.mxu0 %v1240_v53 }
  0x35   :  { %1136 = vmatpush3.bf16.msra.mxu1 %v1248_v59  ;;  %1109 = vmatprep.subr.bf16.mxu0 %v1249_v60 }
  0x36   :  { %1137 = vmatprep.subr.bf16.mxu1 %v1251_v62 }
  0x38   :  { %1110 = vmatpush3.bf16.msra.mxu0 %v1250_v61 }
  0x39   :  { %1138 = vmatpush3.bf16.msra.mxu1 %v1252_v63  ;;  %1111 = vmatprep.subr.bf16.mxu0 %v1253_v0 }
  0x3a   :  { %1139 = vmatprep.subr.bf16.mxu1 %v1255_v2 }
  0x3c   :  { %1112 = vmatpush3.bf16.msra.mxu0 %v1254_v1 }
  0x3d   :  { %1140 = vmatpush3.bf16.msra.mxu1 %v1256_v3  ;;  %1113 = vmatprep.subr.bf16.mxu0 %v1257_v4 }
  0x3e   :  { %1141 = vmatprep.subr.bf16.mxu1 %v1259_v6 }
  0x40   :  { %1114 = vmatpush3.bf16.msra.mxu0 %v1258_v5 }
  0x41   :  { %1142 = vmatpush3.bf16.msra.mxu1 %v1263_v9  ;;  %1165 = vmatprep.subr.bf16.mxu0 %v1264_v10 }
  0x43   :  { %831 = vmatmul.mubr.bf16.vlgmr.msra.gmra.mxu0 %v1260_v7 }
  0x44   :  { %1166 = vmatpush3.bf16.msra.mxu0 %v1264_v10  ;;  %880 = vmatmul.mubr.bf16.vlgmr.msra.gmra.mxu1 %v1265_v11 }
  0x45   :  { %1167 = vmatprep.subr.bf16.mxu0 %v1268_v13  ;;  %838 = vmatprep.mubr.bf16.mxu0 %v1269_v14 }
  0x46   :  { %887 = vmatprep.mubr.bf16.mxu1 %v1273_v17 }
  0x48   :  { %1168 = vmatpush3.bf16.msra.mxu0 %v1268_v13 }
  0x49   :  { %1169 = vmatprep.subr.bf16.mxu0 %v1272_v16 }
  0x4b   :  { %839 = vmatmul.mubr.bf16.gmra.mxu0 %v1271_v15 }
  0x4c   :  { %1170 = vmatpush3.bf16.msra.mxu0 %v1272_v16  ;;  %888 = vmatmul.mubr.bf16.gmra.mxu1 %v1275_v18 }
  0x4d   :  { %1171 = vmatprep.subr.bf16.mxu0 %v1276_v19  ;;  %1181 = vmatprep.mubr.bf16.mxu0 %v1281_v21 }
  0x50   :  { %1172 = vmatpush3.bf16.msra.mxu0 %v1276_v19 }
  0x51   :  { %1173 = vmatprep.subr.bf16.mxu0 %v1277_v20 }
  0x54   :  { %1174 = vmatpush3.bf16.msra.mxu0 %v1277_v20 }
  0x55   :  { %1175 = vmatprep.subr.bf16.mxu0 %v1278_v22 }
  0x58   :  { %1176 = vmatpush3.bf16.msra.mxu0 %v1278_v22 }
  0x59   :  { %1177 = vmatprep.subr.bf16.mxu0 %v1279_v23 }
  0x5c   :  { %1178 = vmatpush3.bf16.msra.mxu0 %v1279_v23 }
  0x5d   :  { %1179 = vmatprep.subr.bf16.mxu0 %v1280_v24 }
  0x60   :  { %1180 = vmatpush3.bf16.msra.mxu0 %v1280_v24 }
  0x63   :  { %1182 = vmatmul.mubr.bf16.vlgmr.msra.gmra.mxu0 %v1282_v25 }
  0xe3   :  { %v1059_v26 = vpop.f32.mrf.mxu0 }
  0xe4   :  { %v1087_v27 = vpop.f32.mrf.mxu1 }
  0xe5   :  { %v1060_v28 = vpop.f32.mrf.mxu0 }
  0xe6   :  { %v1088_v29 = vpop.f32.mrf.mxu1  ;;  %v1061_v57 = vadd.f32 %v1060_v28, %v1059_v26 }
  0xe7   :  { %v1062_v30 = vpop.f32.mrf.mxu0  ;;  %v1089_v58 = vadd.f32 %v1088_v29, %v1087_v27 }
  0xe8   :  { %v1090_v31 = vpop.f32.mrf.mxu1 }
  0xe9   :  { %v1063_v32 = vpop.f32.mrf.mxu0  ;;  %v784_v2 = vadd.f32 %v1089_v58, %v1061_v57 }
  0xea   :  { %v1091_v34 = vpop.f32.mrf.mxu1  ;;  %v1064_v3 = vadd.f32 %v1063_v32, %v1062_v30 }
  0xeb   :  { %v1065_v33 = vpop.f32.mrf.mxu0  ;;  %v1092_v4 = vadd.f32 %v1091_v34, %v1090_v31 }
  0xec   :  { %v1093_v35 = vpop.f32.mrf.mxu1 }
  0xed   :  { %v1066_v36 = vpop.f32.mrf.mxu0  ;;  %v787_v13 = vadd.f32 %v1092_v4, %v1064_v3 }
  0xee   :  { %v1094_v37 = vpop.f32.mrf.mxu1  ;;  %v1067_v55 = vadd.f32 %v1066_v36, %v1065_v33 }
  0xef   :  { %v1068_v38 = vpop.f32.mrf.mxu0  ;;  %v1095_v56 = vadd.f32 %v1094_v37, %v1093_v35 }
  0xf0   :  { %v1096_v39 = vpop.f32.mrf.mxu1 }
  0xf1   :  { %v1069_v40 = vpop.f32.mrf.mxu0  ;;  %v792_v62 = vadd.f32 %v1095_v56, %v1067_v55 }
  0xf2   :  { %v1097_v42 = vpop.f32.mrf.mxu1  ;;  %v1070_v63 = vadd.f32 %v1069_v40, %v1068_v38 }
  0xf3   :  { %v1098_v0 = vadd.f32 %v1097_v42, %v1096_v39 }
  0xf5   :  { %v795_v9 = vadd.f32 %v1098_v0, %v1070_v63 }
 0x103   :  { %v1115_v41 = vpop.f32.mrf.mxu0 }
 0x104   :  { %v1143_v44 = vpop.f32.mrf.mxu1 }
 0x105   :  { %v1116_v43 = vpop.f32.mrf.mxu0 }
 0x106   :  { %v1144_v46 = vpop.f32.mrf.mxu1  ;;  %v1117_v1 = vadd.f32 %v1116_v43, %v1115_v41 }
 0x107   :  { %v1118_v45 = vpop.f32.mrf.mxu0  ;;  %v1145_v11 = vadd.f32 %v1144_v46, %v1143_v44 }
 0x108   :  { %v1146_v48 = vpop.f32.mrf.mxu1  ;;  %v833_v10 = vadd.f32 %v1117_v1, %v784_v2 }
 0x109   :  { %v1119_v47 = vpop.f32.mrf.mxu0 }
 0x10a   :  { %v1147_v50 = vpop.f32.mrf.mxu1  ;;  %v1120_v12 = vadd.f32 %v1119_v47, %v1118_v45  ;;  %v882_v21 = vadd.f32 %v1145_v11, %v833_v10 }
 0x10b   :  { %v1121_v49 = vpop.f32.mrf.mxu0  ;;  %v1148_v19 = vadd.f32 %v1147_v50, %v1146_v48 }
 0x10c   :  { %v1149_v52 = vpop.f32.mrf.mxu1  ;;  %v836_v18 = vadd.f32 %v1120_v12, %v787_v13 }
 0x10d   :  { %v1122_v51 = vpop.f32.mrf.mxu0 }
 0x10e   :  { %v1150_v54 = vpop.f32.mrf.mxu1  ;;  %v1123_v59 = vadd.f32 %v1122_v51, %v1121_v49  ;;  %v885_v27 = vadd.f32 %v1148_v19, %v836_v18 }
 0x10f   :  { %v1124_v53 = vpop.f32.mrf.mxu0  ;;  %v1151_v6 = vadd.f32 %v1150_v54, %v1149_v52 }
 0x110   :  { %v1152_v61 = vpop.f32.mrf.mxu1  ;;  %v841_v5 = vadd.f32 %v1123_v59, %v792_v62 }
 0x111   :  { %v1125_v60 = vpop.f32.mrf.mxu0 }
 0x112   :  { %v1126_v7 = vadd.f32 %v1125_v60, %v1124_v53  ;;  %v1153_v8 = vpop.f32.mrf.mxu1  ;;  %v890_v16 = vadd.f32 %v1151_v6, %v841_v5 }
 0x113   :  { %v1154_v15 = vadd.f32 %v1153_v8, %v1152_v61 }
 0x114   :  { %v844_v14 = vadd.f32 %v1126_v7, %v795_v9 }
 0x116   :  { %v893_v24 = vadd.f32 %v1154_v15, %v844_v14 }
 0x123   :  { %v1183_v17 = vpop.f32.mrf.mxu0 }
 0x124   :  { %v939_v20 = vadd.f32 %v1183_v17, %v890_v16 }
 0x125   :  { %v930_v22 = vpop.f32.mrf.mxu0 }
 0x126   :  { %947 = vst [vmem:[%s1582_s2 + $0x10] sm:$0xff] %v939_v20  ;;  %v931_v23 = vadd.f32 %v930_v22, %v882_v21 }
 0x127   :  { %v1184_v25 = vpop.f32.mrf.mxu0 }
 0x128   :  { %945 = vst [vmem:[%s1582_s2] sm:$0xff] %v931_v23  ;;  %v942_v26 = vadd.f32 %v1184_v25, %v893_v24 }
 0x129   :  { %v933_v28 = vpop.f32.mrf.mxu0 }
 0x12a   :  { %948 = vst [vmem:[%s1582_s2 + $0x18] sm:$0xff] %v942_v26  ;;  %v934_v29 = vadd.f32 %v933_v28, %v885_v27 }
 0x12c   :  { %946 = vst [vmem:[%s1582_s2 + $0x8] sm:$0xff] %v934_v29 }

// kernel: encoder_forward.27
= control target key start
LH: loop header
LB: loop body
LE: loop exit
PB: predicated region body
PF: predicated region fallthrough
CT: control target
= control target key end

     0   :  { %s256_s1 = inlined_call_operand.vmem [shape: bf16[128,128], index: 1, kind: input, shape index: {}]   ;;  %s257_s0 = inlined_call_operand.vmem [shape: bf16[32,128], index: 0, kind: input, shape index: {}]   ;;  %s258_s2 = inlined_call_operand.vmem [shape: f32[32,128], index: 2, kind: output, shape index: {}]  }
   0x1   :  { %v189_v0 = vld [vmem:[%s256_s1 + $0x38] sm:$0xff]   ;;  %v190_v1 = vld [vmem:[%s256_s1 + $0x30] sm:$0xff]   ;;  %v191_v2 = vld [vmem:[%s256_s1 + $0x28] sm:$0xff]  }
   0x2   :  { %169 = vmatprep.subr.bf16.mxu0 %v189_v0  ;;  %v192_v3 = vld [vmem:[%s256_s1 + $0x20] sm:$0xff]   ;;  %v193_v5 = vld [vmem:[%s256_s1 + $0x18] sm:$0xff]   ;;  %v194_v6 = vld [vmem:[%s256_s1 + $0x10] sm:$0xff]  }
   0x3   :  { %170 = vmatpush3.bf16.msra.mxu0 %v189_v0  ;;  %v197_v4 = vld [vmem:[%s257_s0] sm:$0xff]   ;;  %v195_v7 = vld [vmem:[%s256_s1 + $0x8] sm:$0xff]  }
   0x4   :  { %171 = vmatprep.subr.bf16.mxu0 %v190_v1  ;;  %185 = vmatprep.mubr.bf16.mxu0 %v197_v4  ;;  %v196_v8 = vld [vmem:[%s256_s1] sm:$0xff]   ;;  %v198_v9 = vld [vmem:[%s257_s0 + $0x8] sm:$0xff]  }
   0x7   :  { %172 = vmatpush3.bf16.msra.mxu0 %v190_v1 }
   0x8   :  { %173 = vmatprep.subr.bf16.mxu0 %v191_v2 }
   0xb   :  { %174 = vmatpush3.bf16.msra.mxu0 %v191_v2 }
   0xc   :  { %175 = vmatprep.subr.bf16.mxu0 %v192_v3 }
   0xf   :  { %176 = vmatpush3.bf16.msra.mxu0 %v192_v3 }
  0x10   :  { %177 = vmatprep.subr.bf16.mxu0 %v193_v5 }
  0x13   :  { %178 = vmatpush3.bf16.msra.mxu0 %v193_v5 }
  0x14   :  { %179 = vmatprep.subr.bf16.mxu0 %v194_v6 }
  0x17   :  { %180 = vmatpush3.bf16.msra.mxu0 %v194_v6 }
  0x18   :  { %181 = vmatprep.subr.bf16.mxu0 %v195_v7 }
  0x1b   :  { %182 = vmatpush3.bf16.msra.mxu0 %v195_v7 }
  0x1c   :  { %183 = vmatprep.subr.bf16.mxu0 %v196_v8 }
  0x1f   :  { %184 = vmatpush3.bf16.msra.mxu0 %v196_v8 }
  0x22   :  { %186 = vmatmul.mubr.bf16.vlgmr.msra.gmra.mxu0 %v198_v9 }
  0xe2   :  { %v187_v10 = vpop.f32.mrf.mxu0 }
  0xe3   :  { %143 = vst [vmem:[%s258_s2 + $0x10] sm:$0xff] %v187_v10 }
  0xe4   :  { %v126_v11 = vpop.f32.mrf.mxu0 }
  0xe5   :  { %141 = vst [vmem:[%s258_s2] sm:$0xff] %v126_v11 }
  0xe6   :  { %v188_v12 = vpop.f32.mrf.mxu0 }
  0xe7   :  { %144 = vst [vmem:[%s258_s2 + $0x18] sm:$0xff] %v188_v12 }
  0xe8   :  { %v129_v13 = vpop.f32.mrf.mxu0 }
  0xe9   :  { %142 = vst [vmem:[%s258_s2 + $0x8] sm:$0xff] %v129_v13 }

// kernel: encoder_forward.30
= control target key start
LH: loop header
LB: loop body
LE: loop exit
PB: predicated region body
PF: predicated region fallthrough
CT: control target
= control target key end

     0   :  { %s2025_s1 = inlined_call_operand.vmem [shape: bf16[1152,256], index: 1, kind: input, shape index: {}]   ;;  %s2026_s0 = inlined_call_operand.vmem [shape: bf16[16,1152], index: 0, kind: input, shape index: {}]   ;;  %s2027_s2 = inlined_call_operand.vmem [shape: f32[16,256], index: 2, kind: output, shape index: {}]  }
   0x1   :  { %v1309_v0 = vld [vmem:[%s2025_s1 + $0x74] ss:$8 sps:$4 sm:$0xff]   ;;  %v1313_v2 = vld [vmem:[%s2025_s1 + $0x70] ss:$8 sps:$4 sm:$0xff]   ;;  %v1315_v4 = vld [vmem:[%s2025_s1 + $0x64] ss:$8 sps:$4 sm:$0xff]  }
   0x2   :  { %v1311_v1 = vld [vmem:[%s2025_s1 + $0x174] ss:$8 sps:$4 sm:$0xff]   ;;  %932 = vmatprep.subr.bf16.mxu0 %v1309_v0  ;;  %v1314_v3 = vld [vmem:[%s2025_s1 + $0x170] ss:$8 sps:$4 sm:$0xff]   ;;  %v1317_v5 = vld [vmem:[%s2025_s1 + $0x164] ss:$8 sps:$4 sm:$0xff]  }
   0x3   :  { %975 = vmatprep.subr.bf16.mxu1 %v1311_v1  ;;  %933 = vmatpush1.bf16.msra.mxu0 %v1313_v2  ;;  %v1319_v6 = vld [vmem:[%s2025_s1 + $0x60] ss:$8 sps:$4 sm:$0xff]   ;;  %v1321_v8 = vld [vmem:[%s2025_s1 + $0x54] ss:$8 sps:$4 sm:$0xff]   ;;  %v1325_v10 = vld [vmem:[%s2025_s1 + $0x50] ss:$8 sps:$4 sm:$0xff]  }
   0x4   :  { %976 = vmatpush1.bf16.msra.mxu1 %v1314_v3  ;;  %934 = vmatprep.subr.bf16.mxu0 %v1315_v4  ;;  %v1320_v7 = vld [vmem:[%s2025_s1 + $0x160] ss:$8 sps:$4 sm:$0xff]   ;;  %v1323_v9 = vld [vmem:[%s2025_s1 + $0x154] ss:$8 sps:$4 sm:$0xff]   ;;  %v1326_v11 = vld [vmem:[%s2025_s1 + $0x150] ss:$8 sps:$4 sm:$0xff]  }
   0x5   :  { %977 = vmatprep.subr.bf16.mxu1 %v1317_v5  ;;  %v1327_v12 = vld [vmem:[%s2025_s1 + $0x44] ss:$8 sps:$4 sm:$0xff]   ;;  %v1331_v14 = vld [vmem:[%s2025_s1 + $0x40] ss:$8 sps:$4 sm:$0xff]   ;;  %v1333_v16 = vld [vmem:[%s2025_s1 + $0x34] ss:$8 sps:$4 sm:$0xff]  }
   0x6   :  { %v1329_v13 = vld [vmem:[%s2025_s1 + $0x144] ss:$8 sps:$4 sm:$0xff]   ;;  %v1332_v15 = vld [vmem:[%s2025_s1 + $0x140] ss:$8 sps:$4 sm:$0xff]   ;;  %v1335_v17 = vld [vmem:[%s2025_s1 + $0x134] ss:$8 sps:$4 sm:$0xff]  }
   0x7   :  { %935 = vmatpush1.bf16.msra.mxu0 %v1319_v6  ;;  %v1337_v18 = vld [vmem:[%s2025_s1 + $0x30] ss:$8 sps:$4 sm:$0xff]   ;;  %v1339_v20 = vld [vmem:[%s2025_s1 + $0x24] ss:$8 sps:$4 sm:$0xff]   ;;  %v1343_v22 = vld [vmem:[%s2025_s1 + $0x20] ss:$8 sps:$4 sm:$0xff]  }
   0x8   :  { %978 = vmatpush1.bf16.msra.mxu1 %v1320_v7  ;;  %936 = vmatprep.subr.bf16.mxu0 %v1321_v8  ;;  %v1338_v19 = vld [vmem:[%s2025_s1 + $0x130] ss:$8 sps:$4 sm:$0xff]   ;;  %v1341_v21 = vld [vmem:[%s2025_s1 + $0x124] ss:$8 sps:$4 sm:$0xff]   ;;  %v1344_v23 = vld [vmem:[%s2025_s1 + $0x120] ss:$8 sps:$4 sm:$0xff]  }
   0x9   :  { %979 = vmatprep.subr.bf16.mxu1 %v1323_v9  ;;  %v1345_v24 = vld [vmem:[%s2025_s1 + $0x14] ss:$8 sps:$4 sm:$0xff]   ;;  %v1349_v26 = vld [vmem:[%s2025_s1 + $0x10] ss:$8 sps:$4 sm:$0xff]   ;;  %v1351_v28 = vld [vmem:[%s2025_s1 + $0x4] ss:$8 sps:$4 sm:$0xff]  }
   0xa   :  { %v1347_v25 = vld [vmem:[%s2025_s1 + $0x114] ss:$8 sps:$4 sm:$0xff]   ;;  %v1350_v27 = vld [vmem:[%s2025_s1 + $0x110] ss:$8 sps:$4 sm:$0xff]   ;;  %v1353_v29 = vld [vmem:[%s2025_s1 + $0x104] ss:$8 sps:$4 sm:$0xff]  }
   0xb   :  { %937 = vmatpush1.bf16.msra.mxu0 %v1325_v10  ;;  %v1355_v30 = vld [vmem:[%s2025_s1] ss:$8 sps:$4 sm:$0xff]   ;;  %v1357_v32 = vld [vmem:[%s2025_s1 + $0xf4] ss:$8 sps:$4 sm:$0xff]   ;;  %v1361_v34 = vld [vmem:[%s2025_s1 + $0xf0] ss:$8 sps:$4 sm:$0xff]  }
   0xc   :  { %980 = vmatpush1.bf16.msra.mxu1 %v1326_v11  ;;  %938 = vmatprep.subr.bf16.mxu0 %v1327_v12  ;;  %v1356_v31 = vld [vmem:[%s2025_s1 + $0x100] ss:$8 sps:$4 sm:$0xff]   ;;  %v1359_v33 = vld [vmem:[%s2025_s1 + $0x1f4] ss:$8 sps:$4 sm:$0xff]   ;;  %v1362_v35 = vld [vmem:[%s2025_s1 + $0x1f0] ss:$8 sps:$4 sm:$0xff]  }
   0xd   :  { %981 = vmatprep.subr.bf16.mxu1 %v1329_v13  ;;  %v1363_v36 = vld [vmem:[%s2025_s1 + $0xe4] ss:$8 sps:$4 sm:$0xff]   ;;  %v1367_v38 = vld [vmem:[%s2025_s1 + $0xe0] ss:$8 sps:$4 sm:$0xff]   ;;  %v1369_v40 = vld [vmem:[%s2025_s1 + $0xd4] ss:$8 sps:$4 sm:$0xff]  }
   0xe   :  { %v1365_v37 = vld [vmem:[%s2025_s1 + $0x1e4] ss:$8 sps:$4 sm:$0xff]   ;;  %v1368_v39 = vld [vmem:[%s2025_s1 + $0x1e0] ss:$8 sps:$4 sm:$0xff]   ;;  %v1371_v41 = vld [vmem:[%s2025_s1 + $0x1d4] ss:$8 sps:$4 sm:$0xff]  }
   0xf   :  { %939 = vmatpush1.bf16.msra.mxu0 %v1331_v14  ;;  %v1373_v42 = vld [vmem:[%s2025_s1 + $0xd0] ss:$8 sps:$4 sm:$0xff]   ;;  %v1375_v44 = vld [vmem:[%s2025_s1 + $0xc4] ss:$8 sps:$4 sm:$0xff]   ;;  %v1379_v46 = vld [vmem:[%s2025_s1 + $0xc0] ss:$8 sps:$4 sm:$0xff]  }
  0x10   :  { %982 = vmatpush1.bf16.msra.mxu1 %v1332_v15  ;;  %940 = vmatprep.subr.bf16.mxu0 %v1333_v16  ;;  %v1374_v43 = vld [vmem:[%s2025_s1 + $0x1d0] ss:$8 sps:$4 sm:$0xff]   ;;  %v1377_v45 = vld [vmem:[%s2025_s1 + $0x1c4] ss:$8 sps:$4 sm:$0xff]   ;;  %v1380_v47 = vld [vmem:[%s2025_s1 + $0x1c0] ss:$8 sps:$4 sm:$0xff]  }
  0x11   :  { %983 = vmatprep.subr.bf16.mxu1 %v1335_v17  ;;  %v1381_v48 = vld [vmem:[%s2025_s1 + $0xb4] ss:$8 sps:$4 sm:$0xff]   ;;  %v1407_v49 = vld [vmem:[%s2026_s0 + $0x4] ss:$36 sps:$4 sm:$0xff]   ;;  %v1410_v51 = vld [vmem:[%s2026_s0 + $0xc] ss:$36 sps:$4 sm:$0xff]  }
  0x12   :  { %v1383_v50 = vld [vmem:[%s2025_s1 + $0x1b4] ss:$8 sps:$4 sm:$0xff]   ;;  %964 = vmatprep.mubr.bf16.mxu0 %v1407_v49  ;;  %v1385_v52 = vld [vmem:[%s2025_s1 + $0xb0] ss:$8 sps:$4 sm:$0xff]   ;;  %1007 = vmatprep.mubr.bf16.mxu1 %v1410_v51  ;;  %v1387_v54 = vld [vmem:[%s2025_s1 + $0xa4] ss:$8 sps:$4 sm:$0xff]  }
  0x13   :  { %941 = vmatpush1.bf16.msra.mxu0 %v1337_v18  ;;  %v1386_v53 = vld [vmem:[%s2025_s1 + $0x1b0] ss:$8 sps:$4 sm:$0xff]   ;;  %v1389_v55 = vld [vmem:[%s2025_s1 + $0x1a4] ss:$8 sps:$4 sm:$0xff]   ;;  %v1391_v56 = vld [vmem:[%s2025_s1 + $0xa0] ss:$8 sps:$4 sm:$0xff]  }
  0x14   :  { %984 = vmatpush1.bf16.msra.mxu1 %v1338_v19  ;;  %942 = vmatprep.subr.bf16.mxu0 %v1339_v20  ;;  %v1392_v57 = vld [vmem:[%s2025_s1 + $0x1a0] ss:$8 sps:$4 sm:$0xff]   ;;  %v1393_v58 = vld [vmem:[%s2025_s1 + $0x94] ss:$8 sps:$4 sm:$0xff]   ;;  %v1397_v60 = vld [vmem:[%s2025_s1 + $0x90] ss:$8 sps:$4 sm:$0xff]  }
  0x15   :  { %985 = vmatprep.subr.bf16.mxu1 %v1341_v21  ;;  %v1395_v59 = vld [vmem:[%s2025_s1 + $0x194] ss:$8 sps:$4 sm:$0xff]   ;;  %v1398_v61 = vld [vmem:[%s2025_s1 + $0x190] ss:$8 sps:$4 sm:$0xff]   ;;  %v1399_v62 = vld [vmem:[%s2025_s1 + $0x84] ss:$8 sps:$4 sm:$0xff]  }
  0x16   :  { %v1401_v63 = vld [vmem:[%s2025_s1 + $0x184] ss:$8 sps:$4 sm:$0xff]   ;;  %v1403_v0 = vld [vmem:[%s2025_s1 + $0x80] ss:$8 sps:$4 sm:$0xff]   ;;  %v1413_v2 = vld [vmem:[%s2025_s1 + $0x274] ss:$8 sps:$4 sm:$0xff]  }
  0x17   :  { %943 = vmatpush1.bf16.msra.mxu0 %v1343_v22  ;;  %v1404_v1 = vld [vmem:[%s2025_s1 + $0x180] ss:$8 sps:$4 sm:$0xff]   ;;  %v1416_v3 = vld [vmem:[%s2025_s1 + $0x374] ss:$8 sps:$4 sm:$0xff]   ;;  %v1411_v6 = vld [vmem:[%s2025_s1 + $0x270] ss:$8 sps:$4 sm:$0xff]  }
  0x18   :  { %986 = vmatpush1.bf16.msra.mxu1 %v1344_v23  ;;  %944 = vmatprep.subr.bf16.mxu0 %v1345_v24  ;;  %v1405_v4 = vld [vmem:[%s2026_s0] ss:$36 sps:$4 sm:$0xff]   ;;  %v1408_v5 = vld [vmem:[%s2026_s0 + $0x8] ss:$36 sps:$4 sm:$0xff]   ;;  %v1414_v7 = vld [vmem:[%s2025_s1 + $0x370] ss:$8 sps:$4 sm:$0xff]  }
  0x19   :  { %987 = vmatprep.subr.bf16.mxu1 %v1347_v25  ;;  %v1419_v8 = vld [vmem:[%s2025_s1 + $0x264] ss:$8 sps:$4 sm:$0xff]   ;;  %v1417_v10 = vld [vmem:[%s2025_s1 + $0x260] ss:$8 sps:$4 sm:$0xff]   ;;  %v1425_v12 = vld [vmem:[%s2025_s1 + $0x254] ss:$8 sps:$4 sm:$0xff]  }
  0x1a   :  { %v1422_v9 = vld [vmem:[%s2025_s1 + $0x364] ss:$8 sps:$4 sm:$0xff]   ;;  %v1420_v11 = vld [vmem:[%s2025_s1 + $0x360] ss:$8 sps:$4 sm:$0xff]   ;;  %v1428_v13 = vld [vmem:[%s2025_s1 + $0x354] ss:$8 sps:$4 sm:$0xff]  }
  0x1b   :  { %945 = vmatpush1.bf16.msra.mxu0 %v1349_v26  ;;  %v1423_v14 = vld [vmem:[%s2025_s1 + $0x250] ss:$8 sps:$4 sm:$0xff]   ;;  %v1431_v16 = vld [vmem:[%s2025_s1 + $0x244] ss:$8 sps:$4 sm:$0xff]   ;;  %v1429_v18 = vld [vmem:[%s2025_s1 + $0x240] ss:$8 sps:$4 sm:$0xff]  }
  0x1c   :  { %988 = vmatpush1.bf16.msra.mxu1 %v1350_v27  ;;  %946 = vmatprep.subr.bf16.mxu0 %v1351_v28  ;;  %v1426_v15 = vld [vmem:[%s2025_s1 + $0x350] ss:$8 sps:$4 sm:$0xff]   ;;  %v1434_v17 = vld [vmem:[%s2025_s1 + $0x344] ss:$8 sps:$4 sm:$0xff]   ;;  %v1432_v19 = vld [vmem:[%s2025_s1 + $0x340] ss:$8 sps:$4 sm:$0xff]  }
  0x1d   :  { %989 = vmatprep.subr.bf16.mxu1 %v1353_v29  ;;  %v1437_v20 = vld [vmem:[%s2025_s1 + $0x234] ss:$8 sps:$4 sm:$0xff]   ;;  %v1435_v22 = vld [vmem:[%s2025_s1 + $0x230] ss:$8 sps:$4 sm:$0xff]   ;;  %v1443_v24 = vld [vmem:[%s2025_s1 + $0x224] ss:$8 sps:$4 sm:$0xff]  }
  0x1e   :  { %v1440_v21 = vld [vmem:[%s2025_s1 + $0x334] ss:$8 sps:$4 sm:$0xff]   ;;  %v1438_v23 = vld [vmem:[%s2025_s1 + $0x330] ss:$8 sps:$4 sm:$0xff]   ;;  %v1446_v25 = vld [vmem:[%s2025_s1 + $0x324] ss:$8 sps:$4 sm:$0xff]  }
  0x1f   :  { %947 = vmatpush1.bf16.msra.mxu0 %v1355_v30  ;;  %v1441_v26 = vld [vmem:[%s2025_s1 + $0x220] ss:$8 sps:$4 sm:$0xff]   ;;  %v1449_v28 = vld [vmem:[%s2025_s1 + $0x214] ss:$8 sps:$4 sm:$0xff]   ;;  %v1447_v30 = vld [vmem:[%s2025_s1 + $0x210] ss:$8 sps:$4 sm:$0xff]  }
  0x20   :  { %990 = vmatpush1.bf16.msra.mxu1 %v1356_v31  ;;  %948 = vmatprep.subr.bf16.mxu0 %v1357_v32  ;;  %v1444_v27 = vld [vmem:[%s2025_s1 + $0x320] ss:$8 sps:$4 sm:$0xff]   ;;  %v1452_v29 = vld [vmem:[%s2025_s1 + $0x314] ss:$8 sps:$4 sm:$0xff]   ;;  %v1450_v31 = vld [vmem:[%s2025_s1 + $0x310] ss:$8 sps:$4 sm:$0xff]  }
  0x21   :  { %991 = vmatprep.subr.bf16.mxu1 %v1359_v33  ;;  %v1455_v32 = vld [vmem:[%s2025_s1 + $0x204] ss:$8 sps:$4 sm:$0xff]   ;;  %v1474_v49 = vld [vmem:[%s2025_s1 + $0x3d0] ss:$8 sps:$4 sm:$0xff]  }
  0x22   :  { %v1458_v33 = vld [vmem:[%s2025_s1 + $0x304] ss:$8 sps:$4 sm:$0xff]  }
  0x23   :  { %949 = vmatpush2.bf16.msra.mxu0 %v1361_v34  ;;  %v1509_v34 = vld [vmem:[%s2026_s0 + $0x14] ss:$36 sps:$4 sm:$0xff]   ;;  %v1482_v51 = vld [vmem:[%s2025_s1 + $0x3c4] ss:$8 sps:$4 sm:$0xff]  }
  0x24   :  { %992 = vmatpush2.bf16.msra.mxu1 %v1362_v35  ;;  %950 = vmatprep.subr.bf16.mxu0 %v1363_v36  ;;  %v1453_v35 = vld [vmem:[%s2025_s1 + $0x200] ss:$8 sps:$4 sm:$0xff]  }
  0x25   :  { %993 = vmatprep.subr.bf16.mxu1 %v1365_v37  ;;  %v1456_v36 = vld [vmem:[%s2025_s1 + $0x300] ss:$8 sps:$4 sm:$0xff]  }
  0x26   :  { %v1515_v37 = vld [vmem:[%s2026_s0 + $0x1c] ss:$36 sps:$4 sm:$0xff]  }
  0x27   :  { %951 = vmatpush2.bf16.msra.mxu0 %v1367_v38  ;;  %v1461_v38 = vld [vmem:[%s2025_s1 + $0x2f4] ss:$8 sps:$4 sm:$0xff]  }
  0x28   :  { %994 = vmatpush2.bf16.msra.mxu1 %v1368_v39  ;;  %952 = vmatprep.subr.bf16.mxu0 %v1369_v40  ;;  %v1464_v39 = vld [vmem:[%s2025_s1 + $0x3f4] ss:$8 sps:$4 sm:$0xff]   ;;  %v1459_v40 = vld [vmem:[%s2025_s1 + $0x2f0] ss:$8 sps:$4 sm:$0xff]  }
  0x29   :  { %995 = vmatprep.subr.bf16.mxu1 %v1371_v41  ;;  %v1462_v41 = vld [vmem:[%s2025_s1 + $0x3f0] ss:$8 sps:$4 sm:$0xff]  }
  0x2b   :  { %953 = vmatpush2.bf16.msra.mxu0 %v1373_v42  ;;  %v1467_v42 = vld [vmem:[%s2025_s1 + $0x2e4] ss:$8 sps:$4 sm:$0xff]  }
  0x2c   :  { %996 = vmatpush2.bf16.msra.mxu1 %v1374_v43  ;;  %954 = vmatprep.subr.bf16.mxu0 %v1375_v44  ;;  %v1470_v43 = vld [vmem:[%s2025_s1 + $0x3e4] ss:$8 sps:$4 sm:$0xff]   ;;  %v1465_v44 = vld [vmem:[%s2025_s1 + $0x2e0] ss:$8 sps:$4 sm:$0xff]  }
  0x2d   :  { %997 = vmatprep.subr.bf16.mxu1 %v1377_v45  ;;  %v1468_v45 = vld [vmem:[%s2025_s1 + $0x3e0] ss:$8 sps:$4 sm:$0xff]  }
  0x2f   :  { %955 = vmatpush2.bf16.msra.mxu0 %v1379_v46  ;;  %v1473_v46 = vld [vmem:[%s2025_s1 + $0x2d4] ss:$8 sps:$4 sm:$0xff]  }
  0x30   :  { %998 = vmatpush2.bf16.msra.mxu1 %v1380_v47  ;;  %956 = vmatprep.subr.bf16.mxu0 %v1381_v48  ;;  %v1476_v47 = vld [vmem:[%s2025_s1 + $0x3d4] ss:$8 sps:$4 sm:$0xff]   ;;  %v1471_v48 = vld [vmem:[%s2025_s1 + $0x2d0] ss:$8 sps:$4 sm:$0xff]  }
  0x31   :  { %999 = vmatprep.subr.bf16.mxu1 %v1383_v50  ;;  %v1479_v50 = vld [vmem:[%s2025_s1 + $0x2c4] ss:$8 sps:$4 sm:$0xff]  }
  0x33   :  { %957 = vmatpush2.bf16.msra.mxu0 %v1385_v52  ;;  %v1477_v52 = vld [vmem:[%s2025_s1 + $0x2c0] ss:$8 sps:$4 sm:$0xff]  }
  0x34   :  { %1000 = vmatpush2.bf16.msra.mxu1 %v1386_v53  ;;  %958 = vmatprep.subr.bf16.mxu0 %v1387_v54  ;;  %v1480_v53 = vld [vmem:[%s2025_s1 + $0x3c0] ss:$8 sps:$4 sm:$0xff]   ;;  %v1485_v54 = vld [vmem:[%s2025_s1 + $0x2b4] ss:$8 sps:$4 sm:$0xff]  }
  0x35   :  { %1001 = vmatprep.subr.bf16.mxu1 %v1389_v55  ;;  %v1488_v55 = vld [vmem:[%s2025_s1 + $0x3b4] ss:$8 sps:$4 sm:$0xff]  }
  0x37   :  { %959 = vmatpush2.bf16.msra.mxu0 %v1391_v56  ;;  %v1483_v56 = vld [vmem:[%s2025_s1 + $0x2b0] ss:$8 sps:$4 sm:$0xff]  }
  0x38   :  { %1002 = vmatpush2.bf16.msra.mxu1 %v1392_v57  ;;  %960 = vmatprep.subr.bf16.mxu0 %v1393_v58  ;;  %v1486_v57 = vld [vmem:[%s2025_s1 + $0x3b0] ss:$8 sps:$4 sm:$0xff]   ;;  %v1491_v58 = vld [vmem:[%s2025_s1 + $0x2a4] ss:$8 sps:$4 sm:$0xff]  }
  0x39   :  { %1003 = vmatprep.subr.bf16.mxu1 %v1395_v59  ;;  %v1494_v59 = vld [vmem:[%s2025_s1 + $0x3a4] ss:$8 sps:$4 sm:$0xff]  }
  0x3b   :  { %961 = vmatpush2.bf16.msra.mxu0 %v1397_v60  ;;  %v1489_v60 = vld [vmem:[%s2025_s1 + $0x2a0] ss:$8 sps:$4 sm:$0xff]  }
  0x3c   :  { %1004 = vmatpush2.bf16.msra.mxu1 %v1398_v61  ;;  %962 = vmatprep.subr.bf16.mxu0 %v1399_v62  ;;  %v1492_v61 = vld [vmem:[%s2025_s1 + $0x3a0] ss:$8 sps:$4 sm:$0xff]   ;;  %v1497_v62 = vld [vmem:[%s2025_s1 + $0x294] ss:$8 sps:$4 sm:$0xff]  }
  0x3d   :  { %1005 = vmatprep.subr.bf16.mxu1 %v1401_v63  ;;  %v1500_v63 = vld [vmem:[%s2025_s1 + $0x394] ss:$8 sps:$4 sm:$0xff]  }
  0x3f   :  { %963 = vmatpush2.bf16.msra.mxu0 %v1403_v0  ;;  %v1495_v0 = vld [vmem:[%s2025_s1 + $0x290] ss:$8 sps:$4 sm:$0xff]  }
  0x40   :  { %1006 = vmatpush2.bf16.msra.mxu1 %v1404_v1  ;;  %1018 = vmatprep.subr.bf16.mxu0 %v1413_v2  ;;  %v1498_v1 = vld [vmem:[%s2025_s1 + $0x390] ss:$8 sps:$4 sm:$0xff]   ;;  %v1503_v2 = vld [vmem:[%s2025_s1 + $0x284] ss:$8 sps:$4 sm:$0xff]  }
  0x41   :  { %1061 = vmatprep.subr.bf16.mxu1 %v1416_v3  ;;  %v1506_v3 = vld [vmem:[%s2025_s1 + $0x384] ss:$8 sps:$4 sm:$0xff]  }
  0x42   :  { %965 = vmatmul.mubr.bf16.vlgmr.msra.gmra.mxu0 %v1405_v4  ;;  %v1501_v4 = vld [vmem:[%s2025_s1 + $0x280] ss:$8 sps:$4 sm:$0xff]  }
  0x43   :  { %1008 = vmatmul.mubr.bf16.vlgmr.msra.gmra.mxu1 %v1408_v5  ;;  %1019 = vmatpush1.bf16.msra.mxu0 %v1411_v6  ;;  %v1504_v5 = vld [vmem:[%s2025_s1 + $0x380] ss:$8 sps:$4 sm:$0xff]   ;;  %v1512_v6 = vld [vmem:[%s2025_s1 + $0x474] ss:$8 sps:$4 sm:$0xff]  }
  0x44   :  { %1062 = vmatpush1.bf16.msra.mxu1 %v1414_v7  ;;  %1020 = vmatprep.subr.bf16.mxu0 %v1419_v8  ;;  %v1507_v7 = vld [vmem:[%s2026_s0 + $0x10] ss:$36 sps:$4 sm:$0xff]   ;;  %v1513_v8 = vld [vmem:[%s2026_s0 + $0x18] ss:$36 sps:$4 sm:$0xff]  }
  0x45   :  { %1063 = vmatprep.subr.bf16.mxu1 %v1422_v9  ;;  %1050 = vmatprep.mubr.bf16.mxu0 %v1509_v34  ;;  %v1510_v9 = vld [vmem:[%s2025_s1 + $0x470] ss:$8 sps:$4 sm:$0xff]  }
  0x46   :  { %1093 = vmatprep.mubr.bf16.mxu1 %v1515_v37 }
  0x47   :  { %1021 = vmatpush1.bf16.msra.mxu0 %v1417_v10  ;;  %v1518_v10 = vld [vmem:[%s2025_s1 + $0x464] ss:$8 sps:$4 sm:$0xff]  }
  0x48   :  { %1064 = vmatpush1.bf16.msra.mxu1 %v1420_v11  ;;  %1022 = vmatprep.subr.bf16.mxu0 %v1425_v12  ;;  %v1516_v11 = vld [vmem:[%s2025_s1 + $0x460] ss:$8 sps:$4 sm:$0xff]   ;;  %v1538_v12 = vmov 0  }
  0x49   :  { %1065 = vmatprep.subr.bf16.mxu1 %v1428_v13  ;;  %v1521_v13 = vld [vmem:[%s2025_s1 + $0x454] ss:$8 sps:$4 sm:$0xff]  }
  0x4b   :  { %1023 = vmatpush1.bf16.msra.mxu0 %v1423_v14  ;;  %v1519_v14 = vld [vmem:[%s2025_s1 + $0x450] ss:$8 sps:$4 sm:$0xff]  }
  0x4c   :  { %1066 = vmatpush1.bf16.msra.mxu1 %v1426_v15  ;;  %1024 = vmatprep.subr.bf16.mxu0 %v1431_v16  ;;  %v1524_v15 = vld [vmem:[%s2025_s1 + $0x444] ss:$8 sps:$4 sm:$0xff]   ;;  %v1522_v16 = vld [vmem:[%s2025_s1 + $0x440] ss:$8 sps:$4 sm:$0xff]  }
  0x4d   :  { %1067 = vmatprep.subr.bf16.mxu1 %v1434_v17  ;;  %v1527_v17 = vld [vmem:[%s2025_s1 + $0x434] ss:$8 sps:$4 sm:$0xff]  }
  0x4f   :  { %1025 = vmatpush1.bf16.msra.mxu0 %v1429_v18  ;;  %v1525_v18 = vld [vmem:[%s2025_s1 + $0x430] ss:$8 sps:$4 sm:$0xff]  }
  0x50   :  { %1068 = vmatpush1.bf16.msra.mxu1 %v1432_v19  ;;  %1026 = vmatprep.subr.bf16.mxu0 %v1437_v20  ;;  %v1530_v19 = vld [vmem:[%s2025_s1 + $0x424] ss:$8 sps:$4 sm:$0xff]   ;;  %v1528_v20 = vld [vmem:[%s2025_s1 + $0x420] ss:$8 sps:$4 sm:$0xff]  }
  0x51   :  { %1069 = vmatprep.subr.bf16.mxu1 %v1440_v21  ;;  %v1533_v21 = vld [vmem:[%s2025_s1 + $0x414] ss:$8 sps:$4 sm:$0xff]  }
  0x53   :  { %1027 = vmatpush1.bf16.msra.mxu0 %v1435_v22  ;;  %v1531_v22 = vld [vmem:[%s2025_s1 + $0x410] ss:$8 sps:$4 sm:$0xff]  }
  0x54   :  { %1070 = vmatpush1.bf16.msra.mxu1 %v1438_v23  ;;  %1028 = vmatprep.subr.bf16.mxu0 %v1443_v24  ;;  %v1536_v23 = vld [vmem:[%s2025_s1 + $0x404] ss:$8 sps:$4 sm:$0xff]   ;;  %v1534_v24 = vld [vmem:[%s2025_s1 + $0x400] ss:$8 sps:$4 sm:$0xff]  }
  0x55   :  { %1071 = vmatprep.subr.bf16.mxu1 %v1446_v25  ;;  %v1537_v25 = vld [vmem:[%s2026_s0 + $0x20] ss:$36 sps:$4 sm:$0xff]  }
  0x57   :  { %1029 = vmatpush1.bf16.msra.mxu0 %v1441_v26 }
  0x58   :  { %1072 = vmatpush1.bf16.msra.mxu1 %v1444_v27  ;;  %1030 = vmatprep.subr.bf16.mxu0 %v1449_v28 }
  0x59   :  { %1073 = vmatprep.subr.bf16.mxu1 %v1452_v29 }
  0x5b   :  { %1031 = vmatpush1.bf16.msra.mxu0 %v1447_v30 }
  0x5c   :  { %1074 = vmatpush1.bf16.msra.mxu1 %v1450_v31  ;;  %1032 = vmatprep.subr.bf16.mxu0 %v1455_v32 }
  0x5d   :  { %1075 = vmatprep.subr.bf16.mxu1 %v1458_v33 }
  0x5f   :  { %1033 = vmatpush1.bf16.msra.mxu0 %v1453_v35 }
  0x60   :  { %1076 = vmatpush1.bf16.msra.mxu1 %v1456_v36  ;;  %1034 = vmatprep.subr.bf16.mxu0 %v1461_v38 }
  0x61   :  { %1077 = vmatprep.subr.bf16.mxu1 %v1464_v39 }
  0x63   :  { %1035 = vmatpush2.bf16.msra.mxu0 %v1459_v40 }
  0x64   :  { %1078 = vmatpush2.bf16.msra.mxu1 %v1462_v41  ;;  %1036 = vmatprep.subr.bf16.mxu0 %v1467_v42 }
  0x65   :  { %1079 = vmatprep.subr.bf16.mxu1 %v1470_v43 }
  0x67   :  { %1037 = vmatpush2.bf16.msra.mxu0 %v1465_v44 }
  0x68   :  { %1080 = vmatpush2.bf16.msra.mxu1 %v1468_v45  ;;  %1038 = vmatprep.subr.bf16.mxu0 %v1473_v46 }
  0x69   :  { %1081 = vmatprep.subr.bf16.mxu1 %v1476_v47 }
  0x6b   :  { %1039 = vmatpush2.bf16.msra.mxu0 %v1471_v48 }
  0x6c   :  { %1082 = vmatpush2.bf16.msra.mxu1 %v1474_v49  ;;  %1040 = vmatprep.subr.bf16.mxu0 %v1479_v50 }
  0x6d   :  { %1083 = vmatprep.subr.bf16.mxu1 %v1482_v51 }
  0x6f   :  { %1041 = vmatpush2.bf16.msra.mxu0 %v1477_v52 }
  0x70   :  { %1084 = vmatpush2.bf16.msra.mxu1 %v1480_v53  ;;  %1042 = vmatprep.subr.bf16.mxu0 %v1485_v54 }
  0x71   :  { %1085 = vmatprep.subr.bf16.mxu1 %v1488_v55 }
  0x73   :  { %1043 = vmatpush2.bf16.msra.mxu0 %v1483_v56 }
  0x74   :  { %1086 = vmatpush2.bf16.msra.mxu1 %v1486_v57  ;;  %1044 = vmatprep.subr.bf16.mxu0 %v1491_v58 }
  0x75   :  { %1087 = vmatprep.subr.bf16.mxu1 %v1494_v59 }
  0x77   :  { %1045 = vmatpush2.bf16.msra.mxu0 %v1489_v60 }
  0x78   :  { %1088 = vmatpush2.bf16.msra.mxu1 %v1492_v61  ;;  %1046 = vmatprep.subr.bf16.mxu0 %v1497_v62 }
  0x79   :  { %1089 = vmatprep.subr.bf16.mxu1 %v1500_v63 }
  0x7b   :  { %1047 = vmatpush2.bf16.msra.mxu0 %v1495_v0 }
  0x7c   :  { %1090 = vmatpush2.bf16.msra.mxu1 %v1498_v1  ;;  %1048 = vmatprep.subr.bf16.mxu0 %v1503_v2 }
  0x7d   :  { %1091 = vmatprep.subr.bf16.mxu1 %v1506_v3 }
  0x7f   :  { %1049 = vmatpush2.bf16.msra.mxu0 %v1501_v4 }
  0x80   :  { %1092 = vmatpush2.bf16.msra.mxu1 %v1504_v5  ;;  %1104 = vmatprep.subr.bf16.mxu0 %v1512_v6 }
  0x82   :  { %1051 = vmatmul.mubr.bf16.vlgmr.msra.gmra.mxu0 %v1507_v7 }
  0x83   :  { %1094 = vmatmul.mubr.bf16.vlgmr.msra.gmra.mxu1 %v1513_v8  ;;  %1105 = vmatpush1.bf16.msra.mxu0 %v1510_v9 }
  0x84   :  { %1136 = vmatprep.mubr.bf16.mxu0 %v1538_v12  ;;  %1106 = vmatprep.subr.bf16.mxu0 %v1518_v10 }
  0x87   :  { %1107 = vmatpush1.bf16.msra.mxu0 %v1516_v11 }
  0x88   :  { %1108 = vmatprep.subr.bf16.mxu0 %v1521_v13 }
  0x8b   :  { %1109 = vmatpush1.bf16.msra.mxu0 %v1519_v14 }
  0x8c   :  { %1110 = vmatprep.subr.bf16.mxu0 %v1524_v15 }
  0x8f   :  { %1111 = vmatpush1.bf16.msra.mxu0 %v1522_v16 }
  0x90   :  { %1112 = vmatprep.subr.bf16.mxu0 %v1527_v17 }
  0x93   :  { %1113 = vmatpush1.bf16.msra.mxu0 %v1525_v18 }
  0x94   :  { %1114 = vmatprep.subr.bf16.mxu0 %v1530_v19 }
  0x97   :  { %1115 = vmatpush1.bf16.msra.mxu0 %v1528_v20 }
  0x98   :  { %1116 = vmatprep.subr.bf16.mxu0 %v1533_v21 }
  0x9b   :  { %1117 = vmatpush1.bf16.msra.mxu0 %v1531_v22 }
  0x9c   :  { %1118 = vmatprep.subr.bf16.mxu0 %v1536_v23 }
  0x9f   :  { %1119 = vmatpush1.bf16.msra.mxu0 %v1534_v24 }
  0xa2   :  { %1137 = vmatmul.mubr.bf16.vlgmr.msra.gmra.mxu0 %v1537_v25 }
 0x102   :  { %v966_v26 = vpop.f32.mrf.mxu0 }
 0x103   :  { %v1009_v27 = vpop.f32.mrf.mxu1 }
 0x104   :  { %v968_v28 = vpop.f32.mrf.mxu0  ;;  %v1010_v37 = vadd.f32 %v1009_v27, %v966_v26 }
 0x105   :  { %v1011_v29 = vpop.f32.mrf.mxu1 }
 0x106   :  { %v970_v30 = vpop.f32.mrf.mxu0  ;;  %v1012_v40 = vadd.f32 %v1011_v29, %v968_v28 }
 0x107   :  { %v1013_v31 = vpop.f32.mrf.mxu1 }
 0x108   :  { %v972_v32 = vpop.f32.mrf.mxu0  ;;  %v1014_v42 = vadd.f32 %v1013_v31, %v970_v30 }
 0x109   :  { %v1015_v34 = vpop.f32.mrf.mxu1 }
 0x10a   :  { %v1016_v46 = vadd.f32 %v1015_v34, %v972_v32 }
 0x142   :  { %v1052_v33 = vpop.f32.mrf.mxu0 }
 0x143   :  { %v1095_v36 = vpop.f32.mrf.mxu1  ;;  %v1053_v41 = vadd.f32 %v1052_v33, %v1010_v37 }
 0x144   :  { %v1054_v35 = vpop.f32.mrf.mxu0 }
 0x145   :  { %v1097_v39 = vpop.f32.mrf.mxu1  ;;  %v1055_v43 = vadd.f32 %v1054_v35, %v1012_v40  ;;  %v1096_v47 = vadd.f32 %v1095_v36, %v1053_v41 }
 0x146   :  { %v1056_v38 = vpop.f32.mrf.mxu0 }
 0x147   :  { %v1099_v45 = vpop.f32.mrf.mxu1  ;;  %v1057_v48 = vadd.f32 %v1056_v38, %v1014_v42  ;;  %v1098_v50 = vadd.f32 %v1097_v39, %v1055_v43 }
 0x148   :  { %v1058_v44 = vpop.f32.mrf.mxu0 }
 0x149   :  { %v1059_v51 = vadd.f32 %v1058_v44, %v1016_v46  ;;  %v1101_v53 = vpop.f32.mrf.mxu1  ;;  %v1100_v55 = vadd.f32 %v1099_v45, %v1057_v48 }
 0x14b   :  { %v1102_v58 = vadd.f32 %v1101_v53, %v1059_v51 }
 0x162   :  { %v1138_v49 = vpop.f32.mrf.mxu0 }
 0x163   :  { %v1139_v52 = vadd.f32 %v1138_v49, %v1096_v47 }
 0x164   :  { %v1140_v54 = vpop.f32.mrf.mxu0 }
 0x165   :  { %1147 = vst [vmem:[%s2027_s2] sm:$0xff] %v1139_v52  ;;  %v1141_v56 = vadd.f32 %v1140_v54, %v1098_v50 }
 0x166   :  { %v1142_v57 = vpop.f32.mrf.mxu0 }
 0x167   :  { %1148 = vst [vmem:[%s2027_s2 + $0x8] sm:$0xff] %v1141_v56  ;;  %v1143_v59 = vadd.f32 %v1142_v57, %v1100_v55 }
 0x168   :  { %v1144_v60 = vpop.f32.mrf.mxu0 }
 0x169   :  { %1149 = vst [vmem:[%s2027_s2 + $0x10] sm:$0xff] %v1143_v59  ;;  %v1145_v61 = vadd.f32 %v1144_v60, %v1102_v58 }
 0x16b   :  { %1150 = vst [vmem:[%s2027_s2 + $0x18] sm:$0xff] %v1145_v61 }

// kernel: encoder_forward.32
= control target key start
LH: loop header
LB: loop body
LE: loop exit
PB: predicated region body
PF: predicated region fallthrough
CT: control target
= control target key end

     0   :  { %v210_v1 = vmov 0   ;;  %s289_s1 = inlined_call_operand.vmem [shape: bf16[128,256], index: 1, kind: input, shape index: {}]   ;;  %s290_s0 = inlined_call_operand.vmem [shape: bf16[16,128], index: 0, kind: input, shape index: {}]   ;;  %s291_s2 = inlined_call_operand.vmem [shape: f32[16,256], index: 2, kind: output, shape index: {}]  }
   0x1   :  { %v185_v0 = vld [vmem:[%s289_s1 + $0x74] ss:$8 sps:$4 sm:$0xff]   ;;  %148 = vmatprep.mubr.bf16.mxu0 %v210_v1  ;;  %v187_v2 = vld [vmem:[%s289_s1 + $0x70] ss:$8 sps:$4 sm:$0xff]   ;;  %v188_v3 = vld [vmem:[%s289_s1 + $0x64] ss:$8 sps:$4 sm:$0xff]  }
   0x2   :  { %116 = vmatprep.subr.bf16.mxu0 %v185_v0  ;;  %v190_v4 = vld [vmem:[%s289_s1 + $0x60] ss:$8 sps:$4 sm:$0xff]   ;;  %v191_v5 = vld [vmem:[%s289_s1 + $0x54] ss:$8 sps:$4 sm:$0xff]   ;;  %v193_v6 = vld [vmem:[%s289_s1 + $0x50] ss:$8 sps:$4 sm:$0xff]  }
   0x3   :  { %117 = vmatpush1.bf16.msra.mxu0 %v187_v2  ;;  %v194_v7 = vld [vmem:[%s289_s1 + $0x44] ss:$8 sps:$4 sm:$0xff]   ;;  %v196_v8 = vld [vmem:[%s289_s1 + $0x40] ss:$8 sps:$4 sm:$0xff]   ;;  %v197_v9 = vld [vmem:[%s289_s1 + $0x34] ss:$8 sps:$4 sm:$0xff]  }
   0x4   :  { %118 = vmatprep.subr.bf16.mxu0 %v188_v3  ;;  %v199_v10 = vld [vmem:[%s289_s1 + $0x30] ss:$8 sps:$4 sm:$0xff]   ;;  %v200_v11 = vld [vmem:[%s289_s1 + $0x24] ss:$8 sps:$4 sm:$0xff]   ;;  %v202_v12 = vld [vmem:[%s289_s1 + $0x20] ss:$8 sps:$4 sm:$0xff]  }
   0x5   :  { %v203_v13 = vld [vmem:[%s289_s1 + $0x14] ss:$8 sps:$4 sm:$0xff]   ;;  %v205_v14 = vld [vmem:[%s289_s1 + $0x10] ss:$8 sps:$4 sm:$0xff]   ;;  %v206_v15 = vld [vmem:[%s289_s1 + $0x4] ss:$8 sps:$4 sm:$0xff]  }
   0x6   :  { %v208_v16 = vld [vmem:[%s289_s1] ss:$8 sps:$4 sm:$0xff]  }
   0x7   :  { %119 = vmatpush1.bf16.msra.mxu0 %v190_v4  ;;  %v209_v17 = vld [vmem:[%s290_s0] sm:$0xff]  }
   0x8   :  { %120 = vmatprep.subr.bf16.mxu0 %v191_v5 }
   0xb   :  { %121 = vmatpush1.bf16.msra.mxu0 %v193_v6 }
   0xc   :  { %122 = vmatprep.subr.bf16.mxu0 %v194_v7 }
   0xf   :  { %123 = vmatpush1.bf16.msra.mxu0 %v196_v8 }
  0x10   :  { %124 = vmatprep.subr.bf16.mxu0 %v197_v9 }
  0x13   :  { %125 = vmatpush1.bf16.msra.mxu0 %v199_v10 }
  0x14   :  { %126 = vmatprep.subr.bf16.mxu0 %v200_v11 }
  0x17   :  { %127 = vmatpush1.bf16.msra.mxu0 %v202_v12 }
  0x18   :  { %128 = vmatprep.subr.bf16.mxu0 %v203_v13 }
  0x1b   :  { %129 = vmatpush1.bf16.msra.mxu0 %v205_v14 }
  0x1c   :  { %130 = vmatprep.subr.bf16.mxu0 %v206_v15 }
  0x1f   :  { %131 = vmatpush1.bf16.msra.mxu0 %v208_v16 }
  0x22   :  { %149 = vmatmul.mubr.bf16.vlgmr.msra.gmra.mxu0 %v209_v17 }
  0xe2   :  { %v150_v18 = vpop.f32.mrf.mxu0 }
  0xe3   :  { %159 = vst [vmem:[%s291_s2] sm:$0xff] %v150_v18 }
  0xe4   :  { %v152_v19 = vpop.f32.mrf.mxu0 }
  0xe5   :  { %160 = vst [vmem:[%s291_s2 + $0x8] sm:$0xff] %v152_v19 }
  0xe6   :  { %v154_v20 = vpop.f32.mrf.mxu0 }
  0xe7   :  { %161 = vst [vmem:[%s291_s2 + $0x10] sm:$0xff] %v154_v20 }
  0xe8   :  { %v156_v21 = vpop.f32.mrf.mxu0 }
  0xe9   :  { %162 = vst [vmem:[%s291_s2 + $0x18] sm:$0xff] %v156_v21 }

// kernel: encoder_forward.31
= control target key start
LH: loop header
LB: loop body
LE: loop exit
PB: predicated region body
PF: predicated region fallthrough
CT: control target
= control target key end

     0   :  { %s3952_s1 = inlined_call_operand.vmem [shape: bf16[2304,256], index: 1, kind: input, shape index: {}]   ;;  %s3953_s0 = inlined_call_operand.vmem [shape: bf16[16,2304], index: 0, kind: input, shape index: {}]   ;;  %s3954_s2 = inlined_call_operand.vmem [shape: f32[16,256], index: 2, kind: output, shape index: {}]  }
   0x1   :  { %v2548_v0 = vld [vmem:[%s3952_s1 + $0x74] ss:$8 sps:$4 sm:$0xff]   ;;  %v2552_v2 = vld [vmem:[%s3952_s1 + $0x70] ss:$8 sps:$4 sm:$0xff]   ;;  %v2554_v4 = vld [vmem:[%s3952_s1 + $0x64] ss:$8 sps:$4 sm:$0xff]  }
   0x2   :  { %v2550_v1 = vld [vmem:[%s3952_s1 + $0x174] ss:$8 sps:$4 sm:$0xff]   ;;  %1847 = vmatprep.subr.bf16.mxu0 %v2548_v0  ;;  %v2553_v3 = vld [vmem:[%s3952_s1 + $0x170] ss:$8 sps:$4 sm:$0xff]   ;;  %v2556_v5 = vld [vmem:[%s3952_s1 + $0x164] ss:$8 sps:$4 sm:$0xff]  }
   0x3   :  { %1890 = vmatprep.subr.bf16.mxu1 %v2550_v1  ;;  %1848 = vmatpush1.bf16.msra.mxu0 %v2552_v2  ;;  %v2558_v6 = vld [vmem:[%s3952_s1 + $0x60] ss:$8 sps:$4 sm:$0xff]   ;;  %v2560_v8 = vld [vmem:[%s3952_s1 + $0x54] ss:$8 sps:$4 sm:$0xff]   ;;  %v2564_v10 = vld [vmem:[%s3952_s1 + $0x50] ss:$8 sps:$4 sm:$0xff]  }
   0x4   :  { %1891 = vmatpush1.bf16.msra.mxu1 %v2553_v3  ;;  %1849 = vmatprep.subr.bf16.mxu0 %v2554_v4  ;;  %v2559_v7 = vld [vmem:[%s3952_s1 + $0x160] ss:$8 sps:$4 sm:$0xff]   ;;  %v2562_v9 = vld [vmem:[%s3952_s1 + $0x154] ss:$8 sps:$4 sm:$0xff]   ;;  %v2565_v11 = vld [vmem:[%s3952_s1 + $0x150] ss:$8 sps:$4 sm:$0xff]  }
   0x5   :  { %1892 = vmatprep.subr.bf16.mxu1 %v2556_v5  ;;  %v2566_v12 = vld [vmem:[%s3952_s1 + $0x44] ss:$8 sps:$4 sm:$0xff]   ;;  %v2570_v14 = vld [vmem:[%s3952_s1 + $0x40] ss:$8 sps:$4 sm:$0xff]   ;;  %v2572_v16 = vld [vmem:[%s3952_s1 + $0x34] ss:$8 sps:$4 sm:$0xff]  }
   0x6   :  { %v2568_v13 = vld [vmem:[%s3952_s1 + $0x144] ss:$8 sps:$4 sm:$0xff]   ;;  %v2571_v15 = vld [vmem:[%s3952_s1 + $0x140] ss:$8 sps:$4 sm:$0xff]   ;;  %v2574_v17 = vld [vmem:[%s3952_s1 + $0x134] ss:$8 sps:$4 sm:$0xff]  }
   0x7   :  { %1850 = vmatpush1.bf16.msra.mxu0 %v2558_v6  ;;  %v2576_v18 = vld [vmem:[%s3952_s1 + $0x30] ss:$8 sps:$4 sm:$0xff]   ;;  %v2578_v20 = vld [vmem:[%s3952_s1 + $0x24] ss:$8 sps:$4 sm:$0xff]   ;;  %v2582_v22 = vld [vmem:[%s3952_s1 + $0x20] ss:$8 sps:$4 sm:$0xff]  }
   0x8   :  { %1893 = vmatpush1.bf16.msra.mxu1 %v2559_v7  ;;  %1851 = vmatprep.subr.bf16.mxu0 %v2560_v8  ;;  %v2577_v19 = vld [vmem:[%s3952_s1 + $0x130] ss:$8 sps:$4 sm:$0xff]   ;;  %v2580_v21 = vld [vmem:[%s3952_s1 + $0x124] ss:$8 sps:$4 sm:$0xff]   ;;  %v2583_v23 = vld [vmem:[%s3952_s1 + $0x120] ss:$8 sps:$4 sm:$0xff]  }
   0x9   :  { %1894 = vmatprep.subr.bf16.mxu1 %v2562_v9  ;;  %v2584_v24 = vld [vmem:[%s3952_s1 + $0x14] ss:$8 sps:$4 sm:$0xff]   ;;  %v2588_v26 = vld [vmem:[%s3952_s1 + $0x10] ss:$8 sps:$4 sm:$0xff]   ;;  %v2590_v28 = vld [vmem:[%s3952_s1 + $0x4] ss:$8 sps:$4 sm:$0xff]  }
   0xa   :  { %v2586_v25 = vld [vmem:[%s3952_s1 + $0x114] ss:$8 sps:$4 sm:$0xff]   ;;  %v2589_v27 = vld [vmem:[%s3952_s1 + $0x110] ss:$8 sps:$4 sm:$0xff]   ;;  %v2592_v29 = vld [vmem:[%s3952_s1 + $0x104] ss:$8 sps:$4 sm:$0xff]  }
   0xb   :  { %1852 = vmatpush1.bf16.msra.mxu0 %v2564_v10  ;;  %v2594_v30 = vld [vmem:[%s3952_s1] ss:$8 sps:$4 sm:$0xff]   ;;  %v2596_v32 = vld [vmem:[%s3952_s1 + $0xf4] ss:$8 sps:$4 sm:$0xff]   ;;  %v2600_v34 = vld [vmem:[%s3952_s1 + $0xf0] ss:$8 sps:$4 sm:$0xff]  }
   0xc   :  { %1895 = vmatpush1.bf16.msra.mxu1 %v2565_v11  ;;  %1853 = vmatprep.subr.bf16.mxu0 %v2566_v12  ;;  %v2595_v31 = vld [vmem:[%s3952_s1 + $0x100] ss:$8 sps:$4 sm:$0xff]   ;;  %v2598_v33 = vld [vmem:[%s3952_s1 + $0x1f4] ss:$8 sps:$4 sm:$0xff]   ;;  %v2601_v35 = vld [vmem:[%s3952_s1 + $0x1f0] ss:$8 sps:$4 sm:$0xff]  }
   0xd   :  { %1896 = vmatprep.subr.bf16.mxu1 %v2568_v13  ;;  %v2602_v36 = vld [vmem:[%s3952_s1 + $0xe4] ss:$8 sps:$4 sm:$0xff]   ;;  %v2606_v38 = vld [vmem:[%s3952_s1 + $0xe0] ss:$8 sps:$4 sm:$0xff]   ;;  %v2608_v40 = vld [vmem:[%s3952_s1 + $0xd4] ss:$8 sps:$4 sm:$0xff]  }
   0xe   :  { %v2604_v37 = vld [vmem:[%s3952_s1 + $0x1e4] ss:$8 sps:$4 sm:$0xff]   ;;  %v2607_v39 = vld [vmem:[%s3952_s1 + $0x1e0] ss:$8 sps:$4 sm:$0xff]   ;;  %v2610_v41 = vld [vmem:[%s3952_s1 + $0x1d4] ss:$8 sps:$4 sm:$0xff]  }
   0xf   :  { %1854 = vmatpush1.bf16.msra.mxu0 %v2570_v14  ;;  %v2612_v42 = vld [vmem:[%s3952_s1 + $0xd0] ss:$8 sps:$4 sm:$0xff]   ;;  %v2614_v44 = vld [vmem:[%s3952_s1 + $0xc4] ss:$8 sps:$4 sm:$0xff]   ;;  %v2618_v46 = vld [vmem:[%s3952_s1 + $0xc0] ss:$8 sps:$4 sm:$0xff]  }
  0x10   :  { %1897 = vmatpush1.bf16.msra.mxu1 %v2571_v15  ;;  %1855 = vmatprep.subr.bf16.mxu0 %v2572_v16  ;;  %v2613_v43 = vld [vmem:[%s3952_s1 + $0x1d0] ss:$8 sps:$4 sm:$0xff]   ;;  %v2616_v45 = vld [vmem:[%s3952_s1 + $0x1c4] ss:$8 sps:$4 sm:$0xff]   ;;  %v2619_v47 = vld [vmem:[%s3952_s1 + $0x1c0] ss:$8 sps:$4 sm:$0xff]  }
  0x11   :  { %1898 = vmatprep.subr.bf16.mxu1 %v2574_v17  ;;  %v2620_v48 = vld [vmem:[%s3952_s1 + $0xb4] ss:$8 sps:$4 sm:$0xff]   ;;  %v2646_v49 = vld [vmem:[%s3953_s0 + $0x4] ss:$72 sps:$4 sm:$0xff]   ;;  %v2624_v52 = vld [vmem:[%s3952_s1 + $0xb0] ss:$8 sps:$4 sm:$0xff]  }
  0x12   :  { %v2622_v50 = vld [vmem:[%s3952_s1 + $0x1b4] ss:$8 sps:$4 sm:$0xff]   ;;  %1879 = vmatprep.mubr.bf16.mxu0 %v2646_v49  ;;  %v2625_v53 = vld [vmem:[%s3952_s1 + $0x1b0] ss:$8 sps:$4 sm:$0xff]   ;;  %v2626_v54 = vld [vmem:[%s3952_s1 + $0xa4] ss:$8 sps:$4 sm:$0xff]  }
  0x13   :  { %1856 = vmatpush1.bf16.msra.mxu0 %v2576_v18  ;;  %v2649_v51 = vld [vmem:[%s3953_s0 + $0xc] ss:$72 sps:$4 sm:$0xff]   ;;  %v2630_v56 = vld [vmem:[%s3952_s1 + $0xa0] ss:$8 sps:$4 sm:$0xff]   ;;  %v2636_v60 = vld [vmem:[%s3952_s1 + $0x90] ss:$8 sps:$4 sm:$0xff]  }
  0x14   :  { %1899 = vmatpush1.bf16.msra.mxu1 %v2577_v19  ;;  %1857 = vmatprep.subr.bf16.mxu0 %v2578_v20  ;;  %v2628_v55 = vld [vmem:[%s3952_s1 + $0x1a4] ss:$8 sps:$4 sm:$0xff]   ;;  %v2631_v57 = vld [vmem:[%s3952_s1 + $0x1a0] ss:$8 sps:$4 sm:$0xff]   ;;  %v2632_v58 = vld [vmem:[%s3952_s1 + $0x94] ss:$8 sps:$4 sm:$0xff]  }
  0x15   :  { %1900 = vmatprep.subr.bf16.mxu1 %v2580_v21  ;;  %1922 = vmatprep.mubr.bf16.mxu1 %v2649_v51  ;;  %v2634_v59 = vld [vmem:[%s3952_s1 + $0x194] ss:$8 sps:$4 sm:$0xff]   ;;  %v2637_v61 = vld [vmem:[%s3952_s1 + $0x190] ss:$8 sps:$4 sm:$0xff]   ;;  %v2638_v62 = vld [vmem:[%s3952_s1 + $0x84] ss:$8 sps:$4 sm:$0xff]  }
  0x16   :  { %v2640_v63 = vld [vmem:[%s3952_s1 + $0x184] ss:$8 sps:$4 sm:$0xff]   ;;  %v2642_v0 = vld [vmem:[%s3952_s1 + $0x80] ss:$8 sps:$4 sm:$0xff]   ;;  %v2652_v2 = vld [vmem:[%s3952_s1 + $0x274] ss:$8 sps:$4 sm:$0xff]  }
  0x17   :  { %1858 = vmatpush1.bf16.msra.mxu0 %v2582_v22  ;;  %v2643_v1 = vld [vmem:[%s3952_s1 + $0x180] ss:$8 sps:$4 sm:$0xff]   ;;  %v2655_v3 = vld [vmem:[%s3952_s1 + $0x374] ss:$8 sps:$4 sm:$0xff]   ;;  %v2650_v6 = vld [vmem:[%s3952_s1 + $0x270] ss:$8 sps:$4 sm:$0xff]  }
  0x18   :  { %1901 = vmatpush1.bf16.msra.mxu1 %v2583_v23  ;;  %1859 = vmatprep.subr.bf16.mxu0 %v2584_v24  ;;  %v2644_v4 = vld [vmem:[%s3953_s0] ss:$72 sps:$4 sm:$0xff]   ;;  %v2653_v7 = vld [vmem:[%s3952_s1 + $0x370] ss:$8 sps:$4 sm:$0xff]   ;;  %v2658_v8 = vld [vmem:[%s3952_s1 + $0x264] ss:$8 sps:$4 sm:$0xff]  }
  0x19   :  { %1902 = vmatprep.subr.bf16.mxu1 %v2586_v25  ;;  %v2647_v5 = vld [vmem:[%s3953_s0 + $0x8] ss:$72 sps:$4 sm:$0xff]   ;;  %v2661_v9 = vld [vmem:[%s3952_s1 + $0x364] ss:$8 sps:$4 sm:$0xff]   ;;  %v2664_v12 = vld [vmem:[%s3952_s1 + $0x254] ss:$8 sps:$4 sm:$0xff]  }
  0x1a   :  { %v2656_v10 = vld [vmem:[%s3952_s1 + $0x260] ss:$8 sps:$4 sm:$0xff]   ;;  %v2667_v13 = vld [vmem:[%s3952_s1 + $0x354] ss:$8 sps:$4 sm:$0xff]   ;;  %v2662_v14 = vld [vmem:[%s3952_s1 + $0x250] ss:$8 sps:$4 sm:$0xff]  }
  0x1b   :  { %1860 = vmatpush1.bf16.msra.mxu0 %v2588_v26  ;;  %v2659_v11 = vld [vmem:[%s3952_s1 + $0x360] ss:$8 sps:$4 sm:$0xff]   ;;  %v2665_v15 = vld [vmem:[%s3952_s1 + $0x350] ss:$8 sps:$4 sm:$0xff]   ;;  %v2670_v16 = vld [vmem:[%s3952_s1 + $0x244] ss:$8 sps:$4 sm:$0xff]  }
  0x1c   :  { %1903 = vmatpush1.bf16.msra.mxu1 %v2589_v27  ;;  %1861 = vmatprep.subr.bf16.mxu0 %v2590_v28  ;;  %v2673_v17 = vld [vmem:[%s3952_s1 + $0x344] ss:$8 sps:$4 sm:$0xff]   ;;  %v2668_v18 = vld [vmem:[%s3952_s1 + $0x240] ss:$8 sps:$4 sm:$0xff]   ;;  %v2676_v20 = vld [vmem:[%s3952_s1 + $0x234] ss:$8 sps:$4 sm:$0xff]  }
  0x1d   :  { %1904 = vmatprep.subr.bf16.mxu1 %v2592_v29  ;;  %v2671_v19 = vld [vmem:[%s3952_s1 + $0x340] ss:$8 sps:$4 sm:$0xff]   ;;  %v2679_v21 = vld [vmem:[%s3952_s1 + $0x334] ss:$8 sps:$4 sm:$0xff]   ;;  %v2674_v22 = vld [vmem:[%s3952_s1 + $0x230] ss:$8 sps:$4 sm:$0xff]  }
  0x1e   :  { %v2677_v23 = vld [vmem:[%s3952_s1 + $0x330] ss:$8 sps:$4 sm:$0xff]   ;;  %v2682_v24 = vld [vmem:[%s3952_s1 + $0x224] ss:$8 sps:$4 sm:$0xff]   ;;  %v2680_v26 = vld [vmem:[%s3952_s1 + $0x220] ss:$8 sps:$4 sm:$0xff]  }
  0x1f   :  { %1862 = vmatpush1.bf16.msra.mxu0 %v2594_v30  ;;  %v2685_v25 = vld [vmem:[%s3952_s1 + $0x324] ss:$8 sps:$4 sm:$0xff]   ;;  %v2683_v27 = vld [vmem:[%s3952_s1 + $0x320] ss:$8 sps:$4 sm:$0xff]   ;;  %v2688_v28 = vld [vmem:[%s3952_s1 + $0x214] ss:$8 sps:$4 sm:$0xff]  }
  0x20   :  { %1905 = vmatpush1.bf16.msra.mxu1 %v2595_v31  ;;  %1863 = vmatprep.subr.bf16.mxu0 %v2596_v32  ;;  %v2691_v29 = vld [vmem:[%s3952_s1 + $0x314] ss:$8 sps:$4 sm:$0xff]   ;;  %v2686_v30 = vld [vmem:[%s3952_s1 + $0x210] ss:$8 sps:$4 sm:$0xff]   ;;  %v2694_v32 = vld [vmem:[%s3952_s1 + $0x204] ss:$8 sps:$4 sm:$0xff]  }
  0x21   :  { %1906 = vmatprep.subr.bf16.mxu1 %v2598_v33  ;;  %v2689_v31 = vld [vmem:[%s3952_s1 + $0x310] ss:$8 sps:$4 sm:$0xff]   ;;  %v2697_v33 = vld [vmem:[%s3952_s1 + $0x304] ss:$8 sps:$4 sm:$0xff]  }
  0x22   :  { %v2713_v49 = vld [vmem:[%s3952_s1 + $0x3d0] ss:$8 sps:$4 sm:$0xff]   ;;  %v2721_v51 = vld [vmem:[%s3952_s1 + $0x3c4] ss:$8 sps:$4 sm:$0xff]  }
  0x23   :  { %1864 = vmatpush2.bf16.msra.mxu0 %v2600_v34  ;;  %v2748_v34 = vld [vmem:[%s3953_s0 + $0x14] ss:$72 sps:$4 sm:$0xff]  }
  0x24   :  { %1907 = vmatpush2.bf16.msra.mxu1 %v2601_v35  ;;  %1865 = vmatprep.subr.bf16.mxu0 %v2602_v36  ;;  %v2692_v35 = vld [vmem:[%s3952_s1 + $0x200] ss:$8 sps:$4 sm:$0xff]  }
  0x25   :  { %1908 = vmatprep.subr.bf16.mxu1 %v2604_v37  ;;  %v2695_v36 = vld [vmem:[%s3952_s1 + $0x300] ss:$8 sps:$4 sm:$0xff]   ;;  %v2754_v37 = vld [vmem:[%s3953_s0 + $0x1c] ss:$72 sps:$4 sm:$0xff]  }
  0x27   :  { %1866 = vmatpush2.bf16.msra.mxu0 %v2606_v38  ;;  %v2700_v38 = vld [vmem:[%s3952_s1 + $0x2f4] ss:$8 sps:$4 sm:$0xff]  }
  0x28   :  { %1909 = vmatpush2.bf16.msra.mxu1 %v2607_v39  ;;  %1867 = vmatprep.subr.bf16.mxu0 %v2608_v40  ;;  %v2703_v39 = vld [vmem:[%s3952_s1 + $0x3f4] ss:$8 sps:$4 sm:$0xff]   ;;  %v2698_v40 = vld [vmem:[%s3952_s1 + $0x2f0] ss:$8 sps:$4 sm:$0xff]  }
  0x29   :  { %1910 = vmatprep.subr.bf16.mxu1 %v2610_v41  ;;  %v2701_v41 = vld [vmem:[%s3952_s1 + $0x3f0] ss:$8 sps:$4 sm:$0xff]  }
  0x2b   :  { %1868 = vmatpush2.bf16.msra.mxu0 %v2612_v42  ;;  %v2706_v42 = vld [vmem:[%s3952_s1 + $0x2e4] ss:$8 sps:$4 sm:$0xff]  }
  0x2c   :  { %1911 = vmatpush2.bf16.msra.mxu1 %v2613_v43  ;;  %1869 = vmatprep.subr.bf16.mxu0 %v2614_v44  ;;  %v2709_v43 = vld [vmem:[%s3952_s1 + $0x3e4] ss:$8 sps:$4 sm:$0xff]   ;;  %v2704_v44 = vld [vmem:[%s3952_s1 + $0x2e0] ss:$8 sps:$4 sm:$0xff]  }
  0x2d   :  { %1912 = vmatprep.subr.bf16.mxu1 %v2616_v45  ;;  %v2707_v45 = vld [vmem:[%s3952_s1 + $0x3e0] ss:$8 sps:$4 sm:$0xff]  }
  0x2f   :  { %1870 = vmatpush2.bf16.msra.mxu0 %v2618_v46  ;;  %v2712_v46 = vld [vmem:[%s3952_s1 + $0x2d4] ss:$8 sps:$4 sm:$0xff]  }
  0x30   :  { %1913 = vmatpush2.bf16.msra.mxu1 %v2619_v47  ;;  %1871 = vmatprep.subr.bf16.mxu0 %v2620_v48  ;;  %v2715_v47 = vld [vmem:[%s3952_s1 + $0x3d4] ss:$8 sps:$4 sm:$0xff]   ;;  %v2710_v48 = vld [vmem:[%s3952_s1 + $0x2d0] ss:$8 sps:$4 sm:$0xff]  }
  0x31   :  { %1914 = vmatprep.subr.bf16.mxu1 %v2622_v50  ;;  %v2718_v50 = vld [vmem:[%s3952_s1 + $0x2c4] ss:$8 sps:$4 sm:$0xff]  }
  0x33   :  { %1872 = vmatpush2.bf16.msra.mxu0 %v2624_v52  ;;  %v2716_v52 = vld [vmem:[%s3952_s1 + $0x2c0] ss:$8 sps:$4 sm:$0xff]  }
  0x34   :  { %1915 = vmatpush2.bf16.msra.mxu1 %v2625_v53  ;;  %1873 = vmatprep.subr.bf16.mxu0 %v2626_v54  ;;  %v2719_v53 = vld [vmem:[%s3952_s1 + $0x3c0] ss:$8 sps:$4 sm:$0xff]   ;;  %v2724_v54 = vld [vmem:[%s3952_s1 + $0x2b4] ss:$8 sps:$4 sm:$0xff]  }
  0x35   :  { %1916 = vmatprep.subr.bf16.mxu1 %v2628_v55  ;;  %v2727_v55 = vld [vmem:[%s3952_s1 + $0x3b4] ss:$8 sps:$4 sm:$0xff]  }
  0x37   :  { %1874 = vmatpush2.bf16.msra.mxu0 %v2630_v56  ;;  %v2722_v56 = vld [vmem:[%s3952_s1 + $0x2b0] ss:$8 sps:$4 sm:$0xff]  }
  0x38   :  { %1917 = vmatpush2.bf16.msra.mxu1 %v2631_v57  ;;  %1875 = vmatprep.subr.bf16.mxu0 %v2632_v58  ;;  %v2725_v57 = vld [vmem:[%s3952_s1 + $0x3b0] ss:$8 sps:$4 sm:$0xff]   ;;  %v2730_v58 = vld [vmem:[%s3952_s1 + $0x2a4] ss:$8 sps:$4 sm:$0xff]  }
  0x39   :  { %1918 = vmatprep.subr.bf16.mxu1 %v2634_v59  ;;  %v2733_v59 = vld [vmem:[%s3952_s1 + $0x3a4] ss:$8 sps:$4 sm:$0xff]  }
  0x3b   :  { %1876 = vmatpush2.bf16.msra.mxu0 %v2636_v60  ;;  %v2728_v60 = vld [vmem:[%s3952_s1 + $0x2a0] ss:$8 sps:$4 sm:$0xff]  }
  0x3c   :  { %1919 = vmatpush2.bf16.msra.mxu1 %v2637_v61  ;;  %1877 = vmatprep.subr.bf16.mxu0 %v2638_v62  ;;  %v2731_v61 = vld [vmem:[%s3952_s1 + $0x3a0] ss:$8 sps:$4 sm:$0xff]   ;;  %v2736_v62 = vld [vmem:[%s3952_s1 + $0x294] ss:$8 sps:$4 sm:$0xff]  }
  0x3d   :  { %1920 = vmatprep.subr.bf16.mxu1 %v2640_v63  ;;  %v2739_v63 = vld [vmem:[%s3952_s1 + $0x394] ss:$8 sps:$4 sm:$0xff]  }
  0x3f   :  { %1878 = vmatpush2.bf16.msra.mxu0 %v2642_v0  ;;  %v2734_v0 = vld [vmem:[%s3952_s1 + $0x290] ss:$8 sps:$4 sm:$0xff]  }
  0x40   :  { %1921 = vmatpush2.bf16.msra.mxu1 %v2643_v1  ;;  %1933 = vmatprep.subr.bf16.mxu0 %v2652_v2  ;;  %v2737_v1 = vld [vmem:[%s3952_s1 + $0x390] ss:$8 sps:$4 sm:$0xff]   ;;  %v2742_v2 = vld [vmem:[%s3952_s1 + $0x284] ss:$8 sps:$4 sm:$0xff]  }
  0x41   :  { %1976 = vmatprep.subr.bf16.mxu1 %v2655_v3  ;;  %v2745_v3 = vld [vmem:[%s3952_s1 + $0x384] ss:$8 sps:$4 sm:$0xff]  }
  0x42   :  { %1880 = vmatmul.mubr.bf16.vlgmr.msra.gmra.mxu0 %v2644_v4  ;;  %v2740_v4 = vld [vmem:[%s3952_s1 + $0x280] ss:$8 sps:$4 sm:$0xff]  }
  0x43   :  { %1923 = vmatmul.mubr.bf16.vlgmr.msra.gmra.mxu1 %v2647_v5  ;;  %1934 = vmatpush1.bf16.msra.mxu0 %v2650_v6  ;;  %v2743_v5 = vld [vmem:[%s3952_s1 + $0x380] ss:$8 sps:$4 sm:$0xff]   ;;  %v2751_v6 = vld [vmem:[%s3952_s1 + $0x474] ss:$8 sps:$4 sm:$0xff]  }
  0x44   :  { %1977 = vmatpush1.bf16.msra.mxu1 %v2653_v7  ;;  %1935 = vmatprep.subr.bf16.mxu0 %v2658_v8  ;;  %v2757_v7 = vld [vmem:[%s3952_s1 + $0x574] ss:$8 sps:$4 sm:$0xff]   ;;  %v2746_v8 = vld [vmem:[%s3953_s0 + $0x10] ss:$72 sps:$4 sm:$0xff]  }
  0x45   :  { %1978 = vmatprep.subr.bf16.mxu1 %v2661_v9  ;;  %1965 = vmatprep.mubr.bf16.mxu0 %v2748_v34  ;;  %v2749_v9 = vld [vmem:[%s3952_s1 + $0x470] ss:$8 sps:$4 sm:$0xff]   ;;  %v2790_v34 = vld [vmem:[%s3952_s1 + $0x414] ss:$8 sps:$4 sm:$0xff]  }
  0x46   :  { %2008 = vmatprep.mubr.bf16.mxu1 %v2754_v37  ;;  %v2791_v37 = vld [vmem:[%s3952_s1 + $0x510] ss:$8 sps:$4 sm:$0xff]  }
  0x47   :  { %1936 = vmatpush1.bf16.msra.mxu0 %v2656_v10  ;;  %v2752_v10 = vld [vmem:[%s3953_s0 + $0x18] ss:$72 sps:$4 sm:$0xff]  }
  0x48   :  { %1979 = vmatpush1.bf16.msra.mxu1 %v2659_v11  ;;  %1937 = vmatprep.subr.bf16.mxu0 %v2664_v12  ;;  %v2755_v11 = vld [vmem:[%s3952_s1 + $0x570] ss:$8 sps:$4 sm:$0xff]   ;;  %v2760_v12 = vld [vmem:[%s3952_s1 + $0x464] ss:$8 sps:$4 sm:$0xff]  }
  0x49   :  { %1980 = vmatprep.subr.bf16.mxu1 %v2667_v13  ;;  %v2763_v13 = vld [vmem:[%s3952_s1 + $0x564] ss:$8 sps:$4 sm:$0xff]  }
  0x4b   :  { %1938 = vmatpush1.bf16.msra.mxu0 %v2662_v14  ;;  %v2758_v14 = vld [vmem:[%s3952_s1 + $0x460] ss:$8 sps:$4 sm:$0xff]  }
  0x4c   :  { %1981 = vmatpush1.bf16.msra.mxu1 %v2665_v15  ;;  %1939 = vmatprep.subr.bf16.mxu0 %v2670_v16  ;;  %v2761_v15 = vld [vmem:[%s3952_s1 + $0x560] ss:$8 sps:$4 sm:$0xff]   ;;  %v2766_v16 = vld [vmem:[%s3952_s1 + $0x454] ss:$8 sps:$4 sm:$0xff]  }
  0x4d   :  { %1982 = vmatprep.subr.bf16.mxu1 %v2673_v17  ;;  %v2769_v17 = vld [vmem:[%s3952_s1 + $0x554] ss:$8 sps:$4 sm:$0xff]  }
  0x4f   :  { %1940 = vmatpush1.bf16.msra.mxu0 %v2668_v18  ;;  %v2764_v18 = vld [vmem:[%s3952_s1 + $0x450] ss:$8 sps:$4 sm:$0xff]  }
  0x50   :  { %1983 = vmatpush1.bf16.msra.mxu1 %v2671_v19  ;;  %1941 = vmatprep.subr.bf16.mxu0 %v2676_v20  ;;  %v2850_v19 = vld [vmem:[%s3953_s0 + $0x24] ss:$72 sps:$4 sm:$0xff]   ;;  %v2767_v20 = vld [vmem:[%s3952_s1 + $0x550] ss:$8 sps:$4 sm:$0xff]  }
  0x51   :  { %1984 = vmatprep.subr.bf16.mxu1 %v2679_v21  ;;  %v2772_v21 = vld [vmem:[%s3952_s1 + $0x444] ss:$8 sps:$4 sm:$0xff]  }
  0x53   :  { %1942 = vmatpush1.bf16.msra.mxu0 %v2674_v22  ;;  %v2775_v22 = vld [vmem:[%s3952_s1 + $0x544] ss:$8 sps:$4 sm:$0xff]  }
  0x54   :  { %1985 = vmatpush1.bf16.msra.mxu1 %v2677_v23  ;;  %1943 = vmatprep.subr.bf16.mxu0 %v2682_v24  ;;  %v2856_v23 = vld [vmem:[%s3953_s0 + $0x2c] ss:$72 sps:$4 sm:$0xff]   ;;  %v2770_v24 = vld [vmem:[%s3952_s1 + $0x440] ss:$8 sps:$4 sm:$0xff]  }
  0x55   :  { %1986 = vmatprep.subr.bf16.mxu1 %v2685_v25  ;;  %v2773_v25 = vld [vmem:[%s3952_s1 + $0x540] ss:$8 sps:$4 sm:$0xff]  }
  0x57   :  { %1944 = vmatpush1.bf16.msra.mxu0 %v2680_v26  ;;  %v2778_v26 = vld [vmem:[%s3952_s1 + $0x434] ss:$8 sps:$4 sm:$0xff]  }
  0x58   :  { %1987 = vmatpush1.bf16.msra.mxu1 %v2683_v27  ;;  %1945 = vmatprep.subr.bf16.mxu0 %v2688_v28  ;;  %v2781_v27 = vld [vmem:[%s3952_s1 + $0x534] ss:$8 sps:$4 sm:$0xff]   ;;  %v2776_v28 = vld [vmem:[%s3952_s1 + $0x430] ss:$8 sps:$4 sm:$0xff]  }
  0x59   :  { %1988 = vmatprep.subr.bf16.mxu1 %v2691_v29  ;;  %v2779_v29 = vld [vmem:[%s3952_s1 + $0x530] ss:$8 sps:$4 sm:$0xff]  }
  0x5b   :  { %1946 = vmatpush1.bf16.msra.mxu0 %v2686_v30  ;;  %v2784_v30 = vld [vmem:[%s3952_s1 + $0x424] ss:$8 sps:$4 sm:$0xff]  }
  0x5c   :  { %1989 = vmatpush1.bf16.msra.mxu1 %v2689_v31  ;;  %1947 = vmatprep.subr.bf16.mxu0 %v2694_v32  ;;  %v2787_v31 = vld [vmem:[%s3952_s1 + $0x524] ss:$8 sps:$4 sm:$0xff]   ;;  %v2782_v32 = vld [vmem:[%s3952_s1 + $0x420] ss:$8 sps:$4 sm:$0xff]  }
  0x5d   :  { %1990 = vmatprep.subr.bf16.mxu1 %v2697_v33  ;;  %v2785_v33 = vld [vmem:[%s3952_s1 + $0x520] ss:$8 sps:$4 sm:$0xff]  }
  0x5f   :  { %1948 = vmatpush1.bf16.msra.mxu0 %v2692_v35  ;;  %v2793_v35 = vld [vmem:[%s3952_s1 + $0x514] ss:$8 sps:$4 sm:$0xff]  }
  0x60   :  { %1991 = vmatpush1.bf16.msra.mxu1 %v2695_v36  ;;  %1949 = vmatprep.subr.bf16.mxu0 %v2700_v38  ;;  %v2788_v36 = vld [vmem:[%s3952_s1 + $0x410] ss:$8 sps:$4 sm:$0xff]   ;;  %v2796_v38 = vld [vmem:[%s3952_s1 + $0x404] ss:$8 sps:$4 sm:$0xff]  }
  0x61   :  { %1992 = vmatprep.subr.bf16.mxu1 %v2703_v39  ;;  %v2799_v39 = vld [vmem:[%s3952_s1 + $0x504] ss:$8 sps:$4 sm:$0xff]  }
  0x63   :  { %1950 = vmatpush2.bf16.msra.mxu0 %v2698_v40  ;;  %v2794_v40 = vld [vmem:[%s3952_s1 + $0x400] ss:$8 sps:$4 sm:$0xff]  }
  0x64   :  { %1993 = vmatpush2.bf16.msra.mxu1 %v2701_v41  ;;  %1951 = vmatprep.subr.bf16.mxu0 %v2706_v42  ;;  %v2797_v41 = vld [vmem:[%s3952_s1 + $0x500] ss:$8 sps:$4 sm:$0xff]   ;;  %v2802_v42 = vld [vmem:[%s3952_s1 + $0x4f4] ss:$8 sps:$4 sm:$0xff]  }
  0x65   :  { %1994 = vmatprep.subr.bf16.mxu1 %v2709_v43  ;;  %v2805_v43 = vld [vmem:[%s3952_s1 + $0x5f4] ss:$8 sps:$4 sm:$0xff]  }
  0x67   :  { %1952 = vmatpush2.bf16.msra.mxu0 %v2704_v44  ;;  %v2800_v44 = vld [vmem:[%s3952_s1 + $0x4f0] ss:$8 sps:$4 sm:$0xff]  }
  0x68   :  { %1995 = vmatpush2.bf16.msra.mxu1 %v2707_v45  ;;  %1953 = vmatprep.subr.bf16.mxu0 %v2712_v46  ;;  %v2803_v45 = vld [vmem:[%s3952_s1 + $0x5f0] ss:$8 sps:$4 sm:$0xff]   ;;  %v2808_v46 = vld [vmem:[%s3952_s1 + $0x4e4] ss:$8 sps:$4 sm:$0xff]  }
  0x69   :  { %1996 = vmatprep.subr.bf16.mxu1 %v2715_v47  ;;  %v2811_v47 = vld [vmem:[%s3952_s1 + $0x5e4] ss:$8 sps:$4 sm:$0xff]  }
  0x6b   :  { %1954 = vmatpush2.bf16.msra.mxu0 %v2710_v48  ;;  %v2806_v48 = vld [vmem:[%s3952_s1 + $0x4e0] ss:$8 sps:$4 sm:$0xff]  }
  0x6c   :  { %1997 = vmatpush2.bf16.msra.mxu1 %v2713_v49  ;;  %1955 = vmatprep.subr.bf16.mxu0 %v2718_v50  ;;  %v2809_v49 = vld [vmem:[%s3952_s1 + $0x5e0] ss:$8 sps:$4 sm:$0xff]   ;;  %v2814_v50 = vld [vmem:[%s3952_s1 + $0x4d4] ss:$8 sps:$4 sm:$0xff]  }
  0x6d   :  { %1998 = vmatprep.subr.bf16.mxu1 %v2721_v51  ;;  %v2817_v51 = vld [vmem:[%s3952_s1 + $0x5d4] ss:$8 sps:$4 sm:$0xff]  }
  0x6f   :  { %1956 = vmatpush2.bf16.msra.mxu0 %v2716_v52  ;;  %v2812_v52 = vld [vmem:[%s3952_s1 + $0x4d0] ss:$8 sps:$4 sm:$0xff]  }
  0x70   :  { %1999 = vmatpush2.bf16.msra.mxu1 %v2719_v53  ;;  %1957 = vmatprep.subr.bf16.mxu0 %v2724_v54  ;;  %v2815_v53 = vld [vmem:[%s3952_s1 + $0x5d0] ss:$8 sps:$4 sm:$0xff]   ;;  %v2820_v54 = vld [vmem:[%s3952_s1 + $0x4c4] ss:$8 sps:$4 sm:$0xff]  }
  0x71   :  { %2000 = vmatprep.subr.bf16.mxu1 %v2727_v55  ;;  %v2823_v55 = vld [vmem:[%s3952_s1 + $0x5c4] ss:$8 sps:$4 sm:$0xff]  }
  0x73   :  { %1958 = vmatpush2.bf16.msra.mxu0 %v2722_v56  ;;  %v2818_v56 = vld [vmem:[%s3952_s1 + $0x4c0] ss:$8 sps:$4 sm:$0xff]  }
  0x74   :  { %2001 = vmatpush2.bf16.msra.mxu1 %v2725_v57  ;;  %1959 = vmatprep.subr.bf16.mxu0 %v2730_v58  ;;  %v2821_v57 = vld [vmem:[%s3952_s1 + $0x5c0] ss:$8 sps:$4 sm:$0xff]   ;;  %v2826_v58 = vld [vmem:[%s3952_s1 + $0x4b4] ss:$8 sps:$4 sm:$0xff]  }
  0x75   :  { %2002 = vmatprep.subr.bf16.mxu1 %v2733_v59  ;;  %v2829_v59 = vld [vmem:[%s3952_s1 + $0x5b4] ss:$8 sps:$4 sm:$0xff]  }
  0x77   :  { %1960 = vmatpush2.bf16.msra.mxu0 %v2728_v60  ;;  %v2824_v60 = vld [vmem:[%s3952_s1 + $0x4b0] ss:$8 sps:$4 sm:$0xff]  }
  0x78   :  { %2003 = vmatpush2.bf16.msra.mxu1 %v2731_v61  ;;  %1961 = vmatprep.subr.bf16.mxu0 %v2736_v62  ;;  %v2827_v61 = vld [vmem:[%s3952_s1 + $0x5b0] ss:$8 sps:$4 sm:$0xff]   ;;  %v2832_v62 = vld [vmem:[%s3952_s1 + $0x4a4] ss:$8 sps:$4 sm:$0xff]  }
  0x79   :  { %2004 = vmatprep.subr.bf16.mxu1 %v2739_v63  ;;  %v2835_v63 = vld [vmem:[%s3952_s1 + $0x5a4] ss:$8 sps:$4 sm:$0xff]  }
  0x7b   :  { %1962 = vmatpush2.bf16.msra.mxu0 %v2734_v0  ;;  %v2830_v0 = vld [vmem:[%s3952_s1 + $0x4a0] ss:$8 sps:$4 sm:$0xff]  }
  0x7c   :  { %2005 = vmatpush2.bf16.msra.mxu1 %v2737_v1  ;;  %1963 = vmatprep.subr.bf16.mxu0 %v2742_v2  ;;  %v2833_v1 = vld [vmem:[%s3952_s1 + $0x5a0] ss:$8 sps:$4 sm:$0xff]   ;;  %v2838_v2 = vld [vmem:[%s3952_s1 + $0x494] ss:$8 sps:$4 sm:$0xff]  }
  0x7d   :  { %2006 = vmatprep.subr.bf16.mxu1 %v2745_v3  ;;  %v2841_v3 = vld [vmem:[%s3952_s1 + $0x594] ss:$8 sps:$4 sm:$0xff]  }
  0x7f   :  { %1964 = vmatpush2.bf16.msra.mxu0 %v2740_v4  ;;  %v2836_v4 = vld [vmem:[%s3952_s1 + $0x490] ss:$8 sps:$4 sm:$0xff]  }
  0x80   :  { %2007 = vmatpush2.bf16.msra.mxu1 %v2743_v5  ;;  %2019 = vmatprep.subr.bf16.mxu0 %v2751_v6  ;;  %v2839_v5 = vld [vmem:[%s3952_s1 + $0x590] ss:$8 sps:$4 sm:$0xff]   ;;  %v2844_v6 = vld [vmem:[%s3952_s1 + $0x484] ss:$8 sps:$4 sm:$0xff]  }
  0x81   :  { %2062 = vmatprep.subr.bf16.mxu1 %v2757_v7  ;;  %v2847_v7 = vld [vmem:[%s3952_s1 + $0x584] ss:$8 sps:$4 sm:$0xff]  }
  0x82   :  { %1966 = vmatmul.mubr.bf16.vlgmr.msra.gmra.mxu0 %v2746_v8  ;;  %v2842_v8 = vld [vmem:[%s3952_s1 + $0x480] ss:$8 sps:$4 sm:$0xff]  }
  0x83   :  { %2009 = vmatmul.mubr.bf16.vlgmr.msra.gmra.mxu1 %v2752_v10  ;;  %2020 = vmatpush1.bf16.msra.mxu0 %v2749_v9  ;;  %v2845_v9 = vld [vmem:[%s3952_s1 + $0x580] ss:$8 sps:$4 sm:$0xff]   ;;  %v2853_v10 = vld [vmem:[%s3952_s1 + $0x674] ss:$8 sps:$4 sm:$0xff]  }
  0x84   :  { %2063 = vmatpush1.bf16.msra.mxu1 %v2755_v11  ;;  %2021 = vmatprep.subr.bf16.mxu0 %v2760_v12  ;;  %v2859_v11 = vld [vmem:[%s3952_s1 + $0x774] ss:$8 sps:$4 sm:$0xff]   ;;  %v2848_v12 = vld [vmem:[%s3953_s0 + $0x20] ss:$72 sps:$4 sm:$0xff]  }
  0x85   :  { %2064 = vmatprep.subr.bf16.mxu1 %v2763_v13  ;;  %2051 = vmatprep.mubr.bf16.mxu0 %v2850_v19  ;;  %v2851_v13 = vld [vmem:[%s3952_s1 + $0x670] ss:$8 sps:$4 sm:$0xff]   ;;  %v2958_v19 = vld [vmem:[%s3953_s0 + $0x3c] ss:$72 sps:$4 sm:$0xff]  }
  0x86   :  { %2094 = vmatprep.mubr.bf16.mxu1 %v2856_v23  ;;  %v2871_v23 = vld [vmem:[%s3952_s1 + $0x754] ss:$8 sps:$4 sm:$0xff]  }
  0x87   :  { %2022 = vmatpush1.bf16.msra.mxu0 %v2758_v14  ;;  %v2854_v14 = vld [vmem:[%s3953_s0 + $0x28] ss:$72 sps:$4 sm:$0xff]  }
  0x88   :  { %2065 = vmatpush1.bf16.msra.mxu1 %v2761_v15  ;;  %2023 = vmatprep.subr.bf16.mxu0 %v2766_v16  ;;  %v2857_v15 = vld [vmem:[%s3952_s1 + $0x770] ss:$8 sps:$4 sm:$0xff]   ;;  %v2862_v16 = vld [vmem:[%s3952_s1 + $0x664] ss:$8 sps:$4 sm:$0xff]  }
  0x89   :  { %2066 = vmatprep.subr.bf16.mxu1 %v2769_v17  ;;  %v2865_v17 = vld [vmem:[%s3952_s1 + $0x764] ss:$8 sps:$4 sm:$0xff]  }
  0x8b   :  { %2024 = vmatpush1.bf16.msra.mxu0 %v2764_v18  ;;  %v2952_v18 = vld [vmem:[%s3953_s0 + $0x34] ss:$72 sps:$4 sm:$0xff]  }
  0x8c   :  { %2067 = vmatpush1.bf16.msra.mxu1 %v2767_v20  ;;  %2025 = vmatprep.subr.bf16.mxu0 %v2772_v21  ;;  %v2860_v20 = vld [vmem:[%s3952_s1 + $0x660] ss:$8 sps:$4 sm:$0xff]  }
  0x8d   :  { %2068 = vmatprep.subr.bf16.mxu1 %v2775_v22  ;;  %v2863_v21 = vld [vmem:[%s3952_s1 + $0x760] ss:$8 sps:$4 sm:$0xff]   ;;  %v2868_v22 = vld [vmem:[%s3952_s1 + $0x654] ss:$8 sps:$4 sm:$0xff]  }
  0x8f   :  { %2026 = vmatpush1.bf16.msra.mxu0 %v2770_v24  ;;  %v2866_v24 = vld [vmem:[%s3952_s1 + $0x650] ss:$8 sps:$4 sm:$0xff]  }
  0x90   :  { %2069 = vmatpush1.bf16.msra.mxu1 %v2773_v25  ;;  %2027 = vmatprep.subr.bf16.mxu0 %v2778_v26  ;;  %v2869_v25 = vld [vmem:[%s3952_s1 + $0x750] ss:$8 sps:$4 sm:$0xff]   ;;  %v2874_v26 = vld [vmem:[%s3952_s1 + $0x644] ss:$8 sps:$4 sm:$0xff]  }
  0x91   :  { %2070 = vmatprep.subr.bf16.mxu1 %v2781_v27  ;;  %v2877_v27 = vld [vmem:[%s3952_s1 + $0x744] ss:$8 sps:$4 sm:$0xff]  }
  0x93   :  { %2028 = vmatpush1.bf16.msra.mxu0 %v2776_v28  ;;  %v2872_v28 = vld [vmem:[%s3952_s1 + $0x640] ss:$8 sps:$4 sm:$0xff]  }
  0x94   :  { %2071 = vmatpush1.bf16.msra.mxu1 %v2779_v29  ;;  %2029 = vmatprep.subr.bf16.mxu0 %v2784_v30  ;;  %v2875_v29 = vld [vmem:[%s3952_s1 + $0x740] ss:$8 sps:$4 sm:$0xff]   ;;  %v2880_v30 = vld [vmem:[%s3952_s1 + $0x634] ss:$8 sps:$4 sm:$0xff]  }
  0x95   :  { %2072 = vmatprep.subr.bf16.mxu1 %v2787_v31  ;;  %v2883_v31 = vld [vmem:[%s3952_s1 + $0x734] ss:$8 sps:$4 sm:$0xff]  }
  0x97   :  { %2030 = vmatpush1.bf16.msra.mxu0 %v2782_v32  ;;  %v2878_v32 = vld [vmem:[%s3952_s1 + $0x630] ss:$8 sps:$4 sm:$0xff]  }
  0x98   :  { %2073 = vmatpush1.bf16.msra.mxu1 %v2785_v33  ;;  %2031 = vmatprep.subr.bf16.mxu0 %v2790_v34  ;;  %v2881_v33 = vld [vmem:[%s3952_s1 + $0x730] ss:$8 sps:$4 sm:$0xff]   ;;  %v2886_v34 = vld [vmem:[%s3952_s1 + $0x624] ss:$8 sps:$4 sm:$0xff]  }
  0x99   :  { %2074 = vmatprep.subr.bf16.mxu1 %v2793_v35  ;;  %v2889_v35 = vld [vmem:[%s3952_s1 + $0x724] ss:$8 sps:$4 sm:$0xff]  }
  0x9b   :  { %2032 = vmatpush1.bf16.msra.mxu0 %v2788_v36  ;;  %v2884_v36 = vld [vmem:[%s3952_s1 + $0x620] ss:$8 sps:$4 sm:$0xff]  }
  0x9c   :  { %2075 = vmatpush1.bf16.msra.mxu1 %v2791_v37  ;;  %2033 = vmatprep.subr.bf16.mxu0 %v2796_v38  ;;  %v2887_v37 = vld [vmem:[%s3952_s1 + $0x720] ss:$8 sps:$4 sm:$0xff]   ;;  %v2892_v38 = vld [vmem:[%s3952_s1 + $0x614] ss:$8 sps:$4 sm:$0xff]  }
  0x9d   :  { %2076 = vmatprep.subr.bf16.mxu1 %v2799_v39  ;;  %v2895_v39 = vld [vmem:[%s3952_s1 + $0x714] ss:$8 sps:$4 sm:$0xff]  }
  0x9f   :  { %2034 = vmatpush1.bf16.msra.mxu0 %v2794_v40  ;;  %v2890_v40 = vld [vmem:[%s3952_s1 + $0x610] ss:$8 sps:$4 sm:$0xff]  }
  0xa0   :  { %2077 = vmatpush1.bf16.msra.mxu1 %v2797_v41  ;;  %2035 = vmatprep.subr.bf16.mxu0 %v2802_v42  ;;  %v2893_v41 = vld [vmem:[%s3952_s1 + $0x710] ss:$8 sps:$4 sm:$0xff]   ;;  %v2898_v42 = vld [vmem:[%s3952_s1 + $0x604] ss:$8 sps:$4 sm:$0xff]  }
  0xa1   :  { %2078 = vmatprep.subr.bf16.mxu1 %v2805_v43  ;;  %v2901_v43 = vld [vmem:[%s3952_s1 + $0x704] ss:$8 sps:$4 sm:$0xff]  }
  0xa3   :  { %2036 = vmatpush2.bf16.msra.mxu0 %v2800_v44  ;;  %v2896_v44 = vld [vmem:[%s3952_s1 + $0x600] ss:$8 sps:$4 sm:$0xff]  }
  0xa4   :  { %2079 = vmatpush2.bf16.msra.mxu1 %v2803_v45  ;;  %2037 = vmatprep.subr.bf16.mxu0 %v2808_v46  ;;  %v2899_v45 = vld [vmem:[%s3952_s1 + $0x700] ss:$8 sps:$4 sm:$0xff]   ;;  %v2904_v46 = vld [vmem:[%s3952_s1 + $0x6f4] ss:$8 sps:$4 sm:$0xff]  }
  0xa5   :  { %2080 = vmatprep.subr.bf16.mxu1 %v2811_v47  ;;  %v2907_v47 = vld [vmem:[%s3952_s1 + $0x7f4] ss:$8 sps:$4 sm:$0xff]  }
  0xa7   :  { %2038 = vmatpush2.bf16.msra.mxu0 %v2806_v48  ;;  %v2902_v48 = vld [vmem:[%s3952_s1 + $0x6f0] ss:$8 sps:$4 sm:$0xff]  }
  0xa8   :  { %2081 = vmatpush2.bf16.msra.mxu1 %v2809_v49  ;;  %2039 = vmatprep.subr.bf16.mxu0 %v2814_v50  ;;  %v2905_v49 = vld [vmem:[%s3952_s1 + $0x7f0] ss:$8 sps:$4 sm:$0xff]   ;;  %v2910_v50 = vld [vmem:[%s3952_s1 + $0x6e4] ss:$8 sps:$4 sm:$0xff]  }
  0xa9   :  { %2082 = vmatprep.subr.bf16.mxu1 %v2817_v51  ;;  %v2913_v51 = vld [vmem:[%s3952_s1 + $0x7e4] ss:$8 sps:$4 sm:$0xff]  }
  0xab   :  { %2040 = vmatpush2.bf16.msra.mxu0 %v2812_v52  ;;  %v2908_v52 = vld [vmem:[%s3952_s1 + $0x6e0] ss:$8 sps:$4 sm:$0xff]  }
  0xac   :  { %2083 = vmatpush2.bf16.msra.mxu1 %v2815_v53  ;;  %2041 = vmatprep.subr.bf16.mxu0 %v2820_v54  ;;  %v2911_v53 = vld [vmem:[%s3952_s1 + $0x7e0] ss:$8 sps:$4 sm:$0xff]   ;;  %v2916_v54 = vld [vmem:[%s3952_s1 + $0x6d4] ss:$8 sps:$4 sm:$0xff]  }
  0xad   :  { %2084 = vmatprep.subr.bf16.mxu1 %v2823_v55  ;;  %v2919_v55 = vld [vmem:[%s3952_s1 + $0x7d4] ss:$8 sps:$4 sm:$0xff]  }
  0xaf   :  { %2042 = vmatpush2.bf16.msra.mxu0 %v2818_v56  ;;  %v2914_v56 = vld [vmem:[%s3952_s1 + $0x6d0] ss:$8 sps:$4 sm:$0xff]  }
  0xb0   :  { %2085 = vmatpush2.bf16.msra.mxu1 %v2821_v57  ;;  %2043 = vmatprep.subr.bf16.mxu0 %v2826_v58  ;;  %v2917_v57 = vld [vmem:[%s3952_s1 + $0x7d0] ss:$8 sps:$4 sm:$0xff]   ;;  %v2922_v58 = vld [vmem:[%s3952_s1 + $0x6c4] ss:$8 sps:$4 sm:$0xff]  }
  0xb1   :  { %2086 = vmatprep.subr.bf16.mxu1 %v2829_v59  ;;  %v2925_v59 = vld [vmem:[%s3952_s1 + $0x7c4] ss:$8 sps:$4 sm:$0xff]  }
  0xb3   :  { %2044 = vmatpush2.bf16.msra.mxu0 %v2824_v60  ;;  %v2920_v60 = vld [vmem:[%s3952_s1 + $0x6c0] ss:$8 sps:$4 sm:$0xff]  }
  0xb4   :  { %2087 = vmatpush2.bf16.msra.mxu1 %v2827_v61  ;;  %2045 = vmatprep.subr.bf16.mxu0 %v2832_v62  ;;  %v2923_v61 = vld [vmem:[%s3952_s1 + $0x7c0] ss:$8 sps:$4 sm:$0xff]   ;;  %v2928_v62 = vld [vmem:[%s3952_s1 + $0x6b4] ss:$8 sps:$4 sm:$0xff]  }
  0xb5   :  { %2088 = vmatprep.subr.bf16.mxu1 %v2835_v63  ;;  %v2931_v63 = vld [vmem:[%s3952_s1 + $0x7b4] ss:$8 sps:$4 sm:$0xff]  }
  0xb7   :  { %2046 = vmatpush2.bf16.msra.mxu0 %v2830_v0  ;;  %v2926_v0 = vld [vmem:[%s3952_s1 + $0x6b0] ss:$8 sps:$4 sm:$0xff]  }
  0xb8   :  { %2089 = vmatpush2.bf16.msra.mxu1 %v2833_v1  ;;  %2047 = vmatprep.subr.bf16.mxu0 %v2838_v2  ;;  %v2929_v1 = vld [vmem:[%s3952_s1 + $0x7b0] ss:$8 sps:$4 sm:$0xff]   ;;  %v2934_v2 = vld [vmem:[%s3952_s1 + $0x6a4] ss:$8 sps:$4 sm:$0xff]  }
  0xb9   :  { %2090 = vmatprep.subr.bf16.mxu1 %v2841_v3  ;;  %v2937_v3 = vld [vmem:[%s3952_s1 + $0x7a4] ss:$8 sps:$4 sm:$0xff]  }
  0xbb   :  { %2048 = vmatpush2.bf16.msra.mxu0 %v2836_v4  ;;  %v2932_v4 = vld [vmem:[%s3952_s1 + $0x6a0] ss:$8 sps:$4 sm:$0xff]  }
  0xbc   :  { %2091 = vmatpush2.bf16.msra.mxu1 %v2839_v5  ;;  %2049 = vmatprep.subr.bf16.mxu0 %v2844_v6  ;;  %v2935_v5 = vld [vmem:[%s3952_s1 + $0x7a0] ss:$8 sps:$4 sm:$0xff]   ;;  %v2940_v6 = vld [vmem:[%s3952_s1 + $0x694] ss:$8 sps:$4 sm:$0xff]  }
  0xbd   :  { %2092 = vmatprep.subr.bf16.mxu1 %v2847_v7  ;;  %v2943_v7 = vld [vmem:[%s3952_s1 + $0x794] ss:$8 sps:$4 sm:$0xff]  }
  0xbf   :  { %2050 = vmatpush2.bf16.msra.mxu0 %v2842_v8  ;;  %v2938_v8 = vld [vmem:[%s3952_s1 + $0x690] ss:$8 sps:$4 sm:$0xff]  }
  0xc0   :  { %2093 = vmatpush2.bf16.msra.mxu1 %v2845_v9  ;;  %2105 = vmatprep.subr.bf16.mxu0 %v2853_v10  ;;  %v2941_v9 = vld [vmem:[%s3952_s1 + $0x790] ss:$8 sps:$4 sm:$0xff]   ;;  %v2946_v10 = vld [vmem:[%s3952_s1 + $0x684] ss:$8 sps:$4 sm:$0xff]  }
  0xc1   :  { %2148 = vmatprep.subr.bf16.mxu1 %v2859_v11  ;;  %v2949_v11 = vld [vmem:[%s3952_s1 + $0x784] ss:$8 sps:$4 sm:$0xff]  }
  0xc2   :  { %2052 = vmatmul.mubr.bf16.vlgmr.msra.gmra.mxu0 %v2848_v12  ;;  %v2944_v12 = vld [vmem:[%s3952_s1 + $0x680] ss:$8 sps:$4 sm:$0xff]  }
  0xc3   :  { %2095 = vmatmul.mubr.bf16.vlgmr.msra.gmra.mxu1 %v2854_v14  ;;  %2106 = vmatpush1.bf16.msra.mxu0 %v2851_v13  ;;  %v2947_v13 = vld [vmem:[%s3952_s1 + $0x780] ss:$8 sps:$4 sm:$0xff]   ;;  %v2955_v14 = vld [vmem:[%s3952_s1 + $0x874] ss:$8 sps:$4 sm:$0xff]  }
  0xc4   :  { %2149 = vmatpush1.bf16.msra.mxu1 %v2857_v15  ;;  %2107 = vmatprep.subr.bf16.mxu0 %v2862_v16  ;;  %v2950_v15 = vld [vmem:[%s3953_s0 + $0x30] ss:$72 sps:$4 sm:$0xff]  }
  0xc5   :  { %2150 = vmatprep.subr.bf16.mxu1 %v2865_v17  ;;  %2137 = vmatprep.mubr.bf16.mxu0 %v2952_v18  ;;  %v2956_v16 = vld [vmem:[%s3953_s0 + $0x38] ss:$72 sps:$4 sm:$0xff]   ;;  %v3006_v18 = vld [vmem:[%s3953_s0 + $0x44] ss:$72 sps:$4 sm:$0xff]  }
  0xc6   :  { %2180 = vmatprep.mubr.bf16.mxu1 %v2958_v19  ;;  %v2953_v17 = vld [vmem:[%s3952_s1 + $0x870] ss:$8 sps:$4 sm:$0xff]   ;;  %v2961_v19 = vld [vmem:[%s3952_s1 + $0x864] ss:$8 sps:$4 sm:$0xff]  }
  0xc7   :  { %2108 = vmatpush1.bf16.msra.mxu0 %v2860_v20  ;;  %v2959_v20 = vld [vmem:[%s3952_s1 + $0x860] ss:$8 sps:$4 sm:$0xff]  }
  0xc8   :  { %2151 = vmatpush1.bf16.msra.mxu1 %v2863_v21  ;;  %2109 = vmatprep.subr.bf16.mxu0 %v2868_v22  ;;  %v2964_v21 = vld [vmem:[%s3952_s1 + $0x854] ss:$8 sps:$4 sm:$0xff]   ;;  %v2962_v22 = vld [vmem:[%s3952_s1 + $0x850] ss:$8 sps:$4 sm:$0xff]  }
  0xc9   :  { %2152 = vmatprep.subr.bf16.mxu1 %v2871_v23  ;;  %v2967_v23 = vld [vmem:[%s3952_s1 + $0x844] ss:$8 sps:$4 sm:$0xff]  }
  0xcb   :  { %2110 = vmatpush1.bf16.msra.mxu0 %v2866_v24  ;;  %v2965_v24 = vld [vmem:[%s3952_s1 + $0x840] ss:$8 sps:$4 sm:$0xff]  }
  0xcc   :  { %2153 = vmatpush1.bf16.msra.mxu1 %v2869_v25  ;;  %2111 = vmatprep.subr.bf16.mxu0 %v2874_v26  ;;  %v2970_v25 = vld [vmem:[%s3952_s1 + $0x834] ss:$8 sps:$4 sm:$0xff]   ;;  %v2968_v26 = vld [vmem:[%s3952_s1 + $0x830] ss:$8 sps:$4 sm:$0xff]  }
  0xcd   :  { %2154 = vmatprep.subr.bf16.mxu1 %v2877_v27  ;;  %v2973_v27 = vld [vmem:[%s3952_s1 + $0x824] ss:$8 sps:$4 sm:$0xff]  }
  0xcf   :  { %2112 = vmatpush1.bf16.msra.mxu0 %v2872_v28  ;;  %v2971_v28 = vld [vmem:[%s3952_s1 + $0x820] ss:$8 sps:$4 sm:$0xff]  }
  0xd0   :  { %2155 = vmatpush1.bf16.msra.mxu1 %v2875_v29  ;;  %2113 = vmatprep.subr.bf16.mxu0 %v2880_v30  ;;  %v2976_v29 = vld [vmem:[%s3952_s1 + $0x814] ss:$8 sps:$4 sm:$0xff]   ;;  %v2974_v30 = vld [vmem:[%s3952_s1 + $0x810] ss:$8 sps:$4 sm:$0xff]  }
  0xd1   :  { %2156 = vmatprep.subr.bf16.mxu1 %v2883_v31  ;;  %v2979_v31 = vld [vmem:[%s3952_s1 + $0x804] ss:$8 sps:$4 sm:$0xff]  }
  0xd3   :  { %2114 = vmatpush1.bf16.msra.mxu0 %v2878_v32  ;;  %v2977_v32 = vld [vmem:[%s3952_s1 + $0x800] ss:$8 sps:$4 sm:$0xff]  }
  0xd4   :  { %2157 = vmatpush1.bf16.msra.mxu1 %v2881_v33  ;;  %2115 = vmatprep.subr.bf16.mxu0 %v2886_v34  ;;  %v2982_v33 = vld [vmem:[%s3952_s1 + $0x8f4] ss:$8 sps:$4 sm:$0xff]   ;;  %v2980_v34 = vld [vmem:[%s3952_s1 + $0x8f0] ss:$8 sps:$4 sm:$0xff]  }
  0xd5   :  { %2158 = vmatprep.subr.bf16.mxu1 %v2889_v35  ;;  %v2985_v35 = vld [vmem:[%s3952_s1 + $0x8e4] ss:$8 sps:$4 sm:$0xff]  }
  0xd7   :  { %2116 = vmatpush1.bf16.msra.mxu0 %v2884_v36  ;;  %v2983_v36 = vld [vmem:[%s3952_s1 + $0x8e0] ss:$8 sps:$4 sm:$0xff]  }
  0xd8   :  { %2159 = vmatpush1.bf16.msra.mxu1 %v2887_v37  ;;  %2117 = vmatprep.subr.bf16.mxu0 %v2892_v38  ;;  %v2988_v37 = vld [vmem:[%s3952_s1 + $0x8d4] ss:$8 sps:$4 sm:$0xff]   ;;  %v2986_v38 = vld [vmem:[%s3952_s1 + $0x8d0] ss:$8 sps:$4 sm:$0xff]  }
  0xd9   :  { %2160 = vmatprep.subr.bf16.mxu1 %v2895_v39  ;;  %v2991_v39 = vld [vmem:[%s3952_s1 + $0x8c4] ss:$8 sps:$4 sm:$0xff]  }
  0xdb   :  { %2118 = vmatpush1.bf16.msra.mxu0 %v2890_v40  ;;  %v2989_v40 = vld [vmem:[%s3952_s1 + $0x8c0] ss:$8 sps:$4 sm:$0xff]  }
  0xdc   :  { %2161 = vmatpush1.bf16.msra.mxu1 %v2893_v41  ;;  %2119 = vmatprep.subr.bf16.mxu0 %v2898_v42  ;;  %v2994_v41 = vld [vmem:[%s3952_s1 + $0x8b4] ss:$8 sps:$4 sm:$0xff]   ;;  %v2992_v42 = vld [vmem:[%s3952_s1 + $0x8b0] ss:$8 sps:$4 sm:$0xff]  }
  0xdd   :  { %2162 = vmatprep.subr.bf16.mxu1 %v2901_v43  ;;  %v2997_v43 = vld [vmem:[%s3952_s1 + $0x8a4] ss:$8 sps:$4 sm:$0xff]  }
  0xdf   :  { %2120 = vmatpush1.bf16.msra.mxu0 %v2896_v44  ;;  %v2995_v44 = vld [vmem:[%s3952_s1 + $0x8a0] ss:$8 sps:$4 sm:$0xff]  }
  0xe0   :  { %2163 = vmatpush1.bf16.msra.mxu1 %v2899_v45  ;;  %2121 = vmatprep.subr.bf16.mxu0 %v2904_v46  ;;  %v3000_v45 = vld [vmem:[%s3952_s1 + $0x894] ss:$8 sps:$4 sm:$0xff]   ;;  %v2998_v46 = vld [vmem:[%s3952_s1 + $0x890] ss:$8 sps:$4 sm:$0xff]  }
  0xe1   :  { %2164 = vmatprep.subr.bf16.mxu1 %v2907_v47  ;;  %v3003_v47 = vld [vmem:[%s3952_s1 + $0x884] ss:$8 sps:$4 sm:$0xff]  }
  0xe3   :  { %2122 = vmatpush2.bf16.msra.mxu0 %v2902_v48  ;;  %v3001_v48 = vld [vmem:[%s3952_s1 + $0x880] ss:$8 sps:$4 sm:$0xff]  }
  0xe4   :  { %2165 = vmatpush2.bf16.msra.mxu1 %v2905_v49  ;;  %2123 = vmatprep.subr.bf16.mxu0 %v2910_v50  ;;  %v3004_v49 = vld [vmem:[%s3953_s0 + $0x40] ss:$72 sps:$4 sm:$0xff]  }
  0xe5   :  { %2166 = vmatprep.subr.bf16.mxu1 %v2913_v51 }
  0xe7   :  { %2124 = vmatpush2.bf16.msra.mxu0 %v2908_v52 }
  0xe8   :  { %2167 = vmatpush2.bf16.msra.mxu1 %v2911_v53  ;;  %2125 = vmatprep.subr.bf16.mxu0 %v2916_v54 }
  0xe9   :  { %2168 = vmatprep.subr.bf16.mxu1 %v2919_v55 }
  0xeb   :  { %2126 = vmatpush2.bf16.msra.mxu0 %v2914_v56 }
  0xec   :  { %2169 = vmatpush2.bf16.msra.mxu1 %v2917_v57  ;;  %2127 = vmatprep.subr.bf16.mxu0 %v2922_v58 }
  0xed   :  { %2170 = vmatprep.subr.bf16.mxu1 %v2925_v59 }
  0xef   :  { %2128 = vmatpush2.bf16.msra.mxu0 %v2920_v60 }
  0xf0   :  { %2171 = vmatpush2.bf16.msra.mxu1 %v2923_v61  ;;  %2129 = vmatprep.subr.bf16.mxu0 %v2928_v62 }
  0xf1   :  { %2172 = vmatprep.subr.bf16.mxu1 %v2931_v63 }
  0xf3   :  { %2130 = vmatpush2.bf16.msra.mxu0 %v2926_v0 }
  0xf4   :  { %2173 = vmatpush2.bf16.msra.mxu1 %v2929_v1  ;;  %2131 = vmatprep.subr.bf16.mxu0 %v2934_v2 }
  0xf5   :  { %2174 = vmatprep.subr.bf16.mxu1 %v2937_v3 }
  0xf7   :  { %2132 = vmatpush2.bf16.msra.mxu0 %v2932_v4 }
  0xf8   :  { %2175 = vmatpush2.bf16.msra.mxu1 %v2935_v5  ;;  %2133 = vmatprep.subr.bf16.mxu0 %v2940_v6 }
  0xf9   :  { %2176 = vmatprep.subr.bf16.mxu1 %v2943_v7 }
  0xfb   :  { %2134 = vmatpush2.bf16.msra.mxu0 %v2938_v8 }
  0xfc   :  { %2177 = vmatpush2.bf16.msra.mxu1 %v2941_v9  ;;  %2135 = vmatprep.subr.bf16.mxu0 %v2946_v10 }
  0xfd   :  { %2178 = vmatprep.subr.bf16.mxu1 %v2949_v11 }
  0xff   :  { %2136 = vmatpush2.bf16.msra.mxu0 %v2944_v12 }
 0x100   :  { %2179 = vmatpush2.bf16.msra.mxu1 %v2947_v13  ;;  %2191 = vmatprep.subr.bf16.mxu0 %v2955_v14 }
 0x102   :  { %2138 = vmatmul.mubr.bf16.vlgmr.msra.gmra.mxu0 %v2950_v15  ;;  %v1881_v50 = vpop.f32.mrf.mxu0 }
 0x103   :  { %2181 = vmatmul.mubr.bf16.vlgmr.msra.gmra.mxu1 %v2956_v16  ;;  %2192 = vmatpush1.bf16.msra.mxu0 %v2953_v17  ;;  %v1924_v51 = vpop.f32.mrf.mxu1 }
 0x104   :  { %2223 = vmatprep.mubr.bf16.mxu0 %v3006_v18  ;;  %2193 = vmatprep.subr.bf16.mxu0 %v2961_v19  ;;  %v1883_v52 = vpop.f32.mrf.mxu0  ;;  %v1925_v7 = vadd.f32 %v1924_v51, %v1881_v50 }
 0x105   :  { %v1926_v53 = vpop.f32.mrf.mxu1 }
 0x106   :  { %v1885_v54 = vpop.f32.mrf.mxu0  ;;  %v1927_v8 = vadd.f32 %v1926_v53, %v1883_v52 }
 0x107   :  { %2194 = vmatpush1.bf16.msra.mxu0 %v2959_v20  ;;  %v1928_v55 = vpop.f32.mrf.mxu1 }
 0x108   :  { %2195 = vmatprep.subr.bf16.mxu0 %v2964_v21  ;;  %v1887_v56 = vpop.f32.mrf.mxu0  ;;  %v1929_v12 = vadd.f32 %v1928_v55, %v1885_v54 }
 0x109   :  { %v1930_v58 = vpop.f32.mrf.mxu1 }
 0x10a   :  { %v1931_v15 = vadd.f32 %v1930_v58, %v1887_v56 }
 0x10b   :  { %2196 = vmatpush1.bf16.msra.mxu0 %v2962_v22 }
 0x10c   :  { %2197 = vmatprep.subr.bf16.mxu0 %v2967_v23 }
 0x10f   :  { %2198 = vmatpush1.bf16.msra.mxu0 %v2965_v24 }
 0x110   :  { %2199 = vmatprep.subr.bf16.mxu0 %v2970_v25 }
 0x113   :  { %2200 = vmatpush1.bf16.msra.mxu0 %v2968_v26 }
 0x114   :  { %2201 = vmatprep.subr.bf16.mxu0 %v2973_v27 }
 0x117   :  { %2202 = vmatpush1.bf16.msra.mxu0 %v2971_v28 }
 0x118   :  { %2203 = vmatprep.subr.bf16.mxu0 %v2976_v29 }
 0x11b   :  { %2204 = vmatpush1.bf16.msra.mxu0 %v2974_v30 }
 0x11c   :  { %2205 = vmatprep.subr.bf16.mxu0 %v2979_v31 }
 0x11f   :  { %2206 = vmatpush1.bf16.msra.mxu0 %v2977_v32 }
 0x120   :  { %2207 = vmatprep.subr.bf16.mxu0 %v2982_v33 }
 0x123   :  { %2208 = vmatpush2.bf16.msra.mxu0 %v2980_v34 }
 0x124   :  { %2209 = vmatprep.subr.bf16.mxu0 %v2985_v35 }
 0x127   :  { %2210 = vmatpush2.bf16.msra.mxu0 %v2983_v36 }
 0x128   :  { %2211 = vmatprep.subr.bf16.mxu0 %v2988_v37 }
 0x12b   :  { %2212 = vmatpush2.bf16.msra.mxu0 %v2986_v38 }
 0x12c   :  { %2213 = vmatprep.subr.bf16.mxu0 %v2991_v39 }
 0x12f   :  { %2214 = vmatpush2.bf16.msra.mxu0 %v2989_v40 }
 0x130   :  { %2215 = vmatprep.subr.bf16.mxu0 %v2994_v41 }
 0x133   :  { %2216 = vmatpush2.bf16.msra.mxu0 %v2992_v42 }
 0x134   :  { %2217 = vmatprep.subr.bf16.mxu0 %v2997_v43 }
 0x137   :  { %2218 = vmatpush2.bf16.msra.mxu0 %v2995_v44 }
 0x138   :  { %2219 = vmatprep.subr.bf16.mxu0 %v3000_v45 }
 0x13b   :  { %2220 = vmatpush2.bf16.msra.mxu0 %v2998_v46 }
 0x13c   :  { %2221 = vmatprep.subr.bf16.mxu0 %v3003_v47 }
 0x13f   :  { %2222 = vmatpush2.bf16.msra.mxu0 %v3001_v48 }
 0x142   :  { %2224 = vmatmul.mubr.bf16.vlgmr.msra.gmra.mxu0 %v3004_v49  ;;  %v1967_v57 = vpop.f32.mrf.mxu0 }
 0x143   :  { %v2010_v60 = vpop.f32.mrf.mxu1  ;;  %v1968_v9 = vadd.f32 %v1967_v57, %v1925_v7 }
 0x144   :  { %v1969_v59 = vpop.f32.mrf.mxu0 }
 0x145   :  { %v2012_v62 = vpop.f32.mrf.mxu1  ;;  %v1970_v13 = vadd.f32 %v1969_v59, %v1927_v8  ;;  %v2011_v16 = vadd.f32 %v2010_v60, %v1968_v9 }
 0x146   :  { %v1971_v61 = vpop.f32.mrf.mxu0 }
 0x147   :  { %v2014_v0 = vpop.f32.mrf.mxu1  ;;  %v1972_v17 = vadd.f32 %v1971_v61, %v1929_v12  ;;  %v2013_v19 = vadd.f32 %v2012_v62, %v1970_v13 }
 0x148   :  { %v1973_v63 = vpop.f32.mrf.mxu0 }
 0x149   :  { %v2016_v2 = vpop.f32.mrf.mxu1  ;;  %v1974_v20 = vadd.f32 %v1973_v63, %v1931_v15  ;;  %v2015_v24 = vadd.f32 %v2014_v0, %v1972_v17 }
 0x14b   :  { %v2017_v26 = vadd.f32 %v2016_v2, %v1974_v20 }
 0x182   :  { %v2053_v1 = vpop.f32.mrf.mxu0 }
 0x183   :  { %v2096_v4 = vpop.f32.mrf.mxu1  ;;  %v2054_v21 = vadd.f32 %v2053_v1, %v2011_v16 }
 0x184   :  { %v2055_v3 = vpop.f32.mrf.mxu0 }
 0x185   :  { %v2098_v6 = vpop.f32.mrf.mxu1  ;;  %v2056_v25 = vadd.f32 %v2055_v3, %v2013_v19  ;;  %v2097_v27 = vadd.f32 %v2096_v4, %v2054_v21 }
 0x186   :  { %v2057_v5 = vpop.f32.mrf.mxu0 }
 0x187   :  { %v2100_v11 = vpop.f32.mrf.mxu1  ;;  %v2058_v28 = vadd.f32 %v2057_v5, %v2015_v24  ;;  %v2099_v31 = vadd.f32 %v2098_v6, %v2056_v25 }
 0x188   :  { %v2059_v10 = vpop.f32.mrf.mxu0 }
 0x189   :  { %v2102_v18 = vpop.f32.mrf.mxu1  ;;  %v2060_v32 = vadd.f32 %v2059_v10, %v2017_v26  ;;  %v2101_v34 = vadd.f32 %v2100_v11, %v2058_v28 }
 0x18b   :  { %v2103_v38 = vadd.f32 %v2102_v18, %v2060_v32 }
 0x1c2   :  { %v2139_v14 = vpop.f32.mrf.mxu0 }
 0x1c3   :  { %v2182_v23 = vpop.f32.mrf.mxu1  ;;  %v2140_v33 = vadd.f32 %v2139_v14, %v2097_v27 }
 0x1c4   :  { %v2141_v22 = vpop.f32.mrf.mxu0 }
 0x1c5   :  { %v2184_v30 = vpop.f32.mrf.mxu1  ;;  %v2142_v35 = vadd.f32 %v2141_v22, %v2099_v31  ;;  %v2183_v39 = vadd.f32 %v2182_v23, %v2140_v33 }
 0x1c6   :  { %v2143_v29 = vpop.f32.mrf.mxu0 }
 0x1c7   :  { %v2186_v37 = vpop.f32.mrf.mxu1  ;;  %v2144_v40 = vadd.f32 %v2143_v29, %v2101_v34  ;;  %v2185_v42 = vadd.f32 %v2184_v30, %v2142_v35 }
 0x1c8   :  { %v2145_v36 = vpop.f32.mrf.mxu0 }
 0x1c9   :  { %v2146_v43 = vadd.f32 %v2145_v36, %v2103_v38  ;;  %v2188_v45 = vpop.f32.mrf.mxu1  ;;  %v2187_v47 = vadd.f32 %v2186_v37, %v2144_v40 }
 0x1cb   :  { %v2189_v50 = vadd.f32 %v2188_v45, %v2146_v43 }
 0x202   :  { %v2225_v41 = vpop.f32.mrf.mxu0 }
 0x203   :  { %v2226_v44 = vadd.f32 %v2225_v41, %v2183_v39 }
 0x204   :  { %v2227_v46 = vpop.f32.mrf.mxu0 }
 0x205   :  { %2234 = vst [vmem:[%s3954_s2] sm:$0xff] %v2226_v44  ;;  %v2228_v48 = vadd.f32 %v2227_v46, %v2185_v42 }
 0x206   :  { %v2229_v49 = vpop.f32.mrf.mxu0 }
 0x207   :  { %2235 = vst [vmem:[%s3954_s2 + $0x8] sm:$0xff] %v2228_v48  ;;  %v2230_v51 = vadd.f32 %v2229_v49, %v2187_v47 }
 0x208   :  { %v2231_v52 = vpop.f32.mrf.mxu0 }
 0x209   :  { %2236 = vst [vmem:[%s3954_s2 + $0x10] sm:$0xff] %v2230_v51  ;;  %v2232_v53 = vadd.f32 %v2231_v52, %v2189_v50 }
 0x20b   :  { %2237 = vst [vmem:[%s3954_s2 + $0x18] sm:$0xff] %v2232_v53 }

// kernel: encoder_forward.35
= control target key start
LH: loop header
LB: loop body
LE: loop exit
PB: predicated region body
PF: predicated region fallthrough
CT: control target
= control target key end

     0   :  { %s7775_s1 = inlined_call_operand.vmem [shape: bf16[2304,512], index: 1, kind: input, shape index: {}]   ;;  %s7776_s0 = inlined_call_operand.vmem [shape: bf16[16,2304], index: 0, kind: input, shape index: {}]   ;;  %s7777_s2 = inlined_call_operand.vmem [shape: f32[16,512], index: 2, kind: output, shape index: {}]  }
   0x1   :  { %v4955_v0 = vld [vmem:[%s7775_s1 + $0xe4] ss:$16 sps:$4 sm:$0xff]   ;;  %v4959_v2 = vld [vmem:[%s7775_s1 + $0xe0] ss:$16 sps:$4 sm:$0xff]  }
   0x2   :  { %v4957_v1 = vld [vmem:[%s7775_s1 + $0x2e4] ss:$16 sps:$4 sm:$0xff]   ;;  %3575 = vmatprep.subr.bf16.mxu0 %v4955_v0  ;;  %v4960_v3 = vld [vmem:[%s7775_s1 + $0x2e0] ss:$16 sps:$4 sm:$0xff]  }
   0x3   :  { %3618 = vmatprep.subr.bf16.mxu1 %v4957_v1  ;;  %v4961_v4 = vld [vmem:[%s7775_s1 + $0xc4] ss:$16 sps:$4 sm:$0xff]   ;;  %3576 = vmatpush1.bf16.msra.mxu0 %v4959_v2  ;;  %v4965_v6 = vld [vmem:[%s7775_s1 + $0xc0] ss:$16 sps:$4 sm:$0xff]  }
   0x4   :  { %3619 = vmatpush1.bf16.msra.mxu1 %v4960_v3  ;;  %v4963_v5 = vld [vmem:[%s7775_s1 + $0x2c4] ss:$16 sps:$4 sm:$0xff]   ;;  %3577 = vmatprep.subr.bf16.mxu0 %v4961_v4  ;;  %v4966_v7 = vld [vmem:[%s7775_s1 + $0x2c0] ss:$16 sps:$4 sm:$0xff]  }
   0x5   :  { %3620 = vmatprep.subr.bf16.mxu1 %v4963_v5  ;;  %v4967_v8 = vld [vmem:[%s7775_s1 + $0xa4] ss:$16 sps:$4 sm:$0xff]   ;;  %v4971_v10 = vld [vmem:[%s7775_s1 + $0xa0] ss:$16 sps:$4 sm:$0xff]  }
   0x6   :  { %v4969_v9 = vld [vmem:[%s7775_s1 + $0x2a4] ss:$16 sps:$4 sm:$0xff]   ;;  %v4972_v11 = vld [vmem:[%s7775_s1 + $0x2a0] ss:$16 sps:$4 sm:$0xff]  }
   0x7   :  { %3578 = vmatpush1.bf16.msra.mxu0 %v4965_v6  ;;  %v4973_v12 = vld [vmem:[%s7775_s1 + $0x84] ss:$16 sps:$4 sm:$0xff]   ;;  %v4977_v14 = vld [vmem:[%s7775_s1 + $0x80] ss:$16 sps:$4 sm:$0xff]  }
   0x8   :  { %3621 = vmatpush1.bf16.msra.mxu1 %v4966_v7  ;;  %3579 = vmatprep.subr.bf16.mxu0 %v4967_v8  ;;  %v4975_v13 = vld [vmem:[%s7775_s1 + $0x284] ss:$16 sps:$4 sm:$0xff]   ;;  %v4978_v15 = vld [vmem:[%s7775_s1 + $0x280] ss:$16 sps:$4 sm:$0xff]  }
   0x9   :  { %3622 = vmatprep.subr.bf16.mxu1 %v4969_v9  ;;  %v4979_v16 = vld [vmem:[%s7775_s1 + $0x64] ss:$16 sps:$4 sm:$0xff]   ;;  %v4983_v18 = vld [vmem:[%s7775_s1 + $0x60] ss:$16 sps:$4 sm:$0xff]  }
   0xa   :  { %v4981_v17 = vld [vmem:[%s7775_s1 + $0x264] ss:$16 sps:$4 sm:$0xff]   ;;  %v4984_v19 = vld [vmem:[%s7775_s1 + $0x260] ss:$16 sps:$4 sm:$0xff]  }
   0xb   :  { %3580 = vmatpush1.bf16.msra.mxu0 %v4971_v10  ;;  %v4985_v20 = vld [vmem:[%s7775_s1 + $0x44] ss:$16 sps:$4 sm:$0xff]   ;;  %v4989_v22 = vld [vmem:[%s7775_s1 + $0x40] ss:$16 sps:$4 sm:$0xff]  }
   0xc   :  { %3623 = vmatpush1.bf16.msra.mxu1 %v4972_v11  ;;  %3581 = vmatprep.subr.bf16.mxu0 %v4973_v12  ;;  %v4987_v21 = vld [vmem:[%s7775_s1 + $0x244] ss:$16 sps:$4 sm:$0xff]   ;;  %v4990_v23 = vld [vmem:[%s7775_s1 + $0x240] ss:$16 sps:$4 sm:$0xff]  }
   0xd   :  { %3624 = vmatprep.subr.bf16.mxu1 %v4975_v13  ;;  %v4991_v24 = vld [vmem:[%s7775_s1 + $0x24] ss:$16 sps:$4 sm:$0xff]   ;;  %v4995_v26 = vld [vmem:[%s7775_s1 + $0x20] ss:$16 sps:$4 sm:$0xff]  }
   0xe   :  { %v4993_v25 = vld [vmem:[%s7775_s1 + $0x224] ss:$16 sps:$4 sm:$0xff]   ;;  %v4996_v27 = vld [vmem:[%s7775_s1 + $0x220] ss:$16 sps:$4 sm:$0xff]  }
   0xf   :  { %3582 = vmatpush1.bf16.msra.mxu0 %v4977_v14  ;;  %v4997_v28 = vld [vmem:[%s7775_s1 + $0x4] ss:$16 sps:$4 sm:$0xff]   ;;  %v5001_v30 = vld [vmem:[%s7775_s1] ss:$16 sps:$4 sm:$0xff]  }
  0x10   :  { %3625 = vmatpush1.bf16.msra.mxu1 %v4978_v15  ;;  %3583 = vmatprep.subr.bf16.mxu0 %v4979_v16  ;;  %v4999_v29 = vld [vmem:[%s7775_s1 + $0x204] ss:$16 sps:$4 sm:$0xff]   ;;  %v5002_v31 = vld [vmem:[%s7775_s1 + $0x200] ss:$16 sps:$4 sm:$0xff]  }
  0x11   :  { %3626 = vmatprep.subr.bf16.mxu1 %v4981_v17  ;;  %v5003_v32 = vld [vmem:[%s7775_s1 + $0x1e4] ss:$16 sps:$4 sm:$0xff]   ;;  %v5007_v34 = vld [vmem:[%s7775_s1 + $0x1e0] ss:$16 sps:$4 sm:$0xff]  }
  0x12   :  { %v5005_v33 = vld [vmem:[%s7775_s1 + $0x3e4] ss:$16 sps:$4 sm:$0xff]   ;;  %v5008_v35 = vld [vmem:[%s7775_s1 + $0x3e0] ss:$16 sps:$4 sm:$0xff]  }
  0x13   :  { %3584 = vmatpush1.bf16.msra.mxu0 %v4983_v18  ;;  %v5009_v36 = vld [vmem:[%s7775_s1 + $0x1c4] ss:$16 sps:$4 sm:$0xff]   ;;  %v5013_v38 = vld [vmem:[%s7775_s1 + $0x1c0] ss:$16 sps:$4 sm:$0xff]  }
  0x14   :  { %3627 = vmatpush1.bf16.msra.mxu1 %v4984_v19  ;;  %3585 = vmatprep.subr.bf16.mxu0 %v4985_v20  ;;  %v5011_v37 = vld [vmem:[%s7775_s1 + $0x3c4] ss:$16 sps:$4 sm:$0xff]   ;;  %v5014_v39 = vld [vmem:[%s7775_s1 + $0x3c0] ss:$16 sps:$4 sm:$0xff]  }
  0x15   :  { %3628 = vmatprep.subr.bf16.mxu1 %v4987_v21  ;;  %v5015_v40 = vld [vmem:[%s7775_s1 + $0x1a4] ss:$16 sps:$4 sm:$0xff]   ;;  %v5019_v42 = vld [vmem:[%s7775_s1 + $0x1a0] ss:$16 sps:$4 sm:$0xff]  }
  0x16   :  { %v5017_v41 = vld [vmem:[%s7775_s1 + $0x3a4] ss:$16 sps:$4 sm:$0xff]   ;;  %v5020_v43 = vld [vmem:[%s7775_s1 + $0x3a0] ss:$16 sps:$4 sm:$0xff]  }
  0x17   :  { %3586 = vmatpush1.bf16.msra.mxu0 %v4989_v22  ;;  %v5021_v44 = vld [vmem:[%s7775_s1 + $0x184] ss:$16 sps:$4 sm:$0xff]   ;;  %v5025_v46 = vld [vmem:[%s7775_s1 + $0x180] ss:$16 sps:$4 sm:$0xff]  }
  0x18   :  { %3629 = vmatpush1.bf16.msra.mxu1 %v4990_v23  ;;  %3587 = vmatprep.subr.bf16.mxu0 %v4991_v24  ;;  %v5023_v45 = vld [vmem:[%s7775_s1 + $0x384] ss:$16 sps:$4 sm:$0xff]   ;;  %v5026_v47 = vld [vmem:[%s7775_s1 + $0x380] ss:$16 sps:$4 sm:$0xff]  }
  0x19   :  { %3630 = vmatprep.subr.bf16.mxu1 %v4993_v25  ;;  %v5027_v48 = vld [vmem:[%s7775_s1 + $0x164] ss:$16 sps:$4 sm:$0xff]   ;;  %v5031_v52 = vld [vmem:[%s7775_s1 + $0x160] ss:$16 sps:$4 sm:$0xff]  }
  0x1a   :  { %v5053_v49 = vld [vmem:[%s7776_s0 + $0x4] ss:$72 sps:$4 sm:$0xff]   ;;  %v5032_v53 = vld [vmem:[%s7775_s1 + $0x360] ss:$16 sps:$4 sm:$0xff]  }
  0x1b   :  { %3588 = vmatpush1.bf16.msra.mxu0 %v4995_v26  ;;  %v5029_v50 = vld [vmem:[%s7775_s1 + $0x364] ss:$16 sps:$4 sm:$0xff]   ;;  %3607 = vmatprep.mubr.bf16.mxu0 %v5053_v49  ;;  %v5037_v56 = vld [vmem:[%s7775_s1 + $0x140] ss:$16 sps:$4 sm:$0xff]  }
  0x1c   :  { %3631 = vmatpush1.bf16.msra.mxu1 %v4996_v27  ;;  %3589 = vmatprep.subr.bf16.mxu0 %v4997_v28  ;;  %v5056_v51 = vld [vmem:[%s7776_s0 + $0xc] ss:$72 sps:$4 sm:$0xff]   ;;  %v5038_v57 = vld [vmem:[%s7775_s1 + $0x340] ss:$16 sps:$4 sm:$0xff]  }
  0x1d   :  { %3632 = vmatprep.subr.bf16.mxu1 %v4999_v29  ;;  %3650 = vmatprep.mubr.bf16.mxu1 %v5056_v51  ;;  %v5033_v54 = vld [vmem:[%s7775_s1 + $0x144] ss:$16 sps:$4 sm:$0xff]   ;;  %v5043_v60 = vld [vmem:[%s7775_s1 + $0x120] ss:$16 sps:$4 sm:$0xff]  }
  0x1e   :  { %v5035_v55 = vld [vmem:[%s7775_s1 + $0x344] ss:$16 sps:$4 sm:$0xff]   ;;  %v5044_v61 = vld [vmem:[%s7775_s1 + $0x320] ss:$16 sps:$4 sm:$0xff]  }
  0x1f   :  { %3590 = vmatpush1.bf16.msra.mxu0 %v5001_v30  ;;  %v5039_v58 = vld [vmem:[%s7775_s1 + $0x124] ss:$16 sps:$4 sm:$0xff]   ;;  %v5049_v0 = vld [vmem:[%s7775_s1 + $0x100] ss:$16 sps:$4 sm:$0xff]  }
  0x20   :  { %3633 = vmatpush1.bf16.msra.mxu1 %v5002_v31  ;;  %3591 = vmatprep.subr.bf16.mxu0 %v5003_v32  ;;  %v5041_v59 = vld [vmem:[%s7775_s1 + $0x324] ss:$16 sps:$4 sm:$0xff]   ;;  %v5050_v1 = vld [vmem:[%s7775_s1 + $0x300] ss:$16 sps:$4 sm:$0xff]  }
  0x21   :  { %3634 = vmatprep.subr.bf16.mxu1 %v5005_v33  ;;  %v5045_v62 = vld [vmem:[%s7775_s1 + $0x104] ss:$16 sps:$4 sm:$0xff]   ;;  %v5051_v4 = vld [vmem:[%s7776_s0] ss:$72 sps:$4 sm:$0xff]  }
  0x22   :  { %v5047_v63 = vld [vmem:[%s7775_s1 + $0x304] ss:$16 sps:$4 sm:$0xff]   ;;  %v5054_v5 = vld [vmem:[%s7776_s0 + $0x8] ss:$72 sps:$4 sm:$0xff]  }
  0x23   :  { %3592 = vmatpush2.bf16.msra.mxu0 %v5007_v34  ;;  %v5059_v2 = vld [vmem:[%s7775_s1 + $0x4e4] ss:$16 sps:$4 sm:$0xff]   ;;  %v5057_v6 = vld [vmem:[%s7775_s1 + $0x4e0] ss:$16 sps:$4 sm:$0xff]  }
  0x24   :  { %3635 = vmatpush2.bf16.msra.mxu1 %v5008_v35  ;;  %3593 = vmatprep.subr.bf16.mxu0 %v5009_v36  ;;  %v5062_v3 = vld [vmem:[%s7775_s1 + $0x6e4] ss:$16 sps:$4 sm:$0xff]   ;;  %v5060_v7 = vld [vmem:[%s7775_s1 + $0x6e0] ss:$16 sps:$4 sm:$0xff]  }
  0x25   :  { %3636 = vmatprep.subr.bf16.mxu1 %v5011_v37  ;;  %v5065_v8 = vld [vmem:[%s7775_s1 + $0x4c4] ss:$16 sps:$4 sm:$0xff]   ;;  %v5063_v10 = vld [vmem:[%s7775_s1 + $0x4c0] ss:$16 sps:$4 sm:$0xff]  }
  0x26   :  { %v5068_v9 = vld [vmem:[%s7775_s1 + $0x6c4] ss:$16 sps:$4 sm:$0xff]   ;;  %v5066_v11 = vld [vmem:[%s7775_s1 + $0x6c0] ss:$16 sps:$4 sm:$0xff]  }
  0x27   :  { %3594 = vmatpush2.bf16.msra.mxu0 %v5013_v38  ;;  %v5071_v12 = vld [vmem:[%s7775_s1 + $0x4a4] ss:$16 sps:$4 sm:$0xff]   ;;  %v5069_v14 = vld [vmem:[%s7775_s1 + $0x4a0] ss:$16 sps:$4 sm:$0xff]  }
  0x28   :  { %3637 = vmatpush2.bf16.msra.mxu1 %v5014_v39  ;;  %3595 = vmatprep.subr.bf16.mxu0 %v5015_v40  ;;  %v5074_v13 = vld [vmem:[%s7775_s1 + $0x6a4] ss:$16 sps:$4 sm:$0xff]   ;;  %v5072_v15 = vld [vmem:[%s7775_s1 + $0x6a0] ss:$16 sps:$4 sm:$0xff]  }
  0x29   :  { %3638 = vmatprep.subr.bf16.mxu1 %v5017_v41  ;;  %v5077_v16 = vld [vmem:[%s7775_s1 + $0x484] ss:$16 sps:$4 sm:$0xff]   ;;  %v5075_v18 = vld [vmem:[%s7775_s1 + $0x480] ss:$16 sps:$4 sm:$0xff]  }
  0x2a   :  { %v5080_v17 = vld [vmem:[%s7775_s1 + $0x684] ss:$16 sps:$4 sm:$0xff]   ;;  %v5078_v19 = vld [vmem:[%s7775_s1 + $0x680] ss:$16 sps:$4 sm:$0xff]  }
  0x2b   :  { %3596 = vmatpush2.bf16.msra.mxu0 %v5019_v42  ;;  %v5083_v20 = vld [vmem:[%s7775_s1 + $0x464] ss:$16 sps:$4 sm:$0xff]   ;;  %v5081_v22 = vld [vmem:[%s7775_s1 + $0x460] ss:$16 sps:$4 sm:$0xff]  }
  0x2c   :  { %3639 = vmatpush2.bf16.msra.mxu1 %v5020_v43  ;;  %3597 = vmatprep.subr.bf16.mxu0 %v5021_v44  ;;  %v5086_v21 = vld [vmem:[%s7775_s1 + $0x664] ss:$16 sps:$4 sm:$0xff]   ;;  %v5084_v23 = vld [vmem:[%s7775_s1 + $0x660] ss:$16 sps:$4 sm:$0xff]  }
  0x2d   :  { %3640 = vmatprep.subr.bf16.mxu1 %v5023_v45  ;;  %v5089_v24 = vld [vmem:[%s7775_s1 + $0x444] ss:$16 sps:$4 sm:$0xff]   ;;  %v5087_v26 = vld [vmem:[%s7775_s1 + $0x440] ss:$16 sps:$4 sm:$0xff]  }
  0x2e   :  { %v5092_v25 = vld [vmem:[%s7775_s1 + $0x644] ss:$16 sps:$4 sm:$0xff]   ;;  %v5090_v27 = vld [vmem:[%s7775_s1 + $0x640] ss:$16 sps:$4 sm:$0xff]  }
  0x2f   :  { %3598 = vmatpush2.bf16.msra.mxu0 %v5025_v46  ;;  %v5095_v28 = vld [vmem:[%s7775_s1 + $0x424] ss:$16 sps:$4 sm:$0xff]   ;;  %v5093_v30 = vld [vmem:[%s7775_s1 + $0x420] ss:$16 sps:$4 sm:$0xff]  }
  0x30   :  { %3641 = vmatpush2.bf16.msra.mxu1 %v5026_v47  ;;  %3599 = vmatprep.subr.bf16.mxu0 %v5027_v48  ;;  %v5098_v29 = vld [vmem:[%s7775_s1 + $0x624] ss:$16 sps:$4 sm:$0xff]   ;;  %v5096_v31 = vld [vmem:[%s7775_s1 + $0x620] ss:$16 sps:$4 sm:$0xff]  }
  0x31   :  { %3642 = vmatprep.subr.bf16.mxu1 %v5029_v50  ;;  %v5101_v32 = vld [vmem:[%s7775_s1 + $0x404] ss:$16 sps:$4 sm:$0xff]   ;;  %v5099_v36 = vld [vmem:[%s7775_s1 + $0x400] ss:$16 sps:$4 sm:$0xff]  }
  0x32   :  { %v5104_v33 = vld [vmem:[%s7775_s1 + $0x604] ss:$16 sps:$4 sm:$0xff]   ;;  %v5102_v37 = vld [vmem:[%s7775_s1 + $0x600] ss:$16 sps:$4 sm:$0xff]  }
  0x33   :  { %3600 = vmatpush2.bf16.msra.mxu0 %v5031_v52  ;;  %v5155_v34 = vld [vmem:[%s7776_s0 + $0x14] ss:$72 sps:$4 sm:$0xff]   ;;  %v5105_v40 = vld [vmem:[%s7775_s1 + $0x5e0] ss:$16 sps:$4 sm:$0xff]  }
  0x34   :  { %3643 = vmatpush2.bf16.msra.mxu1 %v5032_v53  ;;  %3601 = vmatprep.subr.bf16.mxu0 %v5033_v54  ;;  %v5158_v35 = vld [vmem:[%s7776_s0 + $0x1c] ss:$72 sps:$4 sm:$0xff]   ;;  %v5108_v41 = vld [vmem:[%s7775_s1 + $0x7e0] ss:$16 sps:$4 sm:$0xff]  }
  0x35   :  { %3644 = vmatprep.subr.bf16.mxu1 %v5035_v55  ;;  %v5107_v38 = vld [vmem:[%s7775_s1 + $0x5e4] ss:$16 sps:$4 sm:$0xff]   ;;  %v5111_v44 = vld [vmem:[%s7775_s1 + $0x5c0] ss:$16 sps:$4 sm:$0xff]  }
  0x36   :  { %v5110_v39 = vld [vmem:[%s7775_s1 + $0x7e4] ss:$16 sps:$4 sm:$0xff]   ;;  %v5114_v45 = vld [vmem:[%s7775_s1 + $0x7c0] ss:$16 sps:$4 sm:$0xff]  }
  0x37   :  { %3602 = vmatpush2.bf16.msra.mxu0 %v5037_v56  ;;  %v5113_v42 = vld [vmem:[%s7775_s1 + $0x5c4] ss:$16 sps:$4 sm:$0xff]   ;;  %v5117_v48 = vld [vmem:[%s7775_s1 + $0x5a0] ss:$16 sps:$4 sm:$0xff]  }
  0x38   :  { %3645 = vmatpush2.bf16.msra.mxu1 %v5038_v57  ;;  %3603 = vmatprep.subr.bf16.mxu0 %v5039_v58  ;;  %v5116_v43 = vld [vmem:[%s7775_s1 + $0x7c4] ss:$16 sps:$4 sm:$0xff]   ;;  %v5120_v49 = vld [vmem:[%s7775_s1 + $0x7a0] ss:$16 sps:$4 sm:$0xff]  }
  0x39   :  { %3646 = vmatprep.subr.bf16.mxu1 %v5041_v59  ;;  %v5119_v46 = vld [vmem:[%s7775_s1 + $0x5a4] ss:$16 sps:$4 sm:$0xff]   ;;  %v5123_v52 = vld [vmem:[%s7775_s1 + $0x580] ss:$16 sps:$4 sm:$0xff]  }
  0x3a   :  { %v5122_v47 = vld [vmem:[%s7775_s1 + $0x7a4] ss:$16 sps:$4 sm:$0xff]   ;;  %v5126_v53 = vld [vmem:[%s7775_s1 + $0x780] ss:$16 sps:$4 sm:$0xff]  }
  0x3b   :  { %3604 = vmatpush2.bf16.msra.mxu0 %v5043_v60  ;;  %v5125_v50 = vld [vmem:[%s7775_s1 + $0x584] ss:$16 sps:$4 sm:$0xff]   ;;  %v5129_v56 = vld [vmem:[%s7775_s1 + $0x560] ss:$16 sps:$4 sm:$0xff]  }
  0x3c   :  { %3647 = vmatpush2.bf16.msra.mxu1 %v5044_v61  ;;  %3605 = vmatprep.subr.bf16.mxu0 %v5045_v62  ;;  %v5128_v51 = vld [vmem:[%s7775_s1 + $0x784] ss:$16 sps:$4 sm:$0xff]   ;;  %v5132_v57 = vld [vmem:[%s7775_s1 + $0x760] ss:$16 sps:$4 sm:$0xff]  }
  0x3d   :  { %3648 = vmatprep.subr.bf16.mxu1 %v5047_v63  ;;  %v5131_v54 = vld [vmem:[%s7775_s1 + $0x564] ss:$16 sps:$4 sm:$0xff]   ;;  %v5135_v60 = vld [vmem:[%s7775_s1 + $0x540] ss:$16 sps:$4 sm:$0xff]  }
  0x3e   :  { %v5134_v55 = vld [vmem:[%s7775_s1 + $0x764] ss:$16 sps:$4 sm:$0xff]   ;;  %v5138_v61 = vld [vmem:[%s7775_s1 + $0x740] ss:$16 sps:$4 sm:$0xff]  }
  0x3f   :  { %3606 = vmatpush2.bf16.msra.mxu0 %v5049_v0  ;;  %v5137_v58 = vld [vmem:[%s7775_s1 + $0x544] ss:$16 sps:$4 sm:$0xff]   ;;  %v5141_v0 = vld [vmem:[%s7775_s1 + $0x520] ss:$16 sps:$4 sm:$0xff]  }
  0x40   :  { %3649 = vmatpush2.bf16.msra.mxu1 %v5050_v1  ;;  %3661 = vmatprep.subr.bf16.mxu0 %v5059_v2  ;;  %v5140_v59 = vld [vmem:[%s7775_s1 + $0x744] ss:$16 sps:$4 sm:$0xff]   ;;  %v5144_v1 = vld [vmem:[%s7775_s1 + $0x720] ss:$16 sps:$4 sm:$0xff]  }
  0x41   :  { %3704 = vmatprep.subr.bf16.mxu1 %v5062_v3  ;;  %v5143_v62 = vld [vmem:[%s7775_s1 + $0x524] ss:$16 sps:$4 sm:$0xff]  }
  0x42   :  { %3608 = vmatmul.mubr.bf16.vlgmr.msra.gmra.mxu0 %v5051_v4  ;;  %v5146_v63 = vld [vmem:[%s7775_s1 + $0x724] ss:$16 sps:$4 sm:$0xff]   ;;  %v5147_v4 = vld [vmem:[%s7775_s1 + $0x500] ss:$16 sps:$4 sm:$0xff]  }
  0x43   :  { %3651 = vmatmul.mubr.bf16.vlgmr.msra.gmra.mxu1 %v5054_v5  ;;  %3662 = vmatpush1.bf16.msra.mxu0 %v5057_v6  ;;  %v5149_v2 = vld [vmem:[%s7775_s1 + $0x504] ss:$16 sps:$4 sm:$0xff]   ;;  %v5150_v5 = vld [vmem:[%s7775_s1 + $0x700] ss:$16 sps:$4 sm:$0xff]  }
  0x44   :  { %3705 = vmatpush1.bf16.msra.mxu1 %v5060_v7  ;;  %3663 = vmatprep.subr.bf16.mxu0 %v5065_v8  ;;  %v5152_v3 = vld [vmem:[%s7775_s1 + $0x704] ss:$16 sps:$4 sm:$0xff]   ;;  %v5153_v8 = vld [vmem:[%s7776_s0 + $0x10] ss:$72 sps:$4 sm:$0xff]  }
  0x45   :  { %3706 = vmatprep.subr.bf16.mxu1 %v5068_v9  ;;  %3693 = vmatprep.mubr.bf16.mxu0 %v5155_v34  ;;  %v5161_v6 = vld [vmem:[%s7775_s1 + $0x8e4] ss:$16 sps:$4 sm:$0xff]   ;;  %v5156_v9 = vld [vmem:[%s7776_s0 + $0x18] ss:$72 sps:$4 sm:$0xff]  }
  0x46   :  { %3736 = vmatprep.mubr.bf16.mxu1 %v5158_v35  ;;  %v5164_v7 = vld [vmem:[%s7775_s1 + $0xae4] ss:$16 sps:$4 sm:$0xff]  }
  0x47   :  { %3664 = vmatpush1.bf16.msra.mxu0 %v5063_v10  ;;  %v5159_v10 = vld [vmem:[%s7775_s1 + $0x8e0] ss:$16 sps:$4 sm:$0xff]   ;;  %v5197_v34 = vld [vmem:[%s7775_s1 + $0x824] ss:$16 sps:$4 sm:$0xff]  }
  0x48   :  { %3707 = vmatpush1.bf16.msra.mxu1 %v5066_v11  ;;  %3665 = vmatprep.subr.bf16.mxu0 %v5071_v12  ;;  %v5162_v11 = vld [vmem:[%s7775_s1 + $0xae0] ss:$16 sps:$4 sm:$0xff]   ;;  %v5167_v12 = vld [vmem:[%s7775_s1 + $0x8c4] ss:$16 sps:$4 sm:$0xff]  }
  0x49   :  { %3708 = vmatprep.subr.bf16.mxu1 %v5074_v13  ;;  %v5170_v13 = vld [vmem:[%s7775_s1 + $0xac4] ss:$16 sps:$4 sm:$0xff]  }
  0x4a   :  { %v5200_v35 = vld [vmem:[%s7775_s1 + $0xa24] ss:$16 sps:$4 sm:$0xff]  }
  0x4b   :  { %3666 = vmatpush1.bf16.msra.mxu0 %v5069_v14  ;;  %v5165_v14 = vld [vmem:[%s7775_s1 + $0x8c0] ss:$16 sps:$4 sm:$0xff]  }
  0x4c   :  { %3709 = vmatpush1.bf16.msra.mxu1 %v5072_v15  ;;  %3667 = vmatprep.subr.bf16.mxu0 %v5077_v16  ;;  %v5168_v15 = vld [vmem:[%s7775_s1 + $0xac0] ss:$16 sps:$4 sm:$0xff]   ;;  %v5173_v16 = vld [vmem:[%s7775_s1 + $0x8a4] ss:$16 sps:$4 sm:$0xff]  }
  0x4d   :  { %3710 = vmatprep.subr.bf16.mxu1 %v5080_v17  ;;  %v5176_v17 = vld [vmem:[%s7775_s1 + $0xaa4] ss:$16 sps:$4 sm:$0xff]  }
  0x4f   :  { %3668 = vmatpush1.bf16.msra.mxu0 %v5075_v18  ;;  %v5171_v18 = vld [vmem:[%s7775_s1 + $0x8a0] ss:$16 sps:$4 sm:$0xff]  }
  0x50   :  { %3711 = vmatpush1.bf16.msra.mxu1 %v5078_v19  ;;  %3669 = vmatprep.subr.bf16.mxu0 %v5083_v20  ;;  %v5257_v19 = vld [vmem:[%s7776_s0 + $0x24] ss:$72 sps:$4 sm:$0xff]   ;;  %v5174_v20 = vld [vmem:[%s7775_s1 + $0xaa0] ss:$16 sps:$4 sm:$0xff]  }
  0x51   :  { %3712 = vmatprep.subr.bf16.mxu1 %v5086_v21  ;;  %v5260_v21 = vld [vmem:[%s7776_s0 + $0x2c] ss:$72 sps:$4 sm:$0xff]  }
  0x53   :  { %3670 = vmatpush1.bf16.msra.mxu0 %v5081_v22  ;;  %v5179_v22 = vld [vmem:[%s7775_s1 + $0x884] ss:$16 sps:$4 sm:$0xff]  }
  0x54   :  { %3713 = vmatpush1.bf16.msra.mxu1 %v5084_v23  ;;  %3671 = vmatprep.subr.bf16.mxu0 %v5089_v24  ;;  %v5182_v23 = vld [vmem:[%s7775_s1 + $0xa84] ss:$16 sps:$4 sm:$0xff]   ;;  %v5177_v24 = vld [vmem:[%s7775_s1 + $0x880] ss:$16 sps:$4 sm:$0xff]  }
  0x55   :  { %3714 = vmatprep.subr.bf16.mxu1 %v5092_v25  ;;  %v5180_v25 = vld [vmem:[%s7775_s1 + $0xa80] ss:$16 sps:$4 sm:$0xff]  }
  0x57   :  { %3672 = vmatpush1.bf16.msra.mxu0 %v5087_v26  ;;  %v5185_v26 = vld [vmem:[%s7775_s1 + $0x864] ss:$16 sps:$4 sm:$0xff]  }
  0x58   :  { %3715 = vmatpush1.bf16.msra.mxu1 %v5090_v27  ;;  %3673 = vmatprep.subr.bf16.mxu0 %v5095_v28  ;;  %v5188_v27 = vld [vmem:[%s7775_s1 + $0xa64] ss:$16 sps:$4 sm:$0xff]   ;;  %v5183_v28 = vld [vmem:[%s7775_s1 + $0x860] ss:$16 sps:$4 sm:$0xff]  }
  0x59   :  { %3716 = vmatprep.subr.bf16.mxu1 %v5098_v29  ;;  %v5186_v29 = vld [vmem:[%s7775_s1 + $0xa60] ss:$16 sps:$4 sm:$0xff]  }
  0x5b   :  { %3674 = vmatpush1.bf16.msra.mxu0 %v5093_v30  ;;  %v5191_v30 = vld [vmem:[%s7775_s1 + $0x844] ss:$16 sps:$4 sm:$0xff]  }
  0x5c   :  { %3717 = vmatpush1.bf16.msra.mxu1 %v5096_v31  ;;  %3675 = vmatprep.subr.bf16.mxu0 %v5101_v32  ;;  %v5194_v31 = vld [vmem:[%s7775_s1 + $0xa44] ss:$16 sps:$4 sm:$0xff]   ;;  %v5189_v32 = vld [vmem:[%s7775_s1 + $0x840] ss:$16 sps:$4 sm:$0xff]  }
  0x5d   :  { %3718 = vmatprep.subr.bf16.mxu1 %v5104_v33  ;;  %v5192_v33 = vld [vmem:[%s7775_s1 + $0xa40] ss:$16 sps:$4 sm:$0xff]  }
  0x5f   :  { %3676 = vmatpush1.bf16.msra.mxu0 %v5099_v36  ;;  %v5195_v36 = vld [vmem:[%s7775_s1 + $0x820] ss:$16 sps:$4 sm:$0xff]  }
  0x60   :  { %3719 = vmatpush1.bf16.msra.mxu1 %v5102_v37  ;;  %3677 = vmatprep.subr.bf16.mxu0 %v5107_v38  ;;  %v5198_v37 = vld [vmem:[%s7775_s1 + $0xa20] ss:$16 sps:$4 sm:$0xff]   ;;  %v5203_v38 = vld [vmem:[%s7775_s1 + $0x804] ss:$16 sps:$4 sm:$0xff]  }
  0x61   :  { %3720 = vmatprep.subr.bf16.mxu1 %v5110_v39  ;;  %v5206_v39 = vld [vmem:[%s7775_s1 + $0xa04] ss:$16 sps:$4 sm:$0xff]  }
  0x63   :  { %3678 = vmatpush2.bf16.msra.mxu0 %v5105_v40  ;;  %v5201_v40 = vld [vmem:[%s7775_s1 + $0x800] ss:$16 sps:$4 sm:$0xff]  }
  0x64   :  { %3721 = vmatpush2.bf16.msra.mxu1 %v5108_v41  ;;  %3679 = vmatprep.subr.bf16.mxu0 %v5113_v42  ;;  %v5204_v41 = vld [vmem:[%s7775_s1 + $0xa00] ss:$16 sps:$4 sm:$0xff]   ;;  %v5209_v42 = vld [vmem:[%s7775_s1 + $0x9e4] ss:$16 sps:$4 sm:$0xff]  }
  0x65   :  { %3722 = vmatprep.subr.bf16.mxu1 %v5116_v43  ;;  %v5212_v43 = vld [vmem:[%s7775_s1 + $0xbe4] ss:$16 sps:$4 sm:$0xff]  }
  0x67   :  { %3680 = vmatpush2.bf16.msra.mxu0 %v5111_v44  ;;  %v5207_v44 = vld [vmem:[%s7775_s1 + $0x9e0] ss:$16 sps:$4 sm:$0xff]  }
  0x68   :  { %3723 = vmatpush2.bf16.msra.mxu1 %v5114_v45  ;;  %3681 = vmatprep.subr.bf16.mxu0 %v5119_v46  ;;  %v5210_v45 = vld [vmem:[%s7775_s1 + $0xbe0] ss:$16 sps:$4 sm:$0xff]   ;;  %v5215_v46 = vld [vmem:[%s7775_s1 + $0x9c4] ss:$16 sps:$4 sm:$0xff]  }
  0x69   :  { %3724 = vmatprep.subr.bf16.mxu1 %v5122_v47  ;;  %v5218_v47 = vld [vmem:[%s7775_s1 + $0xbc4] ss:$16 sps:$4 sm:$0xff]  }
  0x6b   :  { %3682 = vmatpush2.bf16.msra.mxu0 %v5117_v48  ;;  %v5213_v48 = vld [vmem:[%s7775_s1 + $0x9c0] ss:$16 sps:$4 sm:$0xff]  }
  0x6c   :  { %3725 = vmatpush2.bf16.msra.mxu1 %v5120_v49  ;;  %3683 = vmatprep.subr.bf16.mxu0 %v5125_v50  ;;  %v5216_v49 = vld [vmem:[%s7775_s1 + $0xbc0] ss:$16 sps:$4 sm:$0xff]   ;;  %v5221_v50 = vld [vmem:[%s7775_s1 + $0x9a4] ss:$16 sps:$4 sm:$0xff]  }
  0x6d   :  { %3726 = vmatprep.subr.bf16.mxu1 %v5128_v51  ;;  %v5224_v51 = vld [vmem:[%s7775_s1 + $0xba4] ss:$16 sps:$4 sm:$0xff]  }
  0x6f   :  { %3684 = vmatpush2.bf16.msra.mxu0 %v5123_v52  ;;  %v5219_v52 = vld [vmem:[%s7775_s1 + $0x9a0] ss:$16 sps:$4 sm:$0xff]  }
  0x70   :  { %3727 = vmatpush2.bf16.msra.mxu1 %v5126_v53  ;;  %3685 = vmatprep.subr.bf16.mxu0 %v5131_v54  ;;  %v5222_v53 = vld [vmem:[%s7775_s1 + $0xba0] ss:$16 sps:$4 sm:$0xff]   ;;  %v5227_v54 = vld [vmem:[%s7775_s1 + $0x984] ss:$16 sps:$4 sm:$0xff]  }
  0x71   :  { %3728 = vmatprep.subr.bf16.mxu1 %v5134_v55  ;;  %v5230_v55 = vld [vmem:[%s7775_s1 + $0xb84] ss:$16 sps:$4 sm:$0xff]  }
  0x73   :  { %3686 = vmatpush2.bf16.msra.mxu0 %v5129_v56  ;;  %v5225_v56 = vld [vmem:[%s7775_s1 + $0x980] ss:$16 sps:$4 sm:$0xff]  }
  0x74   :  { %3729 = vmatpush2.bf16.msra.mxu1 %v5132_v57  ;;  %3687 = vmatprep.subr.bf16.mxu0 %v5137_v58  ;;  %v5228_v57 = vld [vmem:[%s7775_s1 + $0xb80] ss:$16 sps:$4 sm:$0xff]   ;;  %v5233_v58 = vld [vmem:[%s7775_s1 + $0x964] ss:$16 sps:$4 sm:$0xff]  }
  0x75   :  { %3730 = vmatprep.subr.bf16.mxu1 %v5140_v59  ;;  %v5236_v59 = vld [vmem:[%s7775_s1 + $0xb64] ss:$16 sps:$4 sm:$0xff]  }
  0x77   :  { %3688 = vmatpush2.bf16.msra.mxu0 %v5135_v60  ;;  %v5231_v60 = vld [vmem:[%s7775_s1 + $0x960] ss:$16 sps:$4 sm:$0xff]  }
  0x78   :  { %3731 = vmatpush2.bf16.msra.mxu1 %v5138_v61  ;;  %3689 = vmatprep.subr.bf16.mxu0 %v5143_v62  ;;  %v5234_v61 = vld [vmem:[%s7775_s1 + $0xb60] ss:$16 sps:$4 sm:$0xff]   ;;  %v5239_v62 = vld [vmem:[%s7775_s1 + $0x944] ss:$16 sps:$4 sm:$0xff]  }
  0x79   :  { %3732 = vmatprep.subr.bf16.mxu1 %v5146_v63  ;;  %v5242_v63 = vld [vmem:[%s7775_s1 + $0xb44] ss:$16 sps:$4 sm:$0xff]  }
  0x7b   :  { %3690 = vmatpush2.bf16.msra.mxu0 %v5141_v0  ;;  %v5237_v0 = vld [vmem:[%s7775_s1 + $0x940] ss:$16 sps:$4 sm:$0xff]  }
  0x7c   :  { %3733 = vmatpush2.bf16.msra.mxu1 %v5144_v1  ;;  %3691 = vmatprep.subr.bf16.mxu0 %v5149_v2  ;;  %v5240_v1 = vld [vmem:[%s7775_s1 + $0xb40] ss:$16 sps:$4 sm:$0xff]   ;;  %v5245_v2 = vld [vmem:[%s7775_s1 + $0x924] ss:$16 sps:$4 sm:$0xff]  }
  0x7d   :  { %3734 = vmatprep.subr.bf16.mxu1 %v5152_v3  ;;  %v5248_v3 = vld [vmem:[%s7775_s1 + $0xb24] ss:$16 sps:$4 sm:$0xff]  }
  0x7f   :  { %3692 = vmatpush2.bf16.msra.mxu0 %v5147_v4  ;;  %v5243_v4 = vld [vmem:[%s7775_s1 + $0x920] ss:$16 sps:$4 sm:$0xff]  }
  0x80   :  { %3735 = vmatpush2.bf16.msra.mxu1 %v5150_v5  ;;  %3747 = vmatprep.subr.bf16.mxu0 %v5161_v6  ;;  %v5246_v5 = vld [vmem:[%s7775_s1 + $0xb20] ss:$16 sps:$4 sm:$0xff]   ;;  %v5251_v6 = vld [vmem:[%s7775_s1 + $0x904] ss:$16 sps:$4 sm:$0xff]  }
  0x81   :  { %3790 = vmatprep.subr.bf16.mxu1 %v5164_v7  ;;  %v5254_v7 = vld [vmem:[%s7775_s1 + $0xb04] ss:$16 sps:$4 sm:$0xff]  }
  0x82   :  { %3694 = vmatmul.mubr.bf16.vlgmr.msra.gmra.mxu0 %v5153_v8  ;;  %v5249_v8 = vld [vmem:[%s7775_s1 + $0x900] ss:$16 sps:$4 sm:$0xff]  }
  0x83   :  { %3737 = vmatmul.mubr.bf16.vlgmr.msra.gmra.mxu1 %v5156_v9  ;;  %3748 = vmatpush1.bf16.msra.mxu0 %v5159_v10  ;;  %v5252_v9 = vld [vmem:[%s7775_s1 + $0xb00] ss:$16 sps:$4 sm:$0xff]   ;;  %v5263_v10 = vld [vmem:[%s7775_s1 + $0xce4] ss:$16 sps:$4 sm:$0xff]  }
  0x84   :  { %3791 = vmatpush1.bf16.msra.mxu1 %v5162_v11  ;;  %3749 = vmatprep.subr.bf16.mxu0 %v5167_v12  ;;  %v5266_v11 = vld [vmem:[%s7775_s1 + $0xee4] ss:$16 sps:$4 sm:$0xff]   ;;  %v5255_v12 = vld [vmem:[%s7776_s0 + $0x20] ss:$72 sps:$4 sm:$0xff]  }
  0x85   :  { %3792 = vmatprep.subr.bf16.mxu1 %v5170_v13  ;;  %3779 = vmatprep.mubr.bf16.mxu0 %v5257_v19  ;;  %v5258_v13 = vld [vmem:[%s7776_s0 + $0x28] ss:$72 sps:$4 sm:$0xff]   ;;  %v5362_v19 = vld [vmem:[%s7776_s0 + $0x3c] ss:$72 sps:$4 sm:$0xff]  }
  0x86   :  { %3822 = vmatprep.mubr.bf16.mxu1 %v5260_v21  ;;  %v5270_v21 = vld [vmem:[%s7775_s1 + $0xec0] ss:$16 sps:$4 sm:$0xff]  }
  0x87   :  { %3750 = vmatpush1.bf16.msra.mxu0 %v5165_v14  ;;  %v5261_v14 = vld [vmem:[%s7775_s1 + $0xce0] ss:$16 sps:$4 sm:$0xff]  }
  0x88   :  { %3793 = vmatpush1.bf16.msra.mxu1 %v5168_v15  ;;  %3751 = vmatprep.subr.bf16.mxu0 %v5173_v16  ;;  %v5264_v15 = vld [vmem:[%s7775_s1 + $0xee0] ss:$16 sps:$4 sm:$0xff]   ;;  %v5269_v16 = vld [vmem:[%s7775_s1 + $0xcc4] ss:$16 sps:$4 sm:$0xff]  }
  0x89   :  { %3794 = vmatprep.subr.bf16.mxu1 %v5176_v17  ;;  %v5272_v17 = vld [vmem:[%s7775_s1 + $0xec4] ss:$16 sps:$4 sm:$0xff]  }
  0x8b   :  { %3752 = vmatpush1.bf16.msra.mxu0 %v5171_v18  ;;  %v5359_v18 = vld [vmem:[%s7776_s0 + $0x34] ss:$72 sps:$4 sm:$0xff]  }
  0x8c   :  { %3795 = vmatpush1.bf16.msra.mxu1 %v5174_v20  ;;  %3753 = vmatprep.subr.bf16.mxu0 %v5179_v22  ;;  %v5267_v20 = vld [vmem:[%s7775_s1 + $0xcc0] ss:$16 sps:$4 sm:$0xff]   ;;  %v5275_v22 = vld [vmem:[%s7775_s1 + $0xca4] ss:$16 sps:$4 sm:$0xff]  }
  0x8d   :  { %3796 = vmatprep.subr.bf16.mxu1 %v5182_v23  ;;  %v5278_v23 = vld [vmem:[%s7775_s1 + $0xea4] ss:$16 sps:$4 sm:$0xff]  }
  0x8f   :  { %3754 = vmatpush1.bf16.msra.mxu0 %v5177_v24  ;;  %v5273_v24 = vld [vmem:[%s7775_s1 + $0xca0] ss:$16 sps:$4 sm:$0xff]  }
  0x90   :  { %3797 = vmatpush1.bf16.msra.mxu1 %v5180_v25  ;;  %3755 = vmatprep.subr.bf16.mxu0 %v5185_v26  ;;  %v5276_v25 = vld [vmem:[%s7775_s1 + $0xea0] ss:$16 sps:$4 sm:$0xff]   ;;  %v5281_v26 = vld [vmem:[%s7775_s1 + $0xc84] ss:$16 sps:$4 sm:$0xff]  }
  0x91   :  { %3798 = vmatprep.subr.bf16.mxu1 %v5188_v27  ;;  %v5284_v27 = vld [vmem:[%s7775_s1 + $0xe84] ss:$16 sps:$4 sm:$0xff]  }
  0x93   :  { %3756 = vmatpush1.bf16.msra.mxu0 %v5183_v28  ;;  %v5279_v28 = vld [vmem:[%s7775_s1 + $0xc80] ss:$16 sps:$4 sm:$0xff]  }
  0x94   :  { %3799 = vmatpush1.bf16.msra.mxu1 %v5186_v29  ;;  %3757 = vmatprep.subr.bf16.mxu0 %v5191_v30  ;;  %v5282_v29 = vld [vmem:[%s7775_s1 + $0xe80] ss:$16 sps:$4 sm:$0xff]   ;;  %v5287_v30 = vld [vmem:[%s7775_s1 + $0xc64] ss:$16 sps:$4 sm:$0xff]  }
  0x95   :  { %3800 = vmatprep.subr.bf16.mxu1 %v5194_v31  ;;  %v5290_v31 = vld [vmem:[%s7775_s1 + $0xe64] ss:$16 sps:$4 sm:$0xff]  }
  0x97   :  { %3758 = vmatpush1.bf16.msra.mxu0 %v5189_v32  ;;  %v5285_v32 = vld [vmem:[%s7775_s1 + $0xc60] ss:$16 sps:$4 sm:$0xff]  }
  0x98   :  { %3801 = vmatpush1.bf16.msra.mxu1 %v5192_v33  ;;  %3759 = vmatprep.subr.bf16.mxu0 %v5197_v34  ;;  %v5288_v33 = vld [vmem:[%s7775_s1 + $0xe60] ss:$16 sps:$4 sm:$0xff]   ;;  %v5293_v34 = vld [vmem:[%s7775_s1 + $0xc44] ss:$16 sps:$4 sm:$0xff]  }
  0x99   :  { %3802 = vmatprep.subr.bf16.mxu1 %v5200_v35  ;;  %v5296_v35 = vld [vmem:[%s7775_s1 + $0xe44] ss:$16 sps:$4 sm:$0xff]  }
  0x9b   :  { %3760 = vmatpush1.bf16.msra.mxu0 %v5195_v36  ;;  %v5291_v36 = vld [vmem:[%s7775_s1 + $0xc40] ss:$16 sps:$4 sm:$0xff]  }
  0x9c   :  { %3803 = vmatpush1.bf16.msra.mxu1 %v5198_v37  ;;  %3761 = vmatprep.subr.bf16.mxu0 %v5203_v38  ;;  %v5294_v37 = vld [vmem:[%s7775_s1 + $0xe40] ss:$16 sps:$4 sm:$0xff]   ;;  %v5299_v38 = vld [vmem:[%s7775_s1 + $0xc24] ss:$16 sps:$4 sm:$0xff]  }
  0x9d   :  { %3804 = vmatprep.subr.bf16.mxu1 %v5206_v39  ;;  %v5302_v39 = vld [vmem:[%s7775_s1 + $0xe24] ss:$16 sps:$4 sm:$0xff]  }
  0x9f   :  { %3762 = vmatpush1.bf16.msra.mxu0 %v5201_v40  ;;  %v5297_v40 = vld [vmem:[%s7775_s1 + $0xc20] ss:$16 sps:$4 sm:$0xff]  }
  0xa0   :  { %3805 = vmatpush1.bf16.msra.mxu1 %v5204_v41  ;;  %3763 = vmatprep.subr.bf16.mxu0 %v5209_v42  ;;  %v5300_v41 = vld [vmem:[%s7775_s1 + $0xe20] ss:$16 sps:$4 sm:$0xff]   ;;  %v5305_v42 = vld [vmem:[%s7775_s1 + $0xc04] ss:$16 sps:$4 sm:$0xff]  }
  0xa1   :  { %3806 = vmatprep.subr.bf16.mxu1 %v5212_v43  ;;  %v5308_v43 = vld [vmem:[%s7775_s1 + $0xe04] ss:$16 sps:$4 sm:$0xff]  }
  0xa3   :  { %3764 = vmatpush2.bf16.msra.mxu0 %v5207_v44  ;;  %v5303_v44 = vld [vmem:[%s7775_s1 + $0xc00] ss:$16 sps:$4 sm:$0xff]  }
  0xa4   :  { %3807 = vmatpush2.bf16.msra.mxu1 %v5210_v45  ;;  %3765 = vmatprep.subr.bf16.mxu0 %v5215_v46  ;;  %v5306_v45 = vld [vmem:[%s7775_s1 + $0xe00] ss:$16 sps:$4 sm:$0xff]   ;;  %v5311_v46 = vld [vmem:[%s7775_s1 + $0xde4] ss:$16 sps:$4 sm:$0xff]  }
  0xa5   :  { %3808 = vmatprep.subr.bf16.mxu1 %v5218_v47  ;;  %v5314_v47 = vld [vmem:[%s7775_s1 + $0xfe4] ss:$16 sps:$4 sm:$0xff]  }
  0xa7   :  { %3766 = vmatpush2.bf16.msra.mxu0 %v5213_v48  ;;  %v5309_v48 = vld [vmem:[%s7775_s1 + $0xde0] ss:$16 sps:$4 sm:$0xff]  }
  0xa8   :  { %3809 = vmatpush2.bf16.msra.mxu1 %v5216_v49  ;;  %3767 = vmatprep.subr.bf16.mxu0 %v5221_v50  ;;  %v5312_v49 = vld [vmem:[%s7775_s1 + $0xfe0] ss:$16 sps:$4 sm:$0xff]   ;;  %v5317_v50 = vld [vmem:[%s7775_s1 + $0xdc4] ss:$16 sps:$4 sm:$0xff]  }
  0xa9   :  { %3810 = vmatprep.subr.bf16.mxu1 %v5224_v51  ;;  %v5320_v51 = vld [vmem:[%s7775_s1 + $0xfc4] ss:$16 sps:$4 sm:$0xff]  }
  0xab   :  { %3768 = vmatpush2.bf16.msra.mxu0 %v5219_v52  ;;  %v5315_v52 = vld [vmem:[%s7775_s1 + $0xdc0] ss:$16 sps:$4 sm:$0xff]  }
  0xac   :  { %3811 = vmatpush2.bf16.msra.mxu1 %v5222_v53  ;;  %3769 = vmatprep.subr.bf16.mxu0 %v5227_v54  ;;  %v5318_v53 = vld [vmem:[%s7775_s1 + $0xfc0] ss:$16 sps:$4 sm:$0xff]   ;;  %v5323_v54 = vld [vmem:[%s7775_s1 + $0xda4] ss:$16 sps:$4 sm:$0xff]  }
  0xad   :  { %3812 = vmatprep.subr.bf16.mxu1 %v5230_v55  ;;  %v5326_v55 = vld [vmem:[%s7775_s1 + $0xfa4] ss:$16 sps:$4 sm:$0xff]  }
  0xaf   :  { %3770 = vmatpush2.bf16.msra.mxu0 %v5225_v56  ;;  %v5321_v56 = vld [vmem:[%s7775_s1 + $0xda0] ss:$16 sps:$4 sm:$0xff]  }
  0xb0   :  { %3813 = vmatpush2.bf16.msra.mxu1 %v5228_v57  ;;  %3771 = vmatprep.subr.bf16.mxu0 %v5233_v58  ;;  %v5324_v57 = vld [vmem:[%s7775_s1 + $0xfa0] ss:$16 sps:$4 sm:$0xff]   ;;  %v5329_v58 = vld [vmem:[%s7775_s1 + $0xd84] ss:$16 sps:$4 sm:$0xff]  }
  0xb1   :  { %3814 = vmatprep.subr.bf16.mxu1 %v5236_v59  ;;  %v5332_v59 = vld [vmem:[%s7775_s1 + $0xf84] ss:$16 sps:$4 sm:$0xff]  }
  0xb3   :  { %3772 = vmatpush2.bf16.msra.mxu0 %v5231_v60  ;;  %v5327_v60 = vld [vmem:[%s7775_s1 + $0xd80] ss:$16 sps:$4 sm:$0xff]  }
  0xb4   :  { %3815 = vmatpush2.bf16.msra.mxu1 %v5234_v61  ;;  %3773 = vmatprep.subr.bf16.mxu0 %v5239_v62  ;;  %v5330_v61 = vld [vmem:[%s7775_s1 + $0xf80] ss:$16 sps:$4 sm:$0xff]   ;;  %v5335_v62 = vld [vmem:[%s7775_s1 + $0xd64] ss:$16 sps:$4 sm:$0xff]  }
  0xb5   :  { %3816 = vmatprep.subr.bf16.mxu1 %v5242_v63  ;;  %v5338_v63 = vld [vmem:[%s7775_s1 + $0xf64] ss:$16 sps:$4 sm:$0xff]  }
  0xb7   :  { %3774 = vmatpush2.bf16.msra.mxu0 %v5237_v0  ;;  %v5333_v0 = vld [vmem:[%s7775_s1 + $0xd60] ss:$16 sps:$4 sm:$0xff]  }
  0xb8   :  { %3817 = vmatpush2.bf16.msra.mxu1 %v5240_v1  ;;  %3775 = vmatprep.subr.bf16.mxu0 %v5245_v2  ;;  %v5336_v1 = vld [vmem:[%s7775_s1 + $0xf60] ss:$16 sps:$4 sm:$0xff]   ;;  %v5341_v2 = vld [vmem:[%s7775_s1 + $0xd44] ss:$16 sps:$4 sm:$0xff]  }
  0xb9   :  { %3818 = vmatprep.subr.bf16.mxu1 %v5248_v3  ;;  %v5344_v3 = vld [vmem:[%s7775_s1 + $0xf44] ss:$16 sps:$4 sm:$0xff]  }
  0xbb   :  { %3776 = vmatpush2.bf16.msra.mxu0 %v5243_v4  ;;  %v5339_v4 = vld [vmem:[%s7775_s1 + $0xd40] ss:$16 sps:$4 sm:$0xff]  }
  0xbc   :  { %3819 = vmatpush2.bf16.msra.mxu1 %v5246_v5  ;;  %3777 = vmatprep.subr.bf16.mxu0 %v5251_v6  ;;  %v5342_v5 = vld [vmem:[%s7775_s1 + $0xf40] ss:$16 sps:$4 sm:$0xff]   ;;  %v5347_v6 = vld [vmem:[%s7775_s1 + $0xd24] ss:$16 sps:$4 sm:$0xff]  }
  0xbd   :  { %3820 = vmatprep.subr.bf16.mxu1 %v5254_v7  ;;  %v5350_v7 = vld [vmem:[%s7775_s1 + $0xf24] ss:$16 sps:$4 sm:$0xff]  }
  0xbf   :  { %3778 = vmatpush2.bf16.msra.mxu0 %v5249_v8  ;;  %v5345_v8 = vld [vmem:[%s7775_s1 + $0xd20] ss:$16 sps:$4 sm:$0xff]  }
  0xc0   :  { %3821 = vmatpush2.bf16.msra.mxu1 %v5252_v9  ;;  %3833 = vmatprep.subr.bf16.mxu0 %v5263_v10  ;;  %v5348_v9 = vld [vmem:[%s7775_s1 + $0xf20] ss:$16 sps:$4 sm:$0xff]   ;;  %v5353_v10 = vld [vmem:[%s7775_s1 + $0xd04] ss:$16 sps:$4 sm:$0xff]  }
  0xc1   :  { %3876 = vmatprep.subr.bf16.mxu1 %v5266_v11  ;;  %v5356_v11 = vld [vmem:[%s7775_s1 + $0xf04] ss:$16 sps:$4 sm:$0xff]  }
  0xc2   :  { %3780 = vmatmul.mubr.bf16.vlgmr.msra.gmra.mxu0 %v5255_v12  ;;  %v5351_v12 = vld [vmem:[%s7775_s1 + $0xd00] ss:$16 sps:$4 sm:$0xff]  }
  0xc3   :  { %3823 = vmatmul.mubr.bf16.vlgmr.msra.gmra.mxu1 %v5258_v13  ;;  %3834 = vmatpush1.bf16.msra.mxu0 %v5261_v14  ;;  %v5354_v13 = vld [vmem:[%s7775_s1 + $0xf00] ss:$16 sps:$4 sm:$0xff]   ;;  %v5365_v14 = vld [vmem:[%s7775_s1 + $0x10e4] ss:$16 sps:$4 sm:$0xff]  }
  0xc4   :  { %3877 = vmatpush1.bf16.msra.mxu1 %v5264_v15  ;;  %3835 = vmatprep.subr.bf16.mxu0 %v5269_v16  ;;  %v5368_v15 = vld [vmem:[%s7775_s1 + $0xec] ss:$16 sps:$4 sm:$0xff]   ;;  %v5357_v16 = vld [vmem:[%s7776_s0 + $0x30] ss:$72 sps:$4 sm:$0xff]  }
  0xc5   :  { %3878 = vmatprep.subr.bf16.mxu1 %v5272_v17  ;;  %3865 = vmatprep.mubr.bf16.mxu0 %v5359_v18  ;;  %v5360_v17 = vld [vmem:[%s7776_s0 + $0x38] ss:$72 sps:$4 sm:$0xff]  }
  0xc6   :  { %3908 = vmatprep.mubr.bf16.mxu1 %v5362_v19  ;;  %v5363_v18 = vld [vmem:[%s7775_s1 + $0x10e0] ss:$16 sps:$4 sm:$0xff]   ;;  %v5366_v19 = vld [vmem:[%s7775_s1 + $0xe8] ss:$16 sps:$4 sm:$0xff]  }
  0xc7   :  { %3836 = vmatpush1.bf16.msra.mxu0 %v5267_v20  ;;  %v5371_v20 = vld [vmem:[%s7775_s1 + $0x10c4] ss:$16 sps:$4 sm:$0xff]  }
  0xc8   :  { %3879 = vmatpush1.bf16.msra.mxu1 %v5270_v21  ;;  %3837 = vmatprep.subr.bf16.mxu0 %v5275_v22  ;;  %v5374_v21 = vld [vmem:[%s7775_s1 + $0xcc] ss:$16 sps:$4 sm:$0xff]  }
  0xc9   :  { %3880 = vmatprep.subr.bf16.mxu1 %v5278_v23  ;;  %v5461_v22 = vld [vmem:[%s7776_s0 + $0x44] ss:$72 sps:$4 sm:$0xff]   ;;  %v5369_v23 = vld [vmem:[%s7775_s1 + $0x10c0] ss:$16 sps:$4 sm:$0xff]  }
  0xcb   :  { %3838 = vmatpush1.bf16.msra.mxu0 %v5273_v24  ;;  %v5372_v24 = vld [vmem:[%s7775_s1 + $0xc8] ss:$16 sps:$4 sm:$0xff]  }
  0xcc   :  { %3881 = vmatpush1.bf16.msra.mxu1 %v5276_v25  ;;  %3839 = vmatprep.subr.bf16.mxu0 %v5281_v26  ;;  %v5377_v25 = vld [vmem:[%s7775_s1 + $0x10a4] ss:$16 sps:$4 sm:$0xff]   ;;  %v5380_v26 = vld [vmem:[%s7775_s1 + $0xac] ss:$16 sps:$4 sm:$0xff]  }
  0xcd   :  { %3882 = vmatprep.subr.bf16.mxu1 %v5284_v27  ;;  %v5846_v27 = vld [vmem:[%s7776_s0 + $0x4] ss:$72 sps:$4 sm:$0xff]  }
  0xcf   :  { %3840 = vmatpush1.bf16.msra.mxu0 %v5279_v28  ;;  %v5375_v28 = vld [vmem:[%s7775_s1 + $0x10a0] ss:$16 sps:$4 sm:$0xff]  }
  0xd0   :  { %3883 = vmatpush1.bf16.msra.mxu1 %v5282_v29  ;;  %3841 = vmatprep.subr.bf16.mxu0 %v5287_v30  ;;  %v5378_v29 = vld [vmem:[%s7775_s1 + $0xa8] ss:$16 sps:$4 sm:$0xff]   ;;  %v5383_v30 = vld [vmem:[%s7775_s1 + $0x1084] ss:$16 sps:$4 sm:$0xff]  }
  0xd1   :  { %3884 = vmatprep.subr.bf16.mxu1 %v5290_v31  ;;  %v5386_v31 = vld [vmem:[%s7775_s1 + $0x8c] ss:$16 sps:$4 sm:$0xff]  }
  0xd3   :  { %3842 = vmatpush1.bf16.msra.mxu0 %v5285_v32  ;;  %v5381_v32 = vld [vmem:[%s7775_s1 + $0x1080] ss:$16 sps:$4 sm:$0xff]  }
  0xd4   :  { %3885 = vmatpush1.bf16.msra.mxu1 %v5288_v33  ;;  %3843 = vmatprep.subr.bf16.mxu0 %v5293_v34  ;;  %v5384_v33 = vld [vmem:[%s7775_s1 + $0x88] ss:$16 sps:$4 sm:$0xff]   ;;  %v5389_v34 = vld [vmem:[%s7775_s1 + $0x1064] ss:$16 sps:$4 sm:$0xff]  }
  0xd5   :  { %3886 = vmatprep.subr.bf16.mxu1 %v5296_v35  ;;  %v5392_v35 = vld [vmem:[%s7775_s1 + $0x6c] ss:$16 sps:$4 sm:$0xff]  }
  0xd7   :  { %3844 = vmatpush1.bf16.msra.mxu0 %v5291_v36  ;;  %v5387_v36 = vld [vmem:[%s7775_s1 + $0x1060] ss:$16 sps:$4 sm:$0xff]  }
  0xd8   :  { %3887 = vmatpush1.bf16.msra.mxu1 %v5294_v37  ;;  %3845 = vmatprep.subr.bf16.mxu0 %v5299_v38  ;;  %v5390_v37 = vld [vmem:[%s7775_s1 + $0x68] ss:$16 sps:$4 sm:$0xff]   ;;  %v5395_v38 = vld [vmem:[%s7775_s1 + $0x1044] ss:$16 sps:$4 sm:$0xff]  }
  0xd9   :  { %3888 = vmatprep.subr.bf16.mxu1 %v5302_v39  ;;  %v5398_v39 = vld [vmem:[%s7775_s1 + $0x4c] ss:$16 sps:$4 sm:$0xff]  }
  0xdb   :  { %3846 = vmatpush1.bf16.msra.mxu0 %v5297_v40  ;;  %v5393_v40 = vld [vmem:[%s7775_s1 + $0x1040] ss:$16 sps:$4 sm:$0xff]  }
  0xdc   :  { %3889 = vmatpush1.bf16.msra.mxu1 %v5300_v41  ;;  %3847 = vmatprep.subr.bf16.mxu0 %v5305_v42  ;;  %v5396_v41 = vld [vmem:[%s7775_s1 + $0x48] ss:$16 sps:$4 sm:$0xff]   ;;  %v5401_v42 = vld [vmem:[%s7775_s1 + $0x1024] ss:$16 sps:$4 sm:$0xff]  }
  0xdd   :  { %3890 = vmatprep.subr.bf16.mxu1 %v5308_v43  ;;  %v5404_v43 = vld [vmem:[%s7775_s1 + $0x2c] ss:$16 sps:$4 sm:$0xff]  }
  0xdf   :  { %3848 = vmatpush1.bf16.msra.mxu0 %v5303_v44  ;;  %v5399_v44 = vld [vmem:[%s7775_s1 + $0x1020] ss:$16 sps:$4 sm:$0xff]  }
  0xe0   :  { %3891 = vmatpush1.bf16.msra.mxu1 %v5306_v45  ;;  %3849 = vmatprep.subr.bf16.mxu0 %v5311_v46  ;;  %v5402_v45 = vld [vmem:[%s7775_s1 + $0x28] ss:$16 sps:$4 sm:$0xff]   ;;  %v5407_v46 = vld [vmem:[%s7775_s1 + $0x1004] ss:$16 sps:$4 sm:$0xff]  }
  0xe1   :  { %3892 = vmatprep.subr.bf16.mxu1 %v5314_v47  ;;  %v5410_v47 = vld [vmem:[%s7775_s1 + $0xc] ss:$16 sps:$4 sm:$0xff]  }
  0xe3   :  { %3850 = vmatpush2.bf16.msra.mxu0 %v5309_v48  ;;  %v5405_v48 = vld [vmem:[%s7775_s1 + $0x1000] ss:$16 sps:$4 sm:$0xff]  }
  0xe4   :  { %3893 = vmatpush2.bf16.msra.mxu1 %v5312_v49  ;;  %3851 = vmatprep.subr.bf16.mxu0 %v5317_v50  ;;  %v5408_v49 = vld [vmem:[%s7775_s1 + $0x8] ss:$16 sps:$4 sm:$0xff]   ;;  %v5413_v50 = vld [vmem:[%s7775_s1 + $0x11e4] ss:$16 sps:$4 sm:$0xff]  }
  0xe5   :  { %3894 = vmatprep.subr.bf16.mxu1 %v5320_v51  ;;  %v5416_v51 = vld [vmem:[%s7775_s1 + $0x1ec] ss:$16 sps:$4 sm:$0xff]  }
  0xe7   :  { %3852 = vmatpush2.bf16.msra.mxu0 %v5315_v52  ;;  %v5411_v52 = vld [vmem:[%s7775_s1 + $0x11e0] ss:$16 sps:$4 sm:$0xff]  }
  0xe8   :  { %3895 = vmatpush2.bf16.msra.mxu1 %v5318_v53  ;;  %3853 = vmatprep.subr.bf16.mxu0 %v5323_v54  ;;  %v5414_v53 = vld [vmem:[%s7775_s1 + $0x1e8] ss:$16 sps:$4 sm:$0xff]   ;;  %v5419_v54 = vld [vmem:[%s7775_s1 + $0x11c4] ss:$16 sps:$4 sm:$0xff]  }
  0xe9   :  { %3896 = vmatprep.subr.bf16.mxu1 %v5326_v55  ;;  %v5422_v55 = vld [vmem:[%s7775_s1 + $0x1cc] ss:$16 sps:$4 sm:$0xff]  }
  0xeb   :  { %3854 = vmatpush2.bf16.msra.mxu0 %v5321_v56  ;;  %v5417_v56 = vld [vmem:[%s7775_s1 + $0x11c0] ss:$16 sps:$4 sm:$0xff]  }
  0xec   :  { %3897 = vmatpush2.bf16.msra.mxu1 %v5324_v57  ;;  %3855 = vmatprep.subr.bf16.mxu0 %v5329_v58  ;;  %v5420_v57 = vld [vmem:[%s7775_s1 + $0x1c8] ss:$16 sps:$4 sm:$0xff]   ;;  %v5425_v58 = vld [vmem:[%s7775_s1 + $0x11a4] ss:$16 sps:$4 sm:$0xff]  }
  0xed   :  { %3898 = vmatprep.subr.bf16.mxu1 %v5332_v59  ;;  %v5428_v59 = vld [vmem:[%s7775_s1 + $0x1ac] ss:$16 sps:$4 sm:$0xff]  }
  0xef   :  { %3856 = vmatpush2.bf16.msra.mxu0 %v5327_v60  ;;  %v5423_v60 = vld [vmem:[%s7775_s1 + $0x11a0] ss:$16 sps:$4 sm:$0xff]  }
  0xf0   :  { %3899 = vmatpush2.bf16.msra.mxu1 %v5330_v61  ;;  %3857 = vmatprep.subr.bf16.mxu0 %v5335_v62  ;;  %v5426_v61 = vld [vmem:[%s7775_s1 + $0x1a8] ss:$16 sps:$4 sm:$0xff]   ;;  %v5431_v62 = vld [vmem:[%s7775_s1 + $0x1184] ss:$16 sps:$4 sm:$0xff]  }
  0xf1   :  { %3900 = vmatprep.subr.bf16.mxu1 %v5338_v63  ;;  %v5434_v63 = vld [vmem:[%s7775_s1 + $0x18c] ss:$16 sps:$4 sm:$0xff]  }
  0xf3   :  { %3858 = vmatpush2.bf16.msra.mxu0 %v5333_v0  ;;  %v5429_v0 = vld [vmem:[%s7775_s1 + $0x1180] ss:$16 sps:$4 sm:$0xff]  }
  0xf4   :  { %3901 = vmatpush2.bf16.msra.mxu1 %v5336_v1  ;;  %3859 = vmatprep.subr.bf16.mxu0 %v5341_v2  ;;  %v5432_v1 = vld [vmem:[%s7775_s1 + $0x188] ss:$16 sps:$4 sm:$0xff]   ;;  %v5437_v2 = vld [vmem:[%s7775_s1 + $0x1164] ss:$16 sps:$4 sm:$0xff]  }
  0xf5   :  { %3902 = vmatprep.subr.bf16.mxu1 %v5344_v3  ;;  %v5440_v3 = vld [vmem:[%s7775_s1 + $0x16c] ss:$16 sps:$4 sm:$0xff]  }
  0xf7   :  { %3860 = vmatpush2.bf16.msra.mxu0 %v5339_v4  ;;  %v5435_v4 = vld [vmem:[%s7775_s1 + $0x1160] ss:$16 sps:$4 sm:$0xff]  }
  0xf8   :  { %3903 = vmatpush2.bf16.msra.mxu1 %v5342_v5  ;;  %3861 = vmatprep.subr.bf16.mxu0 %v5347_v6  ;;  %v5438_v5 = vld [vmem:[%s7775_s1 + $0x168] ss:$16 sps:$4 sm:$0xff]   ;;  %v5443_v6 = vld [vmem:[%s7775_s1 + $0x1144] ss:$16 sps:$4 sm:$0xff]  }
  0xf9   :  { %3904 = vmatprep.subr.bf16.mxu1 %v5350_v7  ;;  %v5446_v7 = vld [vmem:[%s7775_s1 + $0x14c] ss:$16 sps:$4 sm:$0xff]  }
  0xfb   :  { %3862 = vmatpush2.bf16.msra.mxu0 %v5345_v8  ;;  %v5441_v8 = vld [vmem:[%s7775_s1 + $0x1140] ss:$16 sps:$4 sm:$0xff]  }
  0xfc   :  { %3905 = vmatpush2.bf16.msra.mxu1 %v5348_v9  ;;  %3863 = vmatprep.subr.bf16.mxu0 %v5353_v10  ;;  %v5444_v9 = vld [vmem:[%s7775_s1 + $0x148] ss:$16 sps:$4 sm:$0xff]   ;;  %v5449_v10 = vld [vmem:[%s7775_s1 + $0x1124] ss:$16 sps:$4 sm:$0xff]  }
  0xfd   :  { %3906 = vmatprep.subr.bf16.mxu1 %v5356_v11  ;;  %v5452_v11 = vld [vmem:[%s7775_s1 + $0x12c] ss:$16 sps:$4 sm:$0xff]  }
  0xff   :  { %3864 = vmatpush2.bf16.msra.mxu0 %v5351_v12  ;;  %v5447_v12 = vld [vmem:[%s7775_s1 + $0x1120] ss:$16 sps:$4 sm:$0xff]  }
 0x100   :  { %3907 = vmatpush2.bf16.msra.mxu1 %v5354_v13  ;;  %3919 = vmatprep.subr.bf16.mxu0 %v5365_v14  ;;  %v5450_v13 = vld [vmem:[%s7775_s1 + $0x128] ss:$16 sps:$4 sm:$0xff]   ;;  %v5455_v14 = vld [vmem:[%s7775_s1 + $0x1104] ss:$16 sps:$4 sm:$0xff]  }
 0x101   :  { %3962 = vmatprep.subr.bf16.mxu1 %v5368_v15  ;;  %v5458_v15 = vld [vmem:[%s7775_s1 + $0x10c] ss:$16 sps:$4 sm:$0xff]  }
 0x102   :  { %3866 = vmatmul.mubr.bf16.vlgmr.msra.gmra.mxu0 %v5357_v16  ;;  %v5453_v16 = vld [vmem:[%s7775_s1 + $0x1100] ss:$16 sps:$4 sm:$0xff]  }
 0x103   :  { %3909 = vmatmul.mubr.bf16.vlgmr.msra.gmra.mxu1 %v5360_v17  ;;  %3920 = vmatpush1.bf16.msra.mxu0 %v5363_v18  ;;  %v5456_v17 = vld [vmem:[%s7775_s1 + $0x108] ss:$16 sps:$4 sm:$0xff]  }
 0x104   :  { %3963 = vmatpush1.bf16.msra.mxu1 %v5366_v19  ;;  %3921 = vmatprep.subr.bf16.mxu0 %v5371_v20  ;;  %v5459_v18 = vld [vmem:[%s7776_s0 + $0x40] ss:$72 sps:$4 sm:$0xff]   ;;  %v5464_v19 = vld [vmem:[%s7775_s1 + $0x2ec] ss:$16 sps:$4 sm:$0xff]  }
 0x105   :  { %3964 = vmatprep.subr.bf16.mxu1 %v5374_v21  ;;  %3951 = vmatprep.mubr.bf16.mxu0 %v5461_v22  ;;  %v5467_v20 = vld [vmem:[%s7775_s1 + $0x4ec] ss:$16 sps:$4 sm:$0xff]   ;;  %v5462_v21 = vld [vmem:[%s7775_s1 + $0x2e8] ss:$16 sps:$4 sm:$0xff]  }
 0x106   :  { %3994 = vmatprep.mubr.bf16.mxu1 %v5846_v27  ;;  %v5465_v22 = vld [vmem:[%s7775_s1 + $0x4e8] ss:$16 sps:$4 sm:$0xff]  }
 0x107   :  { %3922 = vmatpush1.bf16.msra.mxu0 %v5369_v23  ;;  %v5470_v23 = vld [vmem:[%s7775_s1 + $0x2cc] ss:$16 sps:$4 sm:$0xff]   ;;  %v5847_v27 = vld [vmem:[%s7776_s0] ss:$72 sps:$4 sm:$0xff]  }
 0x108   :  { %3965 = vmatpush1.bf16.msra.mxu1 %v5372_v24  ;;  %3923 = vmatprep.subr.bf16.mxu0 %v5377_v25  ;;  %v5473_v24 = vld [vmem:[%s7775_s1 + $0x4cc] ss:$16 sps:$4 sm:$0xff]   ;;  %v5468_v25 = vld [vmem:[%s7775_s1 + $0x2c8] ss:$16 sps:$4 sm:$0xff]  }
 0x109   :  { %3966 = vmatprep.subr.bf16.mxu1 %v5380_v26  ;;  %v5471_v26 = vld [vmem:[%s7775_s1 + $0x4c8] ss:$16 sps:$4 sm:$0xff]  }
 0x10b   :  { %3924 = vmatpush1.bf16.msra.mxu0 %v5375_v28  ;;  %v5476_v28 = vld [vmem:[%s7775_s1 + $0x2ac] ss:$16 sps:$4 sm:$0xff]  }
 0x10c   :  { %3967 = vmatpush1.bf16.msra.mxu1 %v5378_v29  ;;  %3925 = vmatprep.subr.bf16.mxu0 %v5383_v30  ;;  %v5479_v29 = vld [vmem:[%s7775_s1 + $0x4ac] ss:$16 sps:$4 sm:$0xff]   ;;  %v5474_v30 = vld [vmem:[%s7775_s1 + $0x2a8] ss:$16 sps:$4 sm:$0xff]  }
 0x10d   :  { %3968 = vmatprep.subr.bf16.mxu1 %v5386_v31  ;;  %v5477_v31 = vld [vmem:[%s7775_s1 + $0x4a8] ss:$16 sps:$4 sm:$0xff]  }
 0x10f   :  { %3926 = vmatpush1.bf16.msra.mxu0 %v5381_v32  ;;  %v5848_v32 = vld [vmem:[%s7776_s0 + $0xc] ss:$72 sps:$4 sm:$0xff]  }
 0x110   :  { %3969 = vmatpush1.bf16.msra.mxu1 %v5384_v33  ;;  %3927 = vmatprep.subr.bf16.mxu0 %v5389_v34  ;;  %v5849_v33 = vld [vmem:[%s7776_s0 + $0x14] ss:$72 sps:$4 sm:$0xff]  }
 0x111   :  { %3970 = vmatprep.subr.bf16.mxu1 %v5392_v35  ;;  %v5482_v34 = vld [vmem:[%s7775_s1 + $0x28c] ss:$16 sps:$4 sm:$0xff]  }
 0x112   :  { %v5485_v35 = vld [vmem:[%s7775_s1 + $0x48c] ss:$16 sps:$4 sm:$0xff]  }
 0x113   :  { %3928 = vmatpush1.bf16.msra.mxu0 %v5387_v36  ;;  %v5480_v36 = vld [vmem:[%s7775_s1 + $0x288] ss:$16 sps:$4 sm:$0xff]  }
 0x114   :  { %3971 = vmatpush1.bf16.msra.mxu1 %v5390_v37  ;;  %3929 = vmatprep.subr.bf16.mxu0 %v5395_v38  ;;  %v5483_v37 = vld [vmem:[%s7775_s1 + $0x488] ss:$16 sps:$4 sm:$0xff]   ;;  %v5488_v38 = vld [vmem:[%s7775_s1 + $0x26c] ss:$16 sps:$4 sm:$0xff]  }
 0x115   :  { %3972 = vmatprep.subr.bf16.mxu1 %v5398_v39  ;;  %v5491_v39 = vld [vmem:[%s7775_s1 + $0x46c] ss:$16 sps:$4 sm:$0xff]  }
 0x117   :  { %3930 = vmatpush1.bf16.msra.mxu0 %v5393_v40  ;;  %v5486_v40 = vld [vmem:[%s7775_s1 + $0x268] ss:$16 sps:$4 sm:$0xff]  }
 0x118   :  { %3973 = vmatpush1.bf16.msra.mxu1 %v5396_v41  ;;  %3931 = vmatprep.subr.bf16.mxu0 %v5401_v42  ;;  %v5489_v41 = vld [vmem:[%s7775_s1 + $0x468] ss:$16 sps:$4 sm:$0xff]   ;;  %v5494_v42 = vld [vmem:[%s7775_s1 + $0x24c] ss:$16 sps:$4 sm:$0xff]  }
 0x119   :  { %3974 = vmatprep.subr.bf16.mxu1 %v5404_v43  ;;  %v5497_v43 = vld [vmem:[%s7775_s1 + $0x44c] ss:$16 sps:$4 sm:$0xff]  }
 0x11b   :  { %3932 = vmatpush1.bf16.msra.mxu0 %v5399_v44  ;;  %v5492_v44 = vld [vmem:[%s7775_s1 + $0x248] ss:$16 sps:$4 sm:$0xff]  }
 0x11c   :  { %3975 = vmatpush1.bf16.msra.mxu1 %v5402_v45  ;;  %3933 = vmatprep.subr.bf16.mxu0 %v5407_v46  ;;  %v5495_v45 = vld [vmem:[%s7775_s1 + $0x448] ss:$16 sps:$4 sm:$0xff]   ;;  %v5500_v46 = vld [vmem:[%s7775_s1 + $0x22c] ss:$16 sps:$4 sm:$0xff]  }
 0x11d   :  { %3976 = vmatprep.subr.bf16.mxu1 %v5410_v47  ;;  %v5503_v47 = vld [vmem:[%s7775_s1 + $0x42c] ss:$16 sps:$4 sm:$0xff]  }
 0x11f   :  { %3934 = vmatpush1.bf16.msra.mxu0 %v5405_v48  ;;  %v5498_v48 = vld [vmem:[%s7775_s1 + $0x228] ss:$16 sps:$4 sm:$0xff]  }
 0x120   :  { %3977 = vmatpush1.bf16.msra.mxu1 %v5408_v49  ;;  %3935 = vmatprep.subr.bf16.mxu0 %v5413_v50  ;;  %v5501_v49 = vld [vmem:[%s7775_s1 + $0x428] ss:$16 sps:$4 sm:$0xff]   ;;  %v5506_v50 = vld [vmem:[%s7775_s1 + $0x20c] ss:$16 sps:$4 sm:$0xff]  }
 0x121   :  { %3978 = vmatprep.subr.bf16.mxu1 %v5416_v51  ;;  %v5509_v51 = vld [vmem:[%s7775_s1 + $0x40c] ss:$16 sps:$4 sm:$0xff]  }
 0x123   :  { %3936 = vmatpush2.bf16.msra.mxu0 %v5411_v52  ;;  %v5504_v52 = vld [vmem:[%s7775_s1 + $0x208] ss:$16 sps:$4 sm:$0xff]  }
 0x124   :  { %3979 = vmatpush2.bf16.msra.mxu1 %v5414_v53  ;;  %3937 = vmatprep.subr.bf16.mxu0 %v5419_v54  ;;  %v5507_v53 = vld [vmem:[%s7775_s1 + $0x408] ss:$16 sps:$4 sm:$0xff]   ;;  %v5512_v54 = vld [vmem:[%s7775_s1 + $0x3ec] ss:$16 sps:$4 sm:$0xff]  }
 0x125   :  { %3980 = vmatprep.subr.bf16.mxu1 %v5422_v55  ;;  %v5515_v55 = vld [vmem:[%s7775_s1 + $0x5ec] ss:$16 sps:$4 sm:$0xff]  }
 0x127   :  { %3938 = vmatpush2.bf16.msra.mxu0 %v5417_v56  ;;  %v5510_v56 = vld [vmem:[%s7775_s1 + $0x3e8] ss:$16 sps:$4 sm:$0xff]  }
 0x128   :  { %3981 = vmatpush2.bf16.msra.mxu1 %v5420_v57  ;;  %3939 = vmatprep.subr.bf16.mxu0 %v5425_v58  ;;  %v5513_v57 = vld [vmem:[%s7775_s1 + $0x5e8] ss:$16 sps:$4 sm:$0xff]   ;;  %v5518_v58 = vld [vmem:[%s7775_s1 + $0x3cc] ss:$16 sps:$4 sm:$0xff]  }
 0x129   :  { %3982 = vmatprep.subr.bf16.mxu1 %v5428_v59  ;;  %v5521_v59 = vld [vmem:[%s7775_s1 + $0x5cc] ss:$16 sps:$4 sm:$0xff]  }
 0x12b   :  { %3940 = vmatpush2.bf16.msra.mxu0 %v5423_v60  ;;  %v5516_v60 = vld [vmem:[%s7775_s1 + $0x3c8] ss:$16 sps:$4 sm:$0xff]  }
 0x12c   :  { %3983 = vmatpush2.bf16.msra.mxu1 %v5426_v61  ;;  %3941 = vmatprep.subr.bf16.mxu0 %v5431_v62  ;;  %v5519_v61 = vld [vmem:[%s7775_s1 + $0x5c8] ss:$16 sps:$4 sm:$0xff]   ;;  %v5524_v62 = vld [vmem:[%s7775_s1 + $0x3ac] ss:$16 sps:$4 sm:$0xff]  }
 0x12d   :  { %3984 = vmatprep.subr.bf16.mxu1 %v5434_v63  ;;  %v5527_v63 = vld [vmem:[%s7775_s1 + $0x5ac] ss:$16 sps:$4 sm:$0xff]  }
 0x12f   :  { %3942 = vmatpush2.bf16.msra.mxu0 %v5429_v0  ;;  %v5522_v0 = vld [vmem:[%s7775_s1 + $0x3a8] ss:$16 sps:$4 sm:$0xff]  }
 0x130   :  { %3985 = vmatpush2.bf16.msra.mxu1 %v5432_v1  ;;  %3943 = vmatprep.subr.bf16.mxu0 %v5437_v2  ;;  %v5525_v1 = vld [vmem:[%s7775_s1 + $0x5a8] ss:$16 sps:$4 sm:$0xff]   ;;  %v5530_v2 = vld [vmem:[%s7775_s1 + $0x38c] ss:$16 sps:$4 sm:$0xff]  }
 0x131   :  { %3986 = vmatprep.subr.bf16.mxu1 %v5440_v3  ;;  %v5533_v3 = vld [vmem:[%s7775_s1 + $0x58c] ss:$16 sps:$4 sm:$0xff]  }
 0x133   :  { %3944 = vmatpush2.bf16.msra.mxu0 %v5435_v4  ;;  %v5528_v4 = vld [vmem:[%s7775_s1 + $0x388] ss:$16 sps:$4 sm:$0xff]  }
 0x134   :  { %3987 = vmatpush2.bf16.msra.mxu1 %v5438_v5  ;;  %3945 = vmatprep.subr.bf16.mxu0 %v5443_v6  ;;  %v5531_v5 = vld [vmem:[%s7775_s1 + $0x588] ss:$16 sps:$4 sm:$0xff]   ;;  %v5536_v6 = vld [vmem:[%s7775_s1 + $0x36c] ss:$16 sps:$4 sm:$0xff]  }
 0x135   :  { %3988 = vmatprep.subr.bf16.mxu1 %v5446_v7  ;;  %v5539_v7 = vld [vmem:[%s7775_s1 + $0x56c] ss:$16 sps:$4 sm:$0xff]  }
 0x137   :  { %3946 = vmatpush2.bf16.msra.mxu0 %v5441_v8  ;;  %v5534_v8 = vld [vmem:[%s7775_s1 + $0x368] ss:$16 sps:$4 sm:$0xff]  }
 0x138   :  { %3989 = vmatpush2.bf16.msra.mxu1 %v5444_v9  ;;  %3947 = vmatprep.subr.bf16.mxu0 %v5449_v10  ;;  %v5537_v9 = vld [vmem:[%s7775_s1 + $0x568] ss:$16 sps:$4 sm:$0xff]   ;;  %v5542_v10 = vld [vmem:[%s7775_s1 + $0x34c] ss:$16 sps:$4 sm:$0xff]  }
 0x139   :  { %3990 = vmatprep.subr.bf16.mxu1 %v5452_v11  ;;  %v5545_v11 = vld [vmem:[%s7775_s1 + $0x54c] ss:$16 sps:$4 sm:$0xff]  }
 0x13b   :  { %3948 = vmatpush2.bf16.msra.mxu0 %v5447_v12  ;;  %v5540_v12 = vld [vmem:[%s7775_s1 + $0x348] ss:$16 sps:$4 sm:$0xff]  }
 0x13c   :  { %3991 = vmatpush2.bf16.msra.mxu1 %v5450_v13  ;;  %3949 = vmatprep.subr.bf16.mxu0 %v5455_v14  ;;  %v5543_v13 = vld [vmem:[%s7775_s1 + $0x548] ss:$16 sps:$4 sm:$0xff]   ;;  %v5548_v14 = vld [vmem:[%s7775_s1 + $0x32c] ss:$16 sps:$4 sm:$0xff]  }
 0x13d   :  { %3992 = vmatprep.subr.bf16.mxu1 %v5458_v15  ;;  %v5551_v15 = vld [vmem:[%s7775_s1 + $0x52c] ss:$16 sps:$4 sm:$0xff]  }
 0x13f   :  { %3950 = vmatpush2.bf16.msra.mxu0 %v5453_v16  ;;  %v5546_v16 = vld [vmem:[%s7775_s1 + $0x328] ss:$16 sps:$4 sm:$0xff]  }
 0x140   :  { %3993 = vmatpush2.bf16.msra.mxu1 %v5456_v17  ;;  %4005 = vmatprep.subr.bf16.mxu0 %v5464_v19  ;;  %v5549_v17 = vld [vmem:[%s7775_s1 + $0x528] ss:$16 sps:$4 sm:$0xff]   ;;  %v5557_v19 = vld [vmem:[%s7775_s1 + $0x50c] ss:$16 sps:$4 sm:$0xff]  }
 0x141   :  { %4048 = vmatprep.subr.bf16.mxu1 %v5467_v20  ;;  %v5552_v20 = vld [vmem:[%s7775_s1 + $0x308] ss:$16 sps:$4 sm:$0xff]  }
 0x142   :  { %3952 = vmatmul.mubr.bf16.vlgmr.msra.gmra.mxu0 %v5459_v18  ;;  %v5554_v18 = vld [vmem:[%s7775_s1 + $0x30c] ss:$16 sps:$4 sm:$0xff]  }
 0x143   :  { %3995 = vmatmul.mubr.bf16.vlgmr.msra.gmra.mxu1 %v5847_v27  ;;  %4006 = vmatpush1.bf16.msra.mxu0 %v5462_v21  ;;  %v5555_v21 = vld [vmem:[%s7775_s1 + $0x508] ss:$16 sps:$4 sm:$0xff]   ;;  %v5569_v27 = vld [vmem:[%s7775_s1 + $0x8cc] ss:$16 sps:$4 sm:$0xff]  }
 0x144   :  { %4049 = vmatpush1.bf16.msra.mxu1 %v5465_v22  ;;  %4007 = vmatprep.subr.bf16.mxu0 %v5470_v23  ;;  %v5560_v22 = vld [vmem:[%s7775_s1 + $0x6ec] ss:$16 sps:$4 sm:$0xff]  }
 0x145   :  { %4050 = vmatprep.subr.bf16.mxu1 %v5473_v24  ;;  %4037 = vmatprep.mubr.bf16.mxu0 %v5848_v32  ;;  %v5563_v23 = vld [vmem:[%s7775_s1 + $0x8ec] ss:$16 sps:$4 sm:$0xff]   ;;  %v5558_v24 = vld [vmem:[%s7775_s1 + $0x6e8] ss:$16 sps:$4 sm:$0xff]  }
 0x146   :  { %4080 = vmatprep.mubr.bf16.mxu1 %v5849_v33  ;;  %v5572_v32 = vld [vmem:[%s7775_s1 + $0x6ac] ss:$16 sps:$4 sm:$0xff]  }
 0x147   :  { %4008 = vmatpush1.bf16.msra.mxu0 %v5468_v25  ;;  %v5561_v25 = vld [vmem:[%s7775_s1 + $0x8e8] ss:$16 sps:$4 sm:$0xff]   ;;  %v5575_v33 = vld [vmem:[%s7775_s1 + $0x8ac] ss:$16 sps:$4 sm:$0xff]  }
 0x148   :  { %4051 = vmatpush1.bf16.msra.mxu1 %v5471_v26  ;;  %4009 = vmatprep.subr.bf16.mxu0 %v5476_v28  ;;  %v5566_v26 = vld [vmem:[%s7775_s1 + $0x6cc] ss:$16 sps:$4 sm:$0xff]   ;;  %v5850_v28 = vld [vmem:[%s7776_s0 + $0x8] ss:$72 sps:$4 sm:$0xff]  }
 0x149   :  { %4052 = vmatprep.subr.bf16.mxu1 %v5479_v29  ;;  %v5851_v29 = vld [vmem:[%s7776_s0 + $0x10] ss:$72 sps:$4 sm:$0xff]  }
 0x14b   :  { %4010 = vmatpush1.bf16.msra.mxu0 %v5474_v30  ;;  %v5564_v30 = vld [vmem:[%s7775_s1 + $0x6c8] ss:$16 sps:$4 sm:$0xff]  }
 0x14c   :  { %4053 = vmatpush1.bf16.msra.mxu1 %v5477_v31  ;;  %4011 = vmatprep.subr.bf16.mxu0 %v5482_v34  ;;  %v5567_v31 = vld [vmem:[%s7775_s1 + $0x8c8] ss:$16 sps:$4 sm:$0xff]   ;;  %v5852_v34 = vld [vmem:[%s7776_s0 + $0x1c] ss:$72 sps:$4 sm:$0xff]  }
 0x14d   :  { %4054 = vmatprep.subr.bf16.mxu1 %v5485_v35  ;;  %v5853_v35 = vld [vmem:[%s7776_s0 + $0x24] ss:$72 sps:$4 sm:$0xff]  }
 0x14f   :  { %4012 = vmatpush1.bf16.msra.mxu0 %v5480_v36  ;;  %v5570_v36 = vld [vmem:[%s7775_s1 + $0x6a8] ss:$16 sps:$4 sm:$0xff]  }
 0x150   :  { %4055 = vmatpush1.bf16.msra.mxu1 %v5483_v37  ;;  %4013 = vmatprep.subr.bf16.mxu0 %v5488_v38  ;;  %v5573_v37 = vld [vmem:[%s7775_s1 + $0x8a8] ss:$16 sps:$4 sm:$0xff]   ;;  %v5578_v38 = vld [vmem:[%s7775_s1 + $0x68c] ss:$16 sps:$4 sm:$0xff]  }
 0x151   :  { %4056 = vmatprep.subr.bf16.mxu1 %v5491_v39  ;;  %v5581_v39 = vld [vmem:[%s7775_s1 + $0x88c] ss:$16 sps:$4 sm:$0xff]  }
 0x153   :  { %4014 = vmatpush1.bf16.msra.mxu0 %v5486_v40  ;;  %v5576_v40 = vld [vmem:[%s7775_s1 + $0x688] ss:$16 sps:$4 sm:$0xff]  }
 0x154   :  { %4057 = vmatpush1.bf16.msra.mxu1 %v5489_v41  ;;  %4015 = vmatprep.subr.bf16.mxu0 %v5494_v42  ;;  %v5579_v41 = vld [vmem:[%s7775_s1 + $0x888] ss:$16 sps:$4 sm:$0xff]   ;;  %v5584_v42 = vld [vmem:[%s7775_s1 + $0x66c] ss:$16 sps:$4 sm:$0xff]  }
 0x155   :  { %4058 = vmatprep.subr.bf16.mxu1 %v5497_v43  ;;  %v5587_v43 = vld [vmem:[%s7775_s1 + $0x86c] ss:$16 sps:$4 sm:$0xff]  }
 0x157   :  { %4016 = vmatpush1.bf16.msra.mxu0 %v5492_v44  ;;  %v5582_v44 = vld [vmem:[%s7775_s1 + $0x668] ss:$16 sps:$4 sm:$0xff]  }
 0x158   :  { %4059 = vmatpush1.bf16.msra.mxu1 %v5495_v45  ;;  %4017 = vmatprep.subr.bf16.mxu0 %v5500_v46  ;;  %v5585_v45 = vld [vmem:[%s7775_s1 + $0x868] ss:$16 sps:$4 sm:$0xff]   ;;  %v5590_v46 = vld [vmem:[%s7775_s1 + $0x64c] ss:$16 sps:$4 sm:$0xff]  }
 0x159   :  { %4060 = vmatprep.subr.bf16.mxu1 %v5503_v47  ;;  %v5593_v47 = vld [vmem:[%s7775_s1 + $0x84c] ss:$16 sps:$4 sm:$0xff]  }
 0x15b   :  { %4018 = vmatpush1.bf16.msra.mxu0 %v5498_v48  ;;  %v5588_v48 = vld [vmem:[%s7775_s1 + $0x648] ss:$16 sps:$4 sm:$0xff]  }
 0x15c   :  { %4061 = vmatpush1.bf16.msra.mxu1 %v5501_v49  ;;  %4019 = vmatprep.subr.bf16.mxu0 %v5506_v50  ;;  %v5591_v49 = vld [vmem:[%s7775_s1 + $0x848] ss:$16 sps:$4 sm:$0xff]   ;;  %v5596_v50 = vld [vmem:[%s7775_s1 + $0x62c] ss:$16 sps:$4 sm:$0xff]  }
 0x15d   :  { %4062 = vmatprep.subr.bf16.mxu1 %v5509_v51  ;;  %v5599_v51 = vld [vmem:[%s7775_s1 + $0x82c] ss:$16 sps:$4 sm:$0xff]  }
 0x15f   :  { %4020 = vmatpush1.bf16.msra.mxu0 %v5504_v52  ;;  %v5594_v52 = vld [vmem:[%s7775_s1 + $0x628] ss:$16 sps:$4 sm:$0xff]  }
 0x160   :  { %4063 = vmatpush1.bf16.msra.mxu1 %v5507_v53  ;;  %4021 = vmatprep.subr.bf16.mxu0 %v5512_v54  ;;  %v5597_v53 = vld [vmem:[%s7775_s1 + $0x828] ss:$16 sps:$4 sm:$0xff]   ;;  %v5602_v54 = vld [vmem:[%s7775_s1 + $0x60c] ss:$16 sps:$4 sm:$0xff]  }
 0x161   :  { %4064 = vmatprep.subr.bf16.mxu1 %v5515_v55  ;;  %v5605_v55 = vld [vmem:[%s7775_s1 + $0x80c] ss:$16 sps:$4 sm:$0xff]  }
 0x163   :  { %4022 = vmatpush2.bf16.msra.mxu0 %v5510_v56  ;;  %v5600_v56 = vld [vmem:[%s7775_s1 + $0x608] ss:$16 sps:$4 sm:$0xff]  }
 0x164   :  { %4065 = vmatpush2.bf16.msra.mxu1 %v5513_v57  ;;  %4023 = vmatprep.subr.bf16.mxu0 %v5518_v58  ;;  %v5603_v57 = vld [vmem:[%s7775_s1 + $0x808] ss:$16 sps:$4 sm:$0xff]   ;;  %v5608_v58 = vld [vmem:[%s7775_s1 + $0x7ec] ss:$16 sps:$4 sm:$0xff]  }
 0x165   :  { %4066 = vmatprep.subr.bf16.mxu1 %v5521_v59  ;;  %v5611_v59 = vld [vmem:[%s7775_s1 + $0x9ec] ss:$16 sps:$4 sm:$0xff]  }
 0x167   :  { %4024 = vmatpush2.bf16.msra.mxu0 %v5516_v60  ;;  %v5606_v60 = vld [vmem:[%s7775_s1 + $0x7e8] ss:$16 sps:$4 sm:$0xff]  }
 0x168   :  { %4067 = vmatpush2.bf16.msra.mxu1 %v5519_v61  ;;  %4025 = vmatprep.subr.bf16.mxu0 %v5524_v62  ;;  %v5609_v61 = vld [vmem:[%s7775_s1 + $0x9e8] ss:$16 sps:$4 sm:$0xff]   ;;  %v5614_v62 = vld [vmem:[%s7775_s1 + $0x7cc] ss:$16 sps:$4 sm:$0xff]  }
 0x169   :  { %4068 = vmatprep.subr.bf16.mxu1 %v5527_v63  ;;  %v5617_v63 = vld [vmem:[%s7775_s1 + $0x9cc] ss:$16 sps:$4 sm:$0xff]  }
 0x16b   :  { %4026 = vmatpush2.bf16.msra.mxu0 %v5522_v0  ;;  %v5612_v0 = vld [vmem:[%s7775_s1 + $0x7c8] ss:$16 sps:$4 sm:$0xff]  }
 0x16c   :  { %4069 = vmatpush2.bf16.msra.mxu1 %v5525_v1  ;;  %4027 = vmatprep.subr.bf16.mxu0 %v5530_v2  ;;  %v5615_v1 = vld [vmem:[%s7775_s1 + $0x9c8] ss:$16 sps:$4 sm:$0xff]   ;;  %v5620_v2 = vld [vmem:[%s7775_s1 + $0x7ac] ss:$16 sps:$4 sm:$0xff]  }
 0x16d   :  { %4070 = vmatprep.subr.bf16.mxu1 %v5533_v3  ;;  %v5623_v3 = vld [vmem:[%s7775_s1 + $0x9ac] ss:$16 sps:$4 sm:$0xff]  }
 0x16f   :  { %4028 = vmatpush2.bf16.msra.mxu0 %v5528_v4  ;;  %v5618_v4 = vld [vmem:[%s7775_s1 + $0x7a8] ss:$16 sps:$4 sm:$0xff]  }
 0x170   :  { %4071 = vmatpush2.bf16.msra.mxu1 %v5531_v5  ;;  %4029 = vmatprep.subr.bf16.mxu0 %v5536_v6  ;;  %v5621_v5 = vld [vmem:[%s7775_s1 + $0x9a8] ss:$16 sps:$4 sm:$0xff]   ;;  %v5626_v6 = vld [vmem:[%s7775_s1 + $0x78c] ss:$16 sps:$4 sm:$0xff]  }
 0x171   :  { %4072 = vmatprep.subr.bf16.mxu1 %v5539_v7  ;;  %v5629_v7 = vld [vmem:[%s7775_s1 + $0x98c] ss:$16 sps:$4 sm:$0xff]  }
 0x173   :  { %4030 = vmatpush2.bf16.msra.mxu0 %v5534_v8  ;;  %v5624_v8 = vld [vmem:[%s7775_s1 + $0x788] ss:$16 sps:$4 sm:$0xff]  }
 0x174   :  { %4073 = vmatpush2.bf16.msra.mxu1 %v5537_v9  ;;  %4031 = vmatprep.subr.bf16.mxu0 %v5542_v10  ;;  %v5627_v9 = vld [vmem:[%s7775_s1 + $0x988] ss:$16 sps:$4 sm:$0xff]   ;;  %v5632_v10 = vld [vmem:[%s7775_s1 + $0x76c] ss:$16 sps:$4 sm:$0xff]  }
 0x175   :  { %4074 = vmatprep.subr.bf16.mxu1 %v5545_v11  ;;  %v5635_v11 = vld [vmem:[%s7775_s1 + $0x96c] ss:$16 sps:$4 sm:$0xff]  }
 0x177   :  { %4032 = vmatpush2.bf16.msra.mxu0 %v5540_v12  ;;  %v5630_v12 = vld [vmem:[%s7775_s1 + $0x768] ss:$16 sps:$4 sm:$0xff]  }
 0x178   :  { %4075 = vmatpush2.bf16.msra.mxu1 %v5543_v13  ;;  %4033 = vmatprep.subr.bf16.mxu0 %v5548_v14  ;;  %v5633_v13 = vld [vmem:[%s7775_s1 + $0x968] ss:$16 sps:$4 sm:$0xff]   ;;  %v5638_v14 = vld [vmem:[%s7775_s1 + $0x74c] ss:$16 sps:$4 sm:$0xff]  }
 0x179   :  { %4076 = vmatprep.subr.bf16.mxu1 %v5551_v15  ;;  %v5641_v15 = vld [vmem:[%s7775_s1 + $0x94c] ss:$16 sps:$4 sm:$0xff]  }
 0x17b   :  { %4034 = vmatpush2.bf16.msra.mxu0 %v5546_v16  ;;  %v5636_v16 = vld [vmem:[%s7775_s1 + $0x748] ss:$16 sps:$4 sm:$0xff]  }
 0x17c   :  { %4077 = vmatpush2.bf16.msra.mxu1 %v5549_v17  ;;  %4035 = vmatprep.subr.bf16.mxu0 %v5554_v18  ;;  %v5639_v17 = vld [vmem:[%s7775_s1 + $0x948] ss:$16 sps:$4 sm:$0xff]   ;;  %v5644_v18 = vld [vmem:[%s7775_s1 + $0x72c] ss:$16 sps:$4 sm:$0xff]  }
 0x17d   :  { %4078 = vmatprep.subr.bf16.mxu1 %v5557_v19  ;;  %v5647_v19 = vld [vmem:[%s7775_s1 + $0x92c] ss:$16 sps:$4 sm:$0xff]  }
 0x17f   :  { %4036 = vmatpush2.bf16.msra.mxu0 %v5552_v20  ;;  %v5642_v20 = vld [vmem:[%s7775_s1 + $0x728] ss:$16 sps:$4 sm:$0xff]  }
 0x180   :  { %4079 = vmatpush2.bf16.msra.mxu1 %v5555_v21  ;;  %4091 = vmatprep.subr.bf16.mxu0 %v5560_v22  ;;  %v5645_v21 = vld [vmem:[%s7775_s1 + $0x928] ss:$16 sps:$4 sm:$0xff]   ;;  %v5650_v22 = vld [vmem:[%s7775_s1 + $0x70c] ss:$16 sps:$4 sm:$0xff]  }
 0x181   :  { %4134 = vmatprep.subr.bf16.mxu1 %v5563_v23  ;;  %v5653_v23 = vld [vmem:[%s7775_s1 + $0x90c] ss:$16 sps:$4 sm:$0xff]  }
 0x182   :  { %4038 = vmatmul.mubr.bf16.vlgmr.msra.gmra.mxu0 %v5850_v28  ;;  %v5654_v28 = vld [vmem:[%s7775_s1 + $0xae8] ss:$16 sps:$4 sm:$0xff]  }
 0x183   :  { %4081 = vmatmul.mubr.bf16.vlgmr.msra.gmra.mxu1 %v5851_v29  ;;  %4092 = vmatpush1.bf16.msra.mxu0 %v5558_v24  ;;  %v5648_v24 = vld [vmem:[%s7775_s1 + $0x708] ss:$16 sps:$4 sm:$0xff]  }
 0x184   :  { %4135 = vmatpush1.bf16.msra.mxu1 %v5561_v25  ;;  %4093 = vmatprep.subr.bf16.mxu0 %v5566_v26  ;;  %v5651_v25 = vld [vmem:[%s7775_s1 + $0x908] ss:$16 sps:$4 sm:$0xff]   ;;  %v5656_v26 = vld [vmem:[%s7775_s1 + $0xaec] ss:$16 sps:$4 sm:$0xff]  }
 0x185   :  { %4136 = vmatprep.subr.bf16.mxu1 %v5569_v27  ;;  %4123 = vmatprep.mubr.bf16.mxu0 %v5852_v34  ;;  %v5659_v27 = vld [vmem:[%s7775_s1 + $0xcec] ss:$16 sps:$4 sm:$0xff]   ;;  %v5657_v29 = vld [vmem:[%s7775_s1 + $0xce8] ss:$16 sps:$4 sm:$0xff]  }
 0x186   :  { %4166 = vmatprep.mubr.bf16.mxu1 %v5853_v35  ;;  %v5660_v34 = vld [vmem:[%s7775_s1 + $0xac8] ss:$16 sps:$4 sm:$0xff]  }
 0x187   :  { %4094 = vmatpush1.bf16.msra.mxu0 %v5564_v30  ;;  %v5662_v30 = vld [vmem:[%s7775_s1 + $0xacc] ss:$16 sps:$4 sm:$0xff]   ;;  %v5663_v35 = vld [vmem:[%s7775_s1 + $0xcc8] ss:$16 sps:$4 sm:$0xff]  }
 0x188   :  { %4137 = vmatpush1.bf16.msra.mxu1 %v5567_v31  ;;  %4095 = vmatprep.subr.bf16.mxu0 %v5572_v32  ;;  %v5665_v31 = vld [vmem:[%s7775_s1 + $0xccc] ss:$16 sps:$4 sm:$0xff]   ;;  %v5854_v32 = vld [vmem:[%s7776_s0 + $0x18] ss:$72 sps:$4 sm:$0xff]  }
 0x189   :  { %4138 = vmatprep.subr.bf16.mxu1 %v5575_v33  ;;  %v5855_v33 = vld [vmem:[%s7776_s0 + $0x20] ss:$72 sps:$4 sm:$0xff]  }
 0x18b   :  { %4096 = vmatpush1.bf16.msra.mxu0 %v5570_v36  ;;  %v5668_v36 = vld [vmem:[%s7775_s1 + $0xaac] ss:$16 sps:$4 sm:$0xff]  }
 0x18c   :  { %4139 = vmatpush1.bf16.msra.mxu1 %v5573_v37  ;;  %4097 = vmatprep.subr.bf16.mxu0 %v5578_v38  ;;  %v5671_v37 = vld [vmem:[%s7775_s1 + $0xcac] ss:$16 sps:$4 sm:$0xff]  }
 0x18d   :  { %4140 = vmatprep.subr.bf16.mxu1 %v5581_v39  ;;  %v5856_v38 = vld [vmem:[%s7776_s0 + $0x2c] ss:$72 sps:$4 sm:$0xff]  }
 0x18e   :  { %v5857_v39 = vld [vmem:[%s7776_s0 + $0x34] ss:$72 sps:$4 sm:$0xff]  }
 0x18f   :  { %4098 = vmatpush1.bf16.msra.mxu0 %v5576_v40  ;;  %v5666_v40 = vld [vmem:[%s7775_s1 + $0xaa8] ss:$16 sps:$4 sm:$0xff]  }
 0x190   :  { %4141 = vmatpush1.bf16.msra.mxu1 %v5579_v41  ;;  %4099 = vmatprep.subr.bf16.mxu0 %v5584_v42  ;;  %v5669_v41 = vld [vmem:[%s7775_s1 + $0xca8] ss:$16 sps:$4 sm:$0xff]   ;;  %v5674_v42 = vld [vmem:[%s7775_s1 + $0xa8c] ss:$16 sps:$4 sm:$0xff]  }
 0x191   :  { %4142 = vmatprep.subr.bf16.mxu1 %v5587_v43  ;;  %v5677_v43 = vld [vmem:[%s7775_s1 + $0xc8c] ss:$16 sps:$4 sm:$0xff]  }
 0x193   :  { %4100 = vmatpush1.bf16.msra.mxu0 %v5582_v44  ;;  %v7355_v44 = vpop.f32.mrf.mxu0 }
 0x194   :  { %4143 = vmatpush1.bf16.msra.mxu1 %v5585_v45  ;;  %4101 = vmatprep.subr.bf16.mxu0 %v5590_v46  ;;  %v5672_v45 = vld [vmem:[%s7775_s1 + $0xa88] ss:$16 sps:$4 sm:$0xff]  }
 0x195   :  { %4144 = vmatprep.subr.bf16.mxu1 %v5593_v47  ;;  %v5675_v46 = vld [vmem:[%s7775_s1 + $0xc88] ss:$16 sps:$4 sm:$0xff]   ;;  %v5680_v47 = vld [vmem:[%s7775_s1 + $0xa6c] ss:$16 sps:$4 sm:$0xff]  }
 0x197   :  { %4102 = vmatpush1.bf16.msra.mxu0 %v5588_v48  ;;  %v5683_v48 = vld [vmem:[%s7775_s1 + $0xc6c] ss:$16 sps:$4 sm:$0xff]  }
 0x198   :  { %4145 = vmatpush1.bf16.msra.mxu1 %v5591_v49  ;;  %4103 = vmatprep.subr.bf16.mxu0 %v5596_v50  ;;  %v7369_v49 = vpop.f32.mrf.mxu0  ;;  %v5678_v50 = vld [vmem:[%s7775_s1 + $0xa68] ss:$16 sps:$4 sm:$0xff]  }
 0x199   :  { %4146 = vmatprep.subr.bf16.mxu1 %v5599_v51  ;;  %v5681_v51 = vld [vmem:[%s7775_s1 + $0xc68] ss:$16 sps:$4 sm:$0xff]  }
 0x19b   :  { %4104 = vmatpush1.bf16.msra.mxu0 %v5594_v52  ;;  %v7377_v52 = vpop.f32.mrf.mxu1 }
 0x19c   :  { %4147 = vmatpush1.bf16.msra.mxu1 %v5597_v53  ;;  %4105 = vmatprep.subr.bf16.mxu0 %v5602_v54  ;;  %v5686_v53 = vld [vmem:[%s7775_s1 + $0xa4c] ss:$16 sps:$4 sm:$0xff]  }
 0x19d   :  { %4148 = vmatprep.subr.bf16.mxu1 %v5605_v55  ;;  %v5689_v54 = vld [vmem:[%s7775_s1 + $0xc4c] ss:$16 sps:$4 sm:$0xff]   ;;  %v7385_v55 = vpop.f32.mrf.mxu0 }
 0x19f   :  { %4106 = vmatpush1.bf16.msra.mxu0 %v5600_v56  ;;  %v5684_v56 = vld [vmem:[%s7775_s1 + $0xa48] ss:$16 sps:$4 sm:$0xff]  }
 0x1a0   :  { %4149 = vmatpush1.bf16.msra.mxu1 %v5603_v57  ;;  %4107 = vmatprep.subr.bf16.mxu0 %v5608_v58  ;;  %v5687_v57 = vld [vmem:[%s7775_s1 + $0xc48] ss:$16 sps:$4 sm:$0xff]   ;;  %v7393_v58 = vpop.f32.mrf.mxu1 }
 0x1a1   :  { %4150 = vmatprep.subr.bf16.mxu1 %v5611_v59  ;;  %v5692_v59 = vld [vmem:[%s7775_s1 + $0xa2c] ss:$16 sps:$4 sm:$0xff]  }
 0x1a3   :  { %4108 = vmatpush2.bf16.msra.mxu0 %v5606_v60  ;;  %v5695_v60 = vld [vmem:[%s7775_s1 + $0xc2c] ss:$16 sps:$4 sm:$0xff]  }
 0x1a4   :  { %4151 = vmatpush2.bf16.msra.mxu1 %v5609_v61  ;;  %4109 = vmatprep.subr.bf16.mxu0 %v5614_v62  ;;  %v7401_v61 = vpop.f32.mrf.mxu0  ;;  %v5690_v62 = vld [vmem:[%s7775_s1 + $0xa28] ss:$16 sps:$4 sm:$0xff]  }
 0x1a5   :  { %4152 = vmatprep.subr.bf16.mxu1 %v5617_v63  ;;  %v5693_v63 = vld [vmem:[%s7775_s1 + $0xc28] ss:$16 sps:$4 sm:$0xff]  }
 0x1a7   :  { %4110 = vmatpush2.bf16.msra.mxu0 %v5612_v0  ;;  %v7409_v0 = vpop.f32.mrf.mxu1 }
 0x1a8   :  { %4153 = vmatpush2.bf16.msra.mxu1 %v5615_v1  ;;  %4111 = vmatprep.subr.bf16.mxu0 %v5620_v2  ;;  %v7411_v1 = vpop.f32.mrf.mxu0  ;;  %v5698_v2 = vld [vmem:[%s7775_s1 + $0xa0c] ss:$16 sps:$4 sm:$0xff]  }
 0x1a9   :  { %4154 = vmatprep.subr.bf16.mxu1 %v5623_v3  ;;  %v5701_v3 = vld [vmem:[%s7775_s1 + $0xc0c] ss:$16 sps:$4 sm:$0xff]  }
 0x1ab   :  { %4112 = vmatpush2.bf16.msra.mxu0 %v5618_v4  ;;  %v5696_v4 = vld [vmem:[%s7775_s1 + $0xa08] ss:$16 sps:$4 sm:$0xff]  }
 0x1ac   :  { %4155 = vmatpush2.bf16.msra.mxu1 %v5621_v5  ;;  %4113 = vmatprep.subr.bf16.mxu0 %v5626_v6  ;;  %v5699_v5 = vld [vmem:[%s7775_s1 + $0xc08] ss:$16 sps:$4 sm:$0xff]   ;;  %v7425_v6 = vpop.f32.mrf.mxu1 }
 0x1ad   :  { %4156 = vmatprep.subr.bf16.mxu1 %v5629_v7  ;;  %v3697_v7 = vpop.f32.mrf.mxu0 }
 0x1af   :  { %4114 = vmatpush2.bf16.msra.mxu0 %v5624_v8  ;;  %v5704_v8 = vld [vmem:[%s7775_s1 + $0xbec] ss:$16 sps:$4 sm:$0xff]  }
 0x1b0   :  { %4157 = vmatpush2.bf16.msra.mxu1 %v5627_v9  ;;  %4115 = vmatprep.subr.bf16.mxu0 %v5632_v10  ;;  %v5707_v9 = vld [vmem:[%s7775_s1 + $0xdec] ss:$16 sps:$4 sm:$0xff]   ;;  %v7433_v10 = vpop.f32.mrf.mxu1 }
 0x1b1   :  { %4158 = vmatprep.subr.bf16.mxu1 %v5635_v11  ;;  %v5702_v11 = vld [vmem:[%s7775_s1 + $0xbe8] ss:$16 sps:$4 sm:$0xff]  }
 0x1b3   :  { %4116 = vmatpush2.bf16.msra.mxu0 %v5630_v12  ;;  %v5705_v12 = vld [vmem:[%s7775_s1 + $0xde8] ss:$16 sps:$4 sm:$0xff]  }
 0x1b4   :  { %4159 = vmatpush2.bf16.msra.mxu1 %v5633_v13  ;;  %4117 = vmatprep.subr.bf16.mxu0 %v5638_v14  ;;  %v7441_v13 = vpop.f32.mrf.mxu0  ;;  %v5710_v14 = vld [vmem:[%s7775_s1 + $0xbcc] ss:$16 sps:$4 sm:$0xff]  }
 0x1b5   :  { %4160 = vmatprep.subr.bf16.mxu1 %v5641_v15  ;;  %v5713_v15 = vld [vmem:[%s7775_s1 + $0xdcc] ss:$16 sps:$4 sm:$0xff]  }
 0x1b7   :  { %4118 = vmatpush2.bf16.msra.mxu0 %v5636_v16  ;;  %v3740_v16 = vpop.f32.mrf.mxu1 }
 0x1b8   :  { %4161 = vmatpush2.bf16.msra.mxu1 %v5639_v17  ;;  %4119 = vmatprep.subr.bf16.mxu0 %v5644_v18  ;;  %v5708_v17 = vld [vmem:[%s7775_s1 + $0xbc8] ss:$16 sps:$4 sm:$0xff]  }
 0x1b9   :  { %4162 = vmatprep.subr.bf16.mxu1 %v5647_v19  ;;  %v5711_v18 = vld [vmem:[%s7775_s1 + $0xdc8] ss:$16 sps:$4 sm:$0xff]   ;;  %v3701_v19 = vpop.f32.mrf.mxu0 }
 0x1bb   :  { %4120 = vmatpush2.bf16.msra.mxu0 %v5642_v20  ;;  %v5716_v20 = vld [vmem:[%s7775_s1 + $0xbac] ss:$16 sps:$4 sm:$0xff]  }
 0x1bc   :  { %4163 = vmatpush2.bf16.msra.mxu1 %v5645_v21  ;;  %4121 = vmatprep.subr.bf16.mxu0 %v5650_v22  ;;  %v5719_v21 = vld [vmem:[%s7775_s1 + $0xdac] ss:$16 sps:$4 sm:$0xff]   ;;  %v7461_v22 = vpop.f32.mrf.mxu1 }
 0x1bd   :  { %4164 = vmatprep.subr.bf16.mxu1 %v5653_v23  ;;  %v3781_v23 = vpop.f32.mrf.mxu0 }
 0x1bf   :  { %4122 = vmatpush2.bf16.msra.mxu0 %v5648_v24  ;;  %v5714_v24 = vld [vmem:[%s7775_s1 + $0xba8] ss:$16 sps:$4 sm:$0xff]  }
 0x1c0   :  { %4165 = vmatpush2.bf16.msra.mxu1 %v5651_v25  ;;  %4177 = vmatprep.subr.bf16.mxu0 %v5656_v26  ;;  %v5717_v25 = vld [vmem:[%s7775_s1 + $0xda8] ss:$16 sps:$4 sm:$0xff]   ;;  %v5722_v26 = vld [vmem:[%s7775_s1 + $0xb8c] ss:$16 sps:$4 sm:$0xff]  }
 0x1c1   :  { %4220 = vmatprep.subr.bf16.mxu1 %v5659_v27  ;;  %v5725_v27 = vld [vmem:[%s7775_s1 + $0xd8c] ss:$16 sps:$4 sm:$0xff]  }
 0x1c2   :  { %4124 = vmatmul.mubr.bf16.vlgmr.msra.gmra.mxu0 %v5854_v32 }
 0x1c3   :  { %4167 = vmatmul.mubr.bf16.vlgmr.msra.gmra.mxu1 %v5855_v33  ;;  %4178 = vmatpush1.bf16.msra.mxu0 %v5654_v28  ;;  %v3744_v28 = vpop.f32.mrf.mxu1  ;;  %v5728_v33 = vld [vmem:[%s7775_s1 + $0xb6c] ss:$16 sps:$4 sm:$0xff]  }
 0x1c4   :  { %4221 = vmatpush1.bf16.msra.mxu1 %v5657_v29  ;;  %4179 = vmatprep.subr.bf16.mxu0 %v5662_v30  ;;  %v3783_v29 = vpop.f32.mrf.mxu0  ;;  %v5720_v30 = vld [vmem:[%s7775_s1 + $0xb88] ss:$16 sps:$4 sm:$0xff]  }
 0x1c5   :  { %4222 = vmatprep.subr.bf16.mxu1 %v5665_v31  ;;  %4209 = vmatprep.mubr.bf16.mxu0 %v5856_v38  ;;  %v5723_v31 = vld [vmem:[%s7775_s1 + $0xd88] ss:$16 sps:$4 sm:$0xff]   ;;  %v3824_v32 = vpop.f32.mrf.mxu1 }
 0x1c6   :  { %4252 = vmatprep.mubr.bf16.mxu1 %v5857_v39  ;;  %v5729_v38 = vld [vmem:[%s7775_s1 + $0xd68] ss:$16 sps:$4 sm:$0xff]  }
 0x1c7   :  { %4180 = vmatpush1.bf16.msra.mxu0 %v5660_v34  ;;  %v5731_v34 = vld [vmem:[%s7775_s1 + $0xd6c] ss:$16 sps:$4 sm:$0xff]   ;;  %v3826_v39 = vpop.f32.mrf.mxu1 }
 0x1c8   :  { %4223 = vmatpush1.bf16.msra.mxu1 %v5663_v35  ;;  %4181 = vmatprep.subr.bf16.mxu0 %v5668_v36  ;;  %v3785_v35 = vpop.f32.mrf.mxu0  ;;  %v3653_v36 = vadd.f32 %v7377_v52, %v7355_v44  ;;  %v5743_v52 = vld [vmem:[%s7775_s1 + $0xd2c] ss:$16 sps:$4 sm:$0xff]  }
 0x1c9   :  { %4224 = vmatprep.subr.bf16.mxu1 %v5671_v37  ;;  %v5726_v37 = vld [vmem:[%s7775_s1 + $0xb68] ss:$16 sps:$4 sm:$0xff]  }
 0x1ca   :  { %v3787_v44 = vpop.f32.mrf.mxu0 }
 0x1cb   :  { %4182 = vmatpush1.bf16.msra.mxu0 %v5666_v40  ;;  %v5734_v40 = vld [vmem:[%s7775_s1 + $0xb4c] ss:$16 sps:$4 sm:$0xff]  }
 0x1cc   :  { %4225 = vmatpush1.bf16.msra.mxu1 %v5669_v41  ;;  %4183 = vmatprep.subr.bf16.mxu0 %v5674_v42  ;;  %v5737_v41 = vld [vmem:[%s7775_s1 + $0xd4c] ss:$16 sps:$4 sm:$0xff]   ;;  %v3655_v42 = vadd.f32 %v7393_v58, %v7369_v49 }
 0x1cd   :  { %4226 = vmatprep.subr.bf16.mxu1 %v5677_v43  ;;  %v3696_v43 = vadd.f32 %v7411_v1, %v3653_v36  ;;  %v5740_v49 = vld [vmem:[%s7775_s1 + $0xb2c] ss:$16 sps:$4 sm:$0xff]  }
 0x1ce   :  { %v5764_v36 = vld [vmem:[%s7775_s1 + $0xeac] ss:$16 sps:$4 sm:$0xff]  }
 0x1cf   :  { %4184 = vmatpush1.bf16.msra.mxu0 %v5672_v45  ;;  %v3657_v45 = vadd.f32 %v7409_v0, %v7385_v55  ;;  %v5749_v0 = vld [vmem:[%s7775_s1 + $0xd0c] ss:$16 sps:$4 sm:$0xff]  }
 0x1d0   :  { %4227 = vmatpush1.bf16.msra.mxu1 %v5675_v46  ;;  %4185 = vmatprep.subr.bf16.mxu0 %v5680_v47  ;;  %v3698_v46 = vadd.f32 %v3697_v7, %v3655_v42  ;;  %v5732_v47 = vld [vmem:[%s7775_s1 + $0xb48] ss:$16 sps:$4 sm:$0xff]  }
 0x1d1   :  { %4228 = vmatprep.subr.bf16.mxu1 %v5683_v48  ;;  %v5735_v48 = vld [vmem:[%s7775_s1 + $0xd48] ss:$16 sps:$4 sm:$0xff]   ;;  %v3700_v55 = vadd.f32 %v7441_v13, %v3657_v45 }
 0x1d2   :  { %v5744_v7 = vld [vmem:[%s7775_s1 + $0xb08] ss:$16 sps:$4 sm:$0xff]  }
 0x1d3   :  { %4186 = vmatpush1.bf16.msra.mxu0 %v5678_v50  ;;  %v3828_v50 = vpop.f32.mrf.mxu1  ;;  %v3743_v1 = vadd.f32 %v7461_v22, %v3700_v55  ;;  %v5761_v22 = vld [vmem:[%s7775_s1 + $0x10cc] ss:$16 sps:$4 sm:$0xff]  }
 0x1d4   :  { %4229 = vmatpush1.bf16.msra.mxu1 %v5681_v51  ;;  %4187 = vmatprep.subr.bf16.mxu0 %v5686_v53  ;;  %v3867_v51 = vpop.f32.mrf.mxu0  ;;  %v3659_v53 = vadd.f32 %v7425_v6, %v7401_v61  ;;  %v5746_v61 = vld [vmem:[%s7775_s1 + $0xb0c] ss:$16 sps:$4 sm:$0xff]  }
 0x1d5   :  { %4230 = vmatprep.subr.bf16.mxu1 %v5689_v54  ;;  %v3739_v54 = vadd.f32 %v7433_v10, %v3696_v43  ;;  %v3786_v6 = vadd.f32 %v3785_v35, %v3743_v1  ;;  %v5752_v10 = vld [vmem:[%s7775_s1 + $0xeec] ss:$16 sps:$4 sm:$0xff]   ;;  %v5789_v1 = vld [vmem:[%s7775_s1 + $0x1028] ss:$16 sps:$4 sm:$0xff]  }
 0x1d6   :  { %v5779_v55 = vld [vmem:[%s7775_s1 + $0x106c] ss:$16 sps:$4 sm:$0xff]  }
 0x1d7   :  { %4188 = vmatpush1.bf16.msra.mxu0 %v5684_v56  ;;  %v3741_v56 = vadd.f32 %v3740_v16, %v3698_v46  ;;  %v3782_v58 = vadd.f32 %v3781_v23, %v3739_v54  ;;  %v3829_v16 = vadd.f32 %v3828_v50, %v3786_v6  ;;  %v5762_v46 = vld [vmem:[%s7775_s1 + $0xea8] ss:$16 sps:$4 sm:$0xff]   ;;  %v5770_v50 = vld [vmem:[%s7775_s1 + $0xe8c] ss:$16 sps:$4 sm:$0xff]  }
 0x1d8   :  { %4231 = vmatpush1.bf16.msra.mxu1 %v5687_v57  ;;  %4189 = vmatprep.subr.bf16.mxu0 %v5692_v59  ;;  %v3702_v57 = vadd.f32 %v3701_v19, %v3659_v53  ;;  %v5738_v59 = vld [vmem:[%s7775_s1 + $0xb28] ss:$16 sps:$4 sm:$0xff]   ;;  %v5776_v54 = vld [vmem:[%s7775_s1 + $0xe6c] ss:$16 sps:$4 sm:$0xff]  }
 0x1d9   :  { %4232 = vmatprep.subr.bf16.mxu1 %v5695_v60  ;;  %v5741_v60 = vld [vmem:[%s7775_s1 + $0xd28] ss:$16 sps:$4 sm:$0xff]   ;;  %v5800_v6 = vld [vmem:[%s7775_s1 + $0xfec] ss:$16 sps:$4 sm:$0xff]  }
 0x1da   :  { %v5753_v19 = vld [vmem:[%s7775_s1 + $0x10e8] ss:$16 sps:$4 sm:$0xff]  }
 0x1db   :  { %4190 = vmatpush1.bf16.msra.mxu0 %v5690_v62  ;;  %v3830_v62 = vpop.f32.mrf.mxu1  ;;  %v5771_v53 = vld [vmem:[%s7775_s1 + $0x1088] ss:$16 sps:$4 sm:$0xff]  }
 0x1dc   :  { %4233 = vmatpush1.bf16.msra.mxu1 %v5693_v63  ;;  %4191 = vmatprep.subr.bf16.mxu0 %v5698_v2  ;;  %v3869_v63 = vpop.f32.mrf.mxu0  ;;  %v3784_v2 = vadd.f32 %v3783_v29, %v3741_v56  ;;  %v5859_v29 = vld [vmem:[%s7776_s0 + $0x30] ss:$72 sps:$4 sm:$0xff]  }
 0x1dd   :  { %4234 = vmatprep.subr.bf16.mxu1 %v5701_v3  ;;  %v3910_v3 = vpop.f32.mrf.mxu1  ;;  %v5774_v56 = vld [vmem:[%s7775_s1 + $0xe68] ss:$16 sps:$4 sm:$0xff]  }
 0x1df   :  { %4192 = vmatpush1.bf16.msra.mxu0 %v5696_v4  ;;  %v3745_v4 = vadd.f32 %v3744_v28, %v3702_v57  ;;  %v5858_v28 = vld [vmem:[%s7776_s0 + $0x28] ss:$72 sps:$4 sm:$0xff]  }
 0x1e0   :  { %4235 = vmatpush1.bf16.msra.mxu1 %v5699_v5  ;;  %4193 = vmatprep.subr.bf16.mxu0 %v5704_v8  ;;  %v3825_v5 = vadd.f32 %v3824_v32, %v3782_v58  ;;  %v5747_v8 = vld [vmem:[%s7775_s1 + $0xd08] ss:$16 sps:$4 sm:$0xff]   ;;  %v5782_v58 = vld [vmem:[%s7775_s1 + $0xe4c] ss:$16 sps:$4 sm:$0xff]  }
 0x1e1   :  { %4236 = vmatprep.subr.bf16.mxu1 %v5707_v9  ;;  %v3871_v9 = vpop.f32.mrf.mxu0  ;;  %v3788_v13 = vadd.f32 %v3787_v44, %v3745_v4  ;;  %v5777_v57 = vld [vmem:[%s7775_s1 + $0x1068] ss:$16 sps:$4 sm:$0xff]  }
 0x1e2   :  { %v5792_v4 = vld [vmem:[%s7775_s1 + $0xe08] ss:$16 sps:$4 sm:$0xff]  }
 0x1e3   :  { %4194 = vmatpush2.bf16.msra.mxu0 %v5702_v11  ;;  %v5755_v11 = vld [vmem:[%s7775_s1 + $0x10ec] ss:$16 sps:$4 sm:$0xff]   ;;  %v3831_v23 = vadd.f32 %v3830_v62, %v3788_v13  ;;  %v5783_v62 = vld [vmem:[%s7775_s1 + $0x1048] ss:$16 sps:$4 sm:$0xff]  }
 0x1e4   :  { %4237 = vmatpush2.bf16.msra.mxu1 %v5705_v12  ;;  %4195 = vmatprep.subr.bf16.mxu0 %v5710_v14  ;;  %v3827_v12 = vadd.f32 %v3826_v39, %v3784_v2  ;;  %v3868_v14 = vadd.f32 %v3867_v51, %v3825_v5  ;;  %v5773_v51 = vld [vmem:[%s7775_s1 + $0x108c] ss:$16 sps:$4 sm:$0xff]   ;;  %v5795_v5 = vld [vmem:[%s7775_s1 + $0x1008] ss:$16 sps:$4 sm:$0xff]  }
 0x1e5   :  { %4238 = vmatprep.subr.bf16.mxu1 %v5713_v15  ;;  %v3912_v15 = vpop.f32.mrf.mxu1  ;;  %v5794_v2 = vld [vmem:[%s7775_s1 + $0xe0c] ss:$16 sps:$4 sm:$0xff]   ;;  %v5807_v13 = vld [vmem:[%s7775_s1 + $0x11c8] ss:$16 sps:$4 sm:$0xff]  }
 0x1e7   :  { %4196 = vmatpush2.bf16.msra.mxu0 %v5708_v17  ;;  %v3870_v17 = vadd.f32 %v3869_v63, %v3827_v12  ;;  %v5788_v63 = vld [vmem:[%s7775_s1 + $0xe2c] ss:$16 sps:$4 sm:$0xff]   ;;  %v5804_v12 = vld [vmem:[%s7775_s1 + $0xfc8] ss:$16 sps:$4 sm:$0xff]  }
 0x1e8   :  { %4239 = vmatpush2.bf16.msra.mxu1 %v5711_v18  ;;  %4197 = vmatprep.subr.bf16.mxu0 %v5716_v20  ;;  %v5750_v18 = vld [vmem:[%s7775_s1 + $0xee8] ss:$16 sps:$4 sm:$0xff]   ;;  %v3873_v20 = vpop.f32.mrf.mxu0 }
 0x1e9   :  { %4240 = vmatprep.subr.bf16.mxu1 %v5719_v21  ;;  %v5758_v21 = vld [vmem:[%s7775_s1 + $0xecc] ss:$16 sps:$4 sm:$0xff]  }
 0x1eb   :  { %4198 = vmatpush2.bf16.msra.mxu0 %v5714_v24  ;;  %v3911_v24 = vadd.f32 %v3910_v3, %v3868_v14  ;;  %v5797_v3 = vld [vmem:[%s7775_s1 + $0x100c] ss:$16 sps:$4 sm:$0xff]  }
 0x1ec   :  { %4241 = vmatpush2.bf16.msra.mxu1 %v5717_v25  ;;  %4199 = vmatprep.subr.bf16.mxu0 %v5722_v26  ;;  %v3872_v25 = vadd.f32 %v3871_v9, %v3829_v16  ;;  %v3914_v26 = vpop.f32.mrf.mxu1  ;;  %v5801_v9 = vld [vmem:[%s7775_s1 + $0x11e8] ss:$16 sps:$4 sm:$0xff]   ;;  %v5812_v14 = vld [vmem:[%s7775_s1 + $0xfac] ss:$16 sps:$4 sm:$0xff]  }
 0x1ed   :  { %4242 = vmatprep.subr.bf16.mxu1 %v5725_v27  ;;  %v5810_v16 = vld [vmem:[%s7775_s1 + $0xfa8] ss:$16 sps:$4 sm:$0xff]  }
 0x1ee   :  { %v3916_v42 = vpop.f32.mrf.mxu1 }
 0x1ef   :  { %4200 = vmatpush2.bf16.msra.mxu0 %v5720_v30  ;;  %v3913_v30 = vadd.f32 %v3912_v15, %v3870_v17  ;;  %v5815_v15 = vld [vmem:[%s7775_s1 + $0x11ac] ss:$16 sps:$4 sm:$0xff]   ;;  %v5813_v17 = vld [vmem:[%s7775_s1 + $0x11a8] ss:$16 sps:$4 sm:$0xff]  }
 0x1f0   :  { %4243 = vmatpush2.bf16.msra.mxu1 %v5723_v31  ;;  %4201 = vmatprep.subr.bf16.mxu0 %v5728_v33  ;;  %v3874_v31 = vadd.f32 %v3873_v20, %v3831_v23  ;;  %v5756_v33 = vld [vmem:[%s7775_s1 + $0xec8] ss:$16 sps:$4 sm:$0xff]   ;;  %v5827_v23 = vld [vmem:[%s7775_s1 + $0x116c] ss:$16 sps:$4 sm:$0xff]  }
 0x1f1   :  { %4244 = vmatprep.subr.bf16.mxu1 %v5731_v34  ;;  %v5759_v34 = vld [vmem:[%s7775_s1 + $0x10c8] ss:$16 sps:$4 sm:$0xff]  }
 0x1f2   :  { %v3917_v44 = vadd.f32 %v3916_v42, %v3874_v31  ;;  %v5816_v20 = vld [vmem:[%s7775_s1 + $0xf88] ss:$16 sps:$4 sm:$0xff]   ;;  %v5839_v31 = vld [vmem:[%s7775_s1 + $0x112c] ss:$16 sps:$4 sm:$0xff]  }
 0x1f3   :  { %4202 = vmatpush2.bf16.msra.mxu0 %v5726_v37  ;;  %v5767_v37 = vld [vmem:[%s7775_s1 + $0x10ac] ss:$16 sps:$4 sm:$0xff]  }
 0x1f4   :  { %4245 = vmatpush2.bf16.msra.mxu1 %v5729_v38  ;;  %4203 = vmatprep.subr.bf16.mxu0 %v5734_v40  ;;  %v3915_v38 = vadd.f32 %v3914_v26, %v3872_v25  ;;  %v5860_v40 = vld [vmem:[%s7776_s0 + $0x3c] ss:$72 sps:$4 sm:$0xff]   ;;  %v5825_v25 = vld [vmem:[%s7775_s1 + $0x1168] ss:$16 sps:$4 sm:$0xff]  }
 0x1f5   :  { %4246 = vmatprep.subr.bf16.mxu1 %v5737_v41  ;;  %v5861_v41 = vld [vmem:[%s7776_s0 + $0x44] ss:$72 sps:$4 sm:$0xff]  }
 0x1f6   :  { %v5830_v26 = vld [vmem:[%s7775_s1 + $0xf4c] ss:$16 sps:$4 sm:$0xff]  }
 0x1f7   :  { %4204 = vmatpush2.bf16.msra.mxu0 %v5732_v47  ;;  %v5765_v47 = vld [vmem:[%s7775_s1 + $0x10a8] ss:$16 sps:$4 sm:$0xff]  }
 0x1f8   :  { %4247 = vmatpush2.bf16.msra.mxu1 %v5735_v48  ;;  %4205 = vmatprep.subr.bf16.mxu0 %v5740_v49 }
 0x1f9   :  { %4248 = vmatprep.subr.bf16.mxu1 %v5743_v52  ;;  %v5768_v52 = vld [vmem:[%s7775_s1 + $0xe88] ss:$16 sps:$4 sm:$0xff]  }
 0x1fb   :  { %4206 = vmatpush2.bf16.msra.mxu0 %v5738_v59  ;;  %v5785_v59 = vld [vmem:[%s7775_s1 + $0x104c] ss:$16 sps:$4 sm:$0xff]  }
 0x1fc   :  { %4249 = vmatpush2.bf16.msra.mxu1 %v5741_v60  ;;  %4207 = vmatprep.subr.bf16.mxu0 %v5746_v61  ;;  %v5780_v60 = vld [vmem:[%s7775_s1 + $0xe48] ss:$16 sps:$4 sm:$0xff]   ;;  %v5791_v61 = vld [vmem:[%s7775_s1 + $0x102c] ss:$16 sps:$4 sm:$0xff]  }
 0x1fd   :  { %4250 = vmatprep.subr.bf16.mxu1 %v5749_v0  ;;  %v5786_v0 = vld [vmem:[%s7775_s1 + $0xe28] ss:$16 sps:$4 sm:$0xff]  }
 0x1ff   :  { %4208 = vmatpush2.bf16.msra.mxu0 %v5744_v7  ;;  %v5803_v7 = vld [vmem:[%s7775_s1 + $0x11ec] ss:$16 sps:$4 sm:$0xff]  }
 0x200   :  { %4251 = vmatpush2.bf16.msra.mxu1 %v5747_v8  ;;  %4263 = vmatprep.subr.bf16.mxu0 %v5752_v10  ;;  %v5798_v8 = vld [vmem:[%s7775_s1 + $0xfe8] ss:$16 sps:$4 sm:$0xff]   ;;  %v5806_v10 = vld [vmem:[%s7775_s1 + $0xfcc] ss:$16 sps:$4 sm:$0xff]  }
 0x201   :  { %4306 = vmatprep.subr.bf16.mxu1 %v5755_v11  ;;  %v5809_v11 = vld [vmem:[%s7775_s1 + $0x11cc] ss:$16 sps:$4 sm:$0xff]  }
 0x202   :  { %v3953_v27 = vpop.f32.mrf.mxu0  ;;  %4210 = vmatmul.mubr.bf16.vlgmr.msra.gmra.mxu0 %v5858_v28  ;;  %v5828_v28 = vld [vmem:[%s7775_s1 + $0xf48] ss:$16 sps:$4 sm:$0xff]  }
 0x203   :  { %4253 = vmatmul.mubr.bf16.vlgmr.msra.gmra.mxu1 %v5859_v29  ;;  %v3954_v32 = vadd.f32 %v3953_v27, %v3911_v24  ;;  %4264 = vmatpush1.bf16.msra.mxu0 %v5750_v18  ;;  %v5818_v18 = vld [vmem:[%s7775_s1 + $0xf8c] ss:$16 sps:$4 sm:$0xff]   ;;  %v5822_v24 = vld [vmem:[%s7775_s1 + $0xf68] ss:$16 sps:$4 sm:$0xff]  }
 0x204   :  { %4307 = vmatpush1.bf16.msra.mxu1 %v5753_v19  ;;  %v3955_v35 = vpop.f32.mrf.mxu0  ;;  %4265 = vmatprep.subr.bf16.mxu0 %v5758_v21  ;;  %v5821_v19 = vld [vmem:[%s7775_s1 + $0x118c] ss:$16 sps:$4 sm:$0xff]   ;;  %v5819_v21 = vld [vmem:[%s7775_s1 + $0x1188] ss:$16 sps:$4 sm:$0xff]  }
 0x205   :  { %4308 = vmatprep.subr.bf16.mxu1 %v5761_v22  ;;  %4349 = vst [vmem:[%s7777_s2] sm:$0xff] %v3954_v32  ;;  %v3956_v39 = vadd.f32 %v3955_v35, %v3913_v30  ;;  %4295 = vmatprep.mubr.bf16.mxu0 %v5860_v40  ;;  %v5824_v22 = vld [vmem:[%s7775_s1 + $0xf6c] ss:$16 sps:$4 sm:$0xff]   ;;  %v5831_v29 = vld [vmem:[%s7775_s1 + $0x1148] ss:$16 sps:$4 sm:$0xff]   ;;  %v3996_v40 = vpop.f32.mrf.mxu1 }
 0x206   :  { %4338 = vmatprep.mubr.bf16.mxu1 %v5861_v41  ;;  %v3957_v43 = vpop.f32.mrf.mxu0  ;;  %v5833_v27 = vld [vmem:[%s7775_s1 + $0x114c] ss:$16 sps:$4 sm:$0xff]   ;;  %v5834_v32 = vld [vmem:[%s7775_s1 + $0xf28] ss:$16 sps:$4 sm:$0xff]  }
 0x207   :  { %4350 = vst [vmem:[%s7777_s2 + $0x8] sm:$0xff] %v3956_v39  ;;  %v3958_v45 = vadd.f32 %v3957_v43, %v3915_v38  ;;  %4266 = vmatpush1.bf16.msra.mxu0 %v5756_v33  ;;  %v5836_v30 = vld [vmem:[%s7775_s1 + $0xf2c] ss:$16 sps:$4 sm:$0xff]   ;;  %v5837_v33 = vld [vmem:[%s7775_s1 + $0x1128] ss:$16 sps:$4 sm:$0xff]   ;;  %v3998_v41 = vpop.f32.mrf.mxu1 }
 0x208   :  { %4309 = vmatpush1.bf16.msra.mxu1 %v5759_v34  ;;  %v3959_v48 = vpop.f32.mrf.mxu0  ;;  %4267 = vmatprep.subr.bf16.mxu0 %v5764_v36  ;;  %v5842_v34 = vld [vmem:[%s7775_s1 + $0xf0c] ss:$16 sps:$4 sm:$0xff]   ;;  %v5840_v36 = vld [vmem:[%s7775_s1 + $0xf08] ss:$16 sps:$4 sm:$0xff]  }
 0x209   :  { %4310 = vmatprep.subr.bf16.mxu1 %v5767_v37  ;;  %4353 = vst [vmem:[%s7777_s2 + $0x20] sm:$0xff] %v3958_v45  ;;  %v3960_v49 = vadd.f32 %v3959_v48, %v3917_v44  ;;  %v5845_v35 = vld [vmem:[%s7775_s1 + $0x110c] ss:$16 sps:$4 sm:$0xff]   ;;  %v5843_v37 = vld [vmem:[%s7775_s1 + $0x1108] ss:$16 sps:$4 sm:$0xff]   ;;  %v4000_v42 = vpop.f32.mrf.mxu1 }
 0x20a   :  { %v5862_v38 = vld [vmem:[%s7776_s0 + $0x38] ss:$72 sps:$4 sm:$0xff]  }
 0x20b   :  { %4354 = vst [vmem:[%s7777_s2 + $0x28] sm:$0xff] %v3960_v49  ;;  %4268 = vmatpush1.bf16.msra.mxu0 %v5762_v46  ;;  %v5863_v39 = vld [vmem:[%s7776_s0 + $0x40] ss:$72 sps:$4 sm:$0xff]   ;;  %v4002_v43 = vpop.f32.mrf.mxu1 }
 0x20c   :  { %4311 = vmatpush1.bf16.msra.mxu1 %v5765_v47  ;;  %4269 = vmatprep.subr.bf16.mxu0 %v5770_v50 }
 0x20d   :  { %4312 = vmatprep.subr.bf16.mxu1 %v5773_v51 }
 0x20f   :  { %4270 = vmatpush1.bf16.msra.mxu0 %v5768_v52 }
 0x210   :  { %4313 = vmatpush1.bf16.msra.mxu1 %v5771_v53  ;;  %4271 = vmatprep.subr.bf16.mxu0 %v5776_v54 }
 0x211   :  { %4314 = vmatprep.subr.bf16.mxu1 %v5779_v55 }
 0x213   :  { %4272 = vmatpush1.bf16.msra.mxu0 %v5774_v56 }
 0x214   :  { %4315 = vmatpush1.bf16.msra.mxu1 %v5777_v57  ;;  %4273 = vmatprep.subr.bf16.mxu0 %v5782_v58 }
 0x215   :  { %4316 = vmatprep.subr.bf16.mxu1 %v5785_v59 }
 0x217   :  { %4274 = vmatpush1.bf16.msra.mxu0 %v5780_v60 }
 0x218   :  { %4317 = vmatpush1.bf16.msra.mxu1 %v5783_v62  ;;  %4275 = vmatprep.subr.bf16.mxu0 %v5788_v63 }
 0x219   :  { %4318 = vmatprep.subr.bf16.mxu1 %v5791_v61 }
 0x21b   :  { %4276 = vmatpush1.bf16.msra.mxu0 %v5786_v0 }
 0x21c   :  { %4319 = vmatpush1.bf16.msra.mxu1 %v5789_v1  ;;  %4277 = vmatprep.subr.bf16.mxu0 %v5794_v2 }
 0x21d   :  { %4320 = vmatprep.subr.bf16.mxu1 %v5797_v3 }
 0x21f   :  { %4278 = vmatpush1.bf16.msra.mxu0 %v5792_v4 }
 0x220   :  { %4321 = vmatpush1.bf16.msra.mxu1 %v5795_v5  ;;  %4279 = vmatprep.subr.bf16.mxu0 %v5800_v6 }
 0x221   :  { %4322 = vmatprep.subr.bf16.mxu1 %v5803_v7 }
 0x223   :  { %4280 = vmatpush2.bf16.msra.mxu0 %v5798_v8 }
 0x224   :  { %4323 = vmatpush2.bf16.msra.mxu1 %v5801_v9  ;;  %4281 = vmatprep.subr.bf16.mxu0 %v5806_v10 }
 0x225   :  { %4324 = vmatprep.subr.bf16.mxu1 %v5809_v11 }
 0x227   :  { %4282 = vmatpush2.bf16.msra.mxu0 %v5804_v12 }
 0x228   :  { %4325 = vmatpush2.bf16.msra.mxu1 %v5807_v13  ;;  %4283 = vmatprep.subr.bf16.mxu0 %v5812_v14 }
 0x229   :  { %4326 = vmatprep.subr.bf16.mxu1 %v5815_v15 }
 0x22b   :  { %4284 = vmatpush2.bf16.msra.mxu0 %v5810_v16 }
 0x22c   :  { %4327 = vmatpush2.bf16.msra.mxu1 %v5813_v17  ;;  %4285 = vmatprep.subr.bf16.mxu0 %v5818_v18 }
 0x22d   :  { %4328 = vmatprep.subr.bf16.mxu1 %v5821_v19 }
 0x22f   :  { %4286 = vmatpush2.bf16.msra.mxu0 %v5816_v20 }
 0x230   :  { %4329 = vmatpush2.bf16.msra.mxu1 %v5819_v21  ;;  %4287 = vmatprep.subr.bf16.mxu0 %v5824_v22 }
 0x231   :  { %4330 = vmatprep.subr.bf16.mxu1 %v5827_v23 }
 0x233   :  { %4288 = vmatpush2.bf16.msra.mxu0 %v5822_v24 }
 0x234   :  { %4331 = vmatpush2.bf16.msra.mxu1 %v5825_v25  ;;  %4289 = vmatprep.subr.bf16.mxu0 %v5830_v26 }
 0x235   :  { %4332 = vmatprep.subr.bf16.mxu1 %v5833_v27 }
 0x237   :  { %4290 = vmatpush2.bf16.msra.mxu0 %v5828_v28 }
 0x238   :  { %4333 = vmatpush2.bf16.msra.mxu1 %v5831_v29  ;;  %4291 = vmatprep.subr.bf16.mxu0 %v5836_v30 }
 0x239   :  { %4334 = vmatprep.subr.bf16.mxu1 %v5839_v31 }
 0x23b   :  { %4292 = vmatpush2.bf16.msra.mxu0 %v5834_v32 }
 0x23c   :  { %4335 = vmatpush2.bf16.msra.mxu1 %v5837_v33  ;;  %4293 = vmatprep.subr.bf16.mxu0 %v5842_v34 }
 0x23d   :  { %4336 = vmatprep.subr.bf16.mxu1 %v5845_v35 }
 0x23f   :  { %4294 = vmatpush2.bf16.msra.mxu0 %v5840_v36 }
 0x240   :  { %4337 = vmatpush2.bf16.msra.mxu1 %v5843_v37 }
 0x242   :  { %4296 = vmatmul.mubr.bf16.vlgmr.msra.gmra.mxu0 %v5862_v38  ;;  %v4039_v44 = vpop.f32.mrf.mxu0 }
 0x243   :  { %4339 = vmatmul.mubr.bf16.vlgmr.msra.gmra.mxu1 %v5863_v39  ;;  %v4082_v45 = vpop.f32.mrf.mxu1  ;;  %v4040_v58 = vadd.f32 %v4039_v44, %v3996_v40 }
 0x244   :  { %v4041_v46 = vpop.f32.mrf.mxu0 }
 0x245   :  { %v4084_v47 = vpop.f32.mrf.mxu1  ;;  %v4042_v62 = vadd.f32 %v4041_v46, %v3998_v41  ;;  %v4083_v0 = vadd.f32 %v4082_v45, %v4040_v58 }
 0x246   :  { %v4043_v48 = vpop.f32.mrf.mxu0 }
 0x247   :  { %v4086_v50 = vpop.f32.mrf.mxu1  ;;  %v4044_v1 = vadd.f32 %v4043_v48, %v4000_v42  ;;  %v4085_v2 = vadd.f32 %v4084_v47, %v4042_v62 }
 0x248   :  { %v4045_v51 = vpop.f32.mrf.mxu0 }
 0x249   :  { %v4088_v49 = vpop.f32.mrf.mxu1  ;;  %v4046_v3 = vadd.f32 %v4045_v51, %v4002_v43  ;;  %v4087_v7 = vadd.f32 %v4086_v50, %v4044_v1 }
 0x24b   :  { %v4089_v9 = vadd.f32 %v4088_v49, %v4046_v3 }
 0x282   :  { %v4125_v52 = vpop.f32.mrf.mxu0 }
 0x283   :  { %v4168_v53 = vpop.f32.mrf.mxu1  ;;  %v4126_v4 = vadd.f32 %v4125_v52, %v4083_v0 }
 0x284   :  { %v4127_v54 = vpop.f32.mrf.mxu0 }
 0x285   :  { %v4170_v55 = vpop.f32.mrf.mxu1  ;;  %v4128_v8 = vadd.f32 %v4127_v54, %v4085_v2  ;;  %v4169_v10 = vadd.f32 %v4168_v53, %v4126_v4 }
 0x286   :  { %v4129_v56 = vpop.f32.mrf.mxu0 }
 0x287   :  { %v4172_v57 = vpop.f32.mrf.mxu1  ;;  %v4130_v11 = vadd.f32 %v4129_v56, %v4087_v7  ;;  %v4171_v14 = vadd.f32 %v4170_v55, %v4128_v8 }
 0x288   :  { %v4131_v59 = vpop.f32.mrf.mxu0 }
 0x289   :  { %v4174_v60 = vpop.f32.mrf.mxu1  ;;  %v4132_v15 = vadd.f32 %v4131_v59, %v4089_v9  ;;  %v4173_v17 = vadd.f32 %v4172_v57, %v4130_v11 }
 0x28b   :  { %v4175_v21 = vadd.f32 %v4174_v60, %v4132_v15 }
 0x2c2   :  { %v4211_v63 = vpop.f32.mrf.mxu0 }
 0x2c3   :  { %v4254_v61 = vpop.f32.mrf.mxu1  ;;  %v4212_v16 = vadd.f32 %v4211_v63, %v4169_v10 }
 0x2c4   :  { %v4213_v5 = vpop.f32.mrf.mxu0 }
 0x2c5   :  { %v4256_v6 = vpop.f32.mrf.mxu1  ;;  %v4214_v18 = vadd.f32 %v4213_v5, %v4171_v14  ;;  %v4255_v22 = vadd.f32 %v4254_v61, %v4212_v16 }
 0x2c6   :  { %v4215_v12 = vpop.f32.mrf.mxu0 }
 0x2c7   :  { %v4258_v13 = vpop.f32.mrf.mxu1  ;;  %v4216_v23 = vadd.f32 %v4215_v12, %v4173_v17  ;;  %v4257_v26 = vadd.f32 %v4256_v6, %v4214_v18 }
 0x2c8   :  { %v4217_v19 = vpop.f32.mrf.mxu0 }
 0x2c9   :  { %v4260_v20 = vpop.f32.mrf.mxu1  ;;  %v4218_v27 = vadd.f32 %v4217_v19, %v4175_v21  ;;  %v4259_v31 = vadd.f32 %v4258_v13, %v4216_v23 }
 0x2cb   :  { %v4261_v36 = vadd.f32 %v4260_v20, %v4218_v27 }
 0x302   :  { %v4297_v24 = vpop.f32.mrf.mxu0 }
 0x303   :  { %v4340_v25 = vpop.f32.mrf.mxu1  ;;  %v4298_v28 = vadd.f32 %v4297_v24, %v4255_v22 }
 0x304   :  { %v4299_v29 = vpop.f32.mrf.mxu0 }
 0x305   :  { %v4342_v30 = vpop.f32.mrf.mxu1  ;;  %v4341_v32 = vadd.f32 %v4340_v25, %v4298_v28  ;;  %v4300_v33 = vadd.f32 %v4299_v29, %v4257_v26 }
 0x306   :  { %v4301_v34 = vpop.f32.mrf.mxu0 }
 0x307   :  { %v4344_v35 = vpop.f32.mrf.mxu1  ;;  %4351 = vst [vmem:[%s7777_s2 + $0x10] sm:$0xff] %v4341_v32  ;;  %v4343_v37 = vadd.f32 %v4342_v30, %v4300_v33  ;;  %v4302_v38 = vadd.f32 %v4301_v34, %v4259_v31 }
 0x308   :  { %v4303_v39 = vpop.f32.mrf.mxu0 }
 0x309   :  { %4352 = vst [vmem:[%s7777_s2 + $0x18] sm:$0xff] %v4343_v37  ;;  %v4345_v40 = vadd.f32 %v4344_v35, %v4302_v38  ;;  %v4304_v41 = vadd.f32 %v4303_v39, %v4261_v36  ;;  %v4346_v42 = vpop.f32.mrf.mxu1 }
 0x30b   :  { %4355 = vst [vmem:[%s7777_s2 + $0x30] sm:$0xff] %v4345_v40  ;;  %v4347_v43 = vadd.f32 %v4346_v42, %v4304_v41 }
 0x30d   :  { %4356 = vst [vmem:[%s7777_s2 + $0x38] sm:$0xff] %v4347_v43 }

// kernel: encoder_forward.37
= control target key start
LH: loop header
LB: loop body
LE: loop exit
PB: predicated region body
PF: predicated region fallthrough
CT: control target
= control target key end

     0   :  { %s907_s1 = inlined_call_operand.vmem [shape: bf16[256,512], index: 1, kind: input, shape index: {}]   ;;  %s908_s0 = inlined_call_operand.vmem [shape: bf16[16,256], index: 0, kind: input, shape index: {}]   ;;  %s909_s2 = inlined_call_operand.vmem [shape: f32[16,512], index: 2, kind: output, shape index: {}]  }
   0x1   :  { %v571_v0 = vld [vmem:[%s907_s1 + $0xe4] ss:$16 sps:$4 sm:$0xff]   ;;  %v573_v1 = vld [vmem:[%s907_s1 + $0xec] ss:$16 sps:$4 sm:$0xff]   ;;  %v575_v2 = vld [vmem:[%s907_s1 + $0xe0] ss:$16 sps:$4 sm:$0xff]  }
   0x2   :  { %407 = vmatprep.subr.bf16.mxu0 %v571_v0  ;;  %v576_v3 = vld [vmem:[%s907_s1 + $0xe8] ss:$16 sps:$4 sm:$0xff]   ;;  %450 = vmatprep.subr.bf16.mxu1 %v573_v1  ;;  %v577_v4 = vld [vmem:[%s907_s1 + $0xc4] ss:$16 sps:$4 sm:$0xff]   ;;  %v579_v5 = vld [vmem:[%s907_s1 + $0xcc] ss:$16 sps:$4 sm:$0xff]  }
   0x3   :  { %408 = vmatpush1.bf16.msra.mxu0 %v575_v2  ;;  %451 = vmatpush1.bf16.msra.mxu1 %v576_v3  ;;  %v581_v6 = vld [vmem:[%s907_s1 + $0xc0] ss:$16 sps:$4 sm:$0xff]   ;;  %v582_v7 = vld [vmem:[%s907_s1 + $0xc8] ss:$16 sps:$4 sm:$0xff]   ;;  %v583_v8 = vld [vmem:[%s907_s1 + $0xa4] ss:$16 sps:$4 sm:$0xff]  }
   0x4   :  { %409 = vmatprep.subr.bf16.mxu0 %v577_v4  ;;  %452 = vmatprep.subr.bf16.mxu1 %v579_v5  ;;  %v585_v9 = vld [vmem:[%s907_s1 + $0xac] ss:$16 sps:$4 sm:$0xff]   ;;  %v587_v10 = vld [vmem:[%s907_s1 + $0xa0] ss:$16 sps:$4 sm:$0xff]   ;;  %v588_v11 = vld [vmem:[%s907_s1 + $0xa8] ss:$16 sps:$4 sm:$0xff]  }
   0x5   :  { %v589_v12 = vld [vmem:[%s907_s1 + $0x84] ss:$16 sps:$4 sm:$0xff]   ;;  %v591_v13 = vld [vmem:[%s907_s1 + $0x8c] ss:$16 sps:$4 sm:$0xff]   ;;  %v593_v14 = vld [vmem:[%s907_s1 + $0x80] ss:$16 sps:$4 sm:$0xff]  }
   0x6   :  { %v594_v15 = vld [vmem:[%s907_s1 + $0x88] ss:$16 sps:$4 sm:$0xff]   ;;  %v595_v16 = vld [vmem:[%s907_s1 + $0x64] ss:$16 sps:$4 sm:$0xff]   ;;  %v597_v17 = vld [vmem:[%s907_s1 + $0x6c] ss:$16 sps:$4 sm:$0xff]  }
   0x7   :  { %410 = vmatpush1.bf16.msra.mxu0 %v581_v6  ;;  %453 = vmatpush1.bf16.msra.mxu1 %v582_v7  ;;  %v599_v18 = vld [vmem:[%s907_s1 + $0x60] ss:$16 sps:$4 sm:$0xff]   ;;  %v600_v19 = vld [vmem:[%s907_s1 + $0x68] ss:$16 sps:$4 sm:$0xff]   ;;  %v601_v20 = vld [vmem:[%s907_s1 + $0x44] ss:$16 sps:$4 sm:$0xff]  }
   0x8   :  { %411 = vmatprep.subr.bf16.mxu0 %v583_v8  ;;  %454 = vmatprep.subr.bf16.mxu1 %v585_v9  ;;  %v603_v21 = vld [vmem:[%s907_s1 + $0x4c] ss:$16 sps:$4 sm:$0xff]   ;;  %v605_v22 = vld [vmem:[%s907_s1 + $0x40] ss:$16 sps:$4 sm:$0xff]   ;;  %v606_v23 = vld [vmem:[%s907_s1 + $0x48] ss:$16 sps:$4 sm:$0xff]  }
   0x9   :  { %v607_v24 = vld [vmem:[%s907_s1 + $0x24] ss:$16 sps:$4 sm:$0xff]   ;;  %v609_v25 = vld [vmem:[%s907_s1 + $0x2c] ss:$16 sps:$4 sm:$0xff]   ;;  %v611_v26 = vld [vmem:[%s907_s1 + $0x20] ss:$16 sps:$4 sm:$0xff]  }
   0xa   :  { %v612_v27 = vld [vmem:[%s907_s1 + $0x28] ss:$16 sps:$4 sm:$0xff]   ;;  %v613_v28 = vld [vmem:[%s907_s1 + $0x4] ss:$16 sps:$4 sm:$0xff]   ;;  %v615_v29 = vld [vmem:[%s907_s1 + $0xc] ss:$16 sps:$4 sm:$0xff]  }
   0xb   :  { %412 = vmatpush1.bf16.msra.mxu0 %v587_v10  ;;  %455 = vmatpush1.bf16.msra.mxu1 %v588_v11  ;;  %v617_v30 = vld [vmem:[%s907_s1] ss:$16 sps:$4 sm:$0xff]   ;;  %v618_v31 = vld [vmem:[%s907_s1 + $0x8] ss:$16 sps:$4 sm:$0xff]   ;;  %v619_v32 = vld [vmem:[%s907_s1 + $0x1e4] ss:$16 sps:$4 sm:$0xff]  }
   0xc   :  { %413 = vmatprep.subr.bf16.mxu0 %v589_v12  ;;  %456 = vmatprep.subr.bf16.mxu1 %v591_v13  ;;  %v621_v33 = vld [vmem:[%s907_s1 + $0x1ec] ss:$16 sps:$4 sm:$0xff]   ;;  %v623_v34 = vld [vmem:[%s907_s1 + $0x1e0] ss:$16 sps:$4 sm:$0xff]   ;;  %v624_v35 = vld [vmem:[%s907_s1 + $0x1e8] ss:$16 sps:$4 sm:$0xff]  }
   0xd   :  { %v625_v36 = vld [vmem:[%s907_s1 + $0x1c4] ss:$16 sps:$4 sm:$0xff]   ;;  %v627_v37 = vld [vmem:[%s907_s1 + $0x1cc] ss:$16 sps:$4 sm:$0xff]   ;;  %v629_v38 = vld [vmem:[%s907_s1 + $0x1c0] ss:$16 sps:$4 sm:$0xff]  }
   0xe   :  { %v630_v39 = vld [vmem:[%s907_s1 + $0x1c8] ss:$16 sps:$4 sm:$0xff]   ;;  %v631_v40 = vld [vmem:[%s907_s1 + $0x1a4] ss:$16 sps:$4 sm:$0xff]   ;;  %v633_v41 = vld [vmem:[%s907_s1 + $0x1ac] ss:$16 sps:$4 sm:$0xff]  }
   0xf   :  { %414 = vmatpush1.bf16.msra.mxu0 %v593_v14  ;;  %457 = vmatpush1.bf16.msra.mxu1 %v594_v15  ;;  %v635_v42 = vld [vmem:[%s907_s1 + $0x1a0] ss:$16 sps:$4 sm:$0xff]   ;;  %v636_v43 = vld [vmem:[%s907_s1 + $0x1a8] ss:$16 sps:$4 sm:$0xff]   ;;  %v637_v44 = vld [vmem:[%s907_s1 + $0x184] ss:$16 sps:$4 sm:$0xff]  }
  0x10   :  { %415 = vmatprep.subr.bf16.mxu0 %v595_v16  ;;  %458 = vmatprep.subr.bf16.mxu1 %v597_v17  ;;  %v639_v45 = vld [vmem:[%s907_s1 + $0x18c] ss:$16 sps:$4 sm:$0xff]   ;;  %v641_v47 = vld [vmem:[%s907_s1 + $0x180] ss:$16 sps:$4 sm:$0xff]   ;;  %v642_v48 = vld [vmem:[%s907_s1 + $0x188] ss:$16 sps:$4 sm:$0xff]  }
  0x11   :  { %v669_v46 = vld [vmem:[%s908_s0 + $0x4] ss:$8 sps:$4 sm:$0xff]   ;;  %v647_v51 = vld [vmem:[%s907_s1 + $0x160] ss:$16 sps:$4 sm:$0xff]   ;;  %v648_v52 = vld [vmem:[%s907_s1 + $0x168] ss:$16 sps:$4 sm:$0xff]  }
  0x12   :  { %v643_v49 = vld [vmem:[%s907_s1 + $0x164] ss:$16 sps:$4 sm:$0xff]   ;;  %v645_v50 = vld [vmem:[%s907_s1 + $0x16c] ss:$16 sps:$4 sm:$0xff]   ;;  %439 = vmatprep.mubr.bf16.mxu0 %v669_v46  ;;  %482 = vmatprep.mubr.bf16.mxu1 %v669_v46  ;;  %v653_v55 = vld [vmem:[%s907_s1 + $0x140] ss:$16 sps:$4 sm:$0xff]  }
  0x13   :  { %416 = vmatpush1.bf16.msra.mxu0 %v599_v18  ;;  %459 = vmatpush1.bf16.msra.mxu1 %v600_v19  ;;  %v649_v53 = vld [vmem:[%s907_s1 + $0x144] ss:$16 sps:$4 sm:$0xff]   ;;  %v651_v54 = vld [vmem:[%s907_s1 + $0x14c] ss:$16 sps:$4 sm:$0xff]   ;;  %v654_v56 = vld [vmem:[%s907_s1 + $0x148] ss:$16 sps:$4 sm:$0xff]  }
  0x14   :  { %417 = vmatprep.subr.bf16.mxu0 %v601_v20  ;;  %460 = vmatprep.subr.bf16.mxu1 %v603_v21  ;;  %v655_v57 = vld [vmem:[%s907_s1 + $0x124] ss:$16 sps:$4 sm:$0xff]   ;;  %v657_v58 = vld [vmem:[%s907_s1 + $0x12c] ss:$16 sps:$4 sm:$0xff]   ;;  %v659_v59 = vld [vmem:[%s907_s1 + $0x120] ss:$16 sps:$4 sm:$0xff]  }
  0x15   :  { %v660_v60 = vld [vmem:[%s907_s1 + $0x128] ss:$16 sps:$4 sm:$0xff]   ;;  %v661_v61 = vld [vmem:[%s907_s1 + $0x104] ss:$16 sps:$4 sm:$0xff]   ;;  %v663_v62 = vld [vmem:[%s907_s1 + $0x10c] ss:$16 sps:$4 sm:$0xff]  }
  0x16   :  { %v665_v63 = vld [vmem:[%s907_s1 + $0x100] ss:$16 sps:$4 sm:$0xff]   ;;  %v666_v0 = vld [vmem:[%s907_s1 + $0x108] ss:$16 sps:$4 sm:$0xff]  }
  0x17   :  { %418 = vmatpush1.bf16.msra.mxu0 %v605_v22  ;;  %461 = vmatpush1.bf16.msra.mxu1 %v606_v23  ;;  %v667_v1 = vld [vmem:[%s908_s0] ss:$8 sps:$4 sm:$0xff]  }
  0x18   :  { %419 = vmatprep.subr.bf16.mxu0 %v607_v24  ;;  %462 = vmatprep.subr.bf16.mxu1 %v609_v25 }
  0x1b   :  { %420 = vmatpush1.bf16.msra.mxu0 %v611_v26  ;;  %463 = vmatpush1.bf16.msra.mxu1 %v612_v27 }
  0x1c   :  { %421 = vmatprep.subr.bf16.mxu0 %v613_v28  ;;  %464 = vmatprep.subr.bf16.mxu1 %v615_v29 }
  0x1f   :  { %422 = vmatpush1.bf16.msra.mxu0 %v617_v30  ;;  %465 = vmatpush1.bf16.msra.mxu1 %v618_v31 }
  0x20   :  { %423 = vmatprep.subr.bf16.mxu0 %v619_v32  ;;  %466 = vmatprep.subr.bf16.mxu1 %v621_v33 }
  0x23   :  { %424 = vmatpush2.bf16.msra.mxu0 %v623_v34  ;;  %467 = vmatpush2.bf16.msra.mxu1 %v624_v35 }
  0x24   :  { %425 = vmatprep.subr.bf16.mxu0 %v625_v36  ;;  %468 = vmatprep.subr.bf16.mxu1 %v627_v37 }
  0x27   :  { %426 = vmatpush2.bf16.msra.mxu0 %v629_v38  ;;  %469 = vmatpush2.bf16.msra.mxu1 %v630_v39 }
  0x28   :  { %427 = vmatprep.subr.bf16.mxu0 %v631_v40  ;;  %470 = vmatprep.subr.bf16.mxu1 %v633_v41 }
  0x2b   :  { %428 = vmatpush2.bf16.msra.mxu0 %v635_v42  ;;  %471 = vmatpush2.bf16.msra.mxu1 %v636_v43 }
  0x2c   :  { %429 = vmatprep.subr.bf16.mxu0 %v637_v44  ;;  %472 = vmatprep.subr.bf16.mxu1 %v639_v45 }
  0x2f   :  { %430 = vmatpush2.bf16.msra.mxu0 %v641_v47  ;;  %473 = vmatpush2.bf16.msra.mxu1 %v642_v48 }
  0x30   :  { %431 = vmatprep.subr.bf16.mxu0 %v643_v49  ;;  %474 = vmatprep.subr.bf16.mxu1 %v645_v50 }
  0x33   :  { %432 = vmatpush2.bf16.msra.mxu0 %v647_v51  ;;  %475 = vmatpush2.bf16.msra.mxu1 %v648_v52 }
  0x34   :  { %433 = vmatprep.subr.bf16.mxu0 %v649_v53  ;;  %476 = vmatprep.subr.bf16.mxu1 %v651_v54 }
  0x37   :  { %434 = vmatpush2.bf16.msra.mxu0 %v653_v55  ;;  %477 = vmatpush2.bf16.msra.mxu1 %v654_v56 }
  0x38   :  { %435 = vmatprep.subr.bf16.mxu0 %v655_v57  ;;  %478 = vmatprep.subr.bf16.mxu1 %v657_v58 }
  0x3b   :  { %436 = vmatpush2.bf16.msra.mxu0 %v659_v59  ;;  %479 = vmatpush2.bf16.msra.mxu1 %v660_v60 }
  0x3c   :  { %437 = vmatprep.subr.bf16.mxu0 %v661_v61  ;;  %480 = vmatprep.subr.bf16.mxu1 %v663_v62 }
  0x3f   :  { %438 = vmatpush2.bf16.msra.mxu0 %v665_v63  ;;  %481 = vmatpush2.bf16.msra.mxu1 %v666_v0 }
  0x42   :  { %440 = vmatmul.mubr.bf16.vlgmr.msra.gmra.mxu0 %v667_v1  ;;  %483 = vmatmul.mubr.bf16.vlgmr.msra.gmra.mxu1 %v667_v1 }
 0x102   :  { %v441_v2 = vpop.f32.mrf.mxu0  ;;  %v484_v3 = vpop.f32.mrf.mxu1 }
 0x103   :  { %493 = vst [vmem:[%s909_s2] sm:$0xff] %v441_v2  ;;  %495 = vst [vmem:[%s909_s2 + $0x10] sm:$0xff] %v484_v3 }
 0x104   :  { %v443_v4 = vpop.f32.mrf.mxu0  ;;  %v486_v5 = vpop.f32.mrf.mxu1 }
 0x105   :  { %494 = vst [vmem:[%s909_s2 + $0x8] sm:$0xff] %v443_v4  ;;  %496 = vst [vmem:[%s909_s2 + $0x18] sm:$0xff] %v486_v5 }
 0x106   :  { %v445_v6 = vpop.f32.mrf.mxu0  ;;  %v488_v7 = vpop.f32.mrf.mxu1 }
 0x107   :  { %497 = vst [vmem:[%s909_s2 + $0x20] sm:$0xff] %v445_v6  ;;  %499 = vst [vmem:[%s909_s2 + $0x30] sm:$0xff] %v488_v7 }
 0x108   :  { %v447_v8 = vpop.f32.mrf.mxu0  ;;  %v490_v9 = vpop.f32.mrf.mxu1 }
 0x109   :  { %498 = vst [vmem:[%s909_s2 + $0x28] sm:$0xff] %v447_v8  ;;  %500 = vst [vmem:[%s909_s2 + $0x38] sm:$0xff] %v490_v9 }

// kernel: encoder_forward.36
= control target key start
LH: loop header
LB: loop body
LE: loop exit
PB: predicated region body
PF: predicated region fallthrough
CT: control target
= control target key end

     0   :  { %s15572_s1 = inlined_call_operand.vmem [shape: bf16[4608,512], index: 1, kind: input, shape index: {}]   ;;  %s15573_s0 = inlined_call_operand.vmem [shape: bf16[16,4608], index: 0, kind: input, shape index: {}]   ;;  %s15574_s2 = inlined_call_operand.vmem [shape: f32[16,512], index: 2, kind: output, shape index: {}]  }
   0x1   :  { %v9887_v0 = vld [vmem:[%s15572_s1 + $0xe4] ss:$16 sps:$4 sm:$0xff]   ;;  %v9891_v2 = vld [vmem:[%s15572_s1 + $0xe0] ss:$16 sps:$4 sm:$0xff]   ;;  %v9988_v51 = vld [vmem:[%s15573_s0 + $0xc] ss:$144 sps:$4 sm:$0xff]  }
   0x2   :  { %v9889_v1 = vld [vmem:[%s15572_s1 + $0x2e4] ss:$16 sps:$4 sm:$0xff]   ;;  %7139 = vmatprep.subr.bf16.mxu0 %v9887_v0  ;;  %v9892_v3 = vld [vmem:[%s15572_s1 + $0x2e0] ss:$16 sps:$4 sm:$0xff]   ;;  %7214 = vmatprep.mubr.bf16.mxu1 %v9988_v51 }
   0x3   :  { %7182 = vmatprep.subr.bf16.mxu1 %v9889_v1  ;;  %v9893_v4 = vld [vmem:[%s15572_s1 + $0xc4] ss:$16 sps:$4 sm:$0xff]   ;;  %7140 = vmatpush1.bf16.msra.mxu0 %v9891_v2  ;;  %v9897_v6 = vld [vmem:[%s15572_s1 + $0xc0] ss:$16 sps:$4 sm:$0xff]  }
   0x4   :  { %7183 = vmatpush1.bf16.msra.mxu1 %v9892_v3  ;;  %v9895_v5 = vld [vmem:[%s15572_s1 + $0x2c4] ss:$16 sps:$4 sm:$0xff]   ;;  %7141 = vmatprep.subr.bf16.mxu0 %v9893_v4  ;;  %v9898_v7 = vld [vmem:[%s15572_s1 + $0x2c0] ss:$16 sps:$4 sm:$0xff]  }
   0x5   :  { %7184 = vmatprep.subr.bf16.mxu1 %v9895_v5  ;;  %v9899_v8 = vld [vmem:[%s15572_s1 + $0xa4] ss:$16 sps:$4 sm:$0xff]   ;;  %v9903_v10 = vld [vmem:[%s15572_s1 + $0xa0] ss:$16 sps:$4 sm:$0xff]   ;;  %v9986_v5 = vld [vmem:[%s15573_s0 + $0x8] ss:$144 sps:$4 sm:$0xff]  }
   0x6   :  { %v9901_v9 = vld [vmem:[%s15572_s1 + $0x2a4] ss:$16 sps:$4 sm:$0xff]   ;;  %v9904_v11 = vld [vmem:[%s15572_s1 + $0x2a0] ss:$16 sps:$4 sm:$0xff]  }
   0x7   :  { %7142 = vmatpush1.bf16.msra.mxu0 %v9897_v6  ;;  %v9905_v12 = vld [vmem:[%s15572_s1 + $0x84] ss:$16 sps:$4 sm:$0xff]   ;;  %v9909_v14 = vld [vmem:[%s15572_s1 + $0x80] ss:$16 sps:$4 sm:$0xff]  }
   0x8   :  { %7185 = vmatpush1.bf16.msra.mxu1 %v9898_v7  ;;  %7143 = vmatprep.subr.bf16.mxu0 %v9899_v8  ;;  %v9907_v13 = vld [vmem:[%s15572_s1 + $0x284] ss:$16 sps:$4 sm:$0xff]   ;;  %v9910_v15 = vld [vmem:[%s15572_s1 + $0x280] ss:$16 sps:$4 sm:$0xff]  }
   0x9   :  { %7186 = vmatprep.subr.bf16.mxu1 %v9901_v9  ;;  %v9911_v16 = vld [vmem:[%s15572_s1 + $0x64] ss:$16 sps:$4 sm:$0xff]   ;;  %v9915_v18 = vld [vmem:[%s15572_s1 + $0x60] ss:$16 sps:$4 sm:$0xff]  }
   0xa   :  { %v9913_v17 = vld [vmem:[%s15572_s1 + $0x264] ss:$16 sps:$4 sm:$0xff]   ;;  %v9916_v19 = vld [vmem:[%s15572_s1 + $0x260] ss:$16 sps:$4 sm:$0xff]  }
   0xb   :  { %7144 = vmatpush1.bf16.msra.mxu0 %v9903_v10  ;;  %v9917_v20 = vld [vmem:[%s15572_s1 + $0x44] ss:$16 sps:$4 sm:$0xff]   ;;  %v9921_v22 = vld [vmem:[%s15572_s1 + $0x40] ss:$16 sps:$4 sm:$0xff]  }
   0xc   :  { %7187 = vmatpush1.bf16.msra.mxu1 %v9904_v11  ;;  %7145 = vmatprep.subr.bf16.mxu0 %v9905_v12  ;;  %v9919_v21 = vld [vmem:[%s15572_s1 + $0x244] ss:$16 sps:$4 sm:$0xff]   ;;  %v9922_v23 = vld [vmem:[%s15572_s1 + $0x240] ss:$16 sps:$4 sm:$0xff]  }
   0xd   :  { %7188 = vmatprep.subr.bf16.mxu1 %v9907_v13  ;;  %v9923_v24 = vld [vmem:[%s15572_s1 + $0x24] ss:$16 sps:$4 sm:$0xff]   ;;  %v9927_v26 = vld [vmem:[%s15572_s1 + $0x20] ss:$16 sps:$4 sm:$0xff]  }
   0xe   :  { %v9925_v25 = vld [vmem:[%s15572_s1 + $0x224] ss:$16 sps:$4 sm:$0xff]   ;;  %v9928_v27 = vld [vmem:[%s15572_s1 + $0x220] ss:$16 sps:$4 sm:$0xff]  }
   0xf   :  { %7146 = vmatpush1.bf16.msra.mxu0 %v9909_v14  ;;  %v9929_v28 = vld [vmem:[%s15572_s1 + $0x4] ss:$16 sps:$4 sm:$0xff]   ;;  %v9933_v30 = vld [vmem:[%s15572_s1] ss:$16 sps:$4 sm:$0xff]  }
  0x10   :  { %7189 = vmatpush1.bf16.msra.mxu1 %v9910_v15  ;;  %7147 = vmatprep.subr.bf16.mxu0 %v9911_v16  ;;  %v9931_v29 = vld [vmem:[%s15572_s1 + $0x204] ss:$16 sps:$4 sm:$0xff]   ;;  %v9934_v31 = vld [vmem:[%s15572_s1 + $0x200] ss:$16 sps:$4 sm:$0xff]  }
  0x11   :  { %7190 = vmatprep.subr.bf16.mxu1 %v9913_v17  ;;  %v9935_v32 = vld [vmem:[%s15572_s1 + $0x1e4] ss:$16 sps:$4 sm:$0xff]   ;;  %v9939_v34 = vld [vmem:[%s15572_s1 + $0x1e0] ss:$16 sps:$4 sm:$0xff]  }
  0x12   :  { %v9937_v33 = vld [vmem:[%s15572_s1 + $0x3e4] ss:$16 sps:$4 sm:$0xff]   ;;  %v9940_v35 = vld [vmem:[%s15572_s1 + $0x3e0] ss:$16 sps:$4 sm:$0xff]  }
  0x13   :  { %7148 = vmatpush1.bf16.msra.mxu0 %v9915_v18  ;;  %v9941_v36 = vld [vmem:[%s15572_s1 + $0x1c4] ss:$16 sps:$4 sm:$0xff]   ;;  %v9945_v38 = vld [vmem:[%s15572_s1 + $0x1c0] ss:$16 sps:$4 sm:$0xff]  }
  0x14   :  { %7191 = vmatpush1.bf16.msra.mxu1 %v9916_v19  ;;  %7149 = vmatprep.subr.bf16.mxu0 %v9917_v20  ;;  %v9943_v37 = vld [vmem:[%s15572_s1 + $0x3c4] ss:$16 sps:$4 sm:$0xff]   ;;  %v9946_v39 = vld [vmem:[%s15572_s1 + $0x3c0] ss:$16 sps:$4 sm:$0xff]  }
  0x15   :  { %7192 = vmatprep.subr.bf16.mxu1 %v9919_v21  ;;  %v9947_v40 = vld [vmem:[%s15572_s1 + $0x1a4] ss:$16 sps:$4 sm:$0xff]   ;;  %v9951_v42 = vld [vmem:[%s15572_s1 + $0x1a0] ss:$16 sps:$4 sm:$0xff]  }
  0x16   :  { %v9949_v41 = vld [vmem:[%s15572_s1 + $0x3a4] ss:$16 sps:$4 sm:$0xff]   ;;  %v9952_v43 = vld [vmem:[%s15572_s1 + $0x3a0] ss:$16 sps:$4 sm:$0xff]  }
  0x17   :  { %7150 = vmatpush1.bf16.msra.mxu0 %v9921_v22  ;;  %v9953_v44 = vld [vmem:[%s15572_s1 + $0x184] ss:$16 sps:$4 sm:$0xff]   ;;  %v9957_v46 = vld [vmem:[%s15572_s1 + $0x180] ss:$16 sps:$4 sm:$0xff]  }
  0x18   :  { %7193 = vmatpush1.bf16.msra.mxu1 %v9922_v23  ;;  %7151 = vmatprep.subr.bf16.mxu0 %v9923_v24  ;;  %v9955_v45 = vld [vmem:[%s15572_s1 + $0x384] ss:$16 sps:$4 sm:$0xff]   ;;  %v9958_v47 = vld [vmem:[%s15572_s1 + $0x380] ss:$16 sps:$4 sm:$0xff]  }
  0x19   :  { %7194 = vmatprep.subr.bf16.mxu1 %v9925_v25  ;;  %v9959_v48 = vld [vmem:[%s15572_s1 + $0x164] ss:$16 sps:$4 sm:$0xff]   ;;  %v9963_v52 = vld [vmem:[%s15572_s1 + $0x160] ss:$16 sps:$4 sm:$0xff]  }
  0x1a   :  { %v9985_v49 = vld [vmem:[%s15573_s0 + $0x4] ss:$144 sps:$4 sm:$0xff]   ;;  %v9964_v53 = vld [vmem:[%s15572_s1 + $0x360] ss:$16 sps:$4 sm:$0xff]  }
  0x1b   :  { %7152 = vmatpush1.bf16.msra.mxu0 %v9927_v26  ;;  %v9961_v50 = vld [vmem:[%s15572_s1 + $0x364] ss:$16 sps:$4 sm:$0xff]   ;;  %7171 = vmatprep.mubr.bf16.mxu0 %v9985_v49  ;;  %v9969_v56 = vld [vmem:[%s15572_s1 + $0x140] ss:$16 sps:$4 sm:$0xff]  }
  0x1c   :  { %7195 = vmatpush1.bf16.msra.mxu1 %v9928_v27  ;;  %7153 = vmatprep.subr.bf16.mxu0 %v9929_v28  ;;  %v9965_v54 = vld [vmem:[%s15572_s1 + $0x144] ss:$16 sps:$4 sm:$0xff]   ;;  %v9970_v57 = vld [vmem:[%s15572_s1 + $0x340] ss:$16 sps:$4 sm:$0xff]  }
  0x1d   :  { %7196 = vmatprep.subr.bf16.mxu1 %v9931_v29  ;;  %v9967_v55 = vld [vmem:[%s15572_s1 + $0x344] ss:$16 sps:$4 sm:$0xff]   ;;  %v9975_v60 = vld [vmem:[%s15572_s1 + $0x120] ss:$16 sps:$4 sm:$0xff]  }
  0x1e   :  { %v9971_v58 = vld [vmem:[%s15572_s1 + $0x124] ss:$16 sps:$4 sm:$0xff]   ;;  %v9976_v61 = vld [vmem:[%s15572_s1 + $0x320] ss:$16 sps:$4 sm:$0xff]  }
  0x1f   :  { %7154 = vmatpush1.bf16.msra.mxu0 %v9933_v30  ;;  %v9973_v59 = vld [vmem:[%s15572_s1 + $0x324] ss:$16 sps:$4 sm:$0xff]   ;;  %v9981_v0 = vld [vmem:[%s15572_s1 + $0x100] ss:$16 sps:$4 sm:$0xff]  }
  0x20   :  { %7197 = vmatpush1.bf16.msra.mxu1 %v9934_v31  ;;  %7155 = vmatprep.subr.bf16.mxu0 %v9935_v32  ;;  %v9977_v62 = vld [vmem:[%s15572_s1 + $0x104] ss:$16 sps:$4 sm:$0xff]   ;;  %v9982_v1 = vld [vmem:[%s15572_s1 + $0x300] ss:$16 sps:$4 sm:$0xff]  }
  0x21   :  { %7198 = vmatprep.subr.bf16.mxu1 %v9937_v33  ;;  %v9979_v63 = vld [vmem:[%s15572_s1 + $0x304] ss:$16 sps:$4 sm:$0xff]   ;;  %v9983_v4 = vld [vmem:[%s15573_s0] ss:$144 sps:$4 sm:$0xff]  }
  0x22   :  { %v9991_v2 = vld [vmem:[%s15572_s1 + $0x4e4] ss:$16 sps:$4 sm:$0xff]   ;;  %v9989_v6 = vld [vmem:[%s15572_s1 + $0x4e0] ss:$16 sps:$4 sm:$0xff]  }
  0x23   :  { %7156 = vmatpush2.bf16.msra.mxu0 %v9939_v34  ;;  %v9994_v3 = vld [vmem:[%s15572_s1 + $0x6e4] ss:$16 sps:$4 sm:$0xff]   ;;  %v9992_v7 = vld [vmem:[%s15572_s1 + $0x6e0] ss:$16 sps:$4 sm:$0xff]  }
  0x24   :  { %7199 = vmatpush2.bf16.msra.mxu1 %v9940_v35  ;;  %7157 = vmatprep.subr.bf16.mxu0 %v9941_v36  ;;  %v9997_v8 = vld [vmem:[%s15572_s1 + $0x4c4] ss:$16 sps:$4 sm:$0xff]   ;;  %v9995_v10 = vld [vmem:[%s15572_s1 + $0x4c0] ss:$16 sps:$4 sm:$0xff]   ;;  %v10090_v35 = vld [vmem:[%s15573_s0 + $0x1c] ss:$144 sps:$4 sm:$0xff]  }
  0x25   :  { %7200 = vmatprep.subr.bf16.mxu1 %v9943_v37  ;;  %v10000_v9 = vld [vmem:[%s15572_s1 + $0x6c4] ss:$16 sps:$4 sm:$0xff]   ;;  %v9998_v11 = vld [vmem:[%s15572_s1 + $0x6c0] ss:$16 sps:$4 sm:$0xff]  }
  0x26   :  { %v10003_v12 = vld [vmem:[%s15572_s1 + $0x4a4] ss:$16 sps:$4 sm:$0xff]   ;;  %v10001_v14 = vld [vmem:[%s15572_s1 + $0x4a0] ss:$16 sps:$4 sm:$0xff]  }
  0x27   :  { %7158 = vmatpush2.bf16.msra.mxu0 %v9945_v38  ;;  %v10006_v13 = vld [vmem:[%s15572_s1 + $0x6a4] ss:$16 sps:$4 sm:$0xff]   ;;  %v10004_v15 = vld [vmem:[%s15572_s1 + $0x6a0] ss:$16 sps:$4 sm:$0xff]  }
  0x28   :  { %7201 = vmatpush2.bf16.msra.mxu1 %v9946_v39  ;;  %7159 = vmatprep.subr.bf16.mxu0 %v9947_v40  ;;  %v10009_v16 = vld [vmem:[%s15572_s1 + $0x484] ss:$16 sps:$4 sm:$0xff]   ;;  %v10007_v18 = vld [vmem:[%s15572_s1 + $0x480] ss:$16 sps:$4 sm:$0xff]  }
  0x29   :  { %7202 = vmatprep.subr.bf16.mxu1 %v9949_v41  ;;  %v10012_v17 = vld [vmem:[%s15572_s1 + $0x684] ss:$16 sps:$4 sm:$0xff]   ;;  %v10010_v19 = vld [vmem:[%s15572_s1 + $0x680] ss:$16 sps:$4 sm:$0xff]  }
  0x2a   :  { %v10015_v20 = vld [vmem:[%s15572_s1 + $0x464] ss:$16 sps:$4 sm:$0xff]   ;;  %v10013_v22 = vld [vmem:[%s15572_s1 + $0x460] ss:$16 sps:$4 sm:$0xff]  }
  0x2b   :  { %7160 = vmatpush2.bf16.msra.mxu0 %v9951_v42  ;;  %v10018_v21 = vld [vmem:[%s15572_s1 + $0x664] ss:$16 sps:$4 sm:$0xff]   ;;  %v10016_v23 = vld [vmem:[%s15572_s1 + $0x660] ss:$16 sps:$4 sm:$0xff]  }
  0x2c   :  { %7203 = vmatpush2.bf16.msra.mxu1 %v9952_v43  ;;  %7161 = vmatprep.subr.bf16.mxu0 %v9953_v44  ;;  %v10021_v24 = vld [vmem:[%s15572_s1 + $0x444] ss:$16 sps:$4 sm:$0xff]   ;;  %v10019_v26 = vld [vmem:[%s15572_s1 + $0x440] ss:$16 sps:$4 sm:$0xff]  }
  0x2d   :  { %7204 = vmatprep.subr.bf16.mxu1 %v9955_v45  ;;  %v10024_v25 = vld [vmem:[%s15572_s1 + $0x644] ss:$16 sps:$4 sm:$0xff]   ;;  %v10022_v27 = vld [vmem:[%s15572_s1 + $0x640] ss:$16 sps:$4 sm:$0xff]  }
  0x2e   :  { %v10027_v28 = vld [vmem:[%s15572_s1 + $0x424] ss:$16 sps:$4 sm:$0xff]   ;;  %v10025_v30 = vld [vmem:[%s15572_s1 + $0x420] ss:$16 sps:$4 sm:$0xff]  }
  0x2f   :  { %7162 = vmatpush2.bf16.msra.mxu0 %v9957_v46  ;;  %v10030_v29 = vld [vmem:[%s15572_s1 + $0x624] ss:$16 sps:$4 sm:$0xff]   ;;  %v10028_v31 = vld [vmem:[%s15572_s1 + $0x620] ss:$16 sps:$4 sm:$0xff]  }
  0x30   :  { %7205 = vmatpush2.bf16.msra.mxu1 %v9958_v47  ;;  %7163 = vmatprep.subr.bf16.mxu0 %v9959_v48  ;;  %v10033_v32 = vld [vmem:[%s15572_s1 + $0x404] ss:$16 sps:$4 sm:$0xff]   ;;  %v10031_v36 = vld [vmem:[%s15572_s1 + $0x400] ss:$16 sps:$4 sm:$0xff]  }
  0x31   :  { %7206 = vmatprep.subr.bf16.mxu1 %v9961_v50  ;;  %v10036_v33 = vld [vmem:[%s15572_s1 + $0x604] ss:$16 sps:$4 sm:$0xff]   ;;  %v10034_v37 = vld [vmem:[%s15572_s1 + $0x600] ss:$16 sps:$4 sm:$0xff]  }
  0x32   :  { %v10087_v34 = vld [vmem:[%s15573_s0 + $0x14] ss:$144 sps:$4 sm:$0xff]   ;;  %v10037_v40 = vld [vmem:[%s15572_s1 + $0x5e0] ss:$16 sps:$4 sm:$0xff]  }
  0x33   :  { %7164 = vmatpush2.bf16.msra.mxu0 %v9963_v52  ;;  %v10039_v38 = vld [vmem:[%s15572_s1 + $0x5e4] ss:$16 sps:$4 sm:$0xff]   ;;  %v10040_v41 = vld [vmem:[%s15572_s1 + $0x7e0] ss:$16 sps:$4 sm:$0xff]  }
  0x34   :  { %7207 = vmatpush2.bf16.msra.mxu1 %v9964_v53  ;;  %7165 = vmatprep.subr.bf16.mxu0 %v9965_v54  ;;  %v10042_v39 = vld [vmem:[%s15572_s1 + $0x7e4] ss:$16 sps:$4 sm:$0xff]   ;;  %v10043_v44 = vld [vmem:[%s15572_s1 + $0x5c0] ss:$16 sps:$4 sm:$0xff]  }
  0x35   :  { %7208 = vmatprep.subr.bf16.mxu1 %v9967_v55  ;;  %v10045_v42 = vld [vmem:[%s15572_s1 + $0x5c4] ss:$16 sps:$4 sm:$0xff]   ;;  %v10046_v45 = vld [vmem:[%s15572_s1 + $0x7c0] ss:$16 sps:$4 sm:$0xff]  }
  0x36   :  { %v10048_v43 = vld [vmem:[%s15572_s1 + $0x7c4] ss:$16 sps:$4 sm:$0xff]   ;;  %v10049_v48 = vld [vmem:[%s15572_s1 + $0x5a0] ss:$16 sps:$4 sm:$0xff]  }
  0x37   :  { %7166 = vmatpush2.bf16.msra.mxu0 %v9969_v56  ;;  %v10051_v46 = vld [vmem:[%s15572_s1 + $0x5a4] ss:$16 sps:$4 sm:$0xff]   ;;  %v10052_v49 = vld [vmem:[%s15572_s1 + $0x7a0] ss:$16 sps:$4 sm:$0xff]  }
  0x38   :  { %7209 = vmatpush2.bf16.msra.mxu1 %v9970_v57  ;;  %7167 = vmatprep.subr.bf16.mxu0 %v9971_v58  ;;  %v10054_v47 = vld [vmem:[%s15572_s1 + $0x7a4] ss:$16 sps:$4 sm:$0xff]   ;;  %v10055_v52 = vld [vmem:[%s15572_s1 + $0x580] ss:$16 sps:$4 sm:$0xff]  }
  0x39   :  { %7210 = vmatprep.subr.bf16.mxu1 %v9973_v59  ;;  %v10057_v50 = vld [vmem:[%s15572_s1 + $0x584] ss:$16 sps:$4 sm:$0xff]   ;;  %v10058_v53 = vld [vmem:[%s15572_s1 + $0x780] ss:$16 sps:$4 sm:$0xff]  }
  0x3a   :  { %v10060_v51 = vld [vmem:[%s15572_s1 + $0x784] ss:$16 sps:$4 sm:$0xff]   ;;  %v10061_v56 = vld [vmem:[%s15572_s1 + $0x560] ss:$16 sps:$4 sm:$0xff]  }
  0x3b   :  { %7168 = vmatpush2.bf16.msra.mxu0 %v9975_v60  ;;  %v10063_v54 = vld [vmem:[%s15572_s1 + $0x564] ss:$16 sps:$4 sm:$0xff]   ;;  %v10064_v57 = vld [vmem:[%s15572_s1 + $0x760] ss:$16 sps:$4 sm:$0xff]  }
  0x3c   :  { %7211 = vmatpush2.bf16.msra.mxu1 %v9976_v61  ;;  %7169 = vmatprep.subr.bf16.mxu0 %v9977_v62  ;;  %v10066_v55 = vld [vmem:[%s15572_s1 + $0x764] ss:$16 sps:$4 sm:$0xff]   ;;  %v10067_v60 = vld [vmem:[%s15572_s1 + $0x540] ss:$16 sps:$4 sm:$0xff]  }
  0x3d   :  { %7212 = vmatprep.subr.bf16.mxu1 %v9979_v63  ;;  %v10069_v58 = vld [vmem:[%s15572_s1 + $0x544] ss:$16 sps:$4 sm:$0xff]   ;;  %v10070_v61 = vld [vmem:[%s15572_s1 + $0x740] ss:$16 sps:$4 sm:$0xff]  }
  0x3e   :  { %v10072_v59 = vld [vmem:[%s15572_s1 + $0x744] ss:$16 sps:$4 sm:$0xff]  }
  0x3f   :  { %7170 = vmatpush2.bf16.msra.mxu0 %v9981_v0  ;;  %v10075_v62 = vld [vmem:[%s15572_s1 + $0x524] ss:$16 sps:$4 sm:$0xff]   ;;  %v10073_v0 = vld [vmem:[%s15572_s1 + $0x520] ss:$16 sps:$4 sm:$0xff]  }
  0x40   :  { %7213 = vmatpush2.bf16.msra.mxu1 %v9982_v1  ;;  %7225 = vmatprep.subr.bf16.mxu0 %v9991_v2  ;;  %v10078_v63 = vld [vmem:[%s15572_s1 + $0x724] ss:$16 sps:$4 sm:$0xff]   ;;  %v10076_v1 = vld [vmem:[%s15572_s1 + $0x720] ss:$16 sps:$4 sm:$0xff]  }
  0x41   :  { %7268 = vmatprep.subr.bf16.mxu1 %v9994_v3  ;;  %v10081_v2 = vld [vmem:[%s15572_s1 + $0x504] ss:$16 sps:$4 sm:$0xff]  }
  0x42   :  { %7172 = vmatmul.mubr.bf16.vlgmr.msra.gmra.mxu0 %v9983_v4  ;;  %v10084_v3 = vld [vmem:[%s15572_s1 + $0x704] ss:$16 sps:$4 sm:$0xff]   ;;  %v10079_v4 = vld [vmem:[%s15572_s1 + $0x500] ss:$16 sps:$4 sm:$0xff]  }
  0x43   :  { %7215 = vmatmul.mubr.bf16.vlgmr.msra.gmra.mxu1 %v9986_v5  ;;  %7226 = vmatpush1.bf16.msra.mxu0 %v9989_v6  ;;  %v10082_v5 = vld [vmem:[%s15572_s1 + $0x700] ss:$16 sps:$4 sm:$0xff]   ;;  %v10093_v6 = vld [vmem:[%s15572_s1 + $0x8e4] ss:$16 sps:$4 sm:$0xff]  }
  0x44   :  { %7269 = vmatpush1.bf16.msra.mxu1 %v9992_v7  ;;  %7227 = vmatprep.subr.bf16.mxu0 %v9997_v8  ;;  %v10096_v7 = vld [vmem:[%s15572_s1 + $0xae4] ss:$16 sps:$4 sm:$0xff]   ;;  %v10085_v8 = vld [vmem:[%s15573_s0 + $0x10] ss:$144 sps:$4 sm:$0xff]  }
  0x45   :  { %7270 = vmatprep.subr.bf16.mxu1 %v10000_v9  ;;  %7257 = vmatprep.mubr.bf16.mxu0 %v10087_v34  ;;  %v10088_v9 = vld [vmem:[%s15573_s0 + $0x18] ss:$144 sps:$4 sm:$0xff]   ;;  %v10129_v34 = vld [vmem:[%s15572_s1 + $0x824] ss:$16 sps:$4 sm:$0xff]  }
  0x46   :  { %7300 = vmatprep.mubr.bf16.mxu1 %v10090_v35  ;;  %v10132_v35 = vld [vmem:[%s15572_s1 + $0xa24] ss:$16 sps:$4 sm:$0xff]  }
  0x47   :  { %7228 = vmatpush1.bf16.msra.mxu0 %v9995_v10  ;;  %v10091_v10 = vld [vmem:[%s15572_s1 + $0x8e0] ss:$16 sps:$4 sm:$0xff]  }
  0x48   :  { %7271 = vmatpush1.bf16.msra.mxu1 %v9998_v11  ;;  %7229 = vmatprep.subr.bf16.mxu0 %v10003_v12  ;;  %v10094_v11 = vld [vmem:[%s15572_s1 + $0xae0] ss:$16 sps:$4 sm:$0xff]   ;;  %v10099_v12 = vld [vmem:[%s15572_s1 + $0x8c4] ss:$16 sps:$4 sm:$0xff]  }
  0x49   :  { %7272 = vmatprep.subr.bf16.mxu1 %v10006_v13  ;;  %v10102_v13 = vld [vmem:[%s15572_s1 + $0xac4] ss:$16 sps:$4 sm:$0xff]  }
  0x4b   :  { %7230 = vmatpush1.bf16.msra.mxu0 %v10001_v14  ;;  %v10097_v14 = vld [vmem:[%s15572_s1 + $0x8c0] ss:$16 sps:$4 sm:$0xff]  }
  0x4c   :  { %7273 = vmatpush1.bf16.msra.mxu1 %v10004_v15  ;;  %7231 = vmatprep.subr.bf16.mxu0 %v10009_v16  ;;  %v10100_v15 = vld [vmem:[%s15572_s1 + $0xac0] ss:$16 sps:$4 sm:$0xff]   ;;  %v10105_v16 = vld [vmem:[%s15572_s1 + $0x8a4] ss:$16 sps:$4 sm:$0xff]  }
  0x4d   :  { %7274 = vmatprep.subr.bf16.mxu1 %v10012_v17  ;;  %v10108_v17 = vld [vmem:[%s15572_s1 + $0xaa4] ss:$16 sps:$4 sm:$0xff]  }
  0x4f   :  { %7232 = vmatpush1.bf16.msra.mxu0 %v10007_v18  ;;  %v10103_v18 = vld [vmem:[%s15572_s1 + $0x8a0] ss:$16 sps:$4 sm:$0xff]  }
  0x50   :  { %7275 = vmatpush1.bf16.msra.mxu1 %v10010_v19  ;;  %7233 = vmatprep.subr.bf16.mxu0 %v10015_v20  ;;  %v10189_v19 = vld [vmem:[%s15573_s0 + $0x24] ss:$144 sps:$4 sm:$0xff]   ;;  %v10106_v20 = vld [vmem:[%s15572_s1 + $0xaa0] ss:$16 sps:$4 sm:$0xff]  }
  0x51   :  { %7276 = vmatprep.subr.bf16.mxu1 %v10018_v21  ;;  %v10192_v21 = vld [vmem:[%s15573_s0 + $0x2c] ss:$144 sps:$4 sm:$0xff]  }
  0x53   :  { %7234 = vmatpush1.bf16.msra.mxu0 %v10013_v22  ;;  %v10111_v22 = vld [vmem:[%s15572_s1 + $0x884] ss:$16 sps:$4 sm:$0xff]  }
  0x54   :  { %7277 = vmatpush1.bf16.msra.mxu1 %v10016_v23  ;;  %7235 = vmatprep.subr.bf16.mxu0 %v10021_v24  ;;  %v10114_v23 = vld [vmem:[%s15572_s1 + $0xa84] ss:$16 sps:$4 sm:$0xff]   ;;  %v10109_v24 = vld [vmem:[%s15572_s1 + $0x880] ss:$16 sps:$4 sm:$0xff]  }
  0x55   :  { %7278 = vmatprep.subr.bf16.mxu1 %v10024_v25  ;;  %v10112_v25 = vld [vmem:[%s15572_s1 + $0xa80] ss:$16 sps:$4 sm:$0xff]  }
  0x57   :  { %7236 = vmatpush1.bf16.msra.mxu0 %v10019_v26  ;;  %v10117_v26 = vld [vmem:[%s15572_s1 + $0x864] ss:$16 sps:$4 sm:$0xff]  }
  0x58   :  { %7279 = vmatpush1.bf16.msra.mxu1 %v10022_v27  ;;  %7237 = vmatprep.subr.bf16.mxu0 %v10027_v28  ;;  %v10120_v27 = vld [vmem:[%s15572_s1 + $0xa64] ss:$16 sps:$4 sm:$0xff]   ;;  %v10115_v28 = vld [vmem:[%s15572_s1 + $0x860] ss:$16 sps:$4 sm:$0xff]  }
  0x59   :  { %7280 = vmatprep.subr.bf16.mxu1 %v10030_v29  ;;  %v10118_v29 = vld [vmem:[%s15572_s1 + $0xa60] ss:$16 sps:$4 sm:$0xff]  }
  0x5b   :  { %7238 = vmatpush1.bf16.msra.mxu0 %v10025_v30  ;;  %v10123_v30 = vld [vmem:[%s15572_s1 + $0x844] ss:$16 sps:$4 sm:$0xff]  }
  0x5c   :  { %7281 = vmatpush1.bf16.msra.mxu1 %v10028_v31  ;;  %7239 = vmatprep.subr.bf16.mxu0 %v10033_v32  ;;  %v10126_v31 = vld [vmem:[%s15572_s1 + $0xa44] ss:$16 sps:$4 sm:$0xff]   ;;  %v10121_v32 = vld [vmem:[%s15572_s1 + $0x840] ss:$16 sps:$4 sm:$0xff]  }
  0x5d   :  { %7282 = vmatprep.subr.bf16.mxu1 %v10036_v33  ;;  %v10124_v33 = vld [vmem:[%s15572_s1 + $0xa40] ss:$16 sps:$4 sm:$0xff]  }
  0x5f   :  { %7240 = vmatpush1.bf16.msra.mxu0 %v10031_v36  ;;  %v10127_v36 = vld [vmem:[%s15572_s1 + $0x820] ss:$16 sps:$4 sm:$0xff]  }
  0x60   :  { %7283 = vmatpush1.bf16.msra.mxu1 %v10034_v37  ;;  %7241 = vmatprep.subr.bf16.mxu0 %v10039_v38  ;;  %v10130_v37 = vld [vmem:[%s15572_s1 + $0xa20] ss:$16 sps:$4 sm:$0xff]   ;;  %v10135_v38 = vld [vmem:[%s15572_s1 + $0x804] ss:$16 sps:$4 sm:$0xff]  }
  0x61   :  { %7284 = vmatprep.subr.bf16.mxu1 %v10042_v39  ;;  %v10138_v39 = vld [vmem:[%s15572_s1 + $0xa04] ss:$16 sps:$4 sm:$0xff]  }
  0x63   :  { %7242 = vmatpush2.bf16.msra.mxu0 %v10037_v40  ;;  %v10133_v40 = vld [vmem:[%s15572_s1 + $0x800] ss:$16 sps:$4 sm:$0xff]  }
  0x64   :  { %7285 = vmatpush2.bf16.msra.mxu1 %v10040_v41  ;;  %7243 = vmatprep.subr.bf16.mxu0 %v10045_v42  ;;  %v10136_v41 = vld [vmem:[%s15572_s1 + $0xa00] ss:$16 sps:$4 sm:$0xff]   ;;  %v10141_v42 = vld [vmem:[%s15572_s1 + $0x9e4] ss:$16 sps:$4 sm:$0xff]  }
  0x65   :  { %7286 = vmatprep.subr.bf16.mxu1 %v10048_v43  ;;  %v10144_v43 = vld [vmem:[%s15572_s1 + $0xbe4] ss:$16 sps:$4 sm:$0xff]  }
  0x67   :  { %7244 = vmatpush2.bf16.msra.mxu0 %v10043_v44  ;;  %v10139_v44 = vld [vmem:[%s15572_s1 + $0x9e0] ss:$16 sps:$4 sm:$0xff]  }
  0x68   :  { %7287 = vmatpush2.bf16.msra.mxu1 %v10046_v45  ;;  %7245 = vmatprep.subr.bf16.mxu0 %v10051_v46  ;;  %v10142_v45 = vld [vmem:[%s15572_s1 + $0xbe0] ss:$16 sps:$4 sm:$0xff]   ;;  %v10147_v46 = vld [vmem:[%s15572_s1 + $0x9c4] ss:$16 sps:$4 sm:$0xff]  }
  0x69   :  { %7288 = vmatprep.subr.bf16.mxu1 %v10054_v47  ;;  %v10150_v47 = vld [vmem:[%s15572_s1 + $0xbc4] ss:$16 sps:$4 sm:$0xff]  }
  0x6b   :  { %7246 = vmatpush2.bf16.msra.mxu0 %v10049_v48  ;;  %v10145_v48 = vld [vmem:[%s15572_s1 + $0x9c0] ss:$16 sps:$4 sm:$0xff]  }
  0x6c   :  { %7289 = vmatpush2.bf16.msra.mxu1 %v10052_v49  ;;  %7247 = vmatprep.subr.bf16.mxu0 %v10057_v50  ;;  %v10148_v49 = vld [vmem:[%s15572_s1 + $0xbc0] ss:$16 sps:$4 sm:$0xff]   ;;  %v10153_v50 = vld [vmem:[%s15572_s1 + $0x9a4] ss:$16 sps:$4 sm:$0xff]  }
  0x6d   :  { %7290 = vmatprep.subr.bf16.mxu1 %v10060_v51  ;;  %v10156_v51 = vld [vmem:[%s15572_s1 + $0xba4] ss:$16 sps:$4 sm:$0xff]  }
  0x6f   :  { %7248 = vmatpush2.bf16.msra.mxu0 %v10055_v52  ;;  %v10151_v52 = vld [vmem:[%s15572_s1 + $0x9a0] ss:$16 sps:$4 sm:$0xff]  }
  0x70   :  { %7291 = vmatpush2.bf16.msra.mxu1 %v10058_v53  ;;  %7249 = vmatprep.subr.bf16.mxu0 %v10063_v54  ;;  %v10154_v53 = vld [vmem:[%s15572_s1 + $0xba0] ss:$16 sps:$4 sm:$0xff]   ;;  %v10159_v54 = vld [vmem:[%s15572_s1 + $0x984] ss:$16 sps:$4 sm:$0xff]  }
  0x71   :  { %7292 = vmatprep.subr.bf16.mxu1 %v10066_v55  ;;  %v10162_v55 = vld [vmem:[%s15572_s1 + $0xb84] ss:$16 sps:$4 sm:$0xff]  }
  0x73   :  { %7250 = vmatpush2.bf16.msra.mxu0 %v10061_v56  ;;  %v10157_v56 = vld [vmem:[%s15572_s1 + $0x980] ss:$16 sps:$4 sm:$0xff]  }
  0x74   :  { %7293 = vmatpush2.bf16.msra.mxu1 %v10064_v57  ;;  %7251 = vmatprep.subr.bf16.mxu0 %v10069_v58  ;;  %v10160_v57 = vld [vmem:[%s15572_s1 + $0xb80] ss:$16 sps:$4 sm:$0xff]   ;;  %v10165_v58 = vld [vmem:[%s15572_s1 + $0x964] ss:$16 sps:$4 sm:$0xff]  }
  0x75   :  { %7294 = vmatprep.subr.bf16.mxu1 %v10072_v59  ;;  %v10168_v59 = vld [vmem:[%s15572_s1 + $0xb64] ss:$16 sps:$4 sm:$0xff]  }
  0x77   :  { %7252 = vmatpush2.bf16.msra.mxu0 %v10067_v60  ;;  %v10163_v60 = vld [vmem:[%s15572_s1 + $0x960] ss:$16 sps:$4 sm:$0xff]  }
  0x78   :  { %7295 = vmatpush2.bf16.msra.mxu1 %v10070_v61  ;;  %7253 = vmatprep.subr.bf16.mxu0 %v10075_v62  ;;  %v10166_v61 = vld [vmem:[%s15572_s1 + $0xb60] ss:$16 sps:$4 sm:$0xff]   ;;  %v10171_v62 = vld [vmem:[%s15572_s1 + $0x944] ss:$16 sps:$4 sm:$0xff]  }
  0x79   :  { %7296 = vmatprep.subr.bf16.mxu1 %v10078_v63  ;;  %v10174_v63 = vld [vmem:[%s15572_s1 + $0xb44] ss:$16 sps:$4 sm:$0xff]  }
  0x7b   :  { %7254 = vmatpush2.bf16.msra.mxu0 %v10073_v0  ;;  %v10169_v0 = vld [vmem:[%s15572_s1 + $0x940] ss:$16 sps:$4 sm:$0xff]  }
  0x7c   :  { %7297 = vmatpush2.bf16.msra.mxu1 %v10076_v1  ;;  %7255 = vmatprep.subr.bf16.mxu0 %v10081_v2  ;;  %v10172_v1 = vld [vmem:[%s15572_s1 + $0xb40] ss:$16 sps:$4 sm:$0xff]   ;;  %v10177_v2 = vld [vmem:[%s15572_s1 + $0x924] ss:$16 sps:$4 sm:$0xff]  }
  0x7d   :  { %7298 = vmatprep.subr.bf16.mxu1 %v10084_v3  ;;  %v10180_v3 = vld [vmem:[%s15572_s1 + $0xb24] ss:$16 sps:$4 sm:$0xff]  }
  0x7f   :  { %7256 = vmatpush2.bf16.msra.mxu0 %v10079_v4  ;;  %v10175_v4 = vld [vmem:[%s15572_s1 + $0x920] ss:$16 sps:$4 sm:$0xff]  }
  0x80   :  { %7299 = vmatpush2.bf16.msra.mxu1 %v10082_v5  ;;  %7311 = vmatprep.subr.bf16.mxu0 %v10093_v6  ;;  %v10178_v5 = vld [vmem:[%s15572_s1 + $0xb20] ss:$16 sps:$4 sm:$0xff]   ;;  %v10183_v6 = vld [vmem:[%s15572_s1 + $0x904] ss:$16 sps:$4 sm:$0xff]  }
  0x81   :  { %7354 = vmatprep.subr.bf16.mxu1 %v10096_v7  ;;  %v10186_v7 = vld [vmem:[%s15572_s1 + $0xb04] ss:$16 sps:$4 sm:$0xff]  }
  0x82   :  { %7258 = vmatmul.mubr.bf16.vlgmr.msra.gmra.mxu0 %v10085_v8  ;;  %v10181_v8 = vld [vmem:[%s15572_s1 + $0x900] ss:$16 sps:$4 sm:$0xff]  }
  0x83   :  { %7301 = vmatmul.mubr.bf16.vlgmr.msra.gmra.mxu1 %v10088_v9  ;;  %7312 = vmatpush1.bf16.msra.mxu0 %v10091_v10  ;;  %v10184_v9 = vld [vmem:[%s15572_s1 + $0xb00] ss:$16 sps:$4 sm:$0xff]   ;;  %v10195_v10 = vld [vmem:[%s15572_s1 + $0xce4] ss:$16 sps:$4 sm:$0xff]  }
  0x84   :  { %7355 = vmatpush1.bf16.msra.mxu1 %v10094_v11  ;;  %7313 = vmatprep.subr.bf16.mxu0 %v10099_v12  ;;  %v10198_v11 = vld [vmem:[%s15572_s1 + $0xee4] ss:$16 sps:$4 sm:$0xff]   ;;  %v10187_v12 = vld [vmem:[%s15573_s0 + $0x20] ss:$144 sps:$4 sm:$0xff]  }
  0x85   :  { %7356 = vmatprep.subr.bf16.mxu1 %v10102_v13  ;;  %7343 = vmatprep.mubr.bf16.mxu0 %v10189_v19  ;;  %v10190_v13 = vld [vmem:[%s15573_s0 + $0x28] ss:$144 sps:$4 sm:$0xff]   ;;  %v10294_v19 = vld [vmem:[%s15573_s0 + $0x3c] ss:$144 sps:$4 sm:$0xff]  }
  0x86   :  { %7386 = vmatprep.mubr.bf16.mxu1 %v10192_v21  ;;  %v10202_v21 = vld [vmem:[%s15572_s1 + $0xec0] ss:$16 sps:$4 sm:$0xff]  }
  0x87   :  { %7314 = vmatpush1.bf16.msra.mxu0 %v10097_v14  ;;  %v10193_v14 = vld [vmem:[%s15572_s1 + $0xce0] ss:$16 sps:$4 sm:$0xff]  }
  0x88   :  { %7357 = vmatpush1.bf16.msra.mxu1 %v10100_v15  ;;  %7315 = vmatprep.subr.bf16.mxu0 %v10105_v16  ;;  %v10196_v15 = vld [vmem:[%s15572_s1 + $0xee0] ss:$16 sps:$4 sm:$0xff]   ;;  %v10201_v16 = vld [vmem:[%s15572_s1 + $0xcc4] ss:$16 sps:$4 sm:$0xff]  }
  0x89   :  { %7358 = vmatprep.subr.bf16.mxu1 %v10108_v17  ;;  %v10204_v17 = vld [vmem:[%s15572_s1 + $0xec4] ss:$16 sps:$4 sm:$0xff]  }
  0x8b   :  { %7316 = vmatpush1.bf16.msra.mxu0 %v10103_v18  ;;  %v10291_v18 = vld [vmem:[%s15573_s0 + $0x34] ss:$144 sps:$4 sm:$0xff]  }
  0x8c   :  { %7359 = vmatpush1.bf16.msra.mxu1 %v10106_v20  ;;  %7317 = vmatprep.subr.bf16.mxu0 %v10111_v22  ;;  %v10199_v20 = vld [vmem:[%s15572_s1 + $0xcc0] ss:$16 sps:$4 sm:$0xff]   ;;  %v10207_v22 = vld [vmem:[%s15572_s1 + $0xca4] ss:$16 sps:$4 sm:$0xff]  }
  0x8d   :  { %7360 = vmatprep.subr.bf16.mxu1 %v10114_v23  ;;  %v10210_v23 = vld [vmem:[%s15572_s1 + $0xea4] ss:$16 sps:$4 sm:$0xff]  }
  0x8f   :  { %7318 = vmatpush1.bf16.msra.mxu0 %v10109_v24  ;;  %v10205_v24 = vld [vmem:[%s15572_s1 + $0xca0] ss:$16 sps:$4 sm:$0xff]  }
  0x90   :  { %7361 = vmatpush1.bf16.msra.mxu1 %v10112_v25  ;;  %7319 = vmatprep.subr.bf16.mxu0 %v10117_v26  ;;  %v10208_v25 = vld [vmem:[%s15572_s1 + $0xea0] ss:$16 sps:$4 sm:$0xff]   ;;  %v10213_v26 = vld [vmem:[%s15572_s1 + $0xc84] ss:$16 sps:$4 sm:$0xff]  }
  0x91   :  { %7362 = vmatprep.subr.bf16.mxu1 %v10120_v27  ;;  %v10216_v27 = vld [vmem:[%s15572_s1 + $0xe84] ss:$16 sps:$4 sm:$0xff]  }
  0x93   :  { %7320 = vmatpush1.bf16.msra.mxu0 %v10115_v28  ;;  %v10211_v28 = vld [vmem:[%s15572_s1 + $0xc80] ss:$16 sps:$4 sm:$0xff]  }
  0x94   :  { %7363 = vmatpush1.bf16.msra.mxu1 %v10118_v29  ;;  %7321 = vmatprep.subr.bf16.mxu0 %v10123_v30  ;;  %v10214_v29 = vld [vmem:[%s15572_s1 + $0xe80] ss:$16 sps:$4 sm:$0xff]   ;;  %v10219_v30 = vld [vmem:[%s15572_s1 + $0xc64] ss:$16 sps:$4 sm:$0xff]  }
  0x95   :  { %7364 = vmatprep.subr.bf16.mxu1 %v10126_v31  ;;  %v10222_v31 = vld [vmem:[%s15572_s1 + $0xe64] ss:$16 sps:$4 sm:$0xff]  }
  0x97   :  { %7322 = vmatpush1.bf16.msra.mxu0 %v10121_v32  ;;  %v10217_v32 = vld [vmem:[%s15572_s1 + $0xc60] ss:$16 sps:$4 sm:$0xff]  }
  0x98   :  { %7365 = vmatpush1.bf16.msra.mxu1 %v10124_v33  ;;  %7323 = vmatprep.subr.bf16.mxu0 %v10129_v34  ;;  %v10220_v33 = vld [vmem:[%s15572_s1 + $0xe60] ss:$16 sps:$4 sm:$0xff]   ;;  %v10225_v34 = vld [vmem:[%s15572_s1 + $0xc44] ss:$16 sps:$4 sm:$0xff]  }
  0x99   :  { %7366 = vmatprep.subr.bf16.mxu1 %v10132_v35  ;;  %v10228_v35 = vld [vmem:[%s15572_s1 + $0xe44] ss:$16 sps:$4 sm:$0xff]  }
  0x9b   :  { %7324 = vmatpush1.bf16.msra.mxu0 %v10127_v36  ;;  %v10223_v36 = vld [vmem:[%s15572_s1 + $0xc40] ss:$16 sps:$4 sm:$0xff]  }
  0x9c   :  { %7367 = vmatpush1.bf16.msra.mxu1 %v10130_v37  ;;  %7325 = vmatprep.subr.bf16.mxu0 %v10135_v38  ;;  %v10226_v37 = vld [vmem:[%s15572_s1 + $0xe40] ss:$16 sps:$4 sm:$0xff]   ;;  %v10231_v38 = vld [vmem:[%s15572_s1 + $0xc24] ss:$16 sps:$4 sm:$0xff]  }
  0x9d   :  { %7368 = vmatprep.subr.bf16.mxu1 %v10138_v39  ;;  %v10234_v39 = vld [vmem:[%s15572_s1 + $0xe24] ss:$16 sps:$4 sm:$0xff]  }
  0x9f   :  { %7326 = vmatpush1.bf16.msra.mxu0 %v10133_v40  ;;  %v10229_v40 = vld [vmem:[%s15572_s1 + $0xc20] ss:$16 sps:$4 sm:$0xff]  }
  0xa0   :  { %7369 = vmatpush1.bf16.msra.mxu1 %v10136_v41  ;;  %7327 = vmatprep.subr.bf16.mxu0 %v10141_v42  ;;  %v10232_v41 = vld [vmem:[%s15572_s1 + $0xe20] ss:$16 sps:$4 sm:$0xff]   ;;  %v10237_v42 = vld [vmem:[%s15572_s1 + $0xc04] ss:$16 sps:$4 sm:$0xff]  }
  0xa1   :  { %7370 = vmatprep.subr.bf16.mxu1 %v10144_v43  ;;  %v10240_v43 = vld [vmem:[%s15572_s1 + $0xe04] ss:$16 sps:$4 sm:$0xff]  }
  0xa3   :  { %7328 = vmatpush2.bf16.msra.mxu0 %v10139_v44  ;;  %v10235_v44 = vld [vmem:[%s15572_s1 + $0xc00] ss:$16 sps:$4 sm:$0xff]  }
  0xa4   :  { %7371 = vmatpush2.bf16.msra.mxu1 %v10142_v45  ;;  %7329 = vmatprep.subr.bf16.mxu0 %v10147_v46  ;;  %v10238_v45 = vld [vmem:[%s15572_s1 + $0xe00] ss:$16 sps:$4 sm:$0xff]   ;;  %v10243_v46 = vld [vmem:[%s15572_s1 + $0xde4] ss:$16 sps:$4 sm:$0xff]  }
  0xa5   :  { %7372 = vmatprep.subr.bf16.mxu1 %v10150_v47  ;;  %v10246_v47 = vld [vmem:[%s15572_s1 + $0xfe4] ss:$16 sps:$4 sm:$0xff]  }
  0xa7   :  { %7330 = vmatpush2.bf16.msra.mxu0 %v10145_v48  ;;  %v10241_v48 = vld [vmem:[%s15572_s1 + $0xde0] ss:$16 sps:$4 sm:$0xff]  }
  0xa8   :  { %7373 = vmatpush2.bf16.msra.mxu1 %v10148_v49  ;;  %7331 = vmatprep.subr.bf16.mxu0 %v10153_v50  ;;  %v10244_v49 = vld [vmem:[%s15572_s1 + $0xfe0] ss:$16 sps:$4 sm:$0xff]   ;;  %v10249_v50 = vld [vmem:[%s15572_s1 + $0xdc4] ss:$16 sps:$4 sm:$0xff]  }
  0xa9   :  { %7374 = vmatprep.subr.bf16.mxu1 %v10156_v51  ;;  %v10252_v51 = vld [vmem:[%s15572_s1 + $0xfc4] ss:$16 sps:$4 sm:$0xff]  }
  0xab   :  { %7332 = vmatpush2.bf16.msra.mxu0 %v10151_v52  ;;  %v10247_v52 = vld [vmem:[%s15572_s1 + $0xdc0] ss:$16 sps:$4 sm:$0xff]  }
  0xac   :  { %7375 = vmatpush2.bf16.msra.mxu1 %v10154_v53  ;;  %7333 = vmatprep.subr.bf16.mxu0 %v10159_v54  ;;  %v10250_v53 = vld [vmem:[%s15572_s1 + $0xfc0] ss:$16 sps:$4 sm:$0xff]   ;;  %v10255_v54 = vld [vmem:[%s15572_s1 + $0xda4] ss:$16 sps:$4 sm:$0xff]  }
  0xad   :  { %7376 = vmatprep.subr.bf16.mxu1 %v10162_v55  ;;  %v10258_v55 = vld [vmem:[%s15572_s1 + $0xfa4] ss:$16 sps:$4 sm:$0xff]  }
  0xaf   :  { %7334 = vmatpush2.bf16.msra.mxu0 %v10157_v56  ;;  %v10253_v56 = vld [vmem:[%s15572_s1 + $0xda0] ss:$16 sps:$4 sm:$0xff]  }
  0xb0   :  { %7377 = vmatpush2.bf16.msra.mxu1 %v10160_v57  ;;  %7335 = vmatprep.subr.bf16.mxu0 %v10165_v58  ;;  %v10256_v57 = vld [vmem:[%s15572_s1 + $0xfa0] ss:$16 sps:$4 sm:$0xff]   ;;  %v10261_v58 = vld [vmem:[%s15572_s1 + $0xd84] ss:$16 sps:$4 sm:$0xff]  }
  0xb1   :  { %7378 = vmatprep.subr.bf16.mxu1 %v10168_v59  ;;  %v10264_v59 = vld [vmem:[%s15572_s1 + $0xf84] ss:$16 sps:$4 sm:$0xff]  }
  0xb3   :  { %7336 = vmatpush2.bf16.msra.mxu0 %v10163_v60  ;;  %v10259_v60 = vld [vmem:[%s15572_s1 + $0xd80] ss:$16 sps:$4 sm:$0xff]  }
  0xb4   :  { %7379 = vmatpush2.bf16.msra.mxu1 %v10166_v61  ;;  %7337 = vmatprep.subr.bf16.mxu0 %v10171_v62  ;;  %v10262_v61 = vld [vmem:[%s15572_s1 + $0xf80] ss:$16 sps:$4 sm:$0xff]   ;;  %v10267_v62 = vld [vmem:[%s15572_s1 + $0xd64] ss:$16 sps:$4 sm:$0xff]  }
  0xb5   :  { %7380 = vmatprep.subr.bf16.mxu1 %v10174_v63  ;;  %v10270_v63 = vld [vmem:[%s15572_s1 + $0xf64] ss:$16 sps:$4 sm:$0xff]  }
  0xb7   :  { %7338 = vmatpush2.bf16.msra.mxu0 %v10169_v0  ;;  %v10265_v0 = vld [vmem:[%s15572_s1 + $0xd60] ss:$16 sps:$4 sm:$0xff]  }
  0xb8   :  { %7381 = vmatpush2.bf16.msra.mxu1 %v10172_v1  ;;  %7339 = vmatprep.subr.bf16.mxu0 %v10177_v2  ;;  %v10268_v1 = vld [vmem:[%s15572_s1 + $0xf60] ss:$16 sps:$4 sm:$0xff]   ;;  %v10273_v2 = vld [vmem:[%s15572_s1 + $0xd44] ss:$16 sps:$4 sm:$0xff]  }
  0xb9   :  { %7382 = vmatprep.subr.bf16.mxu1 %v10180_v3  ;;  %v10276_v3 = vld [vmem:[%s15572_s1 + $0xf44] ss:$16 sps:$4 sm:$0xff]  }
  0xbb   :  { %7340 = vmatpush2.bf16.msra.mxu0 %v10175_v4  ;;  %v10271_v4 = vld [vmem:[%s15572_s1 + $0xd40] ss:$16 sps:$4 sm:$0xff]  }
  0xbc   :  { %7383 = vmatpush2.bf16.msra.mxu1 %v10178_v5  ;;  %7341 = vmatprep.subr.bf16.mxu0 %v10183_v6  ;;  %v10274_v5 = vld [vmem:[%s15572_s1 + $0xf40] ss:$16 sps:$4 sm:$0xff]   ;;  %v10279_v6 = vld [vmem:[%s15572_s1 + $0xd24] ss:$16 sps:$4 sm:$0xff]  }
  0xbd   :  { %7384 = vmatprep.subr.bf16.mxu1 %v10186_v7  ;;  %v10282_v7 = vld [vmem:[%s15572_s1 + $0xf24] ss:$16 sps:$4 sm:$0xff]  }
  0xbf   :  { %7342 = vmatpush2.bf16.msra.mxu0 %v10181_v8  ;;  %v10277_v8 = vld [vmem:[%s15572_s1 + $0xd20] ss:$16 sps:$4 sm:$0xff]  }
  0xc0   :  { %7385 = vmatpush2.bf16.msra.mxu1 %v10184_v9  ;;  %7397 = vmatprep.subr.bf16.mxu0 %v10195_v10  ;;  %v10280_v9 = vld [vmem:[%s15572_s1 + $0xf20] ss:$16 sps:$4 sm:$0xff]   ;;  %v10285_v10 = vld [vmem:[%s15572_s1 + $0xd04] ss:$16 sps:$4 sm:$0xff]  }
  0xc1   :  { %7440 = vmatprep.subr.bf16.mxu1 %v10198_v11  ;;  %v10288_v11 = vld [vmem:[%s15572_s1 + $0xf04] ss:$16 sps:$4 sm:$0xff]  }
  0xc2   :  { %7344 = vmatmul.mubr.bf16.vlgmr.msra.gmra.mxu0 %v10187_v12  ;;  %v10283_v12 = vld [vmem:[%s15572_s1 + $0xd00] ss:$16 sps:$4 sm:$0xff]  }
  0xc3   :  { %7387 = vmatmul.mubr.bf16.vlgmr.msra.gmra.mxu1 %v10190_v13  ;;  %7398 = vmatpush1.bf16.msra.mxu0 %v10193_v14  ;;  %v10286_v13 = vld [vmem:[%s15572_s1 + $0xf00] ss:$16 sps:$4 sm:$0xff]   ;;  %v10297_v14 = vld [vmem:[%s15572_s1 + $0x10e4] ss:$16 sps:$4 sm:$0xff]  }
  0xc4   :  { %7441 = vmatpush1.bf16.msra.mxu1 %v10196_v15  ;;  %7399 = vmatprep.subr.bf16.mxu0 %v10201_v16  ;;  %v10300_v15 = vld [vmem:[%s15572_s1 + $0x12e4] ss:$16 sps:$4 sm:$0xff]   ;;  %v10289_v16 = vld [vmem:[%s15573_s0 + $0x30] ss:$144 sps:$4 sm:$0xff]  }
  0xc5   :  { %7442 = vmatprep.subr.bf16.mxu1 %v10204_v17  ;;  %7429 = vmatprep.mubr.bf16.mxu0 %v10291_v18  ;;  %v10292_v17 = vld [vmem:[%s15573_s0 + $0x38] ss:$144 sps:$4 sm:$0xff]   ;;  %v10295_v18 = vld [vmem:[%s15572_s1 + $0x10e0] ss:$16 sps:$4 sm:$0xff]  }
  0xc6   :  { %7472 = vmatprep.mubr.bf16.mxu1 %v10294_v19  ;;  %v10298_v19 = vld [vmem:[%s15572_s1 + $0x12e0] ss:$16 sps:$4 sm:$0xff]  }
  0xc7   :  { %7400 = vmatpush1.bf16.msra.mxu0 %v10199_v20  ;;  %v10303_v20 = vld [vmem:[%s15572_s1 + $0x10c4] ss:$16 sps:$4 sm:$0xff]  }
  0xc8   :  { %7443 = vmatpush1.bf16.msra.mxu1 %v10202_v21  ;;  %7401 = vmatprep.subr.bf16.mxu0 %v10207_v22  ;;  %v10306_v21 = vld [vmem:[%s15572_s1 + $0x12c4] ss:$16 sps:$4 sm:$0xff]  }
  0xc9   :  { %7444 = vmatprep.subr.bf16.mxu1 %v10210_v23  ;;  %v10393_v22 = vld [vmem:[%s15573_s0 + $0x44] ss:$144 sps:$4 sm:$0xff]   ;;  %v10396_v23 = vld [vmem:[%s15573_s0 + $0x4c] ss:$144 sps:$4 sm:$0xff]  }
  0xcb   :  { %7402 = vmatpush1.bf16.msra.mxu0 %v10205_v24  ;;  %v10301_v24 = vld [vmem:[%s15572_s1 + $0x10c0] ss:$16 sps:$4 sm:$0xff]  }
  0xcc   :  { %7445 = vmatpush1.bf16.msra.mxu1 %v10208_v25  ;;  %7403 = vmatprep.subr.bf16.mxu0 %v10213_v26  ;;  %v10304_v25 = vld [vmem:[%s15572_s1 + $0x12c0] ss:$16 sps:$4 sm:$0xff]   ;;  %v10309_v26 = vld [vmem:[%s15572_s1 + $0x10a4] ss:$16 sps:$4 sm:$0xff]  }
  0xcd   :  { %7446 = vmatprep.subr.bf16.mxu1 %v10216_v27  ;;  %v10312_v27 = vld [vmem:[%s15572_s1 + $0x12a4] ss:$16 sps:$4 sm:$0xff]  }
  0xcf   :  { %7404 = vmatpush1.bf16.msra.mxu0 %v10211_v28  ;;  %v10307_v28 = vld [vmem:[%s15572_s1 + $0x10a0] ss:$16 sps:$4 sm:$0xff]  }
  0xd0   :  { %7447 = vmatpush1.bf16.msra.mxu1 %v10214_v29  ;;  %7405 = vmatprep.subr.bf16.mxu0 %v10219_v30  ;;  %v10310_v29 = vld [vmem:[%s15572_s1 + $0x12a0] ss:$16 sps:$4 sm:$0xff]   ;;  %v10315_v30 = vld [vmem:[%s15572_s1 + $0x1084] ss:$16 sps:$4 sm:$0xff]  }
  0xd1   :  { %7448 = vmatprep.subr.bf16.mxu1 %v10222_v31  ;;  %v10318_v31 = vld [vmem:[%s15572_s1 + $0x1284] ss:$16 sps:$4 sm:$0xff]  }
  0xd3   :  { %7406 = vmatpush1.bf16.msra.mxu0 %v10217_v32  ;;  %v10313_v32 = vld [vmem:[%s15572_s1 + $0x1080] ss:$16 sps:$4 sm:$0xff]  }
  0xd4   :  { %7449 = vmatpush1.bf16.msra.mxu1 %v10220_v33  ;;  %7407 = vmatprep.subr.bf16.mxu0 %v10225_v34  ;;  %v10316_v33 = vld [vmem:[%s15572_s1 + $0x1280] ss:$16 sps:$4 sm:$0xff]   ;;  %v10321_v34 = vld [vmem:[%s15572_s1 + $0x1064] ss:$16 sps:$4 sm:$0xff]  }
  0xd5   :  { %7450 = vmatprep.subr.bf16.mxu1 %v10228_v35  ;;  %v10324_v35 = vld [vmem:[%s15572_s1 + $0x1264] ss:$16 sps:$4 sm:$0xff]  }
  0xd7   :  { %7408 = vmatpush1.bf16.msra.mxu0 %v10223_v36  ;;  %v10319_v36 = vld [vmem:[%s15572_s1 + $0x1060] ss:$16 sps:$4 sm:$0xff]  }
  0xd8   :  { %7451 = vmatpush1.bf16.msra.mxu1 %v10226_v37  ;;  %7409 = vmatprep.subr.bf16.mxu0 %v10231_v38  ;;  %v10322_v37 = vld [vmem:[%s15572_s1 + $0x1260] ss:$16 sps:$4 sm:$0xff]   ;;  %v10327_v38 = vld [vmem:[%s15572_s1 + $0x1044] ss:$16 sps:$4 sm:$0xff]  }
  0xd9   :  { %7452 = vmatprep.subr.bf16.mxu1 %v10234_v39  ;;  %v10330_v39 = vld [vmem:[%s15572_s1 + $0x1244] ss:$16 sps:$4 sm:$0xff]  }
  0xdb   :  { %7410 = vmatpush1.bf16.msra.mxu0 %v10229_v40  ;;  %v10325_v40 = vld [vmem:[%s15572_s1 + $0x1040] ss:$16 sps:$4 sm:$0xff]  }
  0xdc   :  { %7453 = vmatpush1.bf16.msra.mxu1 %v10232_v41  ;;  %7411 = vmatprep.subr.bf16.mxu0 %v10237_v42  ;;  %v10328_v41 = vld [vmem:[%s15572_s1 + $0x1240] ss:$16 sps:$4 sm:$0xff]   ;;  %v10333_v42 = vld [vmem:[%s15572_s1 + $0x1024] ss:$16 sps:$4 sm:$0xff]  }
  0xdd   :  { %7454 = vmatprep.subr.bf16.mxu1 %v10240_v43  ;;  %v10336_v43 = vld [vmem:[%s15572_s1 + $0x1224] ss:$16 sps:$4 sm:$0xff]  }
  0xdf   :  { %7412 = vmatpush1.bf16.msra.mxu0 %v10235_v44  ;;  %v10331_v44 = vld [vmem:[%s15572_s1 + $0x1020] ss:$16 sps:$4 sm:$0xff]  }
  0xe0   :  { %7455 = vmatpush1.bf16.msra.mxu1 %v10238_v45  ;;  %7413 = vmatprep.subr.bf16.mxu0 %v10243_v46  ;;  %v10334_v45 = vld [vmem:[%s15572_s1 + $0x1220] ss:$16 sps:$4 sm:$0xff]   ;;  %v10339_v46 = vld [vmem:[%s15572_s1 + $0x1004] ss:$16 sps:$4 sm:$0xff]  }
  0xe1   :  { %7456 = vmatprep.subr.bf16.mxu1 %v10246_v47  ;;  %v10342_v47 = vld [vmem:[%s15572_s1 + $0x1204] ss:$16 sps:$4 sm:$0xff]  }
  0xe3   :  { %7414 = vmatpush2.bf16.msra.mxu0 %v10241_v48  ;;  %v10337_v48 = vld [vmem:[%s15572_s1 + $0x1000] ss:$16 sps:$4 sm:$0xff]  }
  0xe4   :  { %7457 = vmatpush2.bf16.msra.mxu1 %v10244_v49  ;;  %7415 = vmatprep.subr.bf16.mxu0 %v10249_v50  ;;  %v10340_v49 = vld [vmem:[%s15572_s1 + $0x1200] ss:$16 sps:$4 sm:$0xff]   ;;  %v10345_v50 = vld [vmem:[%s15572_s1 + $0x11e4] ss:$16 sps:$4 sm:$0xff]  }
  0xe5   :  { %7458 = vmatprep.subr.bf16.mxu1 %v10252_v51  ;;  %v10348_v51 = vld [vmem:[%s15572_s1 + $0x13e4] ss:$16 sps:$4 sm:$0xff]  }
  0xe7   :  { %7416 = vmatpush2.bf16.msra.mxu0 %v10247_v52  ;;  %v10343_v52 = vld [vmem:[%s15572_s1 + $0x11e0] ss:$16 sps:$4 sm:$0xff]  }
  0xe8   :  { %7459 = vmatpush2.bf16.msra.mxu1 %v10250_v53  ;;  %7417 = vmatprep.subr.bf16.mxu0 %v10255_v54  ;;  %v10346_v53 = vld [vmem:[%s15572_s1 + $0x13e0] ss:$16 sps:$4 sm:$0xff]   ;;  %v10351_v54 = vld [vmem:[%s15572_s1 + $0x11c4] ss:$16 sps:$4 sm:$0xff]  }
  0xe9   :  { %7460 = vmatprep.subr.bf16.mxu1 %v10258_v55  ;;  %v10354_v55 = vld [vmem:[%s15572_s1 + $0x13c4] ss:$16 sps:$4 sm:$0xff]  }
  0xeb   :  { %7418 = vmatpush2.bf16.msra.mxu0 %v10253_v56  ;;  %v10349_v56 = vld [vmem:[%s15572_s1 + $0x11c0] ss:$16 sps:$4 sm:$0xff]  }
  0xec   :  { %7461 = vmatpush2.bf16.msra.mxu1 %v10256_v57  ;;  %7419 = vmatprep.subr.bf16.mxu0 %v10261_v58  ;;  %v10352_v57 = vld [vmem:[%s15572_s1 + $0x13c0] ss:$16 sps:$4 sm:$0xff]   ;;  %v10357_v58 = vld [vmem:[%s15572_s1 + $0x11a4] ss:$16 sps:$4 sm:$0xff]  }
  0xed   :  { %7462 = vmatprep.subr.bf16.mxu1 %v10264_v59  ;;  %v10360_v59 = vld [vmem:[%s15572_s1 + $0x13a4] ss:$16 sps:$4 sm:$0xff]  }
  0xef   :  { %7420 = vmatpush2.bf16.msra.mxu0 %v10259_v60  ;;  %v10355_v60 = vld [vmem:[%s15572_s1 + $0x11a0] ss:$16 sps:$4 sm:$0xff]  }
  0xf0   :  { %7463 = vmatpush2.bf16.msra.mxu1 %v10262_v61  ;;  %7421 = vmatprep.subr.bf16.mxu0 %v10267_v62  ;;  %v10358_v61 = vld [vmem:[%s15572_s1 + $0x13a0] ss:$16 sps:$4 sm:$0xff]   ;;  %v10363_v62 = vld [vmem:[%s15572_s1 + $0x1184] ss:$16 sps:$4 sm:$0xff]  }
  0xf1   :  { %7464 = vmatprep.subr.bf16.mxu1 %v10270_v63  ;;  %v10366_v63 = vld [vmem:[%s15572_s1 + $0x1384] ss:$16 sps:$4 sm:$0xff]  }
  0xf3   :  { %7422 = vmatpush2.bf16.msra.mxu0 %v10265_v0  ;;  %v10361_v0 = vld [vmem:[%s15572_s1 + $0x1180] ss:$16 sps:$4 sm:$0xff]  }
  0xf4   :  { %7465 = vmatpush2.bf16.msra.mxu1 %v10268_v1  ;;  %7423 = vmatprep.subr.bf16.mxu0 %v10273_v2  ;;  %v10364_v1 = vld [vmem:[%s15572_s1 + $0x1380] ss:$16 sps:$4 sm:$0xff]   ;;  %v10369_v2 = vld [vmem:[%s15572_s1 + $0x1164] ss:$16 sps:$4 sm:$0xff]  }
  0xf5   :  { %7466 = vmatprep.subr.bf16.mxu1 %v10276_v3  ;;  %v10372_v3 = vld [vmem:[%s15572_s1 + $0x1364] ss:$16 sps:$4 sm:$0xff]  }
  0xf7   :  { %7424 = vmatpush2.bf16.msra.mxu0 %v10271_v4  ;;  %v10367_v4 = vld [vmem:[%s15572_s1 + $0x1160] ss:$16 sps:$4 sm:$0xff]  }
  0xf8   :  { %7467 = vmatpush2.bf16.msra.mxu1 %v10274_v5  ;;  %7425 = vmatprep.subr.bf16.mxu0 %v10279_v6  ;;  %v10370_v5 = vld [vmem:[%s15572_s1 + $0x1360] ss:$16 sps:$4 sm:$0xff]   ;;  %v10375_v6 = vld [vmem:[%s15572_s1 + $0x1144] ss:$16 sps:$4 sm:$0xff]  }
  0xf9   :  { %7468 = vmatprep.subr.bf16.mxu1 %v10282_v7  ;;  %v10378_v7 = vld [vmem:[%s15572_s1 + $0x1344] ss:$16 sps:$4 sm:$0xff]  }
  0xfb   :  { %7426 = vmatpush2.bf16.msra.mxu0 %v10277_v8  ;;  %v10373_v8 = vld [vmem:[%s15572_s1 + $0x1140] ss:$16 sps:$4 sm:$0xff]  }
  0xfc   :  { %7469 = vmatpush2.bf16.msra.mxu1 %v10280_v9  ;;  %7427 = vmatprep.subr.bf16.mxu0 %v10285_v10  ;;  %v10376_v9 = vld [vmem:[%s15572_s1 + $0x1340] ss:$16 sps:$4 sm:$0xff]   ;;  %v10381_v10 = vld [vmem:[%s15572_s1 + $0x1124] ss:$16 sps:$4 sm:$0xff]  }
  0xfd   :  { %7470 = vmatprep.subr.bf16.mxu1 %v10288_v11  ;;  %v10384_v11 = vld [vmem:[%s15572_s1 + $0x1324] ss:$16 sps:$4 sm:$0xff]  }
  0xff   :  { %7428 = vmatpush2.bf16.msra.mxu0 %v10283_v12  ;;  %v10379_v12 = vld [vmem:[%s15572_s1 + $0x1120] ss:$16 sps:$4 sm:$0xff]  }
 0x100   :  { %7471 = vmatpush2.bf16.msra.mxu1 %v10286_v13  ;;  %7483 = vmatprep.subr.bf16.mxu0 %v10297_v14  ;;  %v10382_v13 = vld [vmem:[%s15572_s1 + $0x1320] ss:$16 sps:$4 sm:$0xff]   ;;  %v10387_v14 = vld [vmem:[%s15572_s1 + $0x1104] ss:$16 sps:$4 sm:$0xff]  }
 0x101   :  { %7526 = vmatprep.subr.bf16.mxu1 %v10300_v15  ;;  %v10390_v15 = vld [vmem:[%s15572_s1 + $0x1304] ss:$16 sps:$4 sm:$0xff]  }
 0x102   :  { %7430 = vmatmul.mubr.bf16.vlgmr.msra.gmra.mxu0 %v10289_v16  ;;  %v10385_v16 = vld [vmem:[%s15572_s1 + $0x1100] ss:$16 sps:$4 sm:$0xff]  }
 0x103   :  { %7473 = vmatmul.mubr.bf16.vlgmr.msra.gmra.mxu1 %v10292_v17  ;;  %7484 = vmatpush1.bf16.msra.mxu0 %v10295_v18  ;;  %v10388_v17 = vld [vmem:[%s15572_s1 + $0x1300] ss:$16 sps:$4 sm:$0xff]  }
 0x104   :  { %7527 = vmatpush1.bf16.msra.mxu1 %v10298_v19  ;;  %7485 = vmatprep.subr.bf16.mxu0 %v10303_v20  ;;  %v10391_v18 = vld [vmem:[%s15573_s0 + $0x40] ss:$144 sps:$4 sm:$0xff]   ;;  %v10394_v19 = vld [vmem:[%s15573_s0 + $0x48] ss:$144 sps:$4 sm:$0xff]   ;;  %v10399_v20 = vld [vmem:[%s15572_s1 + $0x14e4] ss:$16 sps:$4 sm:$0xff]  }
 0x105   :  { %7528 = vmatprep.subr.bf16.mxu1 %v10306_v21  ;;  %7515 = vmatprep.mubr.bf16.mxu0 %v10393_v22  ;;  %v10402_v21 = vld [vmem:[%s15572_s1 + $0x16e4] ss:$16 sps:$4 sm:$0xff]   ;;  %v10397_v22 = vld [vmem:[%s15572_s1 + $0x14e0] ss:$16 sps:$4 sm:$0xff]  }
 0x106   :  { %7558 = vmatprep.mubr.bf16.mxu1 %v10396_v23  ;;  %v10400_v23 = vld [vmem:[%s15572_s1 + $0x16e0] ss:$16 sps:$4 sm:$0xff]  }
 0x107   :  { %7486 = vmatpush1.bf16.msra.mxu0 %v10301_v24  ;;  %v10405_v24 = vld [vmem:[%s15572_s1 + $0x14c4] ss:$16 sps:$4 sm:$0xff]  }
 0x108   :  { %7529 = vmatpush1.bf16.msra.mxu1 %v10304_v25  ;;  %7487 = vmatprep.subr.bf16.mxu0 %v10309_v26  ;;  %v10408_v25 = vld [vmem:[%s15572_s1 + $0x16c4] ss:$16 sps:$4 sm:$0xff]   ;;  %v10403_v26 = vld [vmem:[%s15572_s1 + $0x14c0] ss:$16 sps:$4 sm:$0xff]  }
 0x109   :  { %7530 = vmatprep.subr.bf16.mxu1 %v10312_v27  ;;  %v10406_v27 = vld [vmem:[%s15572_s1 + $0x16c0] ss:$16 sps:$4 sm:$0xff]  }
 0x10b   :  { %7488 = vmatpush1.bf16.msra.mxu0 %v10307_v28  ;;  %v10495_v28 = vld [vmem:[%s15573_s0 + $0x54] ss:$144 sps:$4 sm:$0xff]  }
 0x10c   :  { %7531 = vmatpush1.bf16.msra.mxu1 %v10310_v29  ;;  %7489 = vmatprep.subr.bf16.mxu0 %v10315_v30  ;;  %v10498_v29 = vld [vmem:[%s15573_s0 + $0x5c] ss:$144 sps:$4 sm:$0xff]   ;;  %v10411_v30 = vld [vmem:[%s15572_s1 + $0x14a4] ss:$16 sps:$4 sm:$0xff]  }
 0x10d   :  { %7532 = vmatprep.subr.bf16.mxu1 %v10318_v31  ;;  %v10414_v31 = vld [vmem:[%s15572_s1 + $0x16a4] ss:$16 sps:$4 sm:$0xff]  }
 0x10f   :  { %7490 = vmatpush1.bf16.msra.mxu0 %v10313_v32  ;;  %v10409_v32 = vld [vmem:[%s15572_s1 + $0x14a0] ss:$16 sps:$4 sm:$0xff]  }
 0x110   :  { %7533 = vmatpush1.bf16.msra.mxu1 %v10316_v33  ;;  %7491 = vmatprep.subr.bf16.mxu0 %v10321_v34  ;;  %v10412_v33 = vld [vmem:[%s15572_s1 + $0x16a0] ss:$16 sps:$4 sm:$0xff]   ;;  %v10417_v34 = vld [vmem:[%s15572_s1 + $0x1484] ss:$16 sps:$4 sm:$0xff]  }
 0x111   :  { %7534 = vmatprep.subr.bf16.mxu1 %v10324_v35  ;;  %v10420_v35 = vld [vmem:[%s15572_s1 + $0x1684] ss:$16 sps:$4 sm:$0xff]  }
 0x113   :  { %7492 = vmatpush1.bf16.msra.mxu0 %v10319_v36  ;;  %v10415_v36 = vld [vmem:[%s15572_s1 + $0x1480] ss:$16 sps:$4 sm:$0xff]  }
 0x114   :  { %7535 = vmatpush1.bf16.msra.mxu1 %v10322_v37  ;;  %7493 = vmatprep.subr.bf16.mxu0 %v10327_v38  ;;  %v10418_v37 = vld [vmem:[%s15572_s1 + $0x1680] ss:$16 sps:$4 sm:$0xff]   ;;  %v10423_v38 = vld [vmem:[%s15572_s1 + $0x1464] ss:$16 sps:$4 sm:$0xff]  }
 0x115   :  { %7536 = vmatprep.subr.bf16.mxu1 %v10330_v39  ;;  %v10426_v39 = vld [vmem:[%s15572_s1 + $0x1664] ss:$16 sps:$4 sm:$0xff]  }
 0x117   :  { %7494 = vmatpush1.bf16.msra.mxu0 %v10325_v40  ;;  %v10421_v40 = vld [vmem:[%s15572_s1 + $0x1460] ss:$16 sps:$4 sm:$0xff]  }
 0x118   :  { %7537 = vmatpush1.bf16.msra.mxu1 %v10328_v41  ;;  %7495 = vmatprep.subr.bf16.mxu0 %v10333_v42  ;;  %v10424_v41 = vld [vmem:[%s15572_s1 + $0x1660] ss:$16 sps:$4 sm:$0xff]   ;;  %v10429_v42 = vld [vmem:[%s15572_s1 + $0x1444] ss:$16 sps:$4 sm:$0xff]  }
 0x119   :  { %7538 = vmatprep.subr.bf16.mxu1 %v10336_v43  ;;  %v10432_v43 = vld [vmem:[%s15572_s1 + $0x1644] ss:$16 sps:$4 sm:$0xff]  }
 0x11b   :  { %7496 = vmatpush1.bf16.msra.mxu0 %v10331_v44  ;;  %v10427_v44 = vld [vmem:[%s15572_s1 + $0x1440] ss:$16 sps:$4 sm:$0xff]  }
 0x11c   :  { %7539 = vmatpush1.bf16.msra.mxu1 %v10334_v45  ;;  %7497 = vmatprep.subr.bf16.mxu0 %v10339_v46  ;;  %v10430_v45 = vld [vmem:[%s15572_s1 + $0x1640] ss:$16 sps:$4 sm:$0xff]   ;;  %v10435_v46 = vld [vmem:[%s15572_s1 + $0x1424] ss:$16 sps:$4 sm:$0xff]  }
 0x11d   :  { %7540 = vmatprep.subr.bf16.mxu1 %v10342_v47  ;;  %v10438_v47 = vld [vmem:[%s15572_s1 + $0x1624] ss:$16 sps:$4 sm:$0xff]  }
 0x11f   :  { %7498 = vmatpush1.bf16.msra.mxu0 %v10337_v48  ;;  %v10433_v48 = vld [vmem:[%s15572_s1 + $0x1420] ss:$16 sps:$4 sm:$0xff]  }
 0x120   :  { %7541 = vmatpush1.bf16.msra.mxu1 %v10340_v49  ;;  %7499 = vmatprep.subr.bf16.mxu0 %v10345_v50  ;;  %v10436_v49 = vld [vmem:[%s15572_s1 + $0x1620] ss:$16 sps:$4 sm:$0xff]   ;;  %v10441_v50 = vld [vmem:[%s15572_s1 + $0x1404] ss:$16 sps:$4 sm:$0xff]  }
 0x121   :  { %7542 = vmatprep.subr.bf16.mxu1 %v10348_v51  ;;  %v10444_v51 = vld [vmem:[%s15572_s1 + $0x1604] ss:$16 sps:$4 sm:$0xff]  }
 0x123   :  { %7500 = vmatpush2.bf16.msra.mxu0 %v10343_v52  ;;  %v10439_v52 = vld [vmem:[%s15572_s1 + $0x1400] ss:$16 sps:$4 sm:$0xff]  }
 0x124   :  { %7543 = vmatpush2.bf16.msra.mxu1 %v10346_v53  ;;  %7501 = vmatprep.subr.bf16.mxu0 %v10351_v54  ;;  %v10442_v53 = vld [vmem:[%s15572_s1 + $0x1600] ss:$16 sps:$4 sm:$0xff]   ;;  %v10447_v54 = vld [vmem:[%s15572_s1 + $0x15e4] ss:$16 sps:$4 sm:$0xff]  }
 0x125   :  { %7544 = vmatprep.subr.bf16.mxu1 %v10354_v55  ;;  %v10450_v55 = vld [vmem:[%s15572_s1 + $0x17e4] ss:$16 sps:$4 sm:$0xff]  }
 0x127   :  { %7502 = vmatpush2.bf16.msra.mxu0 %v10349_v56  ;;  %v10445_v56 = vld [vmem:[%s15572_s1 + $0x15e0] ss:$16 sps:$4 sm:$0xff]  }
 0x128   :  { %7545 = vmatpush2.bf16.msra.mxu1 %v10352_v57  ;;  %7503 = vmatprep.subr.bf16.mxu0 %v10357_v58  ;;  %v10448_v57 = vld [vmem:[%s15572_s1 + $0x17e0] ss:$16 sps:$4 sm:$0xff]   ;;  %v10453_v58 = vld [vmem:[%s15572_s1 + $0x15c4] ss:$16 sps:$4 sm:$0xff]  }
 0x129   :  { %7546 = vmatprep.subr.bf16.mxu1 %v10360_v59  ;;  %v10456_v59 = vld [vmem:[%s15572_s1 + $0x17c4] ss:$16 sps:$4 sm:$0xff]  }
 0x12b   :  { %7504 = vmatpush2.bf16.msra.mxu0 %v10355_v60  ;;  %v10451_v60 = vld [vmem:[%s15572_s1 + $0x15c0] ss:$16 sps:$4 sm:$0xff]  }
 0x12c   :  { %7547 = vmatpush2.bf16.msra.mxu1 %v10358_v61  ;;  %7505 = vmatprep.subr.bf16.mxu0 %v10363_v62  ;;  %v10454_v61 = vld [vmem:[%s15572_s1 + $0x17c0] ss:$16 sps:$4 sm:$0xff]   ;;  %v10459_v62 = vld [vmem:[%s15572_s1 + $0x15a4] ss:$16 sps:$4 sm:$0xff]  }
 0x12d   :  { %7548 = vmatprep.subr.bf16.mxu1 %v10366_v63  ;;  %v10462_v63 = vld [vmem:[%s15572_s1 + $0x17a4] ss:$16 sps:$4 sm:$0xff]  }
 0x12f   :  { %7506 = vmatpush2.bf16.msra.mxu0 %v10361_v0  ;;  %v10457_v0 = vld [vmem:[%s15572_s1 + $0x15a0] ss:$16 sps:$4 sm:$0xff]  }
 0x130   :  { %7549 = vmatpush2.bf16.msra.mxu1 %v10364_v1  ;;  %7507 = vmatprep.subr.bf16.mxu0 %v10369_v2  ;;  %v10460_v1 = vld [vmem:[%s15572_s1 + $0x17a0] ss:$16 sps:$4 sm:$0xff]   ;;  %v10465_v2 = vld [vmem:[%s15572_s1 + $0x1584] ss:$16 sps:$4 sm:$0xff]  }
 0x131   :  { %7550 = vmatprep.subr.bf16.mxu1 %v10372_v3  ;;  %v10468_v3 = vld [vmem:[%s15572_s1 + $0x1784] ss:$16 sps:$4 sm:$0xff]  }
 0x133   :  { %7508 = vmatpush2.bf16.msra.mxu0 %v10367_v4  ;;  %v10463_v4 = vld [vmem:[%s15572_s1 + $0x1580] ss:$16 sps:$4 sm:$0xff]  }
 0x134   :  { %7551 = vmatpush2.bf16.msra.mxu1 %v10370_v5  ;;  %7509 = vmatprep.subr.bf16.mxu0 %v10375_v6  ;;  %v10466_v5 = vld [vmem:[%s15572_s1 + $0x1780] ss:$16 sps:$4 sm:$0xff]   ;;  %v10471_v6 = vld [vmem:[%s15572_s1 + $0x1564] ss:$16 sps:$4 sm:$0xff]  }
 0x135   :  { %7552 = vmatprep.subr.bf16.mxu1 %v10378_v7  ;;  %v10474_v7 = vld [vmem:[%s15572_s1 + $0x1764] ss:$16 sps:$4 sm:$0xff]  }
 0x137   :  { %7510 = vmatpush2.bf16.msra.mxu0 %v10373_v8  ;;  %v10469_v8 = vld [vmem:[%s15572_s1 + $0x1560] ss:$16 sps:$4 sm:$0xff]  }
 0x138   :  { %7553 = vmatpush2.bf16.msra.mxu1 %v10376_v9  ;;  %7511 = vmatprep.subr.bf16.mxu0 %v10381_v10  ;;  %v10472_v9 = vld [vmem:[%s15572_s1 + $0x1760] ss:$16 sps:$4 sm:$0xff]   ;;  %v10477_v10 = vld [vmem:[%s15572_s1 + $0x1544] ss:$16 sps:$4 sm:$0xff]  }
 0x139   :  { %7554 = vmatprep.subr.bf16.mxu1 %v10384_v11  ;;  %v10480_v11 = vld [vmem:[%s15572_s1 + $0x1744] ss:$16 sps:$4 sm:$0xff]  }
 0x13b   :  { %7512 = vmatpush2.bf16.msra.mxu0 %v10379_v12  ;;  %v10475_v12 = vld [vmem:[%s15572_s1 + $0x1540] ss:$16 sps:$4 sm:$0xff]  }
 0x13c   :  { %7555 = vmatpush2.bf16.msra.mxu1 %v10382_v13  ;;  %7513 = vmatprep.subr.bf16.mxu0 %v10387_v14  ;;  %v10478_v13 = vld [vmem:[%s15572_s1 + $0x1740] ss:$16 sps:$4 sm:$0xff]   ;;  %v10483_v14 = vld [vmem:[%s15572_s1 + $0x1524] ss:$16 sps:$4 sm:$0xff]  }
 0x13d   :  { %7556 = vmatprep.subr.bf16.mxu1 %v10390_v15  ;;  %v10486_v15 = vld [vmem:[%s15572_s1 + $0x1724] ss:$16 sps:$4 sm:$0xff]  }
 0x13f   :  { %7514 = vmatpush2.bf16.msra.mxu0 %v10385_v16  ;;  %v10481_v16 = vld [vmem:[%s15572_s1 + $0x1520] ss:$16 sps:$4 sm:$0xff]  }
 0x140   :  { %7557 = vmatpush2.bf16.msra.mxu1 %v10388_v17  ;;  %7569 = vmatprep.subr.bf16.mxu0 %v10399_v20  ;;  %v10484_v17 = vld [vmem:[%s15572_s1 + $0x1720] ss:$16 sps:$4 sm:$0xff]  }
 0x141   :  { %7612 = vmatprep.subr.bf16.mxu1 %v10402_v21  ;;  %v10487_v20 = vld [vmem:[%s15572_s1 + $0x1500] ss:$16 sps:$4 sm:$0xff]  }
 0x142   :  { %7516 = vmatmul.mubr.bf16.vlgmr.msra.gmra.mxu0 %v10391_v18  ;;  %v10489_v18 = vld [vmem:[%s15572_s1 + $0x1504] ss:$16 sps:$4 sm:$0xff]   ;;  %v10490_v21 = vld [vmem:[%s15572_s1 + $0x1700] ss:$16 sps:$4 sm:$0xff]  }
 0x143   :  { %7559 = vmatmul.mubr.bf16.vlgmr.msra.gmra.mxu1 %v10394_v19  ;;  %7570 = vmatpush1.bf16.msra.mxu0 %v10397_v22  ;;  %v10492_v19 = vld [vmem:[%s15572_s1 + $0x1704] ss:$16 sps:$4 sm:$0xff]   ;;  %v10493_v22 = vld [vmem:[%s15573_s0 + $0x50] ss:$144 sps:$4 sm:$0xff]  }
 0x144   :  { %7613 = vmatpush1.bf16.msra.mxu1 %v10400_v23  ;;  %7571 = vmatprep.subr.bf16.mxu0 %v10405_v24  ;;  %v10496_v23 = vld [vmem:[%s15573_s0 + $0x58] ss:$144 sps:$4 sm:$0xff]   ;;  %v10501_v24 = vld [vmem:[%s15572_s1 + $0x18e4] ss:$16 sps:$4 sm:$0xff]  }
 0x145   :  { %7614 = vmatprep.subr.bf16.mxu1 %v10408_v25  ;;  %7601 = vmatprep.mubr.bf16.mxu0 %v10495_v28  ;;  %v10504_v25 = vld [vmem:[%s15572_s1 + $0x1ae4] ss:$16 sps:$4 sm:$0xff]  }
 0x146   :  { %7644 = vmatprep.mubr.bf16.mxu1 %v10498_v29  ;;  %v10507_v28 = vld [vmem:[%s15572_s1 + $0x18c4] ss:$16 sps:$4 sm:$0xff]  }
 0x147   :  { %7572 = vmatpush1.bf16.msra.mxu0 %v10403_v26  ;;  %v10499_v26 = vld [vmem:[%s15572_s1 + $0x18e0] ss:$16 sps:$4 sm:$0xff]   ;;  %v10510_v29 = vld [vmem:[%s15572_s1 + $0x1ac4] ss:$16 sps:$4 sm:$0xff]  }
 0x148   :  { %7615 = vmatpush1.bf16.msra.mxu1 %v10406_v27  ;;  %7573 = vmatprep.subr.bf16.mxu0 %v10411_v30  ;;  %v10502_v27 = vld [vmem:[%s15572_s1 + $0x1ae0] ss:$16 sps:$4 sm:$0xff]  }
 0x149   :  { %7616 = vmatprep.subr.bf16.mxu1 %v10414_v31  ;;  %v10505_v30 = vld [vmem:[%s15572_s1 + $0x18c0] ss:$16 sps:$4 sm:$0xff]  }
 0x14a   :  { %v10508_v31 = vld [vmem:[%s15572_s1 + $0x1ac0] ss:$16 sps:$4 sm:$0xff]  }
 0x14b   :  { %7574 = vmatpush1.bf16.msra.mxu0 %v10409_v32  ;;  %v10597_v32 = vld [vmem:[%s15573_s0 + $0x64] ss:$144 sps:$4 sm:$0xff]  }
 0x14c   :  { %7617 = vmatpush1.bf16.msra.mxu1 %v10412_v33  ;;  %7575 = vmatprep.subr.bf16.mxu0 %v10417_v34  ;;  %v10600_v33 = vld [vmem:[%s15573_s0 + $0x6c] ss:$144 sps:$4 sm:$0xff]   ;;  %v10513_v34 = vld [vmem:[%s15572_s1 + $0x18a4] ss:$16 sps:$4 sm:$0xff]  }
 0x14d   :  { %7618 = vmatprep.subr.bf16.mxu1 %v10420_v35  ;;  %v10516_v35 = vld [vmem:[%s15572_s1 + $0x1aa4] ss:$16 sps:$4 sm:$0xff]  }
 0x14f   :  { %7576 = vmatpush1.bf16.msra.mxu0 %v10415_v36  ;;  %v10511_v36 = vld [vmem:[%s15572_s1 + $0x18a0] ss:$16 sps:$4 sm:$0xff]  }
 0x150   :  { %7619 = vmatpush1.bf16.msra.mxu1 %v10418_v37  ;;  %7577 = vmatprep.subr.bf16.mxu0 %v10423_v38  ;;  %v10514_v37 = vld [vmem:[%s15572_s1 + $0x1aa0] ss:$16 sps:$4 sm:$0xff]   ;;  %v10519_v38 = vld [vmem:[%s15572_s1 + $0x1884] ss:$16 sps:$4 sm:$0xff]  }
 0x151   :  { %7620 = vmatprep.subr.bf16.mxu1 %v10426_v39  ;;  %v10522_v39 = vld [vmem:[%s15572_s1 + $0x1a84] ss:$16 sps:$4 sm:$0xff]  }
 0x153   :  { %7578 = vmatpush1.bf16.msra.mxu0 %v10421_v40  ;;  %v10517_v40 = vld [vmem:[%s15572_s1 + $0x1880] ss:$16 sps:$4 sm:$0xff]  }
 0x154   :  { %7621 = vmatpush1.bf16.msra.mxu1 %v10424_v41  ;;  %7579 = vmatprep.subr.bf16.mxu0 %v10429_v42  ;;  %v10520_v41 = vld [vmem:[%s15572_s1 + $0x1a80] ss:$16 sps:$4 sm:$0xff]   ;;  %v10525_v42 = vld [vmem:[%s15572_s1 + $0x1864] ss:$16 sps:$4 sm:$0xff]  }
 0x155   :  { %7622 = vmatprep.subr.bf16.mxu1 %v10432_v43  ;;  %v10528_v43 = vld [vmem:[%s15572_s1 + $0x1a64] ss:$16 sps:$4 sm:$0xff]  }
 0x157   :  { %7580 = vmatpush1.bf16.msra.mxu0 %v10427_v44  ;;  %v10523_v44 = vld [vmem:[%s15572_s1 + $0x1860] ss:$16 sps:$4 sm:$0xff]  }
 0x158   :  { %7623 = vmatpush1.bf16.msra.mxu1 %v10430_v45  ;;  %7581 = vmatprep.subr.bf16.mxu0 %v10435_v46  ;;  %v10526_v45 = vld [vmem:[%s15572_s1 + $0x1a60] ss:$16 sps:$4 sm:$0xff]   ;;  %v10531_v46 = vld [vmem:[%s15572_s1 + $0x1844] ss:$16 sps:$4 sm:$0xff]  }
 0x159   :  { %7624 = vmatprep.subr.bf16.mxu1 %v10438_v47  ;;  %v10534_v47 = vld [vmem:[%s15572_s1 + $0x1a44] ss:$16 sps:$4 sm:$0xff]  }
 0x15b   :  { %7582 = vmatpush1.bf16.msra.mxu0 %v10433_v48  ;;  %v10529_v48 = vld [vmem:[%s15572_s1 + $0x1840] ss:$16 sps:$4 sm:$0xff]  }
 0x15c   :  { %7625 = vmatpush1.bf16.msra.mxu1 %v10436_v49  ;;  %7583 = vmatprep.subr.bf16.mxu0 %v10441_v50  ;;  %v10532_v49 = vld [vmem:[%s15572_s1 + $0x1a40] ss:$16 sps:$4 sm:$0xff]   ;;  %v10537_v50 = vld [vmem:[%s15572_s1 + $0x1824] ss:$16 sps:$4 sm:$0xff]  }
 0x15d   :  { %7626 = vmatprep.subr.bf16.mxu1 %v10444_v51  ;;  %v10540_v51 = vld [vmem:[%s15572_s1 + $0x1a24] ss:$16 sps:$4 sm:$0xff]  }
 0x15f   :  { %7584 = vmatpush1.bf16.msra.mxu0 %v10439_v52  ;;  %v10535_v52 = vld [vmem:[%s15572_s1 + $0x1820] ss:$16 sps:$4 sm:$0xff]  }
 0x160   :  { %7627 = vmatpush1.bf16.msra.mxu1 %v10442_v53  ;;  %7585 = vmatprep.subr.bf16.mxu0 %v10447_v54  ;;  %v10538_v53 = vld [vmem:[%s15572_s1 + $0x1a20] ss:$16 sps:$4 sm:$0xff]   ;;  %v10543_v54 = vld [vmem:[%s15572_s1 + $0x1804] ss:$16 sps:$4 sm:$0xff]  }
 0x161   :  { %7628 = vmatprep.subr.bf16.mxu1 %v10450_v55  ;;  %v10546_v55 = vld [vmem:[%s15572_s1 + $0x1a04] ss:$16 sps:$4 sm:$0xff]  }
 0x163   :  { %7586 = vmatpush2.bf16.msra.mxu0 %v10445_v56  ;;  %v10541_v56 = vld [vmem:[%s15572_s1 + $0x1800] ss:$16 sps:$4 sm:$0xff]  }
 0x164   :  { %7629 = vmatpush2.bf16.msra.mxu1 %v10448_v57  ;;  %7587 = vmatprep.subr.bf16.mxu0 %v10453_v58  ;;  %v10544_v57 = vld [vmem:[%s15572_s1 + $0x1a00] ss:$16 sps:$4 sm:$0xff]   ;;  %v10549_v58 = vld [vmem:[%s15572_s1 + $0x19e4] ss:$16 sps:$4 sm:$0xff]  }
 0x165   :  { %7630 = vmatprep.subr.bf16.mxu1 %v10456_v59  ;;  %v10552_v59 = vld [vmem:[%s15572_s1 + $0x1be4] ss:$16 sps:$4 sm:$0xff]  }
 0x167   :  { %7588 = vmatpush2.bf16.msra.mxu0 %v10451_v60  ;;  %v10547_v60 = vld [vmem:[%s15572_s1 + $0x19e0] ss:$16 sps:$4 sm:$0xff]  }
 0x168   :  { %7631 = vmatpush2.bf16.msra.mxu1 %v10454_v61  ;;  %7589 = vmatprep.subr.bf16.mxu0 %v10459_v62  ;;  %v10550_v61 = vld [vmem:[%s15572_s1 + $0x1be0] ss:$16 sps:$4 sm:$0xff]   ;;  %v10555_v62 = vld [vmem:[%s15572_s1 + $0x19c4] ss:$16 sps:$4 sm:$0xff]  }
 0x169   :  { %7632 = vmatprep.subr.bf16.mxu1 %v10462_v63  ;;  %v10558_v63 = vld [vmem:[%s15572_s1 + $0x1bc4] ss:$16 sps:$4 sm:$0xff]  }
 0x16b   :  { %7590 = vmatpush2.bf16.msra.mxu0 %v10457_v0  ;;  %v10553_v0 = vld [vmem:[%s15572_s1 + $0x19c0] ss:$16 sps:$4 sm:$0xff]  }
 0x16c   :  { %7633 = vmatpush2.bf16.msra.mxu1 %v10460_v1  ;;  %7591 = vmatprep.subr.bf16.mxu0 %v10465_v2  ;;  %v10556_v1 = vld [vmem:[%s15572_s1 + $0x1bc0] ss:$16 sps:$4 sm:$0xff]   ;;  %v10561_v2 = vld [vmem:[%s15572_s1 + $0x19a4] ss:$16 sps:$4 sm:$0xff]  }
 0x16d   :  { %7634 = vmatprep.subr.bf16.mxu1 %v10468_v3  ;;  %v10564_v3 = vld [vmem:[%s15572_s1 + $0x1ba4] ss:$16 sps:$4 sm:$0xff]  }
 0x16f   :  { %7592 = vmatpush2.bf16.msra.mxu0 %v10463_v4  ;;  %v10559_v4 = vld [vmem:[%s15572_s1 + $0x19a0] ss:$16 sps:$4 sm:$0xff]  }
 0x170   :  { %7635 = vmatpush2.bf16.msra.mxu1 %v10466_v5  ;;  %7593 = vmatprep.subr.bf16.mxu0 %v10471_v6  ;;  %v10562_v5 = vld [vmem:[%s15572_s1 + $0x1ba0] ss:$16 sps:$4 sm:$0xff]   ;;  %v10567_v6 = vld [vmem:[%s15572_s1 + $0x1984] ss:$16 sps:$4 sm:$0xff]  }
 0x171   :  { %7636 = vmatprep.subr.bf16.mxu1 %v10474_v7  ;;  %v10570_v7 = vld [vmem:[%s15572_s1 + $0x1b84] ss:$16 sps:$4 sm:$0xff]  }
 0x173   :  { %7594 = vmatpush2.bf16.msra.mxu0 %v10469_v8  ;;  %v10565_v8 = vld [vmem:[%s15572_s1 + $0x1980] ss:$16 sps:$4 sm:$0xff]  }
 0x174   :  { %7637 = vmatpush2.bf16.msra.mxu1 %v10472_v9  ;;  %7595 = vmatprep.subr.bf16.mxu0 %v10477_v10  ;;  %v10568_v9 = vld [vmem:[%s15572_s1 + $0x1b80] ss:$16 sps:$4 sm:$0xff]   ;;  %v10573_v10 = vld [vmem:[%s15572_s1 + $0x1964] ss:$16 sps:$4 sm:$0xff]  }
 0x175   :  { %7638 = vmatprep.subr.bf16.mxu1 %v10480_v11  ;;  %v10576_v11 = vld [vmem:[%s15572_s1 + $0x1b64] ss:$16 sps:$4 sm:$0xff]  }
 0x177   :  { %7596 = vmatpush2.bf16.msra.mxu0 %v10475_v12  ;;  %v10571_v12 = vld [vmem:[%s15572_s1 + $0x1960] ss:$16 sps:$4 sm:$0xff]  }
 0x178   :  { %7639 = vmatpush2.bf16.msra.mxu1 %v10478_v13  ;;  %7597 = vmatprep.subr.bf16.mxu0 %v10483_v14  ;;  %v10574_v13 = vld [vmem:[%s15572_s1 + $0x1b60] ss:$16 sps:$4 sm:$0xff]   ;;  %v10579_v14 = vld [vmem:[%s15572_s1 + $0x1944] ss:$16 sps:$4 sm:$0xff]  }
 0x179   :  { %7640 = vmatprep.subr.bf16.mxu1 %v10486_v15  ;;  %v10582_v15 = vld [vmem:[%s15572_s1 + $0x1b44] ss:$16 sps:$4 sm:$0xff]  }
 0x17b   :  { %7598 = vmatpush2.bf16.msra.mxu0 %v10481_v16  ;;  %v10577_v16 = vld [vmem:[%s15572_s1 + $0x1940] ss:$16 sps:$4 sm:$0xff]  }
 0x17c   :  { %7641 = vmatpush2.bf16.msra.mxu1 %v10484_v17  ;;  %7599 = vmatprep.subr.bf16.mxu0 %v10489_v18  ;;  %v10580_v17 = vld [vmem:[%s15572_s1 + $0x1b40] ss:$16 sps:$4 sm:$0xff]   ;;  %v10585_v18 = vld [vmem:[%s15572_s1 + $0x1924] ss:$16 sps:$4 sm:$0xff]  }
 0x17d   :  { %7642 = vmatprep.subr.bf16.mxu1 %v10492_v19  ;;  %v10588_v19 = vld [vmem:[%s15572_s1 + $0x1b24] ss:$16 sps:$4 sm:$0xff]  }
 0x17f   :  { %7600 = vmatpush2.bf16.msra.mxu0 %v10487_v20  ;;  %v10583_v20 = vld [vmem:[%s15572_s1 + $0x1920] ss:$16 sps:$4 sm:$0xff]  }
 0x180   :  { %7643 = vmatpush2.bf16.msra.mxu1 %v10490_v21  ;;  %7655 = vmatprep.subr.bf16.mxu0 %v10501_v24  ;;  %v10586_v21 = vld [vmem:[%s15572_s1 + $0x1b20] ss:$16 sps:$4 sm:$0xff]  }
 0x181   :  { %7698 = vmatprep.subr.bf16.mxu1 %v10504_v25  ;;  %v10589_v24 = vld [vmem:[%s15572_s1 + $0x1900] ss:$16 sps:$4 sm:$0xff]  }
 0x182   :  { %7602 = vmatmul.mubr.bf16.vlgmr.msra.gmra.mxu0 %v10493_v22  ;;  %v10591_v22 = vld [vmem:[%s15572_s1 + $0x1904] ss:$16 sps:$4 sm:$0xff]   ;;  %v10592_v25 = vld [vmem:[%s15572_s1 + $0x1b00] ss:$16 sps:$4 sm:$0xff]  }
 0x183   :  { %7645 = vmatmul.mubr.bf16.vlgmr.msra.gmra.mxu1 %v10496_v23  ;;  %7656 = vmatpush1.bf16.msra.mxu0 %v10499_v26  ;;  %v10594_v23 = vld [vmem:[%s15572_s1 + $0x1b04] ss:$16 sps:$4 sm:$0xff]   ;;  %v10595_v26 = vld [vmem:[%s15573_s0 + $0x60] ss:$144 sps:$4 sm:$0xff]  }
 0x184   :  { %7699 = vmatpush1.bf16.msra.mxu1 %v10502_v27  ;;  %7657 = vmatprep.subr.bf16.mxu0 %v10507_v28  ;;  %v10598_v27 = vld [vmem:[%s15573_s0 + $0x68] ss:$144 sps:$4 sm:$0xff]   ;;  %v10603_v28 = vld [vmem:[%s15572_s1 + $0x1ce4] ss:$16 sps:$4 sm:$0xff]  }
 0x185   :  { %7700 = vmatprep.subr.bf16.mxu1 %v10510_v29  ;;  %7687 = vmatprep.mubr.bf16.mxu0 %v10597_v32  ;;  %v10606_v29 = vld [vmem:[%s15572_s1 + $0x1ee4] ss:$16 sps:$4 sm:$0xff]  }
 0x186   :  { %7730 = vmatprep.mubr.bf16.mxu1 %v10600_v33  ;;  %v10609_v32 = vld [vmem:[%s15572_s1 + $0x1cc4] ss:$16 sps:$4 sm:$0xff]  }
 0x187   :  { %7658 = vmatpush1.bf16.msra.mxu0 %v10505_v30  ;;  %v10601_v30 = vld [vmem:[%s15572_s1 + $0x1ce0] ss:$16 sps:$4 sm:$0xff]   ;;  %v10612_v33 = vld [vmem:[%s15572_s1 + $0x1ec4] ss:$16 sps:$4 sm:$0xff]  }
 0x188   :  { %7701 = vmatpush1.bf16.msra.mxu1 %v10508_v31  ;;  %7659 = vmatprep.subr.bf16.mxu0 %v10513_v34  ;;  %v10604_v31 = vld [vmem:[%s15572_s1 + $0x1ee0] ss:$16 sps:$4 sm:$0xff]  }
 0x189   :  { %7702 = vmatprep.subr.bf16.mxu1 %v10516_v35  ;;  %v10607_v34 = vld [vmem:[%s15572_s1 + $0x1cc0] ss:$16 sps:$4 sm:$0xff]  }
 0x18a   :  { %v10610_v35 = vld [vmem:[%s15572_s1 + $0x1ec0] ss:$16 sps:$4 sm:$0xff]  }
 0x18b   :  { %7660 = vmatpush1.bf16.msra.mxu0 %v10511_v36  ;;  %v10699_v36 = vld [vmem:[%s15573_s0 + $0x74] ss:$144 sps:$4 sm:$0xff]  }
 0x18c   :  { %7703 = vmatpush1.bf16.msra.mxu1 %v10514_v37  ;;  %7661 = vmatprep.subr.bf16.mxu0 %v10519_v38  ;;  %v10702_v37 = vld [vmem:[%s15573_s0 + $0x7c] ss:$144 sps:$4 sm:$0xff]   ;;  %v10615_v38 = vld [vmem:[%s15572_s1 + $0x1ca4] ss:$16 sps:$4 sm:$0xff]  }
 0x18d   :  { %7704 = vmatprep.subr.bf16.mxu1 %v10522_v39  ;;  %v10618_v39 = vld [vmem:[%s15572_s1 + $0x1ea4] ss:$16 sps:$4 sm:$0xff]  }
 0x18f   :  { %7662 = vmatpush1.bf16.msra.mxu0 %v10517_v40  ;;  %v10613_v40 = vld [vmem:[%s15572_s1 + $0x1ca0] ss:$16 sps:$4 sm:$0xff]  }
 0x190   :  { %7705 = vmatpush1.bf16.msra.mxu1 %v10520_v41  ;;  %7663 = vmatprep.subr.bf16.mxu0 %v10525_v42  ;;  %v10616_v41 = vld [vmem:[%s15572_s1 + $0x1ea0] ss:$16 sps:$4 sm:$0xff]   ;;  %v10621_v42 = vld [vmem:[%s15572_s1 + $0x1c84] ss:$16 sps:$4 sm:$0xff]  }
 0x191   :  { %7706 = vmatprep.subr.bf16.mxu1 %v10528_v43  ;;  %v10624_v43 = vld [vmem:[%s15572_s1 + $0x1e84] ss:$16 sps:$4 sm:$0xff]  }
 0x193   :  { %7664 = vmatpush1.bf16.msra.mxu0 %v10523_v44  ;;  %v10619_v44 = vld [vmem:[%s15572_s1 + $0x1c80] ss:$16 sps:$4 sm:$0xff]  }
 0x194   :  { %7707 = vmatpush1.bf16.msra.mxu1 %v10526_v45  ;;  %7665 = vmatprep.subr.bf16.mxu0 %v10531_v46  ;;  %v10622_v45 = vld [vmem:[%s15572_s1 + $0x1e80] ss:$16 sps:$4 sm:$0xff]   ;;  %v10627_v46 = vld [vmem:[%s15572_s1 + $0x1c64] ss:$16 sps:$4 sm:$0xff]  }
 0x195   :  { %7708 = vmatprep.subr.bf16.mxu1 %v10534_v47  ;;  %v10630_v47 = vld [vmem:[%s15572_s1 + $0x1e64] ss:$16 sps:$4 sm:$0xff]  }
 0x197   :  { %7666 = vmatpush1.bf16.msra.mxu0 %v10529_v48  ;;  %v10625_v48 = vld [vmem:[%s15572_s1 + $0x1c60] ss:$16 sps:$4 sm:$0xff]  }
 0x198   :  { %7709 = vmatpush1.bf16.msra.mxu1 %v10532_v49  ;;  %7667 = vmatprep.subr.bf16.mxu0 %v10537_v50  ;;  %v10628_v49 = vld [vmem:[%s15572_s1 + $0x1e60] ss:$16 sps:$4 sm:$0xff]   ;;  %v10633_v50 = vld [vmem:[%s15572_s1 + $0x1c44] ss:$16 sps:$4 sm:$0xff]  }
 0x199   :  { %7710 = vmatprep.subr.bf16.mxu1 %v10540_v51  ;;  %v10636_v51 = vld [vmem:[%s15572_s1 + $0x1e44] ss:$16 sps:$4 sm:$0xff]  }
 0x19b   :  { %7668 = vmatpush1.bf16.msra.mxu0 %v10535_v52  ;;  %v10631_v52 = vld [vmem:[%s15572_s1 + $0x1c40] ss:$16 sps:$4 sm:$0xff]  }
 0x19c   :  { %7711 = vmatpush1.bf16.msra.mxu1 %v10538_v53  ;;  %7669 = vmatprep.subr.bf16.mxu0 %v10543_v54  ;;  %v10634_v53 = vld [vmem:[%s15572_s1 + $0x1e40] ss:$16 sps:$4 sm:$0xff]   ;;  %v10639_v54 = vld [vmem:[%s15572_s1 + $0x1c24] ss:$16 sps:$4 sm:$0xff]  }
 0x19d   :  { %7712 = vmatprep.subr.bf16.mxu1 %v10546_v55  ;;  %v10642_v55 = vld [vmem:[%s15572_s1 + $0x1e24] ss:$16 sps:$4 sm:$0xff]  }
 0x19f   :  { %7670 = vmatpush1.bf16.msra.mxu0 %v10541_v56  ;;  %v10637_v56 = vld [vmem:[%s15572_s1 + $0x1c20] ss:$16 sps:$4 sm:$0xff]  }
 0x1a0   :  { %7713 = vmatpush1.bf16.msra.mxu1 %v10544_v57  ;;  %7671 = vmatprep.subr.bf16.mxu0 %v10549_v58  ;;  %v10640_v57 = vld [vmem:[%s15572_s1 + $0x1e20] ss:$16 sps:$4 sm:$0xff]   ;;  %v10645_v58 = vld [vmem:[%s15572_s1 + $0x1c04] ss:$16 sps:$4 sm:$0xff]  }
 0x1a1   :  { %7714 = vmatprep.subr.bf16.mxu1 %v10552_v59  ;;  %v10648_v59 = vld [vmem:[%s15572_s1 + $0x1e04] ss:$16 sps:$4 sm:$0xff]  }
 0x1a3   :  { %7672 = vmatpush2.bf16.msra.mxu0 %v10547_v60  ;;  %v10643_v60 = vld [vmem:[%s15572_s1 + $0x1c00] ss:$16 sps:$4 sm:$0xff]  }
 0x1a4   :  { %7715 = vmatpush2.bf16.msra.mxu1 %v10550_v61  ;;  %7673 = vmatprep.subr.bf16.mxu0 %v10555_v62  ;;  %v10646_v61 = vld [vmem:[%s15572_s1 + $0x1e00] ss:$16 sps:$4 sm:$0xff]   ;;  %v10651_v62 = vld [vmem:[%s15572_s1 + $0x1de4] ss:$16 sps:$4 sm:$0xff]  }
 0x1a5   :  { %7716 = vmatprep.subr.bf16.mxu1 %v10558_v63  ;;  %v10654_v63 = vld [vmem:[%s15572_s1 + $0x1fe4] ss:$16 sps:$4 sm:$0xff]  }
 0x1a7   :  { %7674 = vmatpush2.bf16.msra.mxu0 %v10553_v0  ;;  %v10649_v0 = vld [vmem:[%s15572_s1 + $0x1de0] ss:$16 sps:$4 sm:$0xff]  }
 0x1a8   :  { %7717 = vmatpush2.bf16.msra.mxu1 %v10556_v1  ;;  %7675 = vmatprep.subr.bf16.mxu0 %v10561_v2  ;;  %v10652_v1 = vld [vmem:[%s15572_s1 + $0x1fe0] ss:$16 sps:$4 sm:$0xff]   ;;  %v10657_v2 = vld [vmem:[%s15572_s1 + $0x1dc4] ss:$16 sps:$4 sm:$0xff]  }
 0x1a9   :  { %7718 = vmatprep.subr.bf16.mxu1 %v10564_v3  ;;  %v10660_v3 = vld [vmem:[%s15572_s1 + $0x1fc4] ss:$16 sps:$4 sm:$0xff]  }
 0x1ab   :  { %7676 = vmatpush2.bf16.msra.mxu0 %v10559_v4  ;;  %v10655_v4 = vld [vmem:[%s15572_s1 + $0x1dc0] ss:$16 sps:$4 sm:$0xff]  }
 0x1ac   :  { %7719 = vmatpush2.bf16.msra.mxu1 %v10562_v5  ;;  %7677 = vmatprep.subr.bf16.mxu0 %v10567_v6  ;;  %v10658_v5 = vld [vmem:[%s15572_s1 + $0x1fc0] ss:$16 sps:$4 sm:$0xff]   ;;  %v10663_v6 = vld [vmem:[%s15572_s1 + $0x1da4] ss:$16 sps:$4 sm:$0xff]  }
 0x1ad   :  { %7720 = vmatprep.subr.bf16.mxu1 %v10570_v7  ;;  %v10666_v7 = vld [vmem:[%s15572_s1 + $0x1fa4] ss:$16 sps:$4 sm:$0xff]  }
 0x1af   :  { %7678 = vmatpush2.bf16.msra.mxu0 %v10565_v8  ;;  %v10661_v8 = vld [vmem:[%s15572_s1 + $0x1da0] ss:$16 sps:$4 sm:$0xff]  }
 0x1b0   :  { %7721 = vmatpush2.bf16.msra.mxu1 %v10568_v9  ;;  %7679 = vmatprep.subr.bf16.mxu0 %v10573_v10  ;;  %v10664_v9 = vld [vmem:[%s15572_s1 + $0x1fa0] ss:$16 sps:$4 sm:$0xff]   ;;  %v10669_v10 = vld [vmem:[%s15572_s1 + $0x1d84] ss:$16 sps:$4 sm:$0xff]  }
 0x1b1   :  { %7722 = vmatprep.subr.bf16.mxu1 %v10576_v11  ;;  %v10672_v11 = vld [vmem:[%s15572_s1 + $0x1f84] ss:$16 sps:$4 sm:$0xff]  }
 0x1b3   :  { %7680 = vmatpush2.bf16.msra.mxu0 %v10571_v12  ;;  %v10667_v12 = vld [vmem:[%s15572_s1 + $0x1d80] ss:$16 sps:$4 sm:$0xff]  }
 0x1b4   :  { %7723 = vmatpush2.bf16.msra.mxu1 %v10574_v13  ;;  %7681 = vmatprep.subr.bf16.mxu0 %v10579_v14  ;;  %v10670_v13 = vld [vmem:[%s15572_s1 + $0x1f80] ss:$16 sps:$4 sm:$0xff]   ;;  %v10675_v14 = vld [vmem:[%s15572_s1 + $0x1d64] ss:$16 sps:$4 sm:$0xff]  }
 0x1b5   :  { %7724 = vmatprep.subr.bf16.mxu1 %v10582_v15  ;;  %v10678_v15 = vld [vmem:[%s15572_s1 + $0x1f64] ss:$16 sps:$4 sm:$0xff]  }
 0x1b7   :  { %7682 = vmatpush2.bf16.msra.mxu0 %v10577_v16  ;;  %v10673_v16 = vld [vmem:[%s15572_s1 + $0x1d60] ss:$16 sps:$4 sm:$0xff]  }
 0x1b8   :  { %7725 = vmatpush2.bf16.msra.mxu1 %v10580_v17  ;;  %7683 = vmatprep.subr.bf16.mxu0 %v10585_v18  ;;  %v10676_v17 = vld [vmem:[%s15572_s1 + $0x1f60] ss:$16 sps:$4 sm:$0xff]   ;;  %v10681_v18 = vld [vmem:[%s15572_s1 + $0x1d44] ss:$16 sps:$4 sm:$0xff]  }
 0x1b9   :  { %7726 = vmatprep.subr.bf16.mxu1 %v10588_v19  ;;  %v10684_v19 = vld [vmem:[%s15572_s1 + $0x1f44] ss:$16 sps:$4 sm:$0xff]  }
 0x1bb   :  { %7684 = vmatpush2.bf16.msra.mxu0 %v10583_v20  ;;  %v10679_v20 = vld [vmem:[%s15572_s1 + $0x1d40] ss:$16 sps:$4 sm:$0xff]  }
 0x1bc   :  { %7727 = vmatpush2.bf16.msra.mxu1 %v10586_v21  ;;  %7685 = vmatprep.subr.bf16.mxu0 %v10591_v22  ;;  %v10682_v21 = vld [vmem:[%s15572_s1 + $0x1f40] ss:$16 sps:$4 sm:$0xff]   ;;  %v10687_v22 = vld [vmem:[%s15572_s1 + $0x1d24] ss:$16 sps:$4 sm:$0xff]  }
 0x1bd   :  { %7728 = vmatprep.subr.bf16.mxu1 %v10594_v23  ;;  %v10690_v23 = vld [vmem:[%s15572_s1 + $0x1f24] ss:$16 sps:$4 sm:$0xff]  }
 0x1bf   :  { %7686 = vmatpush2.bf16.msra.mxu0 %v10589_v24  ;;  %v10685_v24 = vld [vmem:[%s15572_s1 + $0x1d20] ss:$16 sps:$4 sm:$0xff]  }
 0x1c0   :  { %7729 = vmatpush2.bf16.msra.mxu1 %v10592_v25  ;;  %7741 = vmatprep.subr.bf16.mxu0 %v10603_v28  ;;  %v10688_v25 = vld [vmem:[%s15572_s1 + $0x1f20] ss:$16 sps:$4 sm:$0xff]  }
 0x1c1   :  { %7784 = vmatprep.subr.bf16.mxu1 %v10606_v29  ;;  %v10691_v28 = vld [vmem:[%s15572_s1 + $0x1d00] ss:$16 sps:$4 sm:$0xff]  }
 0x1c2   :  { %7688 = vmatmul.mubr.bf16.vlgmr.msra.gmra.mxu0 %v10595_v26  ;;  %v10693_v26 = vld [vmem:[%s15572_s1 + $0x1d04] ss:$16 sps:$4 sm:$0xff]   ;;  %v10694_v29 = vld [vmem:[%s15572_s1 + $0x1f00] ss:$16 sps:$4 sm:$0xff]  }
 0x1c3   :  { %7731 = vmatmul.mubr.bf16.vlgmr.msra.gmra.mxu1 %v10598_v27  ;;  %7742 = vmatpush1.bf16.msra.mxu0 %v10601_v30  ;;  %v10696_v27 = vld [vmem:[%s15572_s1 + $0x1f04] ss:$16 sps:$4 sm:$0xff]   ;;  %v10697_v30 = vld [vmem:[%s15573_s0 + $0x70] ss:$144 sps:$4 sm:$0xff]  }
 0x1c4   :  { %7785 = vmatpush1.bf16.msra.mxu1 %v10604_v31  ;;  %7743 = vmatprep.subr.bf16.mxu0 %v10609_v32  ;;  %v10700_v31 = vld [vmem:[%s15573_s0 + $0x78] ss:$144 sps:$4 sm:$0xff]   ;;  %v10705_v32 = vld [vmem:[%s15572_s1 + $0x20e4] ss:$16 sps:$4 sm:$0xff]  }
 0x1c5   :  { %7786 = vmatprep.subr.bf16.mxu1 %v10612_v33  ;;  %7773 = vmatprep.mubr.bf16.mxu0 %v10699_v36  ;;  %v10708_v33 = vld [vmem:[%s15572_s1 + $0x22e4] ss:$16 sps:$4 sm:$0xff]  }
 0x1c6   :  { %7816 = vmatprep.mubr.bf16.mxu1 %v10702_v37  ;;  %v10711_v36 = vld [vmem:[%s15572_s1 + $0x20c4] ss:$16 sps:$4 sm:$0xff]  }
 0x1c7   :  { %7744 = vmatpush1.bf16.msra.mxu0 %v10607_v34  ;;  %v10703_v34 = vld [vmem:[%s15572_s1 + $0x20e0] ss:$16 sps:$4 sm:$0xff]   ;;  %v10714_v37 = vld [vmem:[%s15572_s1 + $0x22c4] ss:$16 sps:$4 sm:$0xff]  }
 0x1c8   :  { %7787 = vmatpush1.bf16.msra.mxu1 %v10610_v35  ;;  %7745 = vmatprep.subr.bf16.mxu0 %v10615_v38  ;;  %v10706_v35 = vld [vmem:[%s15572_s1 + $0x22e0] ss:$16 sps:$4 sm:$0xff]  }
 0x1c9   :  { %7788 = vmatprep.subr.bf16.mxu1 %v10618_v39  ;;  %v10709_v38 = vld [vmem:[%s15572_s1 + $0x20c0] ss:$16 sps:$4 sm:$0xff]  }
 0x1ca   :  { %v10712_v39 = vld [vmem:[%s15572_s1 + $0x22c0] ss:$16 sps:$4 sm:$0xff]  }
 0x1cb   :  { %7746 = vmatpush1.bf16.msra.mxu0 %v10613_v40  ;;  %v10801_v40 = vld [vmem:[%s15573_s0 + $0x84] ss:$144 sps:$4 sm:$0xff]  }
 0x1cc   :  { %7789 = vmatpush1.bf16.msra.mxu1 %v10616_v41  ;;  %7747 = vmatprep.subr.bf16.mxu0 %v10621_v42  ;;  %v10804_v41 = vld [vmem:[%s15573_s0 + $0x8c] ss:$144 sps:$4 sm:$0xff]   ;;  %v10717_v42 = vld [vmem:[%s15572_s1 + $0x20a4] ss:$16 sps:$4 sm:$0xff]  }
 0x1cd   :  { %7790 = vmatprep.subr.bf16.mxu1 %v10624_v43  ;;  %v10720_v43 = vld [vmem:[%s15572_s1 + $0x22a4] ss:$16 sps:$4 sm:$0xff]  }
 0x1cf   :  { %7748 = vmatpush1.bf16.msra.mxu0 %v10619_v44  ;;  %v10715_v44 = vld [vmem:[%s15572_s1 + $0x20a0] ss:$16 sps:$4 sm:$0xff]  }
 0x1d0   :  { %7791 = vmatpush1.bf16.msra.mxu1 %v10622_v45  ;;  %7749 = vmatprep.subr.bf16.mxu0 %v10627_v46  ;;  %v10718_v45 = vld [vmem:[%s15572_s1 + $0x22a0] ss:$16 sps:$4 sm:$0xff]   ;;  %v10723_v46 = vld [vmem:[%s15572_s1 + $0x2084] ss:$16 sps:$4 sm:$0xff]  }
 0x1d1   :  { %7792 = vmatprep.subr.bf16.mxu1 %v10630_v47  ;;  %v10726_v47 = vld [vmem:[%s15572_s1 + $0x2284] ss:$16 sps:$4 sm:$0xff]  }
 0x1d3   :  { %7750 = vmatpush1.bf16.msra.mxu0 %v10625_v48  ;;  %v10721_v48 = vld [vmem:[%s15572_s1 + $0x2080] ss:$16 sps:$4 sm:$0xff]  }
 0x1d4   :  { %7793 = vmatpush1.bf16.msra.mxu1 %v10628_v49  ;;  %7751 = vmatprep.subr.bf16.mxu0 %v10633_v50  ;;  %v10724_v49 = vld [vmem:[%s15572_s1 + $0x2280] ss:$16 sps:$4 sm:$0xff]   ;;  %v10729_v50 = vld [vmem:[%s15572_s1 + $0x2064] ss:$16 sps:$4 sm:$0xff]  }
 0x1d5   :  { %7794 = vmatprep.subr.bf16.mxu1 %v10636_v51  ;;  %v10732_v51 = vld [vmem:[%s15572_s1 + $0x2264] ss:$16 sps:$4 sm:$0xff]  }
 0x1d7   :  { %7752 = vmatpush1.bf16.msra.mxu0 %v10631_v52  ;;  %v10727_v52 = vld [vmem:[%s15572_s1 + $0x2060] ss:$16 sps:$4 sm:$0xff]  }
 0x1d8   :  { %7795 = vmatpush1.bf16.msra.mxu1 %v10634_v53  ;;  %7753 = vmatprep.subr.bf16.mxu0 %v10639_v54  ;;  %v10730_v53 = vld [vmem:[%s15572_s1 + $0x2260] ss:$16 sps:$4 sm:$0xff]   ;;  %v10735_v54 = vld [vmem:[%s15572_s1 + $0x2044] ss:$16 sps:$4 sm:$0xff]  }
 0x1d9   :  { %7796 = vmatprep.subr.bf16.mxu1 %v10642_v55  ;;  %v10738_v55 = vld [vmem:[%s15572_s1 + $0x2244] ss:$16 sps:$4 sm:$0xff]  }
 0x1db   :  { %7754 = vmatpush1.bf16.msra.mxu0 %v10637_v56  ;;  %v10733_v56 = vld [vmem:[%s15572_s1 + $0x2040] ss:$16 sps:$4 sm:$0xff]  }
 0x1dc   :  { %7797 = vmatpush1.bf16.msra.mxu1 %v10640_v57  ;;  %7755 = vmatprep.subr.bf16.mxu0 %v10645_v58  ;;  %v10736_v57 = vld [vmem:[%s15572_s1 + $0x2240] ss:$16 sps:$4 sm:$0xff]   ;;  %v10741_v58 = vld [vmem:[%s15572_s1 + $0x2024] ss:$16 sps:$4 sm:$0xff]  }
 0x1dd   :  { %7798 = vmatprep.subr.bf16.mxu1 %v10648_v59  ;;  %v10744_v59 = vld [vmem:[%s15572_s1 + $0x2224] ss:$16 sps:$4 sm:$0xff]  }
 0x1df   :  { %7756 = vmatpush1.bf16.msra.mxu0 %v10643_v60  ;;  %v10739_v60 = vld [vmem:[%s15572_s1 + $0x2020] ss:$16 sps:$4 sm:$0xff]  }
 0x1e0   :  { %7799 = vmatpush1.bf16.msra.mxu1 %v10646_v61  ;;  %7757 = vmatprep.subr.bf16.mxu0 %v10651_v62  ;;  %v10742_v61 = vld [vmem:[%s15572_s1 + $0x2220] ss:$16 sps:$4 sm:$0xff]   ;;  %v10747_v62 = vld [vmem:[%s15572_s1 + $0x2004] ss:$16 sps:$4 sm:$0xff]  }
 0x1e1   :  { %7800 = vmatprep.subr.bf16.mxu1 %v10654_v63  ;;  %v10750_v63 = vld [vmem:[%s15572_s1 + $0x2204] ss:$16 sps:$4 sm:$0xff]  }
 0x1e3   :  { %7758 = vmatpush2.bf16.msra.mxu0 %v10649_v0  ;;  %v10745_v0 = vld [vmem:[%s15572_s1 + $0x2000] ss:$16 sps:$4 sm:$0xff]  }
 0x1e4   :  { %7801 = vmatpush2.bf16.msra.mxu1 %v10652_v1  ;;  %7759 = vmatprep.subr.bf16.mxu0 %v10657_v2  ;;  %v10748_v1 = vld [vmem:[%s15572_s1 + $0x2200] ss:$16 sps:$4 sm:$0xff]   ;;  %v10753_v2 = vld [vmem:[%s15572_s1 + $0x21e4] ss:$16 sps:$4 sm:$0xff]  }
 0x1e5   :  { %7802 = vmatprep.subr.bf16.mxu1 %v10660_v3  ;;  %v10756_v3 = vld [vmem:[%s15572_s1 + $0x23e4] ss:$16 sps:$4 sm:$0xff]  }
 0x1e7   :  { %7760 = vmatpush2.bf16.msra.mxu0 %v10655_v4  ;;  %v10751_v4 = vld [vmem:[%s15572_s1 + $0x21e0] ss:$16 sps:$4 sm:$0xff]  }
 0x1e8   :  { %7803 = vmatpush2.bf16.msra.mxu1 %v10658_v5  ;;  %7761 = vmatprep.subr.bf16.mxu0 %v10663_v6  ;;  %v10754_v5 = vld [vmem:[%s15572_s1 + $0x23e0] ss:$16 sps:$4 sm:$0xff]   ;;  %v10759_v6 = vld [vmem:[%s15572_s1 + $0x21c4] ss:$16 sps:$4 sm:$0xff]  }
 0x1e9   :  { %7804 = vmatprep.subr.bf16.mxu1 %v10666_v7  ;;  %v10762_v7 = vld [vmem:[%s15572_s1 + $0x23c4] ss:$16 sps:$4 sm:$0xff]  }
 0x1eb   :  { %7762 = vmatpush2.bf16.msra.mxu0 %v10661_v8  ;;  %v10757_v8 = vld [vmem:[%s15572_s1 + $0x21c0] ss:$16 sps:$4 sm:$0xff]  }
 0x1ec   :  { %7805 = vmatpush2.bf16.msra.mxu1 %v10664_v9  ;;  %7763 = vmatprep.subr.bf16.mxu0 %v10669_v10  ;;  %v10760_v9 = vld [vmem:[%s15572_s1 + $0x23c0] ss:$16 sps:$4 sm:$0xff]   ;;  %v10765_v10 = vld [vmem:[%s15572_s1 + $0x21a4] ss:$16 sps:$4 sm:$0xff]  }
 0x1ed   :  { %7806 = vmatprep.subr.bf16.mxu1 %v10672_v11  ;;  %v10768_v11 = vld [vmem:[%s15572_s1 + $0x23a4] ss:$16 sps:$4 sm:$0xff]  }
 0x1ef   :  { %7764 = vmatpush2.bf16.msra.mxu0 %v10667_v12  ;;  %v10763_v12 = vld [vmem:[%s15572_s1 + $0x21a0] ss:$16 sps:$4 sm:$0xff]  }
 0x1f0   :  { %7807 = vmatpush2.bf16.msra.mxu1 %v10670_v13  ;;  %7765 = vmatprep.subr.bf16.mxu0 %v10675_v14  ;;  %v10766_v13 = vld [vmem:[%s15572_s1 + $0x23a0] ss:$16 sps:$4 sm:$0xff]   ;;  %v10771_v14 = vld [vmem:[%s15572_s1 + $0x2184] ss:$16 sps:$4 sm:$0xff]  }
 0x1f1   :  { %7808 = vmatprep.subr.bf16.mxu1 %v10678_v15  ;;  %v10774_v15 = vld [vmem:[%s15572_s1 + $0x2384] ss:$16 sps:$4 sm:$0xff]  }
 0x1f3   :  { %7766 = vmatpush2.bf16.msra.mxu0 %v10673_v16  ;;  %v10769_v16 = vld [vmem:[%s15572_s1 + $0x2180] ss:$16 sps:$4 sm:$0xff]  }
 0x1f4   :  { %7809 = vmatpush2.bf16.msra.mxu1 %v10676_v17  ;;  %7767 = vmatprep.subr.bf16.mxu0 %v10681_v18  ;;  %v10772_v17 = vld [vmem:[%s15572_s1 + $0x2380] ss:$16 sps:$4 sm:$0xff]   ;;  %v10777_v18 = vld [vmem:[%s15572_s1 + $0x2164] ss:$16 sps:$4 sm:$0xff]  }
 0x1f5   :  { %7810 = vmatprep.subr.bf16.mxu1 %v10684_v19  ;;  %v10780_v19 = vld [vmem:[%s15572_s1 + $0x2364] ss:$16 sps:$4 sm:$0xff]  }
 0x1f7   :  { %7768 = vmatpush2.bf16.msra.mxu0 %v10679_v20  ;;  %v10775_v20 = vld [vmem:[%s15572_s1 + $0x2160] ss:$16 sps:$4 sm:$0xff]  }
 0x1f8   :  { %7811 = vmatpush2.bf16.msra.mxu1 %v10682_v21  ;;  %7769 = vmatprep.subr.bf16.mxu0 %v10687_v22  ;;  %v10778_v21 = vld [vmem:[%s15572_s1 + $0x2360] ss:$16 sps:$4 sm:$0xff]   ;;  %v10783_v22 = vld [vmem:[%s15572_s1 + $0x2144] ss:$16 sps:$4 sm:$0xff]  }
 0x1f9   :  { %7812 = vmatprep.subr.bf16.mxu1 %v10690_v23  ;;  %v10786_v23 = vld [vmem:[%s15572_s1 + $0x2344] ss:$16 sps:$4 sm:$0xff]  }
 0x1fb   :  { %7770 = vmatpush2.bf16.msra.mxu0 %v10685_v24  ;;  %v10781_v24 = vld [vmem:[%s15572_s1 + $0x2140] ss:$16 sps:$4 sm:$0xff]  }
 0x1fc   :  { %7813 = vmatpush2.bf16.msra.mxu1 %v10688_v25  ;;  %7771 = vmatprep.subr.bf16.mxu0 %v10693_v26  ;;  %v10784_v25 = vld [vmem:[%s15572_s1 + $0x2340] ss:$16 sps:$4 sm:$0xff]   ;;  %v10789_v26 = vld [vmem:[%s15572_s1 + $0x2124] ss:$16 sps:$4 sm:$0xff]  }
 0x1fd   :  { %7814 = vmatprep.subr.bf16.mxu1 %v10696_v27  ;;  %v10792_v27 = vld [vmem:[%s15572_s1 + $0x2324] ss:$16 sps:$4 sm:$0xff]  }
 0x1ff   :  { %7772 = vmatpush2.bf16.msra.mxu0 %v10691_v28  ;;  %v10787_v28 = vld [vmem:[%s15572_s1 + $0x2120] ss:$16 sps:$4 sm:$0xff]  }
 0x200   :  { %7815 = vmatpush2.bf16.msra.mxu1 %v10694_v29  ;;  %7827 = vmatprep.subr.bf16.mxu0 %v10705_v32  ;;  %v10790_v29 = vld [vmem:[%s15572_s1 + $0x2320] ss:$16 sps:$4 sm:$0xff]  }
 0x201   :  { %7870 = vmatprep.subr.bf16.mxu1 %v10708_v33  ;;  %v10793_v32 = vld [vmem:[%s15572_s1 + $0x2100] ss:$16 sps:$4 sm:$0xff]  }
 0x202   :  { %7774 = vmatmul.mubr.bf16.vlgmr.msra.gmra.mxu0 %v10697_v30  ;;  %v10795_v30 = vld [vmem:[%s15572_s1 + $0x2104] ss:$16 sps:$4 sm:$0xff]   ;;  %v10796_v33 = vld [vmem:[%s15572_s1 + $0x2300] ss:$16 sps:$4 sm:$0xff]  }
 0x203   :  { %7817 = vmatmul.mubr.bf16.vlgmr.msra.gmra.mxu1 %v10700_v31  ;;  %7828 = vmatpush1.bf16.msra.mxu0 %v10703_v34  ;;  %v10798_v31 = vld [vmem:[%s15572_s1 + $0x2304] ss:$16 sps:$4 sm:$0xff]   ;;  %v10799_v34 = vld [vmem:[%s15573_s0 + $0x80] ss:$144 sps:$4 sm:$0xff]  }
 0x204   :  { %7871 = vmatpush1.bf16.msra.mxu1 %v10706_v35  ;;  %7829 = vmatprep.subr.bf16.mxu0 %v10711_v36  ;;  %v10802_v35 = vld [vmem:[%s15573_s0 + $0x88] ss:$144 sps:$4 sm:$0xff]   ;;  %v10807_v36 = vld [vmem:[%s15572_s1 + $0xec] ss:$16 sps:$4 sm:$0xff]  }
 0x205   :  { %7872 = vmatprep.subr.bf16.mxu1 %v10714_v37  ;;  %7859 = vmatprep.mubr.bf16.mxu0 %v10801_v40  ;;  %v10810_v37 = vld [vmem:[%s15572_s1 + $0x2ec] ss:$16 sps:$4 sm:$0xff]  }
 0x206   :  { %7902 = vmatprep.mubr.bf16.mxu1 %v10804_v41  ;;  %v10813_v40 = vld [vmem:[%s15572_s1 + $0xcc] ss:$16 sps:$4 sm:$0xff]  }
 0x207   :  { %7830 = vmatpush1.bf16.msra.mxu0 %v10709_v38  ;;  %v10805_v38 = vld [vmem:[%s15572_s1 + $0xe8] ss:$16 sps:$4 sm:$0xff]   ;;  %v10816_v41 = vld [vmem:[%s15572_s1 + $0x2cc] ss:$16 sps:$4 sm:$0xff]  }
 0x208   :  { %7873 = vmatpush1.bf16.msra.mxu1 %v10712_v39  ;;  %7831 = vmatprep.subr.bf16.mxu0 %v10717_v42  ;;  %v10808_v39 = vld [vmem:[%s15572_s1 + $0x2e8] ss:$16 sps:$4 sm:$0xff]  }
 0x209   :  { %7874 = vmatprep.subr.bf16.mxu1 %v10720_v43  ;;  %v10811_v42 = vld [vmem:[%s15572_s1 + $0xc8] ss:$16 sps:$4 sm:$0xff]  }
 0x20a   :  { %v10814_v43 = vld [vmem:[%s15572_s1 + $0x2c8] ss:$16 sps:$4 sm:$0xff]  }
 0x20b   :  { %7832 = vmatpush1.bf16.msra.mxu0 %v10715_v44  ;;  %v10819_v44 = vld [vmem:[%s15572_s1 + $0xac] ss:$16 sps:$4 sm:$0xff]  }
 0x20c   :  { %7875 = vmatpush1.bf16.msra.mxu1 %v10718_v45  ;;  %7833 = vmatprep.subr.bf16.mxu0 %v10723_v46  ;;  %v10822_v45 = vld [vmem:[%s15572_s1 + $0x2ac] ss:$16 sps:$4 sm:$0xff]   ;;  %v10817_v46 = vld [vmem:[%s15572_s1 + $0xa8] ss:$16 sps:$4 sm:$0xff]  }
 0x20d   :  { %7876 = vmatprep.subr.bf16.mxu1 %v10726_v47  ;;  %v10820_v47 = vld [vmem:[%s15572_s1 + $0x2a8] ss:$16 sps:$4 sm:$0xff]  }
 0x20f   :  { %7834 = vmatpush1.bf16.msra.mxu0 %v10721_v48  ;;  %v11669_v48 = vld [vmem:[%s15573_s0 + $0x4] ss:$144 sps:$4 sm:$0xff]  }
 0x210   :  { %7877 = vmatpush1.bf16.msra.mxu1 %v10724_v49  ;;  %7835 = vmatprep.subr.bf16.mxu0 %v10729_v50  ;;  %v11670_v49 = vld [vmem:[%s15573_s0 + $0xc] ss:$144 sps:$4 sm:$0xff]  }
 0x211   :  { %7878 = vmatprep.subr.bf16.mxu1 %v10732_v51  ;;  %v10825_v50 = vld [vmem:[%s15572_s1 + $0x8c] ss:$16 sps:$4 sm:$0xff]  }
 0x212   :  { %v10828_v51 = vld [vmem:[%s15572_s1 + $0x28c] ss:$16 sps:$4 sm:$0xff]  }
 0x213   :  { %7836 = vmatpush1.bf16.msra.mxu0 %v10727_v52  ;;  %v10823_v52 = vld [vmem:[%s15572_s1 + $0x88] ss:$16 sps:$4 sm:$0xff]  }
 0x214   :  { %7879 = vmatpush1.bf16.msra.mxu1 %v10730_v53  ;;  %7837 = vmatprep.subr.bf16.mxu0 %v10735_v54  ;;  %v10826_v53 = vld [vmem:[%s15572_s1 + $0x288] ss:$16 sps:$4 sm:$0xff]   ;;  %v10831_v54 = vld [vmem:[%s15572_s1 + $0x6c] ss:$16 sps:$4 sm:$0xff]  }
 0x215   :  { %7880 = vmatprep.subr.bf16.mxu1 %v10738_v55  ;;  %v10834_v55 = vld [vmem:[%s15572_s1 + $0x26c] ss:$16 sps:$4 sm:$0xff]  }
 0x217   :  { %7838 = vmatpush1.bf16.msra.mxu0 %v10733_v56  ;;  %v10829_v56 = vld [vmem:[%s15572_s1 + $0x68] ss:$16 sps:$4 sm:$0xff]  }
 0x218   :  { %7881 = vmatpush1.bf16.msra.mxu1 %v10736_v57  ;;  %7839 = vmatprep.subr.bf16.mxu0 %v10741_v58  ;;  %v10832_v57 = vld [vmem:[%s15572_s1 + $0x268] ss:$16 sps:$4 sm:$0xff]   ;;  %v10837_v58 = vld [vmem:[%s15572_s1 + $0x4c] ss:$16 sps:$4 sm:$0xff]  }
 0x219   :  { %7882 = vmatprep.subr.bf16.mxu1 %v10744_v59  ;;  %v10840_v59 = vld [vmem:[%s15572_s1 + $0x24c] ss:$16 sps:$4 sm:$0xff]  }
 0x21b   :  { %7840 = vmatpush1.bf16.msra.mxu0 %v10739_v60  ;;  %v10835_v60 = vld [vmem:[%s15572_s1 + $0x48] ss:$16 sps:$4 sm:$0xff]  }
 0x21c   :  { %7883 = vmatpush1.bf16.msra.mxu1 %v10742_v61  ;;  %7841 = vmatprep.subr.bf16.mxu0 %v10747_v62  ;;  %v10838_v61 = vld [vmem:[%s15572_s1 + $0x248] ss:$16 sps:$4 sm:$0xff]   ;;  %v10843_v62 = vld [vmem:[%s15572_s1 + $0x2c] ss:$16 sps:$4 sm:$0xff]  }
 0x21d   :  { %7884 = vmatprep.subr.bf16.mxu1 %v10750_v63  ;;  %v10846_v63 = vld [vmem:[%s15572_s1 + $0x22c] ss:$16 sps:$4 sm:$0xff]  }
 0x21f   :  { %7842 = vmatpush1.bf16.msra.mxu0 %v10745_v0  ;;  %v10841_v0 = vld [vmem:[%s15572_s1 + $0x28] ss:$16 sps:$4 sm:$0xff]  }
 0x220   :  { %7885 = vmatpush1.bf16.msra.mxu1 %v10748_v1  ;;  %7843 = vmatprep.subr.bf16.mxu0 %v10753_v2  ;;  %v10844_v1 = vld [vmem:[%s15572_s1 + $0x228] ss:$16 sps:$4 sm:$0xff]   ;;  %v10849_v2 = vld [vmem:[%s15572_s1 + $0xc] ss:$16 sps:$4 sm:$0xff]  }
 0x221   :  { %7886 = vmatprep.subr.bf16.mxu1 %v10756_v3  ;;  %v10852_v3 = vld [vmem:[%s15572_s1 + $0x20c] ss:$16 sps:$4 sm:$0xff]  }
 0x223   :  { %7844 = vmatpush2.bf16.msra.mxu0 %v10751_v4  ;;  %v10847_v4 = vld [vmem:[%s15572_s1 + $0x8] ss:$16 sps:$4 sm:$0xff]  }
 0x224   :  { %7887 = vmatpush2.bf16.msra.mxu1 %v10754_v5  ;;  %7845 = vmatprep.subr.bf16.mxu0 %v10759_v6  ;;  %v10850_v5 = vld [vmem:[%s15572_s1 + $0x208] ss:$16 sps:$4 sm:$0xff]   ;;  %v10855_v6 = vld [vmem:[%s15572_s1 + $0x1ec] ss:$16 sps:$4 sm:$0xff]  }
 0x225   :  { %7888 = vmatprep.subr.bf16.mxu1 %v10762_v7  ;;  %v10858_v7 = vld [vmem:[%s15572_s1 + $0x3ec] ss:$16 sps:$4 sm:$0xff]  }
 0x227   :  { %7846 = vmatpush2.bf16.msra.mxu0 %v10757_v8  ;;  %v10853_v8 = vld [vmem:[%s15572_s1 + $0x1e8] ss:$16 sps:$4 sm:$0xff]  }
 0x228   :  { %7889 = vmatpush2.bf16.msra.mxu1 %v10760_v9  ;;  %7847 = vmatprep.subr.bf16.mxu0 %v10765_v10  ;;  %v10856_v9 = vld [vmem:[%s15572_s1 + $0x3e8] ss:$16 sps:$4 sm:$0xff]   ;;  %v10861_v10 = vld [vmem:[%s15572_s1 + $0x1cc] ss:$16 sps:$4 sm:$0xff]  }
 0x229   :  { %7890 = vmatprep.subr.bf16.mxu1 %v10768_v11  ;;  %v10864_v11 = vld [vmem:[%s15572_s1 + $0x3cc] ss:$16 sps:$4 sm:$0xff]  }
 0x22b   :  { %7848 = vmatpush2.bf16.msra.mxu0 %v10763_v12  ;;  %v10859_v12 = vld [vmem:[%s15572_s1 + $0x1c8] ss:$16 sps:$4 sm:$0xff]  }
 0x22c   :  { %7891 = vmatpush2.bf16.msra.mxu1 %v10766_v13  ;;  %7849 = vmatprep.subr.bf16.mxu0 %v10771_v14  ;;  %v10862_v13 = vld [vmem:[%s15572_s1 + $0x3c8] ss:$16 sps:$4 sm:$0xff]   ;;  %v10867_v14 = vld [vmem:[%s15572_s1 + $0x1ac] ss:$16 sps:$4 sm:$0xff]  }
 0x22d   :  { %7892 = vmatprep.subr.bf16.mxu1 %v10774_v15  ;;  %v10870_v15 = vld [vmem:[%s15572_s1 + $0x3ac] ss:$16 sps:$4 sm:$0xff]  }
 0x22f   :  { %7850 = vmatpush2.bf16.msra.mxu0 %v10769_v16  ;;  %v10865_v16 = vld [vmem:[%s15572_s1 + $0x1a8] ss:$16 sps:$4 sm:$0xff]  }
 0x230   :  { %7893 = vmatpush2.bf16.msra.mxu1 %v10772_v17  ;;  %7851 = vmatprep.subr.bf16.mxu0 %v10777_v18  ;;  %v10868_v17 = vld [vmem:[%s15572_s1 + $0x3a8] ss:$16 sps:$4 sm:$0xff]   ;;  %v10873_v18 = vld [vmem:[%s15572_s1 + $0x18c] ss:$16 sps:$4 sm:$0xff]  }
 0x231   :  { %7894 = vmatprep.subr.bf16.mxu1 %v10780_v19  ;;  %v10876_v19 = vld [vmem:[%s15572_s1 + $0x38c] ss:$16 sps:$4 sm:$0xff]  }
 0x233   :  { %7852 = vmatpush2.bf16.msra.mxu0 %v10775_v20  ;;  %v10871_v20 = vld [vmem:[%s15572_s1 + $0x188] ss:$16 sps:$4 sm:$0xff]  }
 0x234   :  { %7895 = vmatpush2.bf16.msra.mxu1 %v10778_v21  ;;  %7853 = vmatprep.subr.bf16.mxu0 %v10783_v22  ;;  %v10874_v21 = vld [vmem:[%s15572_s1 + $0x388] ss:$16 sps:$4 sm:$0xff]   ;;  %v10879_v22 = vld [vmem:[%s15572_s1 + $0x16c] ss:$16 sps:$4 sm:$0xff]  }
 0x235   :  { %7896 = vmatprep.subr.bf16.mxu1 %v10786_v23  ;;  %v10882_v23 = vld [vmem:[%s15572_s1 + $0x36c] ss:$16 sps:$4 sm:$0xff]  }
 0x237   :  { %7854 = vmatpush2.bf16.msra.mxu0 %v10781_v24  ;;  %v10877_v24 = vld [vmem:[%s15572_s1 + $0x168] ss:$16 sps:$4 sm:$0xff]  }
 0x238   :  { %7897 = vmatpush2.bf16.msra.mxu1 %v10784_v25  ;;  %7855 = vmatprep.subr.bf16.mxu0 %v10789_v26  ;;  %v10880_v25 = vld [vmem:[%s15572_s1 + $0x368] ss:$16 sps:$4 sm:$0xff]   ;;  %v10885_v26 = vld [vmem:[%s15572_s1 + $0x14c] ss:$16 sps:$4 sm:$0xff]  }
 0x239   :  { %7898 = vmatprep.subr.bf16.mxu1 %v10792_v27  ;;  %v10888_v27 = vld [vmem:[%s15572_s1 + $0x34c] ss:$16 sps:$4 sm:$0xff]  }
 0x23b   :  { %7856 = vmatpush2.bf16.msra.mxu0 %v10787_v28  ;;  %v10883_v28 = vld [vmem:[%s15572_s1 + $0x148] ss:$16 sps:$4 sm:$0xff]  }
 0x23c   :  { %7899 = vmatpush2.bf16.msra.mxu1 %v10790_v29  ;;  %7857 = vmatprep.subr.bf16.mxu0 %v10795_v30  ;;  %v10886_v29 = vld [vmem:[%s15572_s1 + $0x348] ss:$16 sps:$4 sm:$0xff]   ;;  %v10891_v30 = vld [vmem:[%s15572_s1 + $0x12c] ss:$16 sps:$4 sm:$0xff]  }
 0x23d   :  { %7900 = vmatprep.subr.bf16.mxu1 %v10798_v31  ;;  %v10894_v31 = vld [vmem:[%s15572_s1 + $0x32c] ss:$16 sps:$4 sm:$0xff]  }
 0x23f   :  { %7858 = vmatpush2.bf16.msra.mxu0 %v10793_v32  ;;  %v10889_v32 = vld [vmem:[%s15572_s1 + $0x128] ss:$16 sps:$4 sm:$0xff]  }
 0x240   :  { %7901 = vmatpush2.bf16.msra.mxu1 %v10796_v33  ;;  %7913 = vmatprep.subr.bf16.mxu0 %v10807_v36  ;;  %v10892_v33 = vld [vmem:[%s15572_s1 + $0x328] ss:$16 sps:$4 sm:$0xff]  }
 0x241   :  { %7956 = vmatprep.subr.bf16.mxu1 %v10810_v37  ;;  %v10895_v36 = vld [vmem:[%s15572_s1 + $0x108] ss:$16 sps:$4 sm:$0xff]  }
 0x242   :  { %7860 = vmatmul.mubr.bf16.vlgmr.msra.gmra.mxu0 %v10799_v34  ;;  %v10897_v34 = vld [vmem:[%s15572_s1 + $0x10c] ss:$16 sps:$4 sm:$0xff]   ;;  %v10898_v37 = vld [vmem:[%s15572_s1 + $0x308] ss:$16 sps:$4 sm:$0xff]  }
 0x243   :  { %7903 = vmatmul.mubr.bf16.vlgmr.msra.gmra.mxu1 %v10802_v35  ;;  %7914 = vmatpush1.bf16.msra.mxu0 %v10805_v38  ;;  %v10900_v35 = vld [vmem:[%s15572_s1 + $0x30c] ss:$16 sps:$4 sm:$0xff]  }
 0x244   :  { %7957 = vmatpush1.bf16.msra.mxu1 %v10808_v39  ;;  %7915 = vmatprep.subr.bf16.mxu0 %v10813_v40  ;;  %v10903_v38 = vld [vmem:[%s15572_s1 + $0x4ec] ss:$16 sps:$4 sm:$0xff]   ;;  %v10901_v40 = vld [vmem:[%s15572_s1 + $0x4e8] ss:$16 sps:$4 sm:$0xff]  }
 0x245   :  { %7958 = vmatprep.subr.bf16.mxu1 %v10816_v41  ;;  %7945 = vmatprep.mubr.bf16.mxu0 %v11669_v48  ;;  %v10906_v39 = vld [vmem:[%s15572_s1 + $0x6ec] ss:$16 sps:$4 sm:$0xff]   ;;  %v10904_v41 = vld [vmem:[%s15572_s1 + $0x6e8] ss:$16 sps:$4 sm:$0xff]  }
 0x246   :  { %7988 = vmatprep.mubr.bf16.mxu1 %v11670_v49  ;;  %v10915_v48 = vld [vmem:[%s15572_s1 + $0x4ac] ss:$16 sps:$4 sm:$0xff]  }
 0x247   :  { %7916 = vmatpush1.bf16.msra.mxu0 %v10811_v42  ;;  %v10909_v42 = vld [vmem:[%s15572_s1 + $0x4cc] ss:$16 sps:$4 sm:$0xff]  }
 0x248   :  { %7959 = vmatpush1.bf16.msra.mxu1 %v10814_v43  ;;  %7917 = vmatprep.subr.bf16.mxu0 %v10819_v44  ;;  %v10912_v43 = vld [vmem:[%s15572_s1 + $0x6cc] ss:$16 sps:$4 sm:$0xff]   ;;  %v10907_v44 = vld [vmem:[%s15572_s1 + $0x4c8] ss:$16 sps:$4 sm:$0xff]  }
 0x249   :  { %7960 = vmatprep.subr.bf16.mxu1 %v10822_v45  ;;  %v10910_v45 = vld [vmem:[%s15572_s1 + $0x6c8] ss:$16 sps:$4 sm:$0xff]   ;;  %v10918_v49 = vld [vmem:[%s15572_s1 + $0x6ac] ss:$16 sps:$4 sm:$0xff]  }
 0x24b   :  { %7918 = vmatpush1.bf16.msra.mxu0 %v10817_v46  ;;  %v11671_v46 = vld [vmem:[%s15573_s0] ss:$144 sps:$4 sm:$0xff]  }
 0x24c   :  { %7961 = vmatpush1.bf16.msra.mxu1 %v10820_v47  ;;  %7919 = vmatprep.subr.bf16.mxu0 %v10825_v50  ;;  %v11672_v47 = vld [vmem:[%s15573_s0 + $0x8] ss:$144 sps:$4 sm:$0xff]  }
 0x24d   :  { %7962 = vmatprep.subr.bf16.mxu1 %v10828_v51  ;;  %v10913_v50 = vld [vmem:[%s15572_s1 + $0x4a8] ss:$16 sps:$4 sm:$0xff]  }
 0x24e   :  { %v10916_v51 = vld [vmem:[%s15572_s1 + $0x6a8] ss:$16 sps:$4 sm:$0xff]  }
 0x24f   :  { %7920 = vmatpush1.bf16.msra.mxu0 %v10823_v52  ;;  %v11673_v52 = vld [vmem:[%s15573_s0 + $0x14] ss:$144 sps:$4 sm:$0xff]  }
 0x250   :  { %7963 = vmatpush1.bf16.msra.mxu1 %v10826_v53  ;;  %7921 = vmatprep.subr.bf16.mxu0 %v10831_v54  ;;  %v11674_v53 = vld [vmem:[%s15573_s0 + $0x1c] ss:$144 sps:$4 sm:$0xff]  }
 0x251   :  { %7964 = vmatprep.subr.bf16.mxu1 %v10834_v55  ;;  %v10921_v54 = vld [vmem:[%s15572_s1 + $0x48c] ss:$16 sps:$4 sm:$0xff]  }
 0x252   :  { %v10924_v55 = vld [vmem:[%s15572_s1 + $0x68c] ss:$16 sps:$4 sm:$0xff]  }
 0x253   :  { %7922 = vmatpush1.bf16.msra.mxu0 %v10829_v56  ;;  %v10919_v56 = vld [vmem:[%s15572_s1 + $0x488] ss:$16 sps:$4 sm:$0xff]  }
 0x254   :  { %7965 = vmatpush1.bf16.msra.mxu1 %v10832_v57  ;;  %7923 = vmatprep.subr.bf16.mxu0 %v10837_v58  ;;  %v10922_v57 = vld [vmem:[%s15572_s1 + $0x688] ss:$16 sps:$4 sm:$0xff]   ;;  %v10927_v58 = vld [vmem:[%s15572_s1 + $0x46c] ss:$16 sps:$4 sm:$0xff]  }
 0x255   :  { %7966 = vmatprep.subr.bf16.mxu1 %v10840_v59  ;;  %v10930_v59 = vld [vmem:[%s15572_s1 + $0x66c] ss:$16 sps:$4 sm:$0xff]  }
 0x257   :  { %7924 = vmatpush1.bf16.msra.mxu0 %v10835_v60  ;;  %v10925_v60 = vld [vmem:[%s15572_s1 + $0x468] ss:$16 sps:$4 sm:$0xff]  }
 0x258   :  { %7967 = vmatpush1.bf16.msra.mxu1 %v10838_v61  ;;  %7925 = vmatprep.subr.bf16.mxu0 %v10843_v62  ;;  %v10928_v61 = vld [vmem:[%s15572_s1 + $0x668] ss:$16 sps:$4 sm:$0xff]   ;;  %v10933_v62 = vld [vmem:[%s15572_s1 + $0x44c] ss:$16 sps:$4 sm:$0xff]  }
 0x259   :  { %7968 = vmatprep.subr.bf16.mxu1 %v10846_v63  ;;  %v10936_v63 = vld [vmem:[%s15572_s1 + $0x64c] ss:$16 sps:$4 sm:$0xff]  }
 0x25b   :  { %7926 = vmatpush1.bf16.msra.mxu0 %v10841_v0  ;;  %v13832_v0 = vpop.f32.mrf.mxu0 }
 0x25c   :  { %7969 = vmatpush1.bf16.msra.mxu1 %v10844_v1  ;;  %7927 = vmatprep.subr.bf16.mxu0 %v10849_v2  ;;  %v13834_v1 = vpop.f32.mrf.mxu1  ;;  %v10931_v2 = vld [vmem:[%s15572_s1 + $0x448] ss:$16 sps:$4 sm:$0xff]  }
 0x25d   :  { %7970 = vmatprep.subr.bf16.mxu1 %v10852_v3  ;;  %v10934_v3 = vld [vmem:[%s15572_s1 + $0x648] ss:$16 sps:$4 sm:$0xff]  }
 0x25f   :  { %7928 = vmatpush1.bf16.msra.mxu0 %v10847_v4  ;;  %v10939_v4 = vld [vmem:[%s15572_s1 + $0x42c] ss:$16 sps:$4 sm:$0xff]  }
 0x260   :  { %7971 = vmatpush1.bf16.msra.mxu1 %v10850_v5  ;;  %7929 = vmatprep.subr.bf16.mxu0 %v10855_v6  ;;  %v10942_v5 = vld [vmem:[%s15572_s1 + $0x62c] ss:$16 sps:$4 sm:$0xff]   ;;  %v13848_v6 = vpop.f32.mrf.mxu0 }
 0x261   :  { %7972 = vmatprep.subr.bf16.mxu1 %v10858_v7  ;;  %v13850_v7 = vpop.f32.mrf.mxu1 }
 0x263   :  { %7930 = vmatpush2.bf16.msra.mxu0 %v10853_v8  ;;  %v10937_v8 = vld [vmem:[%s15572_s1 + $0x428] ss:$16 sps:$4 sm:$0xff]  }
 0x264   :  { %7973 = vmatpush2.bf16.msra.mxu1 %v10856_v9  ;;  %7931 = vmatprep.subr.bf16.mxu0 %v10861_v10  ;;  %v10940_v9 = vld [vmem:[%s15572_s1 + $0x628] ss:$16 sps:$4 sm:$0xff]   ;;  %v10945_v10 = vld [vmem:[%s15572_s1 + $0x40c] ss:$16 sps:$4 sm:$0xff]  }
 0x265   :  { %7974 = vmatprep.subr.bf16.mxu1 %v10864_v11  ;;  %v10948_v11 = vld [vmem:[%s15572_s1 + $0x60c] ss:$16 sps:$4 sm:$0xff]  }
 0x267   :  { %7932 = vmatpush2.bf16.msra.mxu0 %v10859_v12  ;;  %v13864_v12 = vpop.f32.mrf.mxu0 }
 0x268   :  { %7975 = vmatpush2.bf16.msra.mxu1 %v10862_v13  ;;  %7933 = vmatprep.subr.bf16.mxu0 %v10867_v14  ;;  %v13866_v13 = vpop.f32.mrf.mxu1  ;;  %v10943_v14 = vld [vmem:[%s15572_s1 + $0x408] ss:$16 sps:$4 sm:$0xff]  }
 0x269   :  { %7976 = vmatprep.subr.bf16.mxu1 %v10870_v15  ;;  %v10946_v15 = vld [vmem:[%s15572_s1 + $0x608] ss:$16 sps:$4 sm:$0xff]  }
 0x26b   :  { %7934 = vmatpush2.bf16.msra.mxu0 %v10865_v16  ;;  %v10951_v16 = vld [vmem:[%s15572_s1 + $0x5ec] ss:$16 sps:$4 sm:$0xff]  }
 0x26c   :  { %7977 = vmatpush2.bf16.msra.mxu1 %v10868_v17  ;;  %7935 = vmatprep.subr.bf16.mxu0 %v10873_v18  ;;  %v10954_v17 = vld [vmem:[%s15572_s1 + $0x7ec] ss:$16 sps:$4 sm:$0xff]   ;;  %v13880_v18 = vpop.f32.mrf.mxu0 }
 0x26d   :  { %7978 = vmatprep.subr.bf16.mxu1 %v10876_v19  ;;  %v13882_v19 = vpop.f32.mrf.mxu1 }
 0x26f   :  { %7936 = vmatpush2.bf16.msra.mxu0 %v10871_v20  ;;  %v10949_v20 = vld [vmem:[%s15572_s1 + $0x5e8] ss:$16 sps:$4 sm:$0xff]  }
 0x270   :  { %7979 = vmatpush2.bf16.msra.mxu1 %v10874_v21  ;;  %7937 = vmatprep.subr.bf16.mxu0 %v10879_v22  ;;  %v10952_v21 = vld [vmem:[%s15572_s1 + $0x7e8] ss:$16 sps:$4 sm:$0xff]   ;;  %v13890_v22 = vpop.f32.mrf.mxu0 }
 0x271   :  { %7980 = vmatprep.subr.bf16.mxu1 %v10882_v23  ;;  %v13892_v23 = vpop.f32.mrf.mxu1 }
 0x273   :  { %7938 = vmatpush2.bf16.msra.mxu0 %v10877_v24  ;;  %v10957_v24 = vld [vmem:[%s15572_s1 + $0x5cc] ss:$16 sps:$4 sm:$0xff]  }
 0x274   :  { %7981 = vmatpush2.bf16.msra.mxu1 %v10880_v25  ;;  %7939 = vmatprep.subr.bf16.mxu0 %v10885_v26  ;;  %v10960_v25 = vld [vmem:[%s15572_s1 + $0x7cc] ss:$16 sps:$4 sm:$0xff]   ;;  %v10955_v26 = vld [vmem:[%s15572_s1 + $0x5c8] ss:$16 sps:$4 sm:$0xff]  }
 0x275   :  { %7982 = vmatprep.subr.bf16.mxu1 %v10888_v27  ;;  %v10958_v27 = vld [vmem:[%s15572_s1 + $0x7c8] ss:$16 sps:$4 sm:$0xff]  }
 0x277   :  { %7940 = vmatpush2.bf16.msra.mxu0 %v10883_v28  ;;  %v13906_v28 = vpop.f32.mrf.mxu0 }
 0x278   :  { %7983 = vmatpush2.bf16.msra.mxu1 %v10886_v29  ;;  %7941 = vmatprep.subr.bf16.mxu0 %v10891_v30  ;;  %v13908_v29 = vpop.f32.mrf.mxu1  ;;  %v10963_v30 = vld [vmem:[%s15572_s1 + $0x5ac] ss:$16 sps:$4 sm:$0xff]  }
 0x279   :  { %7984 = vmatprep.subr.bf16.mxu1 %v10894_v31  ;;  %v10966_v31 = vld [vmem:[%s15572_s1 + $0x7ac] ss:$16 sps:$4 sm:$0xff]  }
 0x27b   :  { %7942 = vmatpush2.bf16.msra.mxu0 %v10889_v32  ;;  %v10961_v32 = vld [vmem:[%s15572_s1 + $0x5a8] ss:$16 sps:$4 sm:$0xff]  }
 0x27c   :  { %7985 = vmatpush2.bf16.msra.mxu1 %v10892_v33  ;;  %7943 = vmatprep.subr.bf16.mxu0 %v10897_v34  ;;  %v10964_v33 = vld [vmem:[%s15572_s1 + $0x7a8] ss:$16 sps:$4 sm:$0xff]   ;;  %v13922_v34 = vpop.f32.mrf.mxu0 }
 0x27d   :  { %7986 = vmatprep.subr.bf16.mxu1 %v10900_v35  ;;  %v13924_v35 = vpop.f32.mrf.mxu1 }
 0x27f   :  { %7944 = vmatpush2.bf16.msra.mxu0 %v10895_v36  ;;  %v10969_v36 = vld [vmem:[%s15572_s1 + $0x58c] ss:$16 sps:$4 sm:$0xff]  }
 0x280   :  { %7987 = vmatpush2.bf16.msra.mxu1 %v10898_v37  ;;  %7999 = vmatprep.subr.bf16.mxu0 %v10903_v38  ;;  %v10972_v37 = vld [vmem:[%s15572_s1 + $0x78c] ss:$16 sps:$4 sm:$0xff]   ;;  %v10967_v38 = vld [vmem:[%s15572_s1 + $0x588] ss:$16 sps:$4 sm:$0xff]  }
 0x281   :  { %8042 = vmatprep.subr.bf16.mxu1 %v10906_v39  ;;  %v10970_v39 = vld [vmem:[%s15572_s1 + $0x788] ss:$16 sps:$4 sm:$0xff]  }
 0x282   :  { %7946 = vmatmul.mubr.bf16.vlgmr.msra.gmra.mxu0 %v11671_v46  ;;  %v10973_v46 = vld [vmem:[%s15572_s1 + $0x568] ss:$16 sps:$4 sm:$0xff]  }
 0x283   :  { %7989 = vmatmul.mubr.bf16.vlgmr.msra.gmra.mxu1 %v11672_v47  ;;  %8000 = vmatpush1.bf16.msra.mxu0 %v10901_v40  ;;  %v13938_v40 = vpop.f32.mrf.mxu0  ;;  %v10976_v47 = vld [vmem:[%s15572_s1 + $0x768] ss:$16 sps:$4 sm:$0xff]  }
 0x284   :  { %8043 = vmatpush1.bf16.msra.mxu1 %v10904_v41  ;;  %8001 = vmatprep.subr.bf16.mxu0 %v10909_v42  ;;  %v13940_v41 = vpop.f32.mrf.mxu1  ;;  %v10975_v42 = vld [vmem:[%s15572_s1 + $0x56c] ss:$16 sps:$4 sm:$0xff]  }
 0x285   :  { %8044 = vmatprep.subr.bf16.mxu1 %v10912_v43  ;;  %8031 = vmatprep.mubr.bf16.mxu0 %v11673_v52  ;;  %v10978_v43 = vld [vmem:[%s15572_s1 + $0x76c] ss:$16 sps:$4 sm:$0xff]   ;;  %v10979_v52 = vld [vmem:[%s15572_s1 + $0x548] ss:$16 sps:$4 sm:$0xff]  }
 0x286   :  { %8074 = vmatprep.mubr.bf16.mxu1 %v11674_v53  ;;  %v10982_v53 = vld [vmem:[%s15572_s1 + $0x748] ss:$16 sps:$4 sm:$0xff]  }
 0x287   :  { %8002 = vmatpush1.bf16.msra.mxu0 %v10907_v44  ;;  %v13948_v44 = vpop.f32.mrf.mxu0 }
 0x288   :  { %8045 = vmatpush1.bf16.msra.mxu1 %v10910_v45  ;;  %8003 = vmatprep.subr.bf16.mxu0 %v10915_v48  ;;  %v13950_v45 = vpop.f32.mrf.mxu1  ;;  %v10981_v48 = vld [vmem:[%s15572_s1 + $0x54c] ss:$16 sps:$4 sm:$0xff]  }
 0x289   :  { %8046 = vmatprep.subr.bf16.mxu1 %v10918_v49  ;;  %v10984_v49 = vld [vmem:[%s15572_s1 + $0x74c] ss:$16 sps:$4 sm:$0xff]  }
 0x28b   :  { %8004 = vmatpush1.bf16.msra.mxu0 %v10913_v50  ;;  %v13964_v50 = vpop.f32.mrf.mxu0 }
 0x28c   :  { %8047 = vmatpush1.bf16.msra.mxu1 %v10916_v51  ;;  %8005 = vmatprep.subr.bf16.mxu0 %v10921_v54  ;;  %v13966_v51 = vpop.f32.mrf.mxu1  ;;  %v10987_v54 = vld [vmem:[%s15572_s1 + $0x52c] ss:$16 sps:$4 sm:$0xff]  }
 0x28d   :  { %8048 = vmatprep.subr.bf16.mxu1 %v10924_v55  ;;  %v10990_v55 = vld [vmem:[%s15572_s1 + $0x72c] ss:$16 sps:$4 sm:$0xff]  }
 0x28f   :  { %8006 = vmatpush1.bf16.msra.mxu0 %v10919_v56  ;;  %v13980_v56 = vpop.f32.mrf.mxu0 }
 0x290   :  { %8049 = vmatpush1.bf16.msra.mxu1 %v10922_v57  ;;  %8007 = vmatprep.subr.bf16.mxu0 %v10927_v58  ;;  %v13982_v57 = vpop.f32.mrf.mxu1  ;;  %v10985_v58 = vld [vmem:[%s15572_s1 + $0x528] ss:$16 sps:$4 sm:$0xff]  }
 0x291   :  { %8050 = vmatprep.subr.bf16.mxu1 %v10930_v59  ;;  %v10988_v59 = vld [vmem:[%s15572_s1 + $0x728] ss:$16 sps:$4 sm:$0xff]  }
 0x293   :  { %8008 = vmatpush1.bf16.msra.mxu0 %v10925_v60  ;;  %v10993_v60 = vld [vmem:[%s15572_s1 + $0x50c] ss:$16 sps:$4 sm:$0xff]  }
 0x294   :  { %8051 = vmatpush1.bf16.msra.mxu1 %v10928_v61  ;;  %8009 = vmatprep.subr.bf16.mxu0 %v10933_v62  ;;  %v10996_v61 = vld [vmem:[%s15572_s1 + $0x70c] ss:$16 sps:$4 sm:$0xff]   ;;  %v13996_v62 = vpop.f32.mrf.mxu0 }
 0x295   :  { %8052 = vmatprep.subr.bf16.mxu1 %v10936_v63  ;;  %v13998_v63 = vpop.f32.mrf.mxu1 }
 0x297   :  { %8010 = vmatpush1.bf16.msra.mxu0 %v10931_v2  ;;  %v10991_v2 = vld [vmem:[%s15572_s1 + $0x508] ss:$16 sps:$4 sm:$0xff]  }
 0x298   :  { %8053 = vmatpush1.bf16.msra.mxu1 %v10934_v3  ;;  %8011 = vmatprep.subr.bf16.mxu0 %v10939_v4  ;;  %v10994_v3 = vld [vmem:[%s15572_s1 + $0x708] ss:$16 sps:$4 sm:$0xff]   ;;  %v14006_v4 = vpop.f32.mrf.mxu0 }
 0x299   :  { %8054 = vmatprep.subr.bf16.mxu1 %v10942_v5  ;;  %v14008_v5 = vpop.f32.mrf.mxu1 }
 0x29b   :  { %8012 = vmatpush1.bf16.msra.mxu0 %v10937_v8  ;;  %v10999_v8 = vld [vmem:[%s15572_s1 + $0x8ec] ss:$16 sps:$4 sm:$0xff]  }
 0x29c   :  { %8055 = vmatpush1.bf16.msra.mxu1 %v10940_v9  ;;  %8013 = vmatprep.subr.bf16.mxu0 %v10945_v10  ;;  %v11002_v9 = vld [vmem:[%s15572_s1 + $0xaec] ss:$16 sps:$4 sm:$0xff]   ;;  %v10997_v10 = vld [vmem:[%s15572_s1 + $0x8e8] ss:$16 sps:$4 sm:$0xff]  }
 0x29d   :  { %8056 = vmatprep.subr.bf16.mxu1 %v10948_v11  ;;  %v11000_v11 = vld [vmem:[%s15572_s1 + $0xae8] ss:$16 sps:$4 sm:$0xff]  }
 0x29f   :  { %8014 = vmatpush1.bf16.msra.mxu0 %v10943_v14  ;;  %v14022_v14 = vpop.f32.mrf.mxu0 }
 0x2a0   :  { %8057 = vmatpush1.bf16.msra.mxu1 %v10946_v15  ;;  %8015 = vmatprep.subr.bf16.mxu0 %v10951_v16  ;;  %v14024_v15 = vpop.f32.mrf.mxu1  ;;  %v11005_v16 = vld [vmem:[%s15572_s1 + $0x8cc] ss:$16 sps:$4 sm:$0xff]  }
 0x2a1   :  { %8058 = vmatprep.subr.bf16.mxu1 %v10954_v17  ;;  %v11008_v17 = vld [vmem:[%s15572_s1 + $0xacc] ss:$16 sps:$4 sm:$0xff]  }
 0x2a3   :  { %8016 = vmatpush2.bf16.msra.mxu0 %v10949_v20  ;;  %v11675_v20 = vld [vmem:[%s15573_s0 + $0x10] ss:$144 sps:$4 sm:$0xff]  }
 0x2a4   :  { %8059 = vmatpush2.bf16.msra.mxu1 %v10952_v21  ;;  %8017 = vmatprep.subr.bf16.mxu0 %v10957_v24  ;;  %v11676_v21 = vld [vmem:[%s15573_s0 + $0x18] ss:$144 sps:$4 sm:$0xff]  }
 0x2a5   :  { %8060 = vmatprep.subr.bf16.mxu1 %v10960_v25  ;;  %v11003_v24 = vld [vmem:[%s15572_s1 + $0x8c8] ss:$16 sps:$4 sm:$0xff]  }
 0x2a6   :  { %v11006_v25 = vld [vmem:[%s15572_s1 + $0xac8] ss:$16 sps:$4 sm:$0xff]  }
 0x2a7   :  { %8018 = vmatpush2.bf16.msra.mxu0 %v10955_v26  ;;  %v14044_v26 = vpop.f32.mrf.mxu0 }
 0x2a8   :  { %8061 = vmatpush2.bf16.msra.mxu1 %v10958_v27  ;;  %8019 = vmatprep.subr.bf16.mxu0 %v10963_v30  ;;  %v14046_v27 = vpop.f32.mrf.mxu1  ;;  %v11011_v30 = vld [vmem:[%s15572_s1 + $0x8ac] ss:$16 sps:$4 sm:$0xff]  }
 0x2a9   :  { %8062 = vmatprep.subr.bf16.mxu1 %v10966_v31  ;;  %v11014_v31 = vld [vmem:[%s15572_s1 + $0xaac] ss:$16 sps:$4 sm:$0xff]  }
 0x2ab   :  { %8020 = vmatpush2.bf16.msra.mxu0 %v10961_v32  ;;  %v11677_v32 = vld [vmem:[%s15573_s0 + $0x24] ss:$144 sps:$4 sm:$0xff]  }
 0x2ac   :  { %8063 = vmatpush2.bf16.msra.mxu1 %v10964_v33  ;;  %8021 = vmatprep.subr.bf16.mxu0 %v10969_v36  ;;  %v11678_v33 = vld [vmem:[%s15573_s0 + $0x2c] ss:$144 sps:$4 sm:$0xff]   ;;  %v11009_v36 = vld [vmem:[%s15572_s1 + $0x8a8] ss:$16 sps:$4 sm:$0xff]  }
 0x2ad   :  { %8064 = vmatprep.subr.bf16.mxu1 %v10972_v37  ;;  %v11012_v37 = vld [vmem:[%s15572_s1 + $0xaa8] ss:$16 sps:$4 sm:$0xff]  }
 0x2af   :  { %8022 = vmatpush2.bf16.msra.mxu0 %v10967_v38  ;;  %v14066_v38 = vpop.f32.mrf.mxu0 }
 0x2b0   :  { %8065 = vmatpush2.bf16.msra.mxu1 %v10970_v39  ;;  %8023 = vmatprep.subr.bf16.mxu0 %v10975_v42  ;;  %v14068_v39 = vpop.f32.mrf.mxu1  ;;  %v11017_v42 = vld [vmem:[%s15572_s1 + $0x88c] ss:$16 sps:$4 sm:$0xff]  }
 0x2b1   :  { %8066 = vmatprep.subr.bf16.mxu1 %v10978_v43  ;;  %v11020_v43 = vld [vmem:[%s15572_s1 + $0xa8c] ss:$16 sps:$4 sm:$0xff]  }
 0x2b3   :  { %8024 = vmatpush2.bf16.msra.mxu0 %v10973_v46  ;;  %v14076_v46 = vpop.f32.mrf.mxu0 }
 0x2b4   :  { %8067 = vmatpush2.bf16.msra.mxu1 %v10976_v47  ;;  %8025 = vmatprep.subr.bf16.mxu0 %v10981_v48  ;;  %v14078_v47 = vpop.f32.mrf.mxu1  ;;  %v11015_v48 = vld [vmem:[%s15572_s1 + $0x888] ss:$16 sps:$4 sm:$0xff]  }
 0x2b5   :  { %8068 = vmatprep.subr.bf16.mxu1 %v10984_v49  ;;  %v11018_v49 = vld [vmem:[%s15572_s1 + $0xa88] ss:$16 sps:$4 sm:$0xff]  }
 0x2b7   :  { %8026 = vmatpush2.bf16.msra.mxu0 %v10979_v52  ;;  %v11023_v52 = vld [vmem:[%s15572_s1 + $0x86c] ss:$16 sps:$4 sm:$0xff]  }
 0x2b8   :  { %8069 = vmatpush2.bf16.msra.mxu1 %v10982_v53  ;;  %8027 = vmatprep.subr.bf16.mxu0 %v10987_v54  ;;  %v11026_v53 = vld [vmem:[%s15572_s1 + $0xa6c] ss:$16 sps:$4 sm:$0xff]   ;;  %v14092_v54 = vpop.f32.mrf.mxu0 }
 0x2b9   :  { %8070 = vmatprep.subr.bf16.mxu1 %v10990_v55  ;;  %v14094_v55 = vpop.f32.mrf.mxu1 }
 0x2bb   :  { %8028 = vmatpush2.bf16.msra.mxu0 %v10985_v58  ;;  %v11021_v58 = vld [vmem:[%s15572_s1 + $0x868] ss:$16 sps:$4 sm:$0xff]  }
 0x2bc   :  { %8071 = vmatpush2.bf16.msra.mxu1 %v10988_v59  ;;  %8029 = vmatprep.subr.bf16.mxu0 %v10993_v60  ;;  %v11024_v59 = vld [vmem:[%s15572_s1 + $0xa68] ss:$16 sps:$4 sm:$0xff]   ;;  %v11029_v60 = vld [vmem:[%s15572_s1 + $0x84c] ss:$16 sps:$4 sm:$0xff]  }
 0x2bd   :  { %8072 = vmatprep.subr.bf16.mxu1 %v10996_v61  ;;  %v11032_v61 = vld [vmem:[%s15572_s1 + $0xa4c] ss:$16 sps:$4 sm:$0xff]  }
 0x2bf   :  { %8030 = vmatpush2.bf16.msra.mxu0 %v10991_v2  ;;  %v14108_v2 = vpop.f32.mrf.mxu0 }
 0x2c0   :  { %8073 = vmatpush2.bf16.msra.mxu1 %v10994_v3  ;;  %8085 = vmatprep.subr.bf16.mxu0 %v10999_v8  ;;  %v14110_v3 = vpop.f32.mrf.mxu1  ;;  %v11027_v8 = vld [vmem:[%s15572_s1 + $0x848] ss:$16 sps:$4 sm:$0xff]  }
 0x2c1   :  { %8128 = vmatprep.subr.bf16.mxu1 %v11002_v9  ;;  %v11030_v9 = vld [vmem:[%s15572_s1 + $0xa48] ss:$16 sps:$4 sm:$0xff]  }
 0x2c2   :  { %8032 = vmatmul.mubr.bf16.vlgmr.msra.gmra.mxu0 %v11675_v20  ;;  %v7217_v20 = vadd.f32 %v13834_v1, %v13832_v0  ;;  %v11041_v0 = vld [vmem:[%s15572_s1 + $0x80c] ss:$16 sps:$4 sm:$0xff]  }
 0x2c3   :  { %8075 = vmatmul.mubr.bf16.vlgmr.msra.gmra.mxu1 %v11676_v21  ;;  %8086 = vmatpush1.bf16.msra.mxu0 %v10997_v10  ;;  %v11035_v10 = vld [vmem:[%s15572_s1 + $0x82c] ss:$16 sps:$4 sm:$0xff]   ;;  %v11033_v21 = vld [vmem:[%s15572_s1 + $0x828] ss:$16 sps:$4 sm:$0xff]  }
 0x2c4   :  { %8129 = vmatpush1.bf16.msra.mxu1 %v11000_v11  ;;  %8087 = vmatprep.subr.bf16.mxu0 %v11005_v16  ;;  %v11038_v11 = vld [vmem:[%s15572_s1 + $0xa2c] ss:$16 sps:$4 sm:$0xff]   ;;  %v14124_v16 = vpop.f32.mrf.mxu0 }
 0x2c5   :  { %8130 = vmatprep.subr.bf16.mxu1 %v11008_v17  ;;  %8117 = vmatprep.mubr.bf16.mxu0 %v11677_v32  ;;  %v14126_v17 = vpop.f32.mrf.mxu1  ;;  %v11044_v1 = vld [vmem:[%s15572_s1 + $0xa0c] ss:$16 sps:$4 sm:$0xff]   ;;  %v7260_v32 = vadd.f32 %v13890_v22, %v7217_v20 }
 0x2c6   :  { %8160 = vmatprep.mubr.bf16.mxu1 %v11678_v33  ;;  %v7221_v33 = vadd.f32 %v13866_v13, %v13864_v12  ;;  %v11050_v12 = vld [vmem:[%s15572_s1 + $0xbec] ss:$16 sps:$4 sm:$0xff]   ;;  %v7223_v13 = vadd.f32 %v13882_v19, %v13880_v18  ;;  %v11048_v18 = vld [vmem:[%s15572_s1 + $0xbe8] ss:$16 sps:$4 sm:$0xff]  }
 0x2c7   :  { %8088 = vmatpush1.bf16.msra.mxu0 %v11003_v24  ;;  %v11036_v24 = vld [vmem:[%s15572_s1 + $0xa28] ss:$16 sps:$4 sm:$0xff]   ;;  %v7303_v22 = vadd.f32 %v13892_v23, %v7260_v32 }
 0x2c8   :  { %8131 = vmatpush1.bf16.msra.mxu1 %v11006_v25  ;;  %8089 = vmatprep.subr.bf16.mxu0 %v11011_v30  ;;  %v14136_v25 = vpop.f32.mrf.mxu0  ;;  %v14138_v30 = vpop.f32.mrf.mxu1 }
 0x2c9   :  { %8132 = vmatprep.subr.bf16.mxu1 %v11014_v31  ;;  %v7219_v31 = vadd.f32 %v13850_v7, %v13848_v6  ;;  %v11047_v7 = vld [vmem:[%s15572_s1 + $0x9ec] ss:$16 sps:$4 sm:$0xff]  }
 0x2ca   :  { %v14160_v6 = vpop.f32.mrf.mxu1 }
 0x2cb   :  { %8090 = vmatpush1.bf16.msra.mxu0 %v11009_v36  ;;  %v7262_v36 = vadd.f32 %v13906_v28, %v7219_v31  ;;  %v7264_v28 = vadd.f32 %v13922_v34, %v7221_v33  ;;  %v11056_v34 = vld [vmem:[%s15572_s1 + $0xbcc] ss:$16 sps:$4 sm:$0xff]  }
 0x2cc   :  { %8133 = vmatpush1.bf16.msra.mxu1 %v11012_v37  ;;  %8091 = vmatprep.subr.bf16.mxu0 %v11017_v42  ;;  %v11039_v37 = vld [vmem:[%s15572_s1 + $0x808] ss:$16 sps:$4 sm:$0xff]   ;;  %v14183_v23 = vpop.f32.mrf.mxu1 }
 0x2cd   :  { %8134 = vmatprep.subr.bf16.mxu1 %v11020_v43  ;;  %v11042_v42 = vld [vmem:[%s15572_s1 + $0xa08] ss:$16 sps:$4 sm:$0xff]   ;;  %v14158_v43 = vpop.f32.mrf.mxu0 }
 0x2cf   :  { %8092 = vmatpush1.bf16.msra.mxu0 %v11015_v48  ;;  %v7305_v48 = vadd.f32 %v13908_v29, %v7262_v36  ;;  %v14181_v19 = vpop.f32.mrf.mxu0  ;;  %v11053_v29 = vld [vmem:[%s15572_s1 + $0x9cc] ss:$16 sps:$4 sm:$0xff]  }
 0x2d0   :  { %8135 = vmatpush1.bf16.msra.mxu1 %v11018_v49  ;;  %8093 = vmatprep.subr.bf16.mxu0 %v11023_v52  ;;  %v7266_v49 = vadd.f32 %v13938_v40, %v7223_v13  ;;  %v7346_v52 = vadd.f32 %v13948_v44, %v7303_v22  ;;  %v7307_v40 = vadd.f32 %v13924_v35, %v7264_v28  ;;  %v14204_v35 = vpop.f32.mrf.mxu1  ;;  %v11069_v28 = vld [vmem:[%s15572_s1 + $0x968] ss:$16 sps:$4 sm:$0xff]  }
 0x2d1   :  { %8136 = vmatprep.subr.bf16.mxu1 %v11026_v53  ;;  %v11045_v53 = vld [vmem:[%s15572_s1 + $0x9e8] ss:$16 sps:$4 sm:$0xff]   ;;  %v7348_v44 = vadd.f32 %v13964_v50, %v7305_v48 }
 0x2d2   :  { %v14217_v20 = vpop.f32.mrf.mxu1 }
 0x2d3   :  { %8094 = vmatpush1.bf16.msra.mxu0 %v11021_v58  ;;  %v7309_v58 = vadd.f32 %v13940_v41, %v7266_v49  ;;  %v11059_v41 = vld [vmem:[%s15572_s1 + $0x9ac] ss:$16 sps:$4 sm:$0xff]   ;;  %v7391_v50 = vadd.f32 %v13966_v51, %v7348_v44  ;;  %v11060_v51 = vld [vmem:[%s15572_s1 + $0xba8] ss:$16 sps:$4 sm:$0xff]  }
 0x2d4   :  { %8137 = vmatpush1.bf16.msra.mxu1 %v11024_v59  ;;  %8095 = vmatprep.subr.bf16.mxu0 %v11029_v60  ;;  %v7389_v59 = vadd.f32 %v13950_v45, %v7346_v52  ;;  %v7350_v60 = vadd.f32 %v13980_v56, %v7307_v40  ;;  %v11062_v45 = vld [vmem:[%s15572_s1 + $0xbac] ss:$16 sps:$4 sm:$0xff]   ;;  %v14236_v32 = vpop.f32.mrf.mxu1 }
 0x2d5   :  { %8138 = vmatprep.subr.bf16.mxu1 %v11032_v61  ;;  %v11051_v61 = vld [vmem:[%s15572_s1 + $0x9c8] ss:$16 sps:$4 sm:$0xff]   ;;  %v7352_v56 = vadd.f32 %v13996_v62, %v7309_v58  ;;  %v11065_v62 = vld [vmem:[%s15572_s1 + $0x98c] ss:$16 sps:$4 sm:$0xff]  }
 0x2d7   :  { %8096 = vmatpush1.bf16.msra.mxu0 %v11027_v8  ;;  %v11054_v8 = vld [vmem:[%s15572_s1 + $0xbc8] ss:$16 sps:$4 sm:$0xff]  }
 0x2d8   :  { %8139 = vmatpush1.bf16.msra.mxu1 %v11030_v9  ;;  %8097 = vmatprep.subr.bf16.mxu0 %v11035_v10  ;;  %v14202_v9 = vpop.f32.mrf.mxu0  ;;  %v7432_v10 = vadd.f32 %v14006_v4, %v7389_v59  ;;  %v7395_v4 = vadd.f32 %v13998_v63, %v7352_v56  ;;  %v11066_v63 = vld [vmem:[%s15572_s1 + $0xb88] ss:$16 sps:$4 sm:$0xff]  }
 0x2d9   :  { %8140 = vmatprep.subr.bf16.mxu1 %v11038_v11 }
 0x2da   :  { %v14215_v11 = vpop.f32.mrf.mxu0  ;;  %v7438_v36 = vadd.f32 %v14066_v38, %v7395_v4  ;;  %v11093_v4 = vld [vmem:[%s15572_s1 + $0xce8] ss:$16 sps:$4 sm:$0xff]  }
 0x2db   :  { %8098 = vmatpush1.bf16.msra.mxu0 %v11033_v21  ;;  %v7393_v21 = vadd.f32 %v13982_v57, %v7350_v60  ;;  %v11068_v57 = vld [vmem:[%s15572_s1 + $0xb8c] ss:$16 sps:$4 sm:$0xff]  }
 0x2dc   :  { %8141 = vmatpush1.bf16.msra.mxu1 %v11036_v24  ;;  %8099 = vmatprep.subr.bf16.mxu0 %v11041_v0  ;;  %v7434_v24 = vadd.f32 %v14022_v14, %v7391_v50  ;;  %v11057_v0 = vld [vmem:[%s15572_s1 + $0x9a8] ss:$16 sps:$4 sm:$0xff]   ;;  %v7475_v14 = vadd.f32 %v14008_v5, %v7432_v10  ;;  %v7691_v31 = vpop.f32.mrf.mxu0  ;;  %v11071_v5 = vld [vmem:[%s15572_s1 + $0x96c] ss:$16 sps:$4 sm:$0xff]  }
 0x2dd   :  { %8142 = vmatprep.subr.bf16.mxu1 %v11044_v1  ;;  %v7436_v1 = vadd.f32 %v14044_v26, %v7393_v21  ;;  %v11087_v10 = vld [vmem:[%s15572_s1 + $0x908] ss:$16 sps:$4 sm:$0xff]  }
 0x2de   :  { %v7477_v33 = vadd.f32 %v14024_v15, %v7434_v24  ;;  %v11074_v15 = vld [vmem:[%s15572_s1 + $0xb6c] ss:$16 sps:$4 sm:$0xff]  }
 0x2df   :  { %8100 = vmatpush1.bf16.msra.mxu0 %v11039_v37  ;;  %v7518_v37 = vadd.f32 %v14076_v46, %v7475_v14  ;;  %v7479_v26 = vadd.f32 %v14046_v27, %v7436_v1  ;;  %v7693_v46 = vpop.f32.mrf.mxu0  ;;  %v11072_v27 = vld [vmem:[%s15572_s1 + $0xb68] ss:$16 sps:$4 sm:$0xff]  }
 0x2e0   :  { %8143 = vmatpush1.bf16.msra.mxu1 %v11042_v42  ;;  %8101 = vmatprep.subr.bf16.mxu0 %v11047_v7  ;;  %v11063_v42 = vld [vmem:[%s15572_s1 + $0x988] ss:$16 sps:$4 sm:$0xff]   ;;  %v7520_v38 = vadd.f32 %v14092_v54, %v7477_v33  ;;  %v14255_v7 = vpop.f32.mrf.mxu1  ;;  %v11104_v33 = vld [vmem:[%s15572_s1 + $0xecc] ss:$16 sps:$4 sm:$0xff]  }
 0x2e1   :  { %8144 = vmatprep.subr.bf16.mxu1 %v11050_v12  ;;  %v7481_v12 = vadd.f32 %v14068_v39, %v7438_v36  ;;  %v7561_v13 = vadd.f32 %v14078_v47, %v7518_v37  ;;  %v7522_v22 = vadd.f32 %v14108_v2, %v7479_v26  ;;  %v11077_v39 = vld [vmem:[%s15572_s1 + $0x94c] ss:$16 sps:$4 sm:$0xff]   ;;  %v7695_v49 = vpop.f32.mrf.mxu0  ;;  %v11096_v14 = vld [vmem:[%s15572_s1 + $0xee8] ss:$16 sps:$4 sm:$0xff]  }
 0x2e2   :  { %v11080_v47 = vld [vmem:[%s15572_s1 + $0xb4c] ss:$16 sps:$4 sm:$0xff]   ;;  %v7563_v54 = vadd.f32 %v14094_v55, %v7520_v38  ;;  %v7738_v52 = vpop.f32.mrf.mxu1  ;;  %v11078_v55 = vld [vmem:[%s15572_s1 + $0xb48] ss:$16 sps:$4 sm:$0xff]  }
 0x2e3   :  { %8102 = vmatpush2.bf16.msra.mxu0 %v11045_v53  ;;  %v7524_v2 = vadd.f32 %v14124_v16, %v7481_v12  ;;  %v7604_v48 = vadd.f32 %v14136_v25, %v7561_v13  ;;  %v7565_v53 = vadd.f32 %v14110_v3, %v7522_v22  ;;  %v11083_v3 = vld [vmem:[%s15572_s1 + $0x92c] ss:$16 sps:$4 sm:$0xff]   ;;  %v11680_v26 = vld [vmem:[%s15573_s0 + $0x28] ss:$144 sps:$4 sm:$0xff]  }
 0x2e4   :  { %8145 = vmatpush2.bf16.msra.mxu1 %v11048_v18  ;;  %8103 = vmatprep.subr.bf16.mxu0 %v11053_v29  ;;  %v7606_v18 = vadd.f32 %v14158_v43, %v7563_v54  ;;  %v11075_v29 = vld [vmem:[%s15572_s1 + $0x948] ss:$16 sps:$4 sm:$0xff]   ;;  %v7818_v16 = vpop.f32.mrf.mxu1  ;;  %v11086_v25 = vld [vmem:[%s15572_s1 + $0xb2c] ss:$16 sps:$4 sm:$0xff]  }
 0x2e5   :  { %8146 = vmatprep.subr.bf16.mxu1 %v11056_v34  ;;  %v7775_v34 = vpop.f32.mrf.mxu0  ;;  %v7567_v43 = vadd.f32 %v14126_v17, %v7524_v2  ;;  %v7647_v40 = vadd.f32 %v14138_v30, %v7604_v48  ;;  %v7608_v44 = vadd.f32 %v14181_v19, %v7565_v53  ;;  %v11084_v17 = vld [vmem:[%s15572_s1 + $0xb28] ss:$16 sps:$4 sm:$0xff]   ;;  %v11092_v19 = vld [vmem:[%s15572_s1 + $0xb0c] ss:$16 sps:$4 sm:$0xff]   ;;  %v11681_v48 = vld [vmem:[%s15573_s0 + $0x34] ss:$144 sps:$4 sm:$0xff]  }
 0x2e6   :  { %v7649_v58 = vadd.f32 %v14160_v6, %v7606_v18  ;;  %v7820_v30 = vpop.f32.mrf.mxu1  ;;  %v11089_v6 = vld [vmem:[%s15572_s1 + $0x90c] ss:$16 sps:$4 sm:$0xff]   ;;  %v11099_v12 = vld [vmem:[%s15572_s1 + $0xcc8] ss:$16 sps:$4 sm:$0xff]  }
 0x2e7   :  { %8104 = vmatpush2.bf16.msra.mxu0 %v11051_v61  ;;  %v7610_v59 = vadd.f32 %v14202_v9, %v7567_v43  ;;  %v7690_v60 = vadd.f32 %v14215_v11, %v7647_v40  ;;  %v11081_v61 = vld [vmem:[%s15572_s1 + $0x928] ss:$16 sps:$4 sm:$0xff]   ;;  %v7651_v9 = vadd.f32 %v14183_v23, %v7608_v44  ;;  %v11095_v23 = vld [vmem:[%s15572_s1 + $0xcec] ss:$16 sps:$4 sm:$0xff]  }
 0x2e8   :  { %8147 = vmatpush2.bf16.msra.mxu1 %v11054_v8  ;;  %8105 = vmatprep.subr.bf16.mxu0 %v11059_v41  ;;  %v7777_v8 = vpop.f32.mrf.mxu0  ;;  %v7692_v41 = vadd.f32 %v7691_v31, %v7649_v58  ;;  %v11090_v11 = vld [vmem:[%s15572_s1 + $0xb08] ss:$16 sps:$4 sm:$0xff]   ;;  %v7822_v24 = vpop.f32.mrf.mxu1  ;;  %v11116_v43 = vld [vmem:[%s15572_s1 + $0xe8c] ss:$16 sps:$4 sm:$0xff]  }
 0x2e9   :  { %8148 = vmatprep.subr.bf16.mxu1 %v11062_v45  ;;  %v7653_v45 = vadd.f32 %v14204_v35, %v7610_v59  ;;  %v7733_v50 = vadd.f32 %v14217_v20, %v7690_v60  ;;  %v7694_v56 = vadd.f32 %v7693_v46, %v7651_v9  ;;  %v11098_v35 = vld [vmem:[%s15572_s1 + $0xeec] ss:$16 sps:$4 sm:$0xff]   ;;  %v11102_v13 = vld [vmem:[%s15572_s1 + $0xec8] ss:$16 sps:$4 sm:$0xff]  }
 0x2ea   :  { %v7779_v21 = vpop.f32.mrf.mxu0  ;;  %v7735_v20 = vadd.f32 %v14236_v32, %v7692_v41  ;;  %v7824_v31 = vpop.f32.mrf.mxu1  ;;  %v11101_v32 = vld [vmem:[%s15572_s1 + $0xccc] ss:$16 sps:$4 sm:$0xff]   ;;  %v11111_v60 = vld [vmem:[%s15572_s1 + $0xc88] ss:$16 sps:$4 sm:$0xff]  }
 0x2eb   :  { %8106 = vmatpush2.bf16.msra.mxu0 %v11057_v0  ;;  %v7696_v0 = vadd.f32 %v7695_v49, %v7653_v45  ;;  %v11682_v49 = vld [vmem:[%s15573_s0 + $0x3c] ss:$144 sps:$4 sm:$0xff]   ;;  %v11123_v41 = vld [vmem:[%s15572_s1 + $0xc48] ss:$16 sps:$4 sm:$0xff]  }
 0x2ec   :  { %8149 = vmatpush2.bf16.msra.mxu1 %v11060_v51  ;;  %8107 = vmatprep.subr.bf16.mxu0 %v11065_v62  ;;  %v7776_v51 = vadd.f32 %v7775_v34, %v7733_v50  ;;  %v7737_v62 = vadd.f32 %v14255_v7, %v7694_v56  ;;  %v7781_v1 = vpop.f32.mrf.mxu0  ;;  %v11105_v34 = vld [vmem:[%s15572_s1 + $0xca8] ss:$16 sps:$4 sm:$0xff]   ;;  %v11128_v9 = vld [vmem:[%s15572_s1 + $0xe4c] ss:$16 sps:$4 sm:$0xff]  }
 0x2ed   :  { %8150 = vmatprep.subr.bf16.mxu1 %v11068_v57  ;;  %v7778_v57 = vadd.f32 %v7777_v8, %v7735_v20  ;;  %v7739_v36 = vadd.f32 %v7738_v52, %v7696_v0  ;;  %v11122_v8 = vld [vmem:[%s15572_s1 + $0xe6c] ss:$16 sps:$4 sm:$0xff]   ;;  %v11126_v45 = vld [vmem:[%s15572_s1 + $0xe48] ss:$16 sps:$4 sm:$0xff]  }
 0x2ee   :  { %v7819_v37 = vadd.f32 %v7818_v16, %v7776_v51  ;;  %v11108_v16 = vld [vmem:[%s15572_s1 + $0xea8] ss:$16 sps:$4 sm:$0xff]   ;;  %v11131_v50 = vld [vmem:[%s15572_s1 + $0xc2c] ss:$16 sps:$4 sm:$0xff]  }
 0x2ef   :  { %8108 = vmatpush2.bf16.msra.mxu0 %v11063_v42  ;;  %v7780_v42 = vadd.f32 %v7779_v21, %v7737_v62  ;;  %v7821_v38 = vadd.f32 %v7820_v30, %v7778_v57  ;;  %v7782_v46 = vadd.f32 %v7781_v1, %v7739_v36  ;;  %v11117_v30 = vld [vmem:[%s15572_s1 + $0xc68] ss:$16 sps:$4 sm:$0xff]   ;;  %v11134_v56 = vld [vmem:[%s15572_s1 + $0xe2c] ss:$16 sps:$4 sm:$0xff]  }
 0x2f0   :  { %8151 = vmatpush2.bf16.msra.mxu1 %v11066_v63  ;;  %8109 = vmatprep.subr.bf16.mxu0 %v11071_v5  ;;  %v11137_v21 = vld [vmem:[%s15572_s1 + $0xc0c] ss:$16 sps:$4 sm:$0xff]   ;;  %v11141_v51 = vld [vmem:[%s15572_s1 + $0xde8] ss:$16 sps:$4 sm:$0xff]  }
 0x2f1   :  { %8152 = vmatprep.subr.bf16.mxu1 %v11074_v15  ;;  %v11679_v15 = vld [vmem:[%s15573_s0 + $0x20] ss:$144 sps:$4 sm:$0xff]   ;;  %v7825_v18 = vadd.f32 %v7824_v31, %v7782_v46  ;;  %v11143_v20 = vld [vmem:[%s15572_s1 + $0xdec] ss:$16 sps:$4 sm:$0xff]   ;;  %v11144_v62 = vld [vmem:[%s15572_s1 + $0xfe8] ss:$16 sps:$4 sm:$0xff]  }
 0x2f2   :  { %v11146_v0 = vld [vmem:[%s15572_s1 + $0xfec] ss:$16 sps:$4 sm:$0xff]   ;;  %v11150_v1 = vld [vmem:[%s15572_s1 + $0xfc8] ss:$16 sps:$4 sm:$0xff]  }
 0x2f3   :  { %8110 = vmatpush2.bf16.msra.mxu0 %v11069_v28  ;;  %v11149_v57 = vld [vmem:[%s15572_s1 + $0xdcc] ss:$16 sps:$4 sm:$0xff]   ;;  %v11156_v36 = vld [vmem:[%s15572_s1 + $0xfa8] ss:$16 sps:$4 sm:$0xff]  }
 0x2f4   :  { %8153 = vmatpush2.bf16.msra.mxu1 %v11072_v27  ;;  %8111 = vmatprep.subr.bf16.mxu0 %v11077_v39  ;;  %v11107_v27 = vld [vmem:[%s15572_s1 + $0xcac] ss:$16 sps:$4 sm:$0xff]   ;;  %v11168_v46 = vld [vmem:[%s15572_s1 + $0xf68] ss:$16 sps:$4 sm:$0xff]  }
 0x2f5   :  { %8154 = vmatprep.subr.bf16.mxu1 %v11080_v47  ;;  %v11110_v39 = vld [vmem:[%s15572_s1 + $0xeac] ss:$16 sps:$4 sm:$0xff]   ;;  %v7823_v47 = vadd.f32 %v7822_v24, %v7780_v42 }
 0x2f6   :  { %v11140_v24 = vld [vmem:[%s15572_s1 + $0xe0c] ss:$16 sps:$4 sm:$0xff]  }
 0x2f7   :  { %8112 = vmatpush2.bf16.msra.mxu0 %v11075_v29  ;;  %v11155_v31 = vld [vmem:[%s15572_s1 + $0xdac] ss:$16 sps:$4 sm:$0xff]  }
 0x2f8   :  { %8155 = vmatpush2.bf16.msra.mxu1 %v11078_v55  ;;  %8113 = vmatprep.subr.bf16.mxu0 %v11083_v3  ;;  %v11164_v42 = vld [vmem:[%s15572_s1 + $0xf8c] ss:$16 sps:$4 sm:$0xff]  }
 0x2f9   :  { %8156 = vmatprep.subr.bf16.mxu1 %v11086_v25  ;;  %v11113_v25 = vld [vmem:[%s15572_s1 + $0xc8c] ss:$16 sps:$4 sm:$0xff]  }
 0x2fb   :  { %8114 = vmatpush2.bf16.msra.mxu0 %v11081_v61  ;;  %v11114_v61 = vld [vmem:[%s15572_s1 + $0xe88] ss:$16 sps:$4 sm:$0xff]  }
 0x2fc   :  { %8157 = vmatpush2.bf16.msra.mxu1 %v11084_v17  ;;  %8115 = vmatprep.subr.bf16.mxu0 %v11089_v6  ;;  %v11119_v17 = vld [vmem:[%s15572_s1 + $0xc6c] ss:$16 sps:$4 sm:$0xff]   ;;  %v11120_v6 = vld [vmem:[%s15572_s1 + $0xe68] ss:$16 sps:$4 sm:$0xff]  }
 0x2fd   :  { %8158 = vmatprep.subr.bf16.mxu1 %v11092_v19  ;;  %v11125_v19 = vld [vmem:[%s15572_s1 + $0xc4c] ss:$16 sps:$4 sm:$0xff]  }
 0x2ff   :  { %8116 = vmatpush2.bf16.msra.mxu0 %v11087_v10  ;;  %v11129_v10 = vld [vmem:[%s15572_s1 + $0xc28] ss:$16 sps:$4 sm:$0xff]  }
 0x300   :  { %8159 = vmatpush2.bf16.msra.mxu1 %v11090_v11  ;;  %8171 = vmatprep.subr.bf16.mxu0 %v11095_v23  ;;  %v11132_v11 = vld [vmem:[%s15572_s1 + $0xe28] ss:$16 sps:$4 sm:$0xff]  }
 0x301   :  { %8214 = vmatprep.subr.bf16.mxu1 %v11098_v35  ;;  %v11135_v23 = vld [vmem:[%s15572_s1 + $0xc08] ss:$16 sps:$4 sm:$0xff]  }
 0x302   :  { %v7861_v63 = vpop.f32.mrf.mxu0  ;;  %8118 = vmatmul.mubr.bf16.vlgmr.msra.gmra.mxu0 %v11679_v15  ;;  %v11138_v35 = vld [vmem:[%s15572_s1 + $0xe08] ss:$16 sps:$4 sm:$0xff]   ;;  %v11167_v15 = vld [vmem:[%s15572_s1 + $0xd6c] ss:$16 sps:$4 sm:$0xff]  }
 0x303   :  { %v7904_v5 = vpop.f32.mrf.mxu1  ;;  %8161 = vmatmul.mubr.bf16.vlgmr.msra.gmra.mxu1 %v11680_v26  ;;  %v7862_v7 = vadd.f32 %v7861_v63, %v7819_v37  ;;  %8172 = vmatpush1.bf16.msra.mxu0 %v11093_v4  ;;  %v11152_v4 = vld [vmem:[%s15572_s1 + $0xfcc] ss:$16 sps:$4 sm:$0xff]   ;;  %v11159_v63 = vld [vmem:[%s15572_s1 + $0xd88] ss:$16 sps:$4 sm:$0xff]  }
 0x304   :  { %8215 = vmatpush1.bf16.msra.mxu1 %v11096_v14  ;;  %v7863_v22 = vpop.f32.mrf.mxu0  ;;  %8173 = vmatprep.subr.bf16.mxu0 %v11101_v32  ;;  %v11147_v14 = vld [vmem:[%s15572_s1 + $0xdc8] ss:$16 sps:$4 sm:$0xff]   ;;  %v11158_v32 = vld [vmem:[%s15572_s1 + $0xfac] ss:$16 sps:$4 sm:$0xff]  }
 0x305   :  { %v7906_v28 = vpop.f32.mrf.mxu1  ;;  %8216 = vmatprep.subr.bf16.mxu1 %v11104_v33  ;;  %v7905_v54 = vadd.f32 %v7904_v5, %v7862_v7  ;;  %v7864_v2 = vadd.f32 %v7863_v22, %v7821_v38  ;;  %8203 = vmatprep.mubr.bf16.mxu0 %v11681_v48  ;;  %v11153_v33 = vld [vmem:[%s15572_s1 + $0xda8] ss:$16 sps:$4 sm:$0xff]   ;;  %v11161_v37 = vld [vmem:[%s15572_s1 + $0xd8c] ss:$16 sps:$4 sm:$0xff]  }
 0x306   :  { %8246 = vmatprep.mubr.bf16.mxu1 %v11682_v49  ;;  %v7865_v52 = vpop.f32.mrf.mxu0  ;;  %v11162_v5 = vld [vmem:[%s15572_s1 + $0xf88] ss:$16 sps:$4 sm:$0xff]   ;;  %v11170_v26 = vld [vmem:[%s15572_s1 + $0xf6c] ss:$16 sps:$4 sm:$0xff]  }
 0x307   :  { %v7908_v53 = vpop.f32.mrf.mxu1  ;;  %8687 = vst [vmem:[%s15574_s2] sm:$0xff] %v7905_v54  ;;  %v7907_v29 = vadd.f32 %v7906_v28, %v7864_v2  ;;  %v7866_v55 = vadd.f32 %v7865_v52, %v7823_v47  ;;  %8174 = vmatpush1.bf16.msra.mxu0 %v11099_v12  ;;  %v11165_v38 = vld [vmem:[%s15572_s1 + $0xd68] ss:$16 sps:$4 sm:$0xff]   ;;  %v11173_v7 = vld [vmem:[%s15572_s1 + $0xd4c] ss:$16 sps:$4 sm:$0xff]  }
 0x308   :  { %8217 = vmatpush1.bf16.msra.mxu1 %v11102_v13  ;;  %v7867_v3 = vpop.f32.mrf.mxu0  ;;  %8175 = vmatprep.subr.bf16.mxu0 %v11107_v27  ;;  %v11176_v12 = vld [vmem:[%s15572_s1 + $0xf4c] ss:$16 sps:$4 sm:$0xff]   ;;  %v11171_v13 = vld [vmem:[%s15572_s1 + $0xd48] ss:$16 sps:$4 sm:$0xff]  }
 0x309   :  { %8218 = vmatprep.subr.bf16.mxu1 %v11110_v39  ;;  %8688 = vst [vmem:[%s15574_s2 + $0x8] sm:$0xff] %v7907_v29  ;;  %v7909_v40 = vadd.f32 %v7908_v53, %v7866_v55  ;;  %v7868_v44 = vadd.f32 %v7867_v3, %v7825_v18  ;;  %v7910_v58 = vpop.f32.mrf.mxu1  ;;  %v11174_v22 = vld [vmem:[%s15572_s1 + $0xf48] ss:$16 sps:$4 sm:$0xff]   ;;  %v11179_v28 = vld [vmem:[%s15572_s1 + $0xd2c] ss:$16 sps:$4 sm:$0xff]  }
 0x30a   :  { %v11182_v27 = vld [vmem:[%s15572_s1 + $0xf2c] ss:$16 sps:$4 sm:$0xff]   ;;  %v11177_v39 = vld [vmem:[%s15572_s1 + $0xd28] ss:$16 sps:$4 sm:$0xff]  }
 0x30b   :  { %8691 = vst [vmem:[%s15574_s2 + $0x20] sm:$0xff] %v7909_v40  ;;  %v7911_v59 = vadd.f32 %v7910_v58, %v7868_v44  ;;  %8176 = vmatpush1.bf16.msra.mxu0 %v11105_v34  ;;  %v11180_v47 = vld [vmem:[%s15572_s1 + $0xf28] ss:$16 sps:$4 sm:$0xff]   ;;  %v11185_v54 = vld [vmem:[%s15572_s1 + $0xd0c] ss:$16 sps:$4 sm:$0xff]  }
 0x30c   :  { %8219 = vmatpush1.bf16.msra.mxu1 %v11108_v16  ;;  %8177 = vmatprep.subr.bf16.mxu0 %v11113_v25  ;;  %v11188_v2 = vld [vmem:[%s15572_s1 + $0xf0c] ss:$16 sps:$4 sm:$0xff]   ;;  %v11183_v48 = vld [vmem:[%s15572_s1 + $0xd08] ss:$16 sps:$4 sm:$0xff]   ;;  %v11683_v16 = vld [vmem:[%s15573_s0 + $0x30] ss:$144 sps:$4 sm:$0xff]  }
 0x30d   :  { %8220 = vmatprep.subr.bf16.mxu1 %v11116_v43  ;;  %8692 = vst [vmem:[%s15574_s2 + $0x28] sm:$0xff] %v7911_v59  ;;  %v11186_v49 = vld [vmem:[%s15572_s1 + $0xf08] ss:$16 sps:$4 sm:$0xff]   ;;  %v11191_v52 = vld [vmem:[%s15572_s1 + $0x10ec] ss:$16 sps:$4 sm:$0xff]  }
 0x30e   :  { %v11194_v53 = vld [vmem:[%s15572_s1 + $0x12ec] ss:$16 sps:$4 sm:$0xff]   ;;  %v11189_v18 = vld [vmem:[%s15572_s1 + $0x10e8] ss:$16 sps:$4 sm:$0xff]   ;;  %v11685_v58 = vld [vmem:[%s15573_s0 + $0x44] ss:$144 sps:$4 sm:$0xff]  }
 0x30f   :  { %8178 = vmatpush1.bf16.msra.mxu0 %v11111_v60  ;;  %v11192_v29 = vld [vmem:[%s15572_s1 + $0x12e8] ss:$16 sps:$4 sm:$0xff]   ;;  %v11197_v55 = vld [vmem:[%s15572_s1 + $0x10cc] ss:$16 sps:$4 sm:$0xff]  }
 0x310   :  { %8221 = vmatpush1.bf16.msra.mxu1 %v11114_v61  ;;  %8179 = vmatprep.subr.bf16.mxu0 %v11119_v17  ;;  %v11200_v34 = vld [vmem:[%s15572_s1 + $0x12cc] ss:$16 sps:$4 sm:$0xff]   ;;  %v11684_v3 = vld [vmem:[%s15573_s0 + $0x38] ss:$144 sps:$4 sm:$0xff]  }
 0x311   :  { %8222 = vmatprep.subr.bf16.mxu1 %v11122_v8  ;;  %v11195_v25 = vld [vmem:[%s15572_s1 + $0x10c8] ss:$16 sps:$4 sm:$0xff]   ;;  %v11203_v40 = vld [vmem:[%s15572_s1 + $0x10ac] ss:$16 sps:$4 sm:$0xff]  }
 0x312   :  { %v11198_v43 = vld [vmem:[%s15572_s1 + $0x12c8] ss:$16 sps:$4 sm:$0xff]   ;;  %v11206_v44 = vld [vmem:[%s15572_s1 + $0x12ac] ss:$16 sps:$4 sm:$0xff]  }
 0x313   :  { %8180 = vmatpush1.bf16.msra.mxu0 %v11117_v30  ;;  %v11686_v59 = vld [vmem:[%s15573_s0 + $0x4c] ss:$144 sps:$4 sm:$0xff]   ;;  %v11201_v60 = vld [vmem:[%s15572_s1 + $0x10a8] ss:$16 sps:$4 sm:$0xff]  }
 0x314   :  { %8223 = vmatpush1.bf16.msra.mxu1 %v11120_v6  ;;  %8181 = vmatprep.subr.bf16.mxu0 %v11125_v19  ;;  %v11204_v61 = vld [vmem:[%s15572_s1 + $0x12a8] ss:$16 sps:$4 sm:$0xff]   ;;  %v11209_v17 = vld [vmem:[%s15572_s1 + $0x108c] ss:$16 sps:$4 sm:$0xff]  }
 0x315   :  { %8224 = vmatprep.subr.bf16.mxu1 %v11128_v9  ;;  %v11212_v8 = vld [vmem:[%s15572_s1 + $0x128c] ss:$16 sps:$4 sm:$0xff]   ;;  %v11207_v30 = vld [vmem:[%s15572_s1 + $0x1088] ss:$16 sps:$4 sm:$0xff]  }
 0x316   :  { %v11210_v6 = vld [vmem:[%s15572_s1 + $0x1288] ss:$16 sps:$4 sm:$0xff]   ;;  %v11215_v19 = vld [vmem:[%s15572_s1 + $0x106c] ss:$16 sps:$4 sm:$0xff]  }
 0x317   :  { %8182 = vmatpush1.bf16.msra.mxu0 %v11123_v41  ;;  %v11218_v9 = vld [vmem:[%s15572_s1 + $0x126c] ss:$16 sps:$4 sm:$0xff]   ;;  %v11213_v41 = vld [vmem:[%s15572_s1 + $0x1068] ss:$16 sps:$4 sm:$0xff]  }
 0x318   :  { %8225 = vmatpush1.bf16.msra.mxu1 %v11126_v45  ;;  %8183 = vmatprep.subr.bf16.mxu0 %v11131_v50  ;;  %v11216_v45 = vld [vmem:[%s15572_s1 + $0x1268] ss:$16 sps:$4 sm:$0xff]   ;;  %v11221_v50 = vld [vmem:[%s15572_s1 + $0x104c] ss:$16 sps:$4 sm:$0xff]  }
 0x319   :  { %8226 = vmatprep.subr.bf16.mxu1 %v11134_v56  ;;  %v11224_v56 = vld [vmem:[%s15572_s1 + $0x124c] ss:$16 sps:$4 sm:$0xff]  }
 0x31b   :  { %8184 = vmatpush1.bf16.msra.mxu0 %v11129_v10  ;;  %v11219_v10 = vld [vmem:[%s15572_s1 + $0x1048] ss:$16 sps:$4 sm:$0xff]  }
 0x31c   :  { %8227 = vmatpush1.bf16.msra.mxu1 %v11132_v11  ;;  %8185 = vmatprep.subr.bf16.mxu0 %v11137_v21  ;;  %v11222_v11 = vld [vmem:[%s15572_s1 + $0x1248] ss:$16 sps:$4 sm:$0xff]   ;;  %v11227_v21 = vld [vmem:[%s15572_s1 + $0x102c] ss:$16 sps:$4 sm:$0xff]  }
 0x31d   :  { %8228 = vmatprep.subr.bf16.mxu1 %v11140_v24  ;;  %v11230_v24 = vld [vmem:[%s15572_s1 + $0x122c] ss:$16 sps:$4 sm:$0xff]  }
 0x31f   :  { %8186 = vmatpush1.bf16.msra.mxu0 %v11135_v23  ;;  %v11225_v23 = vld [vmem:[%s15572_s1 + $0x1028] ss:$16 sps:$4 sm:$0xff]  }
 0x320   :  { %8229 = vmatpush1.bf16.msra.mxu1 %v11138_v35  ;;  %8187 = vmatprep.subr.bf16.mxu0 %v11143_v20  ;;  %v11228_v35 = vld [vmem:[%s15572_s1 + $0x1228] ss:$16 sps:$4 sm:$0xff]   ;;  %v11233_v20 = vld [vmem:[%s15572_s1 + $0x100c] ss:$16 sps:$4 sm:$0xff]  }
 0x321   :  { %8230 = vmatprep.subr.bf16.mxu1 %v11146_v0  ;;  %v11236_v0 = vld [vmem:[%s15572_s1 + $0x120c] ss:$16 sps:$4 sm:$0xff]  }
 0x323   :  { %8188 = vmatpush2.bf16.msra.mxu0 %v11141_v51  ;;  %v11231_v51 = vld [vmem:[%s15572_s1 + $0x1008] ss:$16 sps:$4 sm:$0xff]  }
 0x324   :  { %8231 = vmatpush2.bf16.msra.mxu1 %v11144_v62  ;;  %8189 = vmatprep.subr.bf16.mxu0 %v11149_v57  ;;  %v11234_v62 = vld [vmem:[%s15572_s1 + $0x1208] ss:$16 sps:$4 sm:$0xff]   ;;  %v11239_v57 = vld [vmem:[%s15572_s1 + $0x11ec] ss:$16 sps:$4 sm:$0xff]  }
 0x325   :  { %8232 = vmatprep.subr.bf16.mxu1 %v11152_v4  ;;  %v11242_v4 = vld [vmem:[%s15572_s1 + $0x13ec] ss:$16 sps:$4 sm:$0xff]  }
 0x327   :  { %8190 = vmatpush2.bf16.msra.mxu0 %v11147_v14  ;;  %v11237_v14 = vld [vmem:[%s15572_s1 + $0x11e8] ss:$16 sps:$4 sm:$0xff]  }
 0x328   :  { %8233 = vmatpush2.bf16.msra.mxu1 %v11150_v1  ;;  %8191 = vmatprep.subr.bf16.mxu0 %v11155_v31  ;;  %v11240_v1 = vld [vmem:[%s15572_s1 + $0x13e8] ss:$16 sps:$4 sm:$0xff]   ;;  %v11245_v31 = vld [vmem:[%s15572_s1 + $0x11cc] ss:$16 sps:$4 sm:$0xff]  }
 0x329   :  { %8234 = vmatprep.subr.bf16.mxu1 %v11158_v32  ;;  %v11248_v32 = vld [vmem:[%s15572_s1 + $0x13cc] ss:$16 sps:$4 sm:$0xff]  }
 0x32b   :  { %8192 = vmatpush2.bf16.msra.mxu0 %v11153_v33  ;;  %v11243_v33 = vld [vmem:[%s15572_s1 + $0x11c8] ss:$16 sps:$4 sm:$0xff]  }
 0x32c   :  { %8235 = vmatpush2.bf16.msra.mxu1 %v11156_v36  ;;  %8193 = vmatprep.subr.bf16.mxu0 %v11161_v37  ;;  %v11246_v36 = vld [vmem:[%s15572_s1 + $0x13c8] ss:$16 sps:$4 sm:$0xff]   ;;  %v11251_v37 = vld [vmem:[%s15572_s1 + $0x11ac] ss:$16 sps:$4 sm:$0xff]  }
 0x32d   :  { %8236 = vmatprep.subr.bf16.mxu1 %v11164_v42  ;;  %v11254_v42 = vld [vmem:[%s15572_s1 + $0x13ac] ss:$16 sps:$4 sm:$0xff]  }
 0x32f   :  { %8194 = vmatpush2.bf16.msra.mxu0 %v11159_v63  ;;  %v11249_v63 = vld [vmem:[%s15572_s1 + $0x11a8] ss:$16 sps:$4 sm:$0xff]  }
 0x330   :  { %8237 = vmatpush2.bf16.msra.mxu1 %v11162_v5  ;;  %8195 = vmatprep.subr.bf16.mxu0 %v11167_v15  ;;  %v11252_v5 = vld [vmem:[%s15572_s1 + $0x13a8] ss:$16 sps:$4 sm:$0xff]   ;;  %v11257_v15 = vld [vmem:[%s15572_s1 + $0x118c] ss:$16 sps:$4 sm:$0xff]  }
 0x331   :  { %8238 = vmatprep.subr.bf16.mxu1 %v11170_v26  ;;  %v11260_v26 = vld [vmem:[%s15572_s1 + $0x138c] ss:$16 sps:$4 sm:$0xff]  }
 0x333   :  { %8196 = vmatpush2.bf16.msra.mxu0 %v11165_v38  ;;  %v11255_v38 = vld [vmem:[%s15572_s1 + $0x1188] ss:$16 sps:$4 sm:$0xff]  }
 0x334   :  { %8239 = vmatpush2.bf16.msra.mxu1 %v11168_v46  ;;  %8197 = vmatprep.subr.bf16.mxu0 %v11173_v7  ;;  %v11258_v46 = vld [vmem:[%s15572_s1 + $0x1388] ss:$16 sps:$4 sm:$0xff]   ;;  %v11263_v7 = vld [vmem:[%s15572_s1 + $0x116c] ss:$16 sps:$4 sm:$0xff]  }
 0x335   :  { %8240 = vmatprep.subr.bf16.mxu1 %v11176_v12  ;;  %v11266_v12 = vld [vmem:[%s15572_s1 + $0x136c] ss:$16 sps:$4 sm:$0xff]  }
 0x337   :  { %8198 = vmatpush2.bf16.msra.mxu0 %v11171_v13  ;;  %v11261_v13 = vld [vmem:[%s15572_s1 + $0x1168] ss:$16 sps:$4 sm:$0xff]  }
 0x338   :  { %8241 = vmatpush2.bf16.msra.mxu1 %v11174_v22  ;;  %8199 = vmatprep.subr.bf16.mxu0 %v11179_v28  ;;  %v11264_v22 = vld [vmem:[%s15572_s1 + $0x1368] ss:$16 sps:$4 sm:$0xff]   ;;  %v11269_v28 = vld [vmem:[%s15572_s1 + $0x114c] ss:$16 sps:$4 sm:$0xff]  }
 0x339   :  { %8242 = vmatprep.subr.bf16.mxu1 %v11182_v27  ;;  %v11272_v27 = vld [vmem:[%s15572_s1 + $0x134c] ss:$16 sps:$4 sm:$0xff]  }
 0x33b   :  { %8200 = vmatpush2.bf16.msra.mxu0 %v11177_v39  ;;  %v11267_v39 = vld [vmem:[%s15572_s1 + $0x1148] ss:$16 sps:$4 sm:$0xff]  }
 0x33c   :  { %8243 = vmatpush2.bf16.msra.mxu1 %v11180_v47  ;;  %8201 = vmatprep.subr.bf16.mxu0 %v11185_v54  ;;  %v11270_v47 = vld [vmem:[%s15572_s1 + $0x1348] ss:$16 sps:$4 sm:$0xff]   ;;  %v11275_v54 = vld [vmem:[%s15572_s1 + $0x112c] ss:$16 sps:$4 sm:$0xff]  }
 0x33d   :  { %8244 = vmatprep.subr.bf16.mxu1 %v11188_v2  ;;  %v11278_v2 = vld [vmem:[%s15572_s1 + $0x132c] ss:$16 sps:$4 sm:$0xff]  }
 0x33f   :  { %8202 = vmatpush2.bf16.msra.mxu0 %v11183_v48  ;;  %v11273_v48 = vld [vmem:[%s15572_s1 + $0x1128] ss:$16 sps:$4 sm:$0xff]  }
 0x340   :  { %8245 = vmatpush2.bf16.msra.mxu1 %v11186_v49  ;;  %8257 = vmatprep.subr.bf16.mxu0 %v11191_v52  ;;  %v11276_v49 = vld [vmem:[%s15572_s1 + $0x1328] ss:$16 sps:$4 sm:$0xff]   ;;  %v11281_v52 = vld [vmem:[%s15572_s1 + $0x110c] ss:$16 sps:$4 sm:$0xff]  }
 0x341   :  { %8300 = vmatprep.subr.bf16.mxu1 %v11194_v53  ;;  %v11284_v53 = vld [vmem:[%s15572_s1 + $0x130c] ss:$16 sps:$4 sm:$0xff]  }
 0x342   :  { %8204 = vmatmul.mubr.bf16.vlgmr.msra.gmra.mxu0 %v11683_v16  ;;  %v11285_v16 = vld [vmem:[%s15572_s1 + $0x14e8] ss:$16 sps:$4 sm:$0xff]  }
 0x343   :  { %8247 = vmatmul.mubr.bf16.vlgmr.msra.gmra.mxu1 %v11684_v3  ;;  %8258 = vmatpush1.bf16.msra.mxu0 %v11189_v18  ;;  %v11279_v18 = vld [vmem:[%s15572_s1 + $0x1108] ss:$16 sps:$4 sm:$0xff]  }
 0x344   :  { %8301 = vmatpush1.bf16.msra.mxu1 %v11192_v29  ;;  %8259 = vmatprep.subr.bf16.mxu0 %v11197_v55  ;;  %v11282_v29 = vld [vmem:[%s15572_s1 + $0x1308] ss:$16 sps:$4 sm:$0xff]   ;;  %v11287_v55 = vld [vmem:[%s15572_s1 + $0x14ec] ss:$16 sps:$4 sm:$0xff]  }
 0x345   :  { %8302 = vmatprep.subr.bf16.mxu1 %v11200_v34  ;;  %8289 = vmatprep.mubr.bf16.mxu0 %v11685_v58  ;;  %v11290_v34 = vld [vmem:[%s15572_s1 + $0x16ec] ss:$16 sps:$4 sm:$0xff]   ;;  %v11288_v3 = vld [vmem:[%s15572_s1 + $0x16e8] ss:$16 sps:$4 sm:$0xff]  }
 0x346   :  { %8332 = vmatprep.mubr.bf16.mxu1 %v11686_v59  ;;  %v11291_v58 = vld [vmem:[%s15572_s1 + $0x14c8] ss:$16 sps:$4 sm:$0xff]  }
 0x347   :  { %8260 = vmatpush1.bf16.msra.mxu0 %v11195_v25  ;;  %v11293_v25 = vld [vmem:[%s15572_s1 + $0x14cc] ss:$16 sps:$4 sm:$0xff]   ;;  %v11294_v59 = vld [vmem:[%s15572_s1 + $0x16c8] ss:$16 sps:$4 sm:$0xff]  }
 0x348   :  { %8303 = vmatpush1.bf16.msra.mxu1 %v11198_v43  ;;  %8261 = vmatprep.subr.bf16.mxu0 %v11203_v40  ;;  %v11296_v43 = vld [vmem:[%s15572_s1 + $0x16cc] ss:$16 sps:$4 sm:$0xff]   ;;  %v11687_v40 = vld [vmem:[%s15573_s0 + $0x40] ss:$144 sps:$4 sm:$0xff]  }
 0x349   :  { %8304 = vmatprep.subr.bf16.mxu1 %v11206_v44  ;;  %v11688_v44 = vld [vmem:[%s15573_s0 + $0x48] ss:$144 sps:$4 sm:$0xff]  }
 0x34b   :  { %8262 = vmatpush1.bf16.msra.mxu0 %v11201_v60  ;;  %v11299_v60 = vld [vmem:[%s15572_s1 + $0x14ac] ss:$16 sps:$4 sm:$0xff]  }
 0x34c   :  { %8305 = vmatpush1.bf16.msra.mxu1 %v11204_v61  ;;  %8263 = vmatprep.subr.bf16.mxu0 %v11209_v17  ;;  %v11302_v61 = vld [vmem:[%s15572_s1 + $0x16ac] ss:$16 sps:$4 sm:$0xff]   ;;  %v11689_v17 = vld [vmem:[%s15573_s0 + $0x54] ss:$144 sps:$4 sm:$0xff]  }
 0x34d   :  { %8306 = vmatprep.subr.bf16.mxu1 %v11212_v8  ;;  %v11690_v8 = vld [vmem:[%s15573_s0 + $0x5c] ss:$144 sps:$4 sm:$0xff]  }
 0x34f   :  { %8264 = vmatpush1.bf16.msra.mxu0 %v11207_v30  ;;  %v11297_v30 = vld [vmem:[%s15572_s1 + $0x14a8] ss:$16 sps:$4 sm:$0xff]  }
 0x350   :  { %8307 = vmatpush1.bf16.msra.mxu1 %v11210_v6  ;;  %8265 = vmatprep.subr.bf16.mxu0 %v11215_v19  ;;  %v11300_v6 = vld [vmem:[%s15572_s1 + $0x16a8] ss:$16 sps:$4 sm:$0xff]   ;;  %v11305_v19 = vld [vmem:[%s15572_s1 + $0x148c] ss:$16 sps:$4 sm:$0xff]  }
 0x351   :  { %8308 = vmatprep.subr.bf16.mxu1 %v11218_v9  ;;  %v11308_v9 = vld [vmem:[%s15572_s1 + $0x168c] ss:$16 sps:$4 sm:$0xff]  }
 0x353   :  { %8266 = vmatpush1.bf16.msra.mxu0 %v11213_v41  ;;  %v11303_v41 = vld [vmem:[%s15572_s1 + $0x1488] ss:$16 sps:$4 sm:$0xff]  }
 0x354   :  { %8309 = vmatpush1.bf16.msra.mxu1 %v11216_v45  ;;  %8267 = vmatprep.subr.bf16.mxu0 %v11221_v50  ;;  %v11306_v45 = vld [vmem:[%s15572_s1 + $0x1688] ss:$16 sps:$4 sm:$0xff]   ;;  %v11311_v50 = vld [vmem:[%s15572_s1 + $0x146c] ss:$16 sps:$4 sm:$0xff]  }
 0x355   :  { %8310 = vmatprep.subr.bf16.mxu1 %v11224_v56  ;;  %v11314_v56 = vld [vmem:[%s15572_s1 + $0x166c] ss:$16 sps:$4 sm:$0xff]  }
 0x357   :  { %8268 = vmatpush1.bf16.msra.mxu0 %v11219_v10  ;;  %v11309_v10 = vld [vmem:[%s15572_s1 + $0x1468] ss:$16 sps:$4 sm:$0xff]  }
 0x358   :  { %8311 = vmatpush1.bf16.msra.mxu1 %v11222_v11  ;;  %8269 = vmatprep.subr.bf16.mxu0 %v11227_v21  ;;  %v11312_v11 = vld [vmem:[%s15572_s1 + $0x1668] ss:$16 sps:$4 sm:$0xff]   ;;  %v11317_v21 = vld [vmem:[%s15572_s1 + $0x144c] ss:$16 sps:$4 sm:$0xff]  }
 0x359   :  { %8312 = vmatprep.subr.bf16.mxu1 %v11230_v24  ;;  %v11320_v24 = vld [vmem:[%s15572_s1 + $0x164c] ss:$16 sps:$4 sm:$0xff]  }
 0x35b   :  { %8270 = vmatpush1.bf16.msra.mxu0 %v11225_v23  ;;  %v11315_v23 = vld [vmem:[%s15572_s1 + $0x1448] ss:$16 sps:$4 sm:$0xff]  }
 0x35c   :  { %8313 = vmatpush1.bf16.msra.mxu1 %v11228_v35  ;;  %8271 = vmatprep.subr.bf16.mxu0 %v11233_v20  ;;  %v11318_v35 = vld [vmem:[%s15572_s1 + $0x1648] ss:$16 sps:$4 sm:$0xff]   ;;  %v11323_v20 = vld [vmem:[%s15572_s1 + $0x142c] ss:$16 sps:$4 sm:$0xff]  }
 0x35d   :  { %8314 = vmatprep.subr.bf16.mxu1 %v11236_v0  ;;  %v11326_v0 = vld [vmem:[%s15572_s1 + $0x162c] ss:$16 sps:$4 sm:$0xff]  }
 0x35f   :  { %8272 = vmatpush1.bf16.msra.mxu0 %v11231_v51  ;;  %v11321_v51 = vld [vmem:[%s15572_s1 + $0x1428] ss:$16 sps:$4 sm:$0xff]  }
 0x360   :  { %8315 = vmatpush1.bf16.msra.mxu1 %v11234_v62  ;;  %8273 = vmatprep.subr.bf16.mxu0 %v11239_v57  ;;  %v11324_v62 = vld [vmem:[%s15572_s1 + $0x1628] ss:$16 sps:$4 sm:$0xff]   ;;  %v11329_v57 = vld [vmem:[%s15572_s1 + $0x140c] ss:$16 sps:$4 sm:$0xff]  }
 0x361   :  { %8316 = vmatprep.subr.bf16.mxu1 %v11242_v4  ;;  %v11332_v4 = vld [vmem:[%s15572_s1 + $0x160c] ss:$16 sps:$4 sm:$0xff]  }
 0x363   :  { %8274 = vmatpush2.bf16.msra.mxu0 %v11237_v14  ;;  %v11327_v14 = vld [vmem:[%s15572_s1 + $0x1408] ss:$16 sps:$4 sm:$0xff]  }
 0x364   :  { %8317 = vmatpush2.bf16.msra.mxu1 %v11240_v1  ;;  %8275 = vmatprep.subr.bf16.mxu0 %v11245_v31  ;;  %v11330_v1 = vld [vmem:[%s15572_s1 + $0x1608] ss:$16 sps:$4 sm:$0xff]   ;;  %v11335_v31 = vld [vmem:[%s15572_s1 + $0x15ec] ss:$16 sps:$4 sm:$0xff]  }
 0x365   :  { %8318 = vmatprep.subr.bf16.mxu1 %v11248_v32  ;;  %v11338_v32 = vld [vmem:[%s15572_s1 + $0x17ec] ss:$16 sps:$4 sm:$0xff]  }
 0x367   :  { %8276 = vmatpush2.bf16.msra.mxu0 %v11243_v33  ;;  %v11333_v33 = vld [vmem:[%s15572_s1 + $0x15e8] ss:$16 sps:$4 sm:$0xff]  }
 0x368   :  { %8319 = vmatpush2.bf16.msra.mxu1 %v11246_v36  ;;  %8277 = vmatprep.subr.bf16.mxu0 %v11251_v37  ;;  %v11336_v36 = vld [vmem:[%s15572_s1 + $0x17e8] ss:$16 sps:$4 sm:$0xff]   ;;  %v11341_v37 = vld [vmem:[%s15572_s1 + $0x15cc] ss:$16 sps:$4 sm:$0xff]  }
 0x369   :  { %8320 = vmatprep.subr.bf16.mxu1 %v11254_v42  ;;  %v11344_v42 = vld [vmem:[%s15572_s1 + $0x17cc] ss:$16 sps:$4 sm:$0xff]  }
 0x36b   :  { %8278 = vmatpush2.bf16.msra.mxu0 %v11249_v63  ;;  %v11339_v63 = vld [vmem:[%s15572_s1 + $0x15c8] ss:$16 sps:$4 sm:$0xff]  }
 0x36c   :  { %8321 = vmatpush2.bf16.msra.mxu1 %v11252_v5  ;;  %8279 = vmatprep.subr.bf16.mxu0 %v11257_v15  ;;  %v11342_v5 = vld [vmem:[%s15572_s1 + $0x17c8] ss:$16 sps:$4 sm:$0xff]   ;;  %v11347_v15 = vld [vmem:[%s15572_s1 + $0x15ac] ss:$16 sps:$4 sm:$0xff]  }
 0x36d   :  { %8322 = vmatprep.subr.bf16.mxu1 %v11260_v26  ;;  %v11350_v26 = vld [vmem:[%s15572_s1 + $0x17ac] ss:$16 sps:$4 sm:$0xff]  }
 0x36f   :  { %8280 = vmatpush2.bf16.msra.mxu0 %v11255_v38  ;;  %v11345_v38 = vld [vmem:[%s15572_s1 + $0x15a8] ss:$16 sps:$4 sm:$0xff]  }
 0x370   :  { %8323 = vmatpush2.bf16.msra.mxu1 %v11258_v46  ;;  %8281 = vmatprep.subr.bf16.mxu0 %v11263_v7  ;;  %v11348_v46 = vld [vmem:[%s15572_s1 + $0x17a8] ss:$16 sps:$4 sm:$0xff]   ;;  %v11353_v7 = vld [vmem:[%s15572_s1 + $0x158c] ss:$16 sps:$4 sm:$0xff]  }
 0x371   :  { %8324 = vmatprep.subr.bf16.mxu1 %v11266_v12  ;;  %v11356_v12 = vld [vmem:[%s15572_s1 + $0x178c] ss:$16 sps:$4 sm:$0xff]  }
 0x373   :  { %8282 = vmatpush2.bf16.msra.mxu0 %v11261_v13  ;;  %v11351_v13 = vld [vmem:[%s15572_s1 + $0x1588] ss:$16 sps:$4 sm:$0xff]  }
 0x374   :  { %8325 = vmatpush2.bf16.msra.mxu1 %v11264_v22  ;;  %8283 = vmatprep.subr.bf16.mxu0 %v11269_v28  ;;  %v11354_v22 = vld [vmem:[%s15572_s1 + $0x1788] ss:$16 sps:$4 sm:$0xff]   ;;  %v11359_v28 = vld [vmem:[%s15572_s1 + $0x156c] ss:$16 sps:$4 sm:$0xff]  }
 0x375   :  { %8326 = vmatprep.subr.bf16.mxu1 %v11272_v27  ;;  %v11362_v27 = vld [vmem:[%s15572_s1 + $0x176c] ss:$16 sps:$4 sm:$0xff]  }
 0x377   :  { %8284 = vmatpush2.bf16.msra.mxu0 %v11267_v39  ;;  %v11357_v39 = vld [vmem:[%s15572_s1 + $0x1568] ss:$16 sps:$4 sm:$0xff]  }
 0x378   :  { %8327 = vmatpush2.bf16.msra.mxu1 %v11270_v47  ;;  %8285 = vmatprep.subr.bf16.mxu0 %v11275_v54  ;;  %v11360_v47 = vld [vmem:[%s15572_s1 + $0x1768] ss:$16 sps:$4 sm:$0xff]   ;;  %v11365_v54 = vld [vmem:[%s15572_s1 + $0x154c] ss:$16 sps:$4 sm:$0xff]  }
 0x379   :  { %8328 = vmatprep.subr.bf16.mxu1 %v11278_v2  ;;  %v11368_v2 = vld [vmem:[%s15572_s1 + $0x174c] ss:$16 sps:$4 sm:$0xff]  }
 0x37b   :  { %8286 = vmatpush2.bf16.msra.mxu0 %v11273_v48  ;;  %v11363_v48 = vld [vmem:[%s15572_s1 + $0x1548] ss:$16 sps:$4 sm:$0xff]  }
 0x37c   :  { %8329 = vmatpush2.bf16.msra.mxu1 %v11276_v49  ;;  %8287 = vmatprep.subr.bf16.mxu0 %v11281_v52  ;;  %v11366_v49 = vld [vmem:[%s15572_s1 + $0x1748] ss:$16 sps:$4 sm:$0xff]   ;;  %v11371_v52 = vld [vmem:[%s15572_s1 + $0x152c] ss:$16 sps:$4 sm:$0xff]  }
 0x37d   :  { %8330 = vmatprep.subr.bf16.mxu1 %v11284_v53  ;;  %v11374_v53 = vld [vmem:[%s15572_s1 + $0x172c] ss:$16 sps:$4 sm:$0xff]  }
 0x37f   :  { %8288 = vmatpush2.bf16.msra.mxu0 %v11279_v18  ;;  %v11369_v18 = vld [vmem:[%s15572_s1 + $0x1528] ss:$16 sps:$4 sm:$0xff]  }
 0x380   :  { %8331 = vmatpush2.bf16.msra.mxu1 %v11282_v29  ;;  %8343 = vmatprep.subr.bf16.mxu0 %v11287_v55  ;;  %v11372_v29 = vld [vmem:[%s15572_s1 + $0x1728] ss:$16 sps:$4 sm:$0xff]   ;;  %v11377_v55 = vld [vmem:[%s15572_s1 + $0x150c] ss:$16 sps:$4 sm:$0xff]  }
 0x381   :  { %8386 = vmatprep.subr.bf16.mxu1 %v11290_v34  ;;  %v11380_v34 = vld [vmem:[%s15572_s1 + $0x170c] ss:$16 sps:$4 sm:$0xff]  }
 0x382   :  { %8290 = vmatmul.mubr.bf16.vlgmr.msra.gmra.mxu0 %v11687_v40  ;;  %v11381_v40 = vld [vmem:[%s15572_s1 + $0x18e8] ss:$16 sps:$4 sm:$0xff]  }
 0x383   :  { %8333 = vmatmul.mubr.bf16.vlgmr.msra.gmra.mxu1 %v11688_v44  ;;  %8344 = vmatpush1.bf16.msra.mxu0 %v11285_v16  ;;  %v11375_v16 = vld [vmem:[%s15572_s1 + $0x1508] ss:$16 sps:$4 sm:$0xff]  }
 0x384   :  { %8387 = vmatpush1.bf16.msra.mxu1 %v11288_v3  ;;  %8345 = vmatprep.subr.bf16.mxu0 %v11293_v25  ;;  %v11378_v3 = vld [vmem:[%s15572_s1 + $0x1708] ss:$16 sps:$4 sm:$0xff]   ;;  %v11383_v25 = vld [vmem:[%s15572_s1 + $0x18ec] ss:$16 sps:$4 sm:$0xff]  }
 0x385   :  { %8388 = vmatprep.subr.bf16.mxu1 %v11296_v43  ;;  %8375 = vmatprep.mubr.bf16.mxu0 %v11689_v17  ;;  %v11386_v43 = vld [vmem:[%s15572_s1 + $0x1aec] ss:$16 sps:$4 sm:$0xff]   ;;  %v11384_v44 = vld [vmem:[%s15572_s1 + $0x1ae8] ss:$16 sps:$4 sm:$0xff]  }
 0x386   :  { %8418 = vmatprep.mubr.bf16.mxu1 %v11690_v8  ;;  %v11387_v17 = vld [vmem:[%s15572_s1 + $0x18c8] ss:$16 sps:$4 sm:$0xff]  }
 0x387   :  { %8346 = vmatpush1.bf16.msra.mxu0 %v11291_v58  ;;  %v11389_v58 = vld [vmem:[%s15572_s1 + $0x18cc] ss:$16 sps:$4 sm:$0xff]   ;;  %v11390_v8 = vld [vmem:[%s15572_s1 + $0x1ac8] ss:$16 sps:$4 sm:$0xff]  }
 0x388   :  { %8389 = vmatpush1.bf16.msra.mxu1 %v11294_v59  ;;  %8347 = vmatprep.subr.bf16.mxu0 %v11299_v60  ;;  %v11392_v59 = vld [vmem:[%s15572_s1 + $0x1acc] ss:$16 sps:$4 sm:$0xff]   ;;  %v11691_v60 = vld [vmem:[%s15573_s0 + $0x50] ss:$144 sps:$4 sm:$0xff]  }
 0x389   :  { %8390 = vmatprep.subr.bf16.mxu1 %v11302_v61  ;;  %v11692_v61 = vld [vmem:[%s15573_s0 + $0x58] ss:$144 sps:$4 sm:$0xff]  }
 0x38b   :  { %8348 = vmatpush1.bf16.msra.mxu0 %v11297_v30  ;;  %v11395_v30 = vld [vmem:[%s15572_s1 + $0x18ac] ss:$16 sps:$4 sm:$0xff]  }
 0x38c   :  { %8391 = vmatpush1.bf16.msra.mxu1 %v11300_v6  ;;  %8349 = vmatprep.subr.bf16.mxu0 %v11305_v19  ;;  %v11398_v6 = vld [vmem:[%s15572_s1 + $0x1aac] ss:$16 sps:$4 sm:$0xff]   ;;  %v11693_v19 = vld [vmem:[%s15573_s0 + $0x64] ss:$144 sps:$4 sm:$0xff]  }
 0x38d   :  { %8392 = vmatprep.subr.bf16.mxu1 %v11308_v9  ;;  %v11694_v9 = vld [vmem:[%s15573_s0 + $0x6c] ss:$144 sps:$4 sm:$0xff]  }
 0x38f   :  { %8350 = vmatpush1.bf16.msra.mxu0 %v11303_v41  ;;  %v11393_v41 = vld [vmem:[%s15572_s1 + $0x18a8] ss:$16 sps:$4 sm:$0xff]  }
 0x390   :  { %8393 = vmatpush1.bf16.msra.mxu1 %v11306_v45  ;;  %8351 = vmatprep.subr.bf16.mxu0 %v11311_v50  ;;  %v11396_v45 = vld [vmem:[%s15572_s1 + $0x1aa8] ss:$16 sps:$4 sm:$0xff]   ;;  %v11401_v50 = vld [vmem:[%s15572_s1 + $0x188c] ss:$16 sps:$4 sm:$0xff]  }
 0x391   :  { %8394 = vmatprep.subr.bf16.mxu1 %v11314_v56  ;;  %v11404_v56 = vld [vmem:[%s15572_s1 + $0x1a8c] ss:$16 sps:$4 sm:$0xff]  }
 0x393   :  { %8352 = vmatpush1.bf16.msra.mxu0 %v11309_v10  ;;  %v11399_v10 = vld [vmem:[%s15572_s1 + $0x1888] ss:$16 sps:$4 sm:$0xff]  }
 0x394   :  { %8395 = vmatpush1.bf16.msra.mxu1 %v11312_v11  ;;  %8353 = vmatprep.subr.bf16.mxu0 %v11317_v21  ;;  %v11402_v11 = vld [vmem:[%s15572_s1 + $0x1a88] ss:$16 sps:$4 sm:$0xff]   ;;  %v11407_v21 = vld [vmem:[%s15572_s1 + $0x186c] ss:$16 sps:$4 sm:$0xff]  }
 0x395   :  { %8396 = vmatprep.subr.bf16.mxu1 %v11320_v24  ;;  %v11410_v24 = vld [vmem:[%s15572_s1 + $0x1a6c] ss:$16 sps:$4 sm:$0xff]  }
 0x397   :  { %8354 = vmatpush1.bf16.msra.mxu0 %v11315_v23  ;;  %v11405_v23 = vld [vmem:[%s15572_s1 + $0x1868] ss:$16 sps:$4 sm:$0xff]  }
 0x398   :  { %8397 = vmatpush1.bf16.msra.mxu1 %v11318_v35  ;;  %8355 = vmatprep.subr.bf16.mxu0 %v11323_v20  ;;  %v11408_v35 = vld [vmem:[%s15572_s1 + $0x1a68] ss:$16 sps:$4 sm:$0xff]   ;;  %v11413_v20 = vld [vmem:[%s15572_s1 + $0x184c] ss:$16 sps:$4 sm:$0xff]  }
 0x399   :  { %8398 = vmatprep.subr.bf16.mxu1 %v11326_v0  ;;  %v11416_v0 = vld [vmem:[%s15572_s1 + $0x1a4c] ss:$16 sps:$4 sm:$0xff]  }
 0x39b   :  { %8356 = vmatpush1.bf16.msra.mxu0 %v11321_v51  ;;  %v11411_v51 = vld [vmem:[%s15572_s1 + $0x1848] ss:$16 sps:$4 sm:$0xff]  }
 0x39c   :  { %8399 = vmatpush1.bf16.msra.mxu1 %v11324_v62  ;;  %8357 = vmatprep.subr.bf16.mxu0 %v11329_v57  ;;  %v11414_v62 = vld [vmem:[%s15572_s1 + $0x1a48] ss:$16 sps:$4 sm:$0xff]   ;;  %v11419_v57 = vld [vmem:[%s15572_s1 + $0x182c] ss:$16 sps:$4 sm:$0xff]  }
 0x39d   :  { %8400 = vmatprep.subr.bf16.mxu1 %v11332_v4  ;;  %v11422_v4 = vld [vmem:[%s15572_s1 + $0x1a2c] ss:$16 sps:$4 sm:$0xff]  }
 0x39f   :  { %8358 = vmatpush1.bf16.msra.mxu0 %v11327_v14  ;;  %v11417_v14 = vld [vmem:[%s15572_s1 + $0x1828] ss:$16 sps:$4 sm:$0xff]  }
 0x3a0   :  { %8401 = vmatpush1.bf16.msra.mxu1 %v11330_v1  ;;  %8359 = vmatprep.subr.bf16.mxu0 %v11335_v31  ;;  %v11420_v1 = vld [vmem:[%s15572_s1 + $0x1a28] ss:$16 sps:$4 sm:$0xff]   ;;  %v11425_v31 = vld [vmem:[%s15572_s1 + $0x180c] ss:$16 sps:$4 sm:$0xff]  }
 0x3a1   :  { %8402 = vmatprep.subr.bf16.mxu1 %v11338_v32  ;;  %v11428_v32 = vld [vmem:[%s15572_s1 + $0x1a0c] ss:$16 sps:$4 sm:$0xff]  }
 0x3a3   :  { %8360 = vmatpush2.bf16.msra.mxu0 %v11333_v33  ;;  %v11423_v33 = vld [vmem:[%s15572_s1 + $0x1808] ss:$16 sps:$4 sm:$0xff]  }
 0x3a4   :  { %8403 = vmatpush2.bf16.msra.mxu1 %v11336_v36  ;;  %8361 = vmatprep.subr.bf16.mxu0 %v11341_v37  ;;  %v11426_v36 = vld [vmem:[%s15572_s1 + $0x1a08] ss:$16 sps:$4 sm:$0xff]   ;;  %v11431_v37 = vld [vmem:[%s15572_s1 + $0x19ec] ss:$16 sps:$4 sm:$0xff]  }
 0x3a5   :  { %8404 = vmatprep.subr.bf16.mxu1 %v11344_v42  ;;  %v11434_v42 = vld [vmem:[%s15572_s1 + $0x1bec] ss:$16 sps:$4 sm:$0xff]  }
 0x3a7   :  { %8362 = vmatpush2.bf16.msra.mxu0 %v11339_v63  ;;  %v11429_v63 = vld [vmem:[%s15572_s1 + $0x19e8] ss:$16 sps:$4 sm:$0xff]  }
 0x3a8   :  { %8405 = vmatpush2.bf16.msra.mxu1 %v11342_v5  ;;  %8363 = vmatprep.subr.bf16.mxu0 %v11347_v15  ;;  %v11432_v5 = vld [vmem:[%s15572_s1 + $0x1be8] ss:$16 sps:$4 sm:$0xff]   ;;  %v11437_v15 = vld [vmem:[%s15572_s1 + $0x19cc] ss:$16 sps:$4 sm:$0xff]  }
 0x3a9   :  { %8406 = vmatprep.subr.bf16.mxu1 %v11350_v26  ;;  %v11440_v26 = vld [vmem:[%s15572_s1 + $0x1bcc] ss:$16 sps:$4 sm:$0xff]  }
 0x3ab   :  { %8364 = vmatpush2.bf16.msra.mxu0 %v11345_v38  ;;  %v11435_v38 = vld [vmem:[%s15572_s1 + $0x19c8] ss:$16 sps:$4 sm:$0xff]  }
 0x3ac   :  { %8407 = vmatpush2.bf16.msra.mxu1 %v11348_v46  ;;  %8365 = vmatprep.subr.bf16.mxu0 %v11353_v7  ;;  %v11438_v46 = vld [vmem:[%s15572_s1 + $0x1bc8] ss:$16 sps:$4 sm:$0xff]   ;;  %v11443_v7 = vld [vmem:[%s15572_s1 + $0x19ac] ss:$16 sps:$4 sm:$0xff]  }
 0x3ad   :  { %8408 = vmatprep.subr.bf16.mxu1 %v11356_v12  ;;  %v11446_v12 = vld [vmem:[%s15572_s1 + $0x1bac] ss:$16 sps:$4 sm:$0xff]  }
 0x3af   :  { %8366 = vmatpush2.bf16.msra.mxu0 %v11351_v13  ;;  %v11441_v13 = vld [vmem:[%s15572_s1 + $0x19a8] ss:$16 sps:$4 sm:$0xff]  }
 0x3b0   :  { %8409 = vmatpush2.bf16.msra.mxu1 %v11354_v22  ;;  %8367 = vmatprep.subr.bf16.mxu0 %v11359_v28  ;;  %v11444_v22 = vld [vmem:[%s15572_s1 + $0x1ba8] ss:$16 sps:$4 sm:$0xff]   ;;  %v11449_v28 = vld [vmem:[%s15572_s1 + $0x198c] ss:$16 sps:$4 sm:$0xff]  }
 0x3b1   :  { %8410 = vmatprep.subr.bf16.mxu1 %v11362_v27  ;;  %v11452_v27 = vld [vmem:[%s15572_s1 + $0x1b8c] ss:$16 sps:$4 sm:$0xff]  }
 0x3b3   :  { %8368 = vmatpush2.bf16.msra.mxu0 %v11357_v39  ;;  %v11447_v39 = vld [vmem:[%s15572_s1 + $0x1988] ss:$16 sps:$4 sm:$0xff]  }
 0x3b4   :  { %8411 = vmatpush2.bf16.msra.mxu1 %v11360_v47  ;;  %8369 = vmatprep.subr.bf16.mxu0 %v11365_v54  ;;  %v11450_v47 = vld [vmem:[%s15572_s1 + $0x1b88] ss:$16 sps:$4 sm:$0xff]   ;;  %v11455_v54 = vld [vmem:[%s15572_s1 + $0x196c] ss:$16 sps:$4 sm:$0xff]  }
 0x3b5   :  { %8412 = vmatprep.subr.bf16.mxu1 %v11368_v2  ;;  %v11458_v2 = vld [vmem:[%s15572_s1 + $0x1b6c] ss:$16 sps:$4 sm:$0xff]  }
 0x3b7   :  { %8370 = vmatpush2.bf16.msra.mxu0 %v11363_v48  ;;  %v11453_v48 = vld [vmem:[%s15572_s1 + $0x1968] ss:$16 sps:$4 sm:$0xff]  }
 0x3b8   :  { %8413 = vmatpush2.bf16.msra.mxu1 %v11366_v49  ;;  %8371 = vmatprep.subr.bf16.mxu0 %v11371_v52  ;;  %v11456_v49 = vld [vmem:[%s15572_s1 + $0x1b68] ss:$16 sps:$4 sm:$0xff]   ;;  %v11461_v52 = vld [vmem:[%s15572_s1 + $0x194c] ss:$16 sps:$4 sm:$0xff]  }
 0x3b9   :  { %8414 = vmatprep.subr.bf16.mxu1 %v11374_v53  ;;  %v11464_v53 = vld [vmem:[%s15572_s1 + $0x1b4c] ss:$16 sps:$4 sm:$0xff]  }
 0x3bb   :  { %8372 = vmatpush2.bf16.msra.mxu0 %v11369_v18  ;;  %v11459_v18 = vld [vmem:[%s15572_s1 + $0x1948] ss:$16 sps:$4 sm:$0xff]  }
 0x3bc   :  { %8415 = vmatpush2.bf16.msra.mxu1 %v11372_v29  ;;  %8373 = vmatprep.subr.bf16.mxu0 %v11377_v55  ;;  %v11462_v29 = vld [vmem:[%s15572_s1 + $0x1b48] ss:$16 sps:$4 sm:$0xff]   ;;  %v11467_v55 = vld [vmem:[%s15572_s1 + $0x192c] ss:$16 sps:$4 sm:$0xff]  }
 0x3bd   :  { %8416 = vmatprep.subr.bf16.mxu1 %v11380_v34  ;;  %v11470_v34 = vld [vmem:[%s15572_s1 + $0x1b2c] ss:$16 sps:$4 sm:$0xff]  }
 0x3bf   :  { %8374 = vmatpush2.bf16.msra.mxu0 %v11375_v16  ;;  %v11465_v16 = vld [vmem:[%s15572_s1 + $0x1928] ss:$16 sps:$4 sm:$0xff]  }
 0x3c0   :  { %8417 = vmatpush2.bf16.msra.mxu1 %v11378_v3  ;;  %8429 = vmatprep.subr.bf16.mxu0 %v11383_v25  ;;  %v11468_v3 = vld [vmem:[%s15572_s1 + $0x1b28] ss:$16 sps:$4 sm:$0xff]   ;;  %v11473_v25 = vld [vmem:[%s15572_s1 + $0x190c] ss:$16 sps:$4 sm:$0xff]  }
 0x3c1   :  { %8472 = vmatprep.subr.bf16.mxu1 %v11386_v43  ;;  %v11476_v43 = vld [vmem:[%s15572_s1 + $0x1b0c] ss:$16 sps:$4 sm:$0xff]  }
 0x3c2   :  { %8376 = vmatmul.mubr.bf16.vlgmr.msra.gmra.mxu0 %v11691_v60  ;;  %v11477_v60 = vld [vmem:[%s15572_s1 + $0x1ce8] ss:$16 sps:$4 sm:$0xff]  }
 0x3c3   :  { %8419 = vmatmul.mubr.bf16.vlgmr.msra.gmra.mxu1 %v11692_v61  ;;  %8430 = vmatpush1.bf16.msra.mxu0 %v11381_v40  ;;  %v11471_v40 = vld [vmem:[%s15572_s1 + $0x1908] ss:$16 sps:$4 sm:$0xff]  }
 0x3c4   :  { %8473 = vmatpush1.bf16.msra.mxu1 %v11384_v44  ;;  %8431 = vmatprep.subr.bf16.mxu0 %v11389_v58  ;;  %v11474_v44 = vld [vmem:[%s15572_s1 + $0x1b08] ss:$16 sps:$4 sm:$0xff]   ;;  %v11479_v58 = vld [vmem:[%s15572_s1 + $0x1cec] ss:$16 sps:$4 sm:$0xff]  }
 0x3c5   :  { %8474 = vmatprep.subr.bf16.mxu1 %v11392_v59  ;;  %8461 = vmatprep.mubr.bf16.mxu0 %v11693_v19  ;;  %v11482_v59 = vld [vmem:[%s15572_s1 + $0x1eec] ss:$16 sps:$4 sm:$0xff]   ;;  %v11480_v61 = vld [vmem:[%s15572_s1 + $0x1ee8] ss:$16 sps:$4 sm:$0xff]  }
 0x3c6   :  { %8504 = vmatprep.mubr.bf16.mxu1 %v11694_v9  ;;  %v11483_v19 = vld [vmem:[%s15572_s1 + $0x1cc8] ss:$16 sps:$4 sm:$0xff]  }
 0x3c7   :  { %8432 = vmatpush1.bf16.msra.mxu0 %v11387_v17  ;;  %v11485_v17 = vld [vmem:[%s15572_s1 + $0x1ccc] ss:$16 sps:$4 sm:$0xff]   ;;  %v11486_v9 = vld [vmem:[%s15572_s1 + $0x1ec8] ss:$16 sps:$4 sm:$0xff]  }
 0x3c8   :  { %8475 = vmatpush1.bf16.msra.mxu1 %v11390_v8  ;;  %8433 = vmatprep.subr.bf16.mxu0 %v11395_v30  ;;  %v11488_v8 = vld [vmem:[%s15572_s1 + $0x1ecc] ss:$16 sps:$4 sm:$0xff]   ;;  %v11695_v30 = vld [vmem:[%s15573_s0 + $0x60] ss:$144 sps:$4 sm:$0xff]  }
 0x3c9   :  { %8476 = vmatprep.subr.bf16.mxu1 %v11398_v6  ;;  %v11696_v6 = vld [vmem:[%s15573_s0 + $0x68] ss:$144 sps:$4 sm:$0xff]  }
 0x3cb   :  { %8434 = vmatpush1.bf16.msra.mxu0 %v11393_v41  ;;  %v11491_v41 = vld [vmem:[%s15572_s1 + $0x1cac] ss:$16 sps:$4 sm:$0xff]  }
 0x3cc   :  { %8477 = vmatpush1.bf16.msra.mxu1 %v11396_v45  ;;  %8435 = vmatprep.subr.bf16.mxu0 %v11401_v50  ;;  %v11494_v45 = vld [vmem:[%s15572_s1 + $0x1eac] ss:$16 sps:$4 sm:$0xff]   ;;  %v11697_v50 = vld [vmem:[%s15573_s0 + $0x74] ss:$144 sps:$4 sm:$0xff]  }
 0x3cd   :  { %8478 = vmatprep.subr.bf16.mxu1 %v11404_v56  ;;  %v11698_v56 = vld [vmem:[%s15573_s0 + $0x7c] ss:$144 sps:$4 sm:$0xff]  }
 0x3cf   :  { %8436 = vmatpush1.bf16.msra.mxu0 %v11399_v10  ;;  %v11489_v10 = vld [vmem:[%s15572_s1 + $0x1ca8] ss:$16 sps:$4 sm:$0xff]  }
 0x3d0   :  { %8479 = vmatpush1.bf16.msra.mxu1 %v11402_v11  ;;  %8437 = vmatprep.subr.bf16.mxu0 %v11407_v21  ;;  %v11492_v11 = vld [vmem:[%s15572_s1 + $0x1ea8] ss:$16 sps:$4 sm:$0xff]   ;;  %v11497_v21 = vld [vmem:[%s15572_s1 + $0x1c8c] ss:$16 sps:$4 sm:$0xff]  }
 0x3d1   :  { %8480 = vmatprep.subr.bf16.mxu1 %v11410_v24  ;;  %v11500_v24 = vld [vmem:[%s15572_s1 + $0x1e8c] ss:$16 sps:$4 sm:$0xff]  }
 0x3d3   :  { %8438 = vmatpush1.bf16.msra.mxu0 %v11405_v23  ;;  %v11495_v23 = vld [vmem:[%s15572_s1 + $0x1c88] ss:$16 sps:$4 sm:$0xff]  }
 0x3d4   :  { %8481 = vmatpush1.bf16.msra.mxu1 %v11408_v35  ;;  %8439 = vmatprep.subr.bf16.mxu0 %v11413_v20  ;;  %v11498_v35 = vld [vmem:[%s15572_s1 + $0x1e88] ss:$16 sps:$4 sm:$0xff]   ;;  %v11503_v20 = vld [vmem:[%s15572_s1 + $0x1c6c] ss:$16 sps:$4 sm:$0xff]  }
 0x3d5   :  { %8482 = vmatprep.subr.bf16.mxu1 %v11416_v0  ;;  %v11506_v0 = vld [vmem:[%s15572_s1 + $0x1e6c] ss:$16 sps:$4 sm:$0xff]  }
 0x3d7   :  { %8440 = vmatpush1.bf16.msra.mxu0 %v11411_v51  ;;  %v11501_v51 = vld [vmem:[%s15572_s1 + $0x1c68] ss:$16 sps:$4 sm:$0xff]  }
 0x3d8   :  { %8483 = vmatpush1.bf16.msra.mxu1 %v11414_v62  ;;  %8441 = vmatprep.subr.bf16.mxu0 %v11419_v57  ;;  %v11504_v62 = vld [vmem:[%s15572_s1 + $0x1e68] ss:$16 sps:$4 sm:$0xff]   ;;  %v11509_v57 = vld [vmem:[%s15572_s1 + $0x1c4c] ss:$16 sps:$4 sm:$0xff]  }
 0x3d9   :  { %8484 = vmatprep.subr.bf16.mxu1 %v11422_v4  ;;  %v11512_v4 = vld [vmem:[%s15572_s1 + $0x1e4c] ss:$16 sps:$4 sm:$0xff]  }
 0x3db   :  { %8442 = vmatpush1.bf16.msra.mxu0 %v11417_v14  ;;  %v11507_v14 = vld [vmem:[%s15572_s1 + $0x1c48] ss:$16 sps:$4 sm:$0xff]  }
 0x3dc   :  { %8485 = vmatpush1.bf16.msra.mxu1 %v11420_v1  ;;  %8443 = vmatprep.subr.bf16.mxu0 %v11425_v31  ;;  %v11510_v1 = vld [vmem:[%s15572_s1 + $0x1e48] ss:$16 sps:$4 sm:$0xff]   ;;  %v11515_v31 = vld [vmem:[%s15572_s1 + $0x1c2c] ss:$16 sps:$4 sm:$0xff]  }
 0x3dd   :  { %8486 = vmatprep.subr.bf16.mxu1 %v11428_v32  ;;  %v11518_v32 = vld [vmem:[%s15572_s1 + $0x1e2c] ss:$16 sps:$4 sm:$0xff]  }
 0x3df   :  { %8444 = vmatpush1.bf16.msra.mxu0 %v11423_v33  ;;  %v11513_v33 = vld [vmem:[%s15572_s1 + $0x1c28] ss:$16 sps:$4 sm:$0xff]  }
 0x3e0   :  { %8487 = vmatpush1.bf16.msra.mxu1 %v11426_v36  ;;  %8445 = vmatprep.subr.bf16.mxu0 %v11431_v37  ;;  %v11516_v36 = vld [vmem:[%s15572_s1 + $0x1e28] ss:$16 sps:$4 sm:$0xff]   ;;  %v11521_v37 = vld [vmem:[%s15572_s1 + $0x1c0c] ss:$16 sps:$4 sm:$0xff]  }
 0x3e1   :  { %8488 = vmatprep.subr.bf16.mxu1 %v11434_v42  ;;  %v11524_v42 = vld [vmem:[%s15572_s1 + $0x1e0c] ss:$16 sps:$4 sm:$0xff]  }
 0x3e3   :  { %8446 = vmatpush2.bf16.msra.mxu0 %v11429_v63  ;;  %v11519_v63 = vld [vmem:[%s15572_s1 + $0x1c08] ss:$16 sps:$4 sm:$0xff]  }
 0x3e4   :  { %8489 = vmatpush2.bf16.msra.mxu1 %v11432_v5  ;;  %8447 = vmatprep.subr.bf16.mxu0 %v11437_v15  ;;  %v11522_v5 = vld [vmem:[%s15572_s1 + $0x1e08] ss:$16 sps:$4 sm:$0xff]   ;;  %v11527_v15 = vld [vmem:[%s15572_s1 + $0x1dec] ss:$16 sps:$4 sm:$0xff]  }
 0x3e5   :  { %8490 = vmatprep.subr.bf16.mxu1 %v11440_v26  ;;  %v11530_v26 = vld [vmem:[%s15572_s1 + $0x1fec] ss:$16 sps:$4 sm:$0xff]  }
 0x3e7   :  { %8448 = vmatpush2.bf16.msra.mxu0 %v11435_v38  ;;  %v11525_v38 = vld [vmem:[%s15572_s1 + $0x1de8] ss:$16 sps:$4 sm:$0xff]  }
 0x3e8   :  { %8491 = vmatpush2.bf16.msra.mxu1 %v11438_v46  ;;  %8449 = vmatprep.subr.bf16.mxu0 %v11443_v7  ;;  %v11528_v46 = vld [vmem:[%s15572_s1 + $0x1fe8] ss:$16 sps:$4 sm:$0xff]   ;;  %v11533_v7 = vld [vmem:[%s15572_s1 + $0x1dcc] ss:$16 sps:$4 sm:$0xff]  }
 0x3e9   :  { %8492 = vmatprep.subr.bf16.mxu1 %v11446_v12  ;;  %v11536_v12 = vld [vmem:[%s15572_s1 + $0x1fcc] ss:$16 sps:$4 sm:$0xff]  }
 0x3eb   :  { %8450 = vmatpush2.bf16.msra.mxu0 %v11441_v13  ;;  %v11531_v13 = vld [vmem:[%s15572_s1 + $0x1dc8] ss:$16 sps:$4 sm:$0xff]  }
 0x3ec   :  { %8493 = vmatpush2.bf16.msra.mxu1 %v11444_v22  ;;  %8451 = vmatprep.subr.bf16.mxu0 %v11449_v28  ;;  %v11534_v22 = vld [vmem:[%s15572_s1 + $0x1fc8] ss:$16 sps:$4 sm:$0xff]   ;;  %v11539_v28 = vld [vmem:[%s15572_s1 + $0x1dac] ss:$16 sps:$4 sm:$0xff]  }
 0x3ed   :  { %8494 = vmatprep.subr.bf16.mxu1 %v11452_v27  ;;  %v11542_v27 = vld [vmem:[%s15572_s1 + $0x1fac] ss:$16 sps:$4 sm:$0xff]  }
 0x3ef   :  { %8452 = vmatpush2.bf16.msra.mxu0 %v11447_v39  ;;  %v11537_v39 = vld [vmem:[%s15572_s1 + $0x1da8] ss:$16 sps:$4 sm:$0xff]  }
 0x3f0   :  { %8495 = vmatpush2.bf16.msra.mxu1 %v11450_v47  ;;  %8453 = vmatprep.subr.bf16.mxu0 %v11455_v54  ;;  %v11540_v47 = vld [vmem:[%s15572_s1 + $0x1fa8] ss:$16 sps:$4 sm:$0xff]   ;;  %v11545_v54 = vld [vmem:[%s15572_s1 + $0x1d8c] ss:$16 sps:$4 sm:$0xff]  }
 0x3f1   :  { %8496 = vmatprep.subr.bf16.mxu1 %v11458_v2  ;;  %v11548_v2 = vld [vmem:[%s15572_s1 + $0x1f8c] ss:$16 sps:$4 sm:$0xff]  }
 0x3f3   :  { %8454 = vmatpush2.bf16.msra.mxu0 %v11453_v48  ;;  %v11543_v48 = vld [vmem:[%s15572_s1 + $0x1d88] ss:$16 sps:$4 sm:$0xff]  }
 0x3f4   :  { %8497 = vmatpush2.bf16.msra.mxu1 %v11456_v49  ;;  %8455 = vmatprep.subr.bf16.mxu0 %v11461_v52  ;;  %v11546_v49 = vld [vmem:[%s15572_s1 + $0x1f88] ss:$16 sps:$4 sm:$0xff]   ;;  %v11551_v52 = vld [vmem:[%s15572_s1 + $0x1d6c] ss:$16 sps:$4 sm:$0xff]  }
 0x3f5   :  { %8498 = vmatprep.subr.bf16.mxu1 %v11464_v53  ;;  %v11554_v53 = vld [vmem:[%s15572_s1 + $0x1f6c] ss:$16 sps:$4 sm:$0xff]  }
 0x3f7   :  { %8456 = vmatpush2.bf16.msra.mxu0 %v11459_v18  ;;  %v11549_v18 = vld [vmem:[%s15572_s1 + $0x1d68] ss:$16 sps:$4 sm:$0xff]  }
 0x3f8   :  { %8499 = vmatpush2.bf16.msra.mxu1 %v11462_v29  ;;  %8457 = vmatprep.subr.bf16.mxu0 %v11467_v55  ;;  %v11552_v29 = vld [vmem:[%s15572_s1 + $0x1f68] ss:$16 sps:$4 sm:$0xff]   ;;  %v11557_v55 = vld [vmem:[%s15572_s1 + $0x1d4c] ss:$16 sps:$4 sm:$0xff]  }
 0x3f9   :  { %8500 = vmatprep.subr.bf16.mxu1 %v11470_v34  ;;  %v11560_v34 = vld [vmem:[%s15572_s1 + $0x1f4c] ss:$16 sps:$4 sm:$0xff]  }
 0x3fb   :  { %8458 = vmatpush2.bf16.msra.mxu0 %v11465_v16  ;;  %v11555_v16 = vld [vmem:[%s15572_s1 + $0x1d48] ss:$16 sps:$4 sm:$0xff]  }
 0x3fc   :  { %8501 = vmatpush2.bf16.msra.mxu1 %v11468_v3  ;;  %8459 = vmatprep.subr.bf16.mxu0 %v11473_v25  ;;  %v11558_v3 = vld [vmem:[%s15572_s1 + $0x1f48] ss:$16 sps:$4 sm:$0xff]   ;;  %v11563_v25 = vld [vmem:[%s15572_s1 + $0x1d2c] ss:$16 sps:$4 sm:$0xff]  }
 0x3fd   :  { %8502 = vmatprep.subr.bf16.mxu1 %v11476_v43  ;;  %v11566_v43 = vld [vmem:[%s15572_s1 + $0x1f2c] ss:$16 sps:$4 sm:$0xff]  }
 0x3ff   :  { %8460 = vmatpush2.bf16.msra.mxu0 %v11471_v40  ;;  %v11561_v40 = vld [vmem:[%s15572_s1 + $0x1d28] ss:$16 sps:$4 sm:$0xff]  }
 0x400   :  { %8503 = vmatpush2.bf16.msra.mxu1 %v11474_v44  ;;  %8515 = vmatprep.subr.bf16.mxu0 %v11479_v58  ;;  %v11564_v44 = vld [vmem:[%s15572_s1 + $0x1f28] ss:$16 sps:$4 sm:$0xff]   ;;  %v11569_v58 = vld [vmem:[%s15572_s1 + $0x1d0c] ss:$16 sps:$4 sm:$0xff]  }
 0x401   :  { %8558 = vmatprep.subr.bf16.mxu1 %v11482_v59  ;;  %v11572_v59 = vld [vmem:[%s15572_s1 + $0x1f0c] ss:$16 sps:$4 sm:$0xff]  }
 0x402   :  { %8462 = vmatmul.mubr.bf16.vlgmr.msra.gmra.mxu0 %v11695_v30  ;;  %v11573_v30 = vld [vmem:[%s15572_s1 + $0x20e8] ss:$16 sps:$4 sm:$0xff]  }
 0x403   :  { %8505 = vmatmul.mubr.bf16.vlgmr.msra.gmra.mxu1 %v11696_v6  ;;  %8516 = vmatpush1.bf16.msra.mxu0 %v11477_v60  ;;  %v11567_v60 = vld [vmem:[%s15572_s1 + $0x1d08] ss:$16 sps:$4 sm:$0xff]  }
 0x404   :  { %8559 = vmatpush1.bf16.msra.mxu1 %v11480_v61  ;;  %8517 = vmatprep.subr.bf16.mxu0 %v11485_v17  ;;  %v11570_v61 = vld [vmem:[%s15572_s1 + $0x1f08] ss:$16 sps:$4 sm:$0xff]   ;;  %v11575_v17 = vld [vmem:[%s15572_s1 + $0x20ec] ss:$16 sps:$4 sm:$0xff]  }
 0x405   :  { %8560 = vmatprep.subr.bf16.mxu1 %v11488_v8  ;;  %8547 = vmatprep.mubr.bf16.mxu0 %v11697_v50  ;;  %v11578_v8 = vld [vmem:[%s15572_s1 + $0x22ec] ss:$16 sps:$4 sm:$0xff]   ;;  %v11576_v6 = vld [vmem:[%s15572_s1 + $0x22e8] ss:$16 sps:$4 sm:$0xff]  }
 0x406   :  { %8590 = vmatprep.mubr.bf16.mxu1 %v11698_v56  ;;  %v11579_v50 = vld [vmem:[%s15572_s1 + $0x20c8] ss:$16 sps:$4 sm:$0xff]  }
 0x407   :  { %8518 = vmatpush1.bf16.msra.mxu0 %v11483_v19  ;;  %v11581_v19 = vld [vmem:[%s15572_s1 + $0x20cc] ss:$16 sps:$4 sm:$0xff]   ;;  %v11582_v56 = vld [vmem:[%s15572_s1 + $0x22c8] ss:$16 sps:$4 sm:$0xff]  }
 0x408   :  { %8561 = vmatpush1.bf16.msra.mxu1 %v11486_v9  ;;  %8519 = vmatprep.subr.bf16.mxu0 %v11491_v41  ;;  %v11584_v9 = vld [vmem:[%s15572_s1 + $0x22cc] ss:$16 sps:$4 sm:$0xff]   ;;  %v11699_v41 = vld [vmem:[%s15573_s0 + $0x70] ss:$144 sps:$4 sm:$0xff]  }
 0x409   :  { %8562 = vmatprep.subr.bf16.mxu1 %v11494_v45  ;;  %v11700_v45 = vld [vmem:[%s15573_s0 + $0x78] ss:$144 sps:$4 sm:$0xff]  }
 0x40b   :  { %8520 = vmatpush1.bf16.msra.mxu0 %v11489_v10  ;;  %v11587_v10 = vld [vmem:[%s15572_s1 + $0x20ac] ss:$16 sps:$4 sm:$0xff]  }
 0x40c   :  { %8563 = vmatpush1.bf16.msra.mxu1 %v11492_v11  ;;  %8521 = vmatprep.subr.bf16.mxu0 %v11497_v21  ;;  %v11590_v11 = vld [vmem:[%s15572_s1 + $0x22ac] ss:$16 sps:$4 sm:$0xff]   ;;  %v11701_v21 = vld [vmem:[%s15573_s0 + $0x84] ss:$144 sps:$4 sm:$0xff]  }
 0x40d   :  { %8564 = vmatprep.subr.bf16.mxu1 %v11500_v24  ;;  %v11702_v24 = vld [vmem:[%s15573_s0 + $0x8c] ss:$144 sps:$4 sm:$0xff]  }
 0x40f   :  { %8522 = vmatpush1.bf16.msra.mxu0 %v11495_v23  ;;  %v11585_v23 = vld [vmem:[%s15572_s1 + $0x20a8] ss:$16 sps:$4 sm:$0xff]  }
 0x410   :  { %8565 = vmatpush1.bf16.msra.mxu1 %v11498_v35  ;;  %8523 = vmatprep.subr.bf16.mxu0 %v11503_v20  ;;  %v11588_v35 = vld [vmem:[%s15572_s1 + $0x22a8] ss:$16 sps:$4 sm:$0xff]   ;;  %v11593_v20 = vld [vmem:[%s15572_s1 + $0x208c] ss:$16 sps:$4 sm:$0xff]  }
 0x411   :  { %8566 = vmatprep.subr.bf16.mxu1 %v11506_v0  ;;  %v11596_v0 = vld [vmem:[%s15572_s1 + $0x228c] ss:$16 sps:$4 sm:$0xff]  }
 0x413   :  { %8524 = vmatpush1.bf16.msra.mxu0 %v11501_v51  ;;  %v11591_v51 = vld [vmem:[%s15572_s1 + $0x2088] ss:$16 sps:$4 sm:$0xff]  }
 0x414   :  { %8567 = vmatpush1.bf16.msra.mxu1 %v11504_v62  ;;  %8525 = vmatprep.subr.bf16.mxu0 %v11509_v57  ;;  %v11594_v62 = vld [vmem:[%s15572_s1 + $0x2288] ss:$16 sps:$4 sm:$0xff]   ;;  %v11599_v57 = vld [vmem:[%s15572_s1 + $0x206c] ss:$16 sps:$4 sm:$0xff]  }
 0x415   :  { %8568 = vmatprep.subr.bf16.mxu1 %v11512_v4  ;;  %v11602_v4 = vld [vmem:[%s15572_s1 + $0x226c] ss:$16 sps:$4 sm:$0xff]  }
 0x417   :  { %8526 = vmatpush1.bf16.msra.mxu0 %v11507_v14  ;;  %v11597_v14 = vld [vmem:[%s15572_s1 + $0x2068] ss:$16 sps:$4 sm:$0xff]  }
 0x418   :  { %8569 = vmatpush1.bf16.msra.mxu1 %v11510_v1  ;;  %8527 = vmatprep.subr.bf16.mxu0 %v11515_v31  ;;  %v11600_v1 = vld [vmem:[%s15572_s1 + $0x2268] ss:$16 sps:$4 sm:$0xff]   ;;  %v11605_v31 = vld [vmem:[%s15572_s1 + $0x204c] ss:$16 sps:$4 sm:$0xff]  }
 0x419   :  { %8570 = vmatprep.subr.bf16.mxu1 %v11518_v32  ;;  %v11608_v32 = vld [vmem:[%s15572_s1 + $0x224c] ss:$16 sps:$4 sm:$0xff]  }
 0x41b   :  { %8528 = vmatpush1.bf16.msra.mxu0 %v11513_v33  ;;  %v11603_v33 = vld [vmem:[%s15572_s1 + $0x2048] ss:$16 sps:$4 sm:$0xff]  }
 0x41c   :  { %8571 = vmatpush1.bf16.msra.mxu1 %v11516_v36  ;;  %8529 = vmatprep.subr.bf16.mxu0 %v11521_v37  ;;  %v11606_v36 = vld [vmem:[%s15572_s1 + $0x2248] ss:$16 sps:$4 sm:$0xff]   ;;  %v11611_v37 = vld [vmem:[%s15572_s1 + $0x202c] ss:$16 sps:$4 sm:$0xff]  }
 0x41d   :  { %8572 = vmatprep.subr.bf16.mxu1 %v11524_v42  ;;  %v11614_v42 = vld [vmem:[%s15572_s1 + $0x222c] ss:$16 sps:$4 sm:$0xff]  }
 0x41f   :  { %8530 = vmatpush1.bf16.msra.mxu0 %v11519_v63  ;;  %v11609_v63 = vld [vmem:[%s15572_s1 + $0x2028] ss:$16 sps:$4 sm:$0xff]  }
 0x420   :  { %8573 = vmatpush1.bf16.msra.mxu1 %v11522_v5  ;;  %8531 = vmatprep.subr.bf16.mxu0 %v11527_v15  ;;  %v11612_v5 = vld [vmem:[%s15572_s1 + $0x2228] ss:$16 sps:$4 sm:$0xff]   ;;  %v11617_v15 = vld [vmem:[%s15572_s1 + $0x200c] ss:$16 sps:$4 sm:$0xff]  }
 0x421   :  { %8574 = vmatprep.subr.bf16.mxu1 %v11530_v26  ;;  %v11620_v26 = vld [vmem:[%s15572_s1 + $0x220c] ss:$16 sps:$4 sm:$0xff]  }
 0x423   :  { %8532 = vmatpush2.bf16.msra.mxu0 %v11525_v38  ;;  %v11615_v38 = vld [vmem:[%s15572_s1 + $0x2008] ss:$16 sps:$4 sm:$0xff]  }
 0x424   :  { %8575 = vmatpush2.bf16.msra.mxu1 %v11528_v46  ;;  %8533 = vmatprep.subr.bf16.mxu0 %v11533_v7  ;;  %v11618_v46 = vld [vmem:[%s15572_s1 + $0x2208] ss:$16 sps:$4 sm:$0xff]   ;;  %v11623_v7 = vld [vmem:[%s15572_s1 + $0x21ec] ss:$16 sps:$4 sm:$0xff]  }
 0x425   :  { %8576 = vmatprep.subr.bf16.mxu1 %v11536_v12  ;;  %v11626_v12 = vld [vmem:[%s15572_s1 + $0x23ec] ss:$16 sps:$4 sm:$0xff]  }
 0x427   :  { %8534 = vmatpush2.bf16.msra.mxu0 %v11531_v13  ;;  %v11621_v13 = vld [vmem:[%s15572_s1 + $0x21e8] ss:$16 sps:$4 sm:$0xff]  }
 0x428   :  { %8577 = vmatpush2.bf16.msra.mxu1 %v11534_v22  ;;  %8535 = vmatprep.subr.bf16.mxu0 %v11539_v28  ;;  %v11624_v22 = vld [vmem:[%s15572_s1 + $0x23e8] ss:$16 sps:$4 sm:$0xff]   ;;  %v11629_v28 = vld [vmem:[%s15572_s1 + $0x21cc] ss:$16 sps:$4 sm:$0xff]  }
 0x429   :  { %8578 = vmatprep.subr.bf16.mxu1 %v11542_v27  ;;  %v11632_v27 = vld [vmem:[%s15572_s1 + $0x23cc] ss:$16 sps:$4 sm:$0xff]  }
 0x42b   :  { %8536 = vmatpush2.bf16.msra.mxu0 %v11537_v39  ;;  %v11627_v39 = vld [vmem:[%s15572_s1 + $0x21c8] ss:$16 sps:$4 sm:$0xff]  }
 0x42c   :  { %8579 = vmatpush2.bf16.msra.mxu1 %v11540_v47  ;;  %8537 = vmatprep.subr.bf16.mxu0 %v11545_v54  ;;  %v11630_v47 = vld [vmem:[%s15572_s1 + $0x23c8] ss:$16 sps:$4 sm:$0xff]   ;;  %v11635_v54 = vld [vmem:[%s15572_s1 + $0x21ac] ss:$16 sps:$4 sm:$0xff]  }
 0x42d   :  { %8580 = vmatprep.subr.bf16.mxu1 %v11548_v2  ;;  %v11638_v2 = vld [vmem:[%s15572_s1 + $0x23ac] ss:$16 sps:$4 sm:$0xff]  }
 0x42f   :  { %8538 = vmatpush2.bf16.msra.mxu0 %v11543_v48  ;;  %v11633_v48 = vld [vmem:[%s15572_s1 + $0x21a8] ss:$16 sps:$4 sm:$0xff]  }
 0x430   :  { %8581 = vmatpush2.bf16.msra.mxu1 %v11546_v49  ;;  %8539 = vmatprep.subr.bf16.mxu0 %v11551_v52  ;;  %v11636_v49 = vld [vmem:[%s15572_s1 + $0x23a8] ss:$16 sps:$4 sm:$0xff]   ;;  %v11641_v52 = vld [vmem:[%s15572_s1 + $0x218c] ss:$16 sps:$4 sm:$0xff]  }
 0x431   :  { %8582 = vmatprep.subr.bf16.mxu1 %v11554_v53  ;;  %v11644_v53 = vld [vmem:[%s15572_s1 + $0x238c] ss:$16 sps:$4 sm:$0xff]  }
 0x433   :  { %8540 = vmatpush2.bf16.msra.mxu0 %v11549_v18  ;;  %v11639_v18 = vld [vmem:[%s15572_s1 + $0x2188] ss:$16 sps:$4 sm:$0xff]  }
 0x434   :  { %8583 = vmatpush2.bf16.msra.mxu1 %v11552_v29  ;;  %8541 = vmatprep.subr.bf16.mxu0 %v11557_v55  ;;  %v11642_v29 = vld [vmem:[%s15572_s1 + $0x2388] ss:$16 sps:$4 sm:$0xff]   ;;  %v11647_v55 = vld [vmem:[%s15572_s1 + $0x216c] ss:$16 sps:$4 sm:$0xff]  }
 0x435   :  { %8584 = vmatprep.subr.bf16.mxu1 %v11560_v34  ;;  %v11650_v34 = vld [vmem:[%s15572_s1 + $0x236c] ss:$16 sps:$4 sm:$0xff]  }
 0x437   :  { %8542 = vmatpush2.bf16.msra.mxu0 %v11555_v16  ;;  %v11645_v16 = vld [vmem:[%s15572_s1 + $0x2168] ss:$16 sps:$4 sm:$0xff]  }
 0x438   :  { %8585 = vmatpush2.bf16.msra.mxu1 %v11558_v3  ;;  %8543 = vmatprep.subr.bf16.mxu0 %v11563_v25  ;;  %v11648_v3 = vld [vmem:[%s15572_s1 + $0x2368] ss:$16 sps:$4 sm:$0xff]   ;;  %v11653_v25 = vld [vmem:[%s15572_s1 + $0x214c] ss:$16 sps:$4 sm:$0xff]  }
 0x439   :  { %8586 = vmatprep.subr.bf16.mxu1 %v11566_v43  ;;  %v11656_v43 = vld [vmem:[%s15572_s1 + $0x234c] ss:$16 sps:$4 sm:$0xff]  }
 0x43b   :  { %8544 = vmatpush2.bf16.msra.mxu0 %v11561_v40  ;;  %v11651_v40 = vld [vmem:[%s15572_s1 + $0x2148] ss:$16 sps:$4 sm:$0xff]  }
 0x43c   :  { %8587 = vmatpush2.bf16.msra.mxu1 %v11564_v44  ;;  %8545 = vmatprep.subr.bf16.mxu0 %v11569_v58  ;;  %v11654_v44 = vld [vmem:[%s15572_s1 + $0x2348] ss:$16 sps:$4 sm:$0xff]   ;;  %v11659_v58 = vld [vmem:[%s15572_s1 + $0x212c] ss:$16 sps:$4 sm:$0xff]  }
 0x43d   :  { %8588 = vmatprep.subr.bf16.mxu1 %v11572_v59  ;;  %v11662_v59 = vld [vmem:[%s15572_s1 + $0x232c] ss:$16 sps:$4 sm:$0xff]  }
 0x43f   :  { %8546 = vmatpush2.bf16.msra.mxu0 %v11567_v60  ;;  %v11657_v60 = vld [vmem:[%s15572_s1 + $0x2128] ss:$16 sps:$4 sm:$0xff]  }
 0x440   :  { %8589 = vmatpush2.bf16.msra.mxu1 %v11570_v61  ;;  %8601 = vmatprep.subr.bf16.mxu0 %v11575_v17  ;;  %v11660_v61 = vld [vmem:[%s15572_s1 + $0x2328] ss:$16 sps:$4 sm:$0xff]   ;;  %v11665_v17 = vld [vmem:[%s15572_s1 + $0x210c] ss:$16 sps:$4 sm:$0xff]  }
 0x441   :  { %8644 = vmatprep.subr.bf16.mxu1 %v11578_v8  ;;  %v11668_v8 = vld [vmem:[%s15572_s1 + $0x230c] ss:$16 sps:$4 sm:$0xff]  }
 0x442   :  { %8548 = vmatmul.mubr.bf16.vlgmr.msra.gmra.mxu0 %v11699_v41  ;;  %v7947_v41 = vpop.f32.mrf.mxu0 }
 0x443   :  { %8591 = vmatmul.mubr.bf16.vlgmr.msra.gmra.mxu1 %v11700_v45  ;;  %8602 = vmatpush1.bf16.msra.mxu0 %v11573_v30  ;;  %v11663_v30 = vld [vmem:[%s15572_s1 + $0x2108] ss:$16 sps:$4 sm:$0xff]   ;;  %v7990_v45 = vpop.f32.mrf.mxu1 }
 0x444   :  { %8645 = vmatpush1.bf16.msra.mxu1 %v11576_v6  ;;  %8603 = vmatprep.subr.bf16.mxu0 %v11581_v19  ;;  %v11666_v6 = vld [vmem:[%s15572_s1 + $0x2308] ss:$16 sps:$4 sm:$0xff]   ;;  %v11703_v19 = vld [vmem:[%s15573_s0 + $0x80] ss:$144 sps:$4 sm:$0xff]  }
 0x445   :  { %8646 = vmatprep.subr.bf16.mxu1 %v11584_v9  ;;  %8633 = vmatprep.mubr.bf16.mxu0 %v11701_v21  ;;  %v11704_v9 = vld [vmem:[%s15573_s0 + $0x88] ss:$144 sps:$4 sm:$0xff]  }
 0x446   :  { %8676 = vmatprep.mubr.bf16.mxu1 %v11702_v24 }
 0x447   :  { %8604 = vmatpush1.bf16.msra.mxu0 %v11579_v50  ;;  %v7949_v50 = vpop.f32.mrf.mxu0 }
 0x448   :  { %8647 = vmatpush1.bf16.msra.mxu1 %v11582_v56  ;;  %8605 = vmatprep.subr.bf16.mxu0 %v11587_v10  ;;  %v7992_v56 = vpop.f32.mrf.mxu1 }
 0x449   :  { %8648 = vmatprep.subr.bf16.mxu1 %v11590_v11  ;;  %v7951_v10 = vpop.f32.mrf.mxu0 }
 0x44a   :  { %v7994_v11 = vpop.f32.mrf.mxu1 }
 0x44b   :  { %8606 = vmatpush1.bf16.msra.mxu0 %v11585_v23  ;;  %v7953_v21 = vpop.f32.mrf.mxu0 }
 0x44c   :  { %8649 = vmatpush1.bf16.msra.mxu1 %v11588_v35  ;;  %8607 = vmatprep.subr.bf16.mxu0 %v11593_v20  ;;  %v7996_v24 = vpop.f32.mrf.mxu1 }
 0x44d   :  { %8650 = vmatprep.subr.bf16.mxu1 %v11596_v0  ;;  %v8033_v23 = vpop.f32.mrf.mxu0 }
 0x44e   :  { %v8076_v35 = vpop.f32.mrf.mxu1 }
 0x44f   :  { %8608 = vmatpush1.bf16.msra.mxu0 %v11591_v51  ;;  %v8035_v20 = vpop.f32.mrf.mxu0 }
 0x450   :  { %8651 = vmatpush1.bf16.msra.mxu1 %v11594_v62  ;;  %8609 = vmatprep.subr.bf16.mxu0 %v11599_v57  ;;  %v8078_v0 = vpop.f32.mrf.mxu1 }
 0x451   :  { %8652 = vmatprep.subr.bf16.mxu1 %v11602_v4  ;;  %v8037_v51 = vpop.f32.mrf.mxu0 }
 0x452   :  { %v8080_v62 = vpop.f32.mrf.mxu1 }
 0x453   :  { %8610 = vmatpush1.bf16.msra.mxu0 %v11597_v14  ;;  %v8039_v57 = vpop.f32.mrf.mxu0 }
 0x454   :  { %8653 = vmatpush1.bf16.msra.mxu1 %v11600_v1  ;;  %8611 = vmatprep.subr.bf16.mxu0 %v11605_v31  ;;  %v8082_v4 = vpop.f32.mrf.mxu1 }
 0x455   :  { %8654 = vmatprep.subr.bf16.mxu1 %v11608_v32  ;;  %v8119_v14 = vpop.f32.mrf.mxu0 }
 0x456   :  { %v8162_v1 = vpop.f32.mrf.mxu1 }
 0x457   :  { %8612 = vmatpush1.bf16.msra.mxu0 %v11603_v33  ;;  %v8121_v31 = vpop.f32.mrf.mxu0 }
 0x458   :  { %8655 = vmatpush1.bf16.msra.mxu1 %v11606_v36  ;;  %8613 = vmatprep.subr.bf16.mxu0 %v11611_v37  ;;  %v8164_v32 = vpop.f32.mrf.mxu1 }
 0x459   :  { %8656 = vmatprep.subr.bf16.mxu1 %v11614_v42  ;;  %v8123_v33 = vpop.f32.mrf.mxu0 }
 0x45a   :  { %v8166_v36 = vpop.f32.mrf.mxu1 }
 0x45b   :  { %8614 = vmatpush1.bf16.msra.mxu0 %v11609_v63  ;;  %v8125_v37 = vpop.f32.mrf.mxu0 }
 0x45c   :  { %8657 = vmatpush1.bf16.msra.mxu1 %v11612_v5  ;;  %8615 = vmatprep.subr.bf16.mxu0 %v11617_v15  ;;  %v8168_v42 = vpop.f32.mrf.mxu1 }
 0x45d   :  { %8658 = vmatprep.subr.bf16.mxu1 %v11620_v26  ;;  %v8205_v63 = vpop.f32.mrf.mxu0 }
 0x45e   :  { %v8248_v5 = vpop.f32.mrf.mxu1 }
 0x45f   :  { %8616 = vmatpush1.bf16.msra.mxu0 %v11615_v38  ;;  %v8207_v15 = vpop.f32.mrf.mxu0 }
 0x460   :  { %8659 = vmatpush1.bf16.msra.mxu1 %v11618_v46  ;;  %8617 = vmatprep.subr.bf16.mxu0 %v11623_v7  ;;  %v8250_v26 = vpop.f32.mrf.mxu1 }
 0x461   :  { %8660 = vmatprep.subr.bf16.mxu1 %v11626_v12  ;;  %v8209_v38 = vpop.f32.mrf.mxu0 }
 0x462   :  { %v8252_v46 = vpop.f32.mrf.mxu1 }
 0x463   :  { %8618 = vmatpush2.bf16.msra.mxu0 %v11621_v13  ;;  %v8211_v7 = vpop.f32.mrf.mxu0 }
 0x464   :  { %8661 = vmatpush2.bf16.msra.mxu1 %v11624_v22  ;;  %8619 = vmatprep.subr.bf16.mxu0 %v11629_v28  ;;  %v8254_v12 = vpop.f32.mrf.mxu1 }
 0x465   :  { %8662 = vmatprep.subr.bf16.mxu1 %v11632_v27  ;;  %v8291_v13 = vpop.f32.mrf.mxu0 }
 0x466   :  { %v8334_v22 = vpop.f32.mrf.mxu1 }
 0x467   :  { %8620 = vmatpush2.bf16.msra.mxu0 %v11627_v39  ;;  %v8293_v28 = vpop.f32.mrf.mxu0 }
 0x468   :  { %8663 = vmatpush2.bf16.msra.mxu1 %v11630_v47  ;;  %8621 = vmatprep.subr.bf16.mxu0 %v11635_v54  ;;  %v8336_v27 = vpop.f32.mrf.mxu1 }
 0x469   :  { %8664 = vmatprep.subr.bf16.mxu1 %v11638_v2  ;;  %v8295_v39 = vpop.f32.mrf.mxu0 }
 0x46a   :  { %v8338_v47 = vpop.f32.mrf.mxu1 }
 0x46b   :  { %8622 = vmatpush2.bf16.msra.mxu0 %v11633_v48  ;;  %v8297_v54 = vpop.f32.mrf.mxu0  ;;  %v7991_v48 = vadd.f32 %v7990_v45, %v7947_v41 }
 0x46c   :  { %8665 = vmatpush2.bf16.msra.mxu1 %v11636_v49  ;;  %8623 = vmatprep.subr.bf16.mxu0 %v11641_v52  ;;  %v8340_v2 = vpop.f32.mrf.mxu1 }
 0x46d   :  { %8666 = vmatprep.subr.bf16.mxu1 %v11644_v53  ;;  %v7993_v53 = vadd.f32 %v7992_v56, %v7949_v50 }
 0x46f   :  { %8624 = vmatpush2.bf16.msra.mxu0 %v11639_v18  ;;  %v8034_v18 = vadd.f32 %v8033_v23, %v7991_v48 }
 0x470   :  { %8667 = vmatpush2.bf16.msra.mxu1 %v11642_v29  ;;  %8625 = vmatprep.subr.bf16.mxu0 %v11647_v55  ;;  %v7995_v29 = vadd.f32 %v7994_v11, %v7951_v10  ;;  %v8036_v55 = vadd.f32 %v8035_v20, %v7993_v53 }
 0x471   :  { %8668 = vmatprep.subr.bf16.mxu1 %v11650_v34 }
 0x473   :  { %8626 = vmatpush2.bf16.msra.mxu0 %v11645_v16 }
 0x474   :  { %8669 = vmatpush2.bf16.msra.mxu1 %v11648_v3  ;;  %8627 = vmatprep.subr.bf16.mxu0 %v11653_v25  ;;  %v7997_v3 = vadd.f32 %v7996_v24, %v7953_v21  ;;  %v8077_v25 = vadd.f32 %v8076_v35, %v8034_v18 }
 0x475   :  { %8670 = vmatprep.subr.bf16.mxu1 %v11656_v43  ;;  %v8038_v43 = vadd.f32 %v8037_v51, %v7995_v29 }
 0x477   :  { %8628 = vmatpush2.bf16.msra.mxu0 %v11651_v40  ;;  %v8079_v40 = vadd.f32 %v8078_v0, %v8036_v55 }
 0x478   :  { %8671 = vmatpush2.bf16.msra.mxu1 %v11654_v44  ;;  %8629 = vmatprep.subr.bf16.mxu0 %v11659_v58  ;;  %v8040_v44 = vadd.f32 %v8039_v57, %v7997_v3  ;;  %v8120_v58 = vadd.f32 %v8119_v14, %v8077_v25 }
 0x479   :  { %8672 = vmatprep.subr.bf16.mxu1 %v11662_v59 }
 0x47b   :  { %8630 = vmatpush2.bf16.msra.mxu0 %v11657_v60 }
 0x47c   :  { %8673 = vmatpush2.bf16.msra.mxu1 %v11660_v61  ;;  %8631 = vmatprep.subr.bf16.mxu0 %v11665_v17  ;;  %v8081_v61 = vadd.f32 %v8080_v62, %v8038_v43  ;;  %v8122_v17 = vadd.f32 %v8121_v31, %v8079_v40 }
 0x47d   :  { %8674 = vmatprep.subr.bf16.mxu1 %v11668_v8  ;;  %v8083_v8 = vadd.f32 %v8082_v4, %v8040_v44 }
 0x47e   :  { %v8165_v41 = vadd.f32 %v8164_v32, %v8122_v17 }
 0x47f   :  { %8632 = vmatpush2.bf16.msra.mxu0 %v11663_v30  ;;  %v8163_v30 = vadd.f32 %v8162_v1, %v8120_v58  ;;  %v8126_v45 = vadd.f32 %v8125_v37, %v8083_v8 }
 0x480   :  { %8675 = vmatpush2.bf16.msra.mxu1 %v11666_v6  ;;  %v8124_v6 = vadd.f32 %v8123_v33, %v8081_v61  ;;  %v8208_v21 = vadd.f32 %v8207_v15, %v8165_v41 }
 0x481   :  { %v8206_v50 = vadd.f32 %v8205_v63, %v8163_v30  ;;  %v8169_v24 = vadd.f32 %v8168_v42, %v8126_v45 }
 0x482   :  { %8634 = vmatmul.mubr.bf16.vlgmr.msra.gmra.mxu0 %v11703_v19  ;;  %v8377_v49 = vpop.f32.mrf.mxu0  ;;  %v8167_v11 = vadd.f32 %v8166_v36, %v8124_v6  ;;  %v8251_v51 = vadd.f32 %v8250_v26, %v8208_v21 }
 0x483   :  { %8677 = vmatmul.mubr.bf16.vlgmr.msra.gmra.mxu1 %v11704_v9  ;;  %v8420_v52 = vpop.f32.mrf.mxu1  ;;  %v8249_v23 = vadd.f32 %v8248_v5, %v8206_v50  ;;  %v8212_v62 = vadd.f32 %v8211_v7, %v8169_v24 }
 0x484   :  { %v8379_v34 = vpop.f32.mrf.mxu0  ;;  %v8210_v35 = vadd.f32 %v8209_v38, %v8167_v11  ;;  %v8294_v14 = vadd.f32 %v8293_v28, %v8251_v51 }
 0x485   :  { %v8422_v16 = vpop.f32.mrf.mxu1  ;;  %v8292_v57 = vadd.f32 %v8291_v13, %v8249_v23  ;;  %v8255_v33 = vadd.f32 %v8254_v12, %v8212_v62 }
 0x486   :  { %v8381_v59 = vpop.f32.mrf.mxu0  ;;  %v8253_v4 = vadd.f32 %v8252_v46, %v8210_v35  ;;  %v8337_v63 = vadd.f32 %v8336_v27, %v8294_v14 }
 0x487   :  { %v8424_v60 = vpop.f32.mrf.mxu1  ;;  %v8335_v32 = vadd.f32 %v8334_v22, %v8292_v57  ;;  %v8298_v48 = vadd.f32 %v8297_v54, %v8255_v33 }
 0x488   :  { %v8383_v19 = vpop.f32.mrf.mxu0  ;;  %v8296_v37 = vadd.f32 %v8295_v39, %v8253_v4  ;;  %v8380_v5 = vadd.f32 %v8379_v34, %v8337_v63 }
 0x489   :  { %v8426_v9 = vpop.f32.mrf.mxu1  ;;  %v8378_v53 = vadd.f32 %v8377_v49, %v8335_v32  ;;  %v8341_v29 = vadd.f32 %v8340_v2, %v8298_v48 }
 0x48a   :  { %v8339_v42 = vadd.f32 %v8338_v47, %v8296_v37  ;;  %v8423_v13 = vadd.f32 %v8422_v16, %v8380_v5 }
 0x48b   :  { %v8421_v26 = vadd.f32 %v8420_v52, %v8378_v53  ;;  %v8384_v46 = vadd.f32 %v8383_v19, %v8341_v29 }
 0x48c   :  { %v8382_v7 = vadd.f32 %v8381_v59, %v8339_v42 }
 0x48d   :  { %v8427_v39 = vadd.f32 %v8426_v9, %v8384_v46 }
 0x48e   :  { %v8425_v12 = vadd.f32 %v8424_v60, %v8382_v7 }
 0x4c2   :  { %v8463_v56 = vpop.f32.mrf.mxu0 }
 0x4c3   :  { %v8506_v10 = vpop.f32.mrf.mxu1  ;;  %v8464_v28 = vadd.f32 %v8463_v56, %v8421_v26 }
 0x4c4   :  { %v8465_v20 = vpop.f32.mrf.mxu0 }
 0x4c5   :  { %v8508_v0 = vpop.f32.mrf.mxu1  ;;  %v8466_v22 = vadd.f32 %v8465_v20, %v8423_v13  ;;  %v8507_v27 = vadd.f32 %v8506_v10, %v8464_v28 }
 0x4c6   :  { %v8467_v1 = vpop.f32.mrf.mxu0 }
 0x4c7   :  { %v8510_v31 = vpop.f32.mrf.mxu1  ;;  %v8468_v54 = vadd.f32 %v8467_v1, %v8425_v12  ;;  %v8509_v43 = vadd.f32 %v8508_v0, %v8466_v22 }
 0x4c8   :  { %v8469_v36 = vpop.f32.mrf.mxu0 }
 0x4c9   :  { %v8512_v15 = vpop.f32.mrf.mxu1  ;;  %v8470_v47 = vadd.f32 %v8469_v36, %v8427_v39  ;;  %v8511_v40 = vadd.f32 %v8510_v31, %v8468_v54 }
 0x4cb   :  { %v8513_v58 = vadd.f32 %v8512_v15, %v8470_v47 }
 0x502   :  { %v8549_v38 = vpop.f32.mrf.mxu0 }
 0x503   :  { %v8592_v18 = vpop.f32.mrf.mxu1  ;;  %v8550_v34 = vadd.f32 %v8549_v38, %v8507_v27 }
 0x504   :  { %v8551_v55 = vpop.f32.mrf.mxu0 }
 0x505   :  { %v8594_v3 = vpop.f32.mrf.mxu1  ;;  %v8552_v44 = vadd.f32 %v8551_v55, %v8509_v43  ;;  %v8593_v16 = vadd.f32 %v8592_v18, %v8550_v34 }
 0x506   :  { %v8553_v49 = vpop.f32.mrf.mxu0 }
 0x507   :  { %v8596_v25 = vpop.f32.mrf.mxu1  ;;  %v8554_v59 = vadd.f32 %v8553_v49, %v8511_v40  ;;  %v8595_v8 = vadd.f32 %v8594_v3, %v8552_v44 }
 0x508   :  { %v8555_v2 = vpop.f32.mrf.mxu0 }
 0x509   :  { %v8598_v52 = vpop.f32.mrf.mxu1  ;;  %v8556_v60 = vadd.f32 %v8555_v2, %v8513_v58  ;;  %v8597_v9 = vadd.f32 %v8596_v25, %v8554_v59 }
 0x50b   :  { %v8599_v10 = vadd.f32 %v8598_v52, %v8556_v60 }
 0x542   :  { %v8635_v61 = vpop.f32.mrf.mxu0 }
 0x543   :  { %v8678_v17 = vpop.f32.mrf.mxu1  ;;  %v8636_v30 = vadd.f32 %v8635_v61, %v8593_v16 }
 0x544   :  { %v8637_v6 = vpop.f32.mrf.mxu0 }
 0x545   :  { %v8680_v19 = vpop.f32.mrf.mxu1  ;;  %v8679_v41 = vadd.f32 %v8678_v17, %v8636_v30  ;;  %v8638_v45 = vadd.f32 %v8637_v6, %v8595_v8 }
 0x546   :  { %v8639_v50 = vpop.f32.mrf.mxu0 }
 0x547   :  { %v8682_v56 = vpop.f32.mrf.mxu1  ;;  %8689 = vst [vmem:[%s15574_s2 + $0x10] sm:$0xff] %v8679_v41  ;;  %v8681_v11 = vadd.f32 %v8680_v19, %v8638_v45  ;;  %v8640_v21 = vadd.f32 %v8639_v50, %v8597_v9 }
 0x548   :  { %v8641_v24 = vpop.f32.mrf.mxu0 }
 0x549   :  { %8690 = vst [vmem:[%s15574_s2 + $0x18] sm:$0xff] %v8681_v11  ;;  %v8683_v23 = vadd.f32 %v8682_v56, %v8640_v21  ;;  %v8642_v35 = vadd.f32 %v8641_v24, %v8599_v10  ;;  %v8684_v20 = vpop.f32.mrf.mxu1 }
 0x54b   :  { %8693 = vst [vmem:[%s15574_s2 + $0x30] sm:$0xff] %v8683_v23  ;;  %v8685_v0 = vadd.f32 %v8684_v20, %v8642_v35 }
 0x54d   :  { %8694 = vst [vmem:[%s15574_s2 + $0x38] sm:$0xff] %v8685_v0 }

</bundles_post_ra>
